<compile_context>
chip_gen: v5e
topology: v5e:2x2
jax: 0.10.0
libtpu: 0.0.40
codegen_flags: <defaults>
</compile_context>

<pallas_src>
import numpy as np
import jax
import jax.numpy as jnp
from jax.experimental import pallas as pl
from jax.experimental.pallas import tpu as pltpu

# ---------------------------------------------------------------------------
# Static network geometry (implied by the PyTorch module: 32x32x3 input)
# ---------------------------------------------------------------------------
H_IN, W_IN, C_IN = 32, 32, 3
K = 5
C1, OH1, OW1 = 6, 28, 28          # conv1 output
PH1, PW1 = 14, 14                 # after pool1
C2, OH2, OW2 = 16, 10, 10         # conv2 output
PH2, PW2 = 5, 5                   # after pool2
D1, D2, D3 = 120, 84, 10          # fc widths
DP = 128                          # lane-padded MLP width

# ---------------------------------------------------------------------------
# Batched-grid constants.  Each image occupies RIMG=32 consecutive rows of the
# flat (rows, W*C) activation matrices; rows that mix data across image
# boundaries ("garbage rows") are computed but never read by valid outputs.
# ---------------------------------------------------------------------------
B = 8                                   # images per grid step
RIMG = H_IN                             # 32 rows per image in the flat layout
BROWS = B * RIMG                        # 256 input rows per step
M1 = (B - 1) * RIMG + OH1               # 252: conv1 rows computed
MP1 = M1 - 1                            # 251: H-pooled conv1 rows (stride-2 carried)
M2 = (B - 1) * RIMG + 2 * (OH2 - 1) + 1  # 243: conv2 rows computed (valid at even offsets)
MP2 = (B - 1) * RIMG + 4 * (PH2 - 1) + 1  # 241: H-pooled conv2 rows (valid at 4k offsets)


# ---------------------------------------------------------------------------
# Single fused Pallas kernel: one grid step == B images
# ---------------------------------------------------------------------------
def _lenet_batched_kernel(x_ref, w1s_ref, b1_ref, s1_ref,
                          w2s_ref, b2_ref, s2_ref, e4_ref,
                          wf1_ref, bf1_ref, wf2_ref, bf2_ref, wf3_ref, bf3_ref,
                          o_ref):
    f32 = jnp.float32
    bf16 = jnp.bfloat16

    # ---- conv1 (5x5, 3->6): KH row-shifted matmuls + bias + ReLU -----------
    #   x_ref        : (256, 96)   rows = B*H, cols = W*Cin (f32)
    #   w1s_ref[kh]  : (96, 168)   cols = OW1*C1 (ow-major, co-minor, bf16)
    acc1 = jnp.dot(x_ref[0:M1, :].astype(bf16), w1s_ref[0],
                   preferred_element_type=f32)
    for kh in range(1, K):
        acc1 = acc1 + jnp.dot(x_ref[kh:kh + M1, :].astype(bf16), w1s_ref[kh],
                              preferred_element_type=f32)
    a1 = jnp.maximum(acc1 + b1_ref[...], 0.0)                 # (252, 168) f32

    # ---- pool1: W-direction on MXU (selection matmuls), H-direction on VPU --
    a1b = a1.astype(bf16)
    wp1 = jnp.maximum(jnp.dot(a1b, s1_ref[0], preferred_element_type=f32),
                      jnp.dot(a1b, s1_ref[1], preferred_element_type=f32))  # (252, 84)
    # row r holds max(wp1[r], wp1[r+1]); valid pooled rows live at even offsets
    pm1 = jnp.maximum(wp1[0:MP1, :], wp1[1:MP1 + 1, :])        # (251, 84)

    # ---- conv2 (5x5, 6->16): stride-2 row shifts absorb the pool1 stride ----
    acc2 = jnp.dot(pm1[0:M2, :].astype(bf16), w2s_ref[0],
                   preferred_element_type=f32)
    for kh in range(1, K):
        acc2 = acc2 + jnp.dot(pm1[2 * kh:2 * kh + M2, :].astype(bf16),
                              w2s_ref[kh], preferred_element_type=f32)
    a2 = jnp.maximum(acc2 + b2_ref[...], 0.0)                  # (243, 160) f32

    # ---- pool2: W on MXU, H on VPU (valid pooled rows at 4k offsets) --------
    a2b = a2.astype(bf16)
    wp2 = jnp.maximum(jnp.dot(a2b, s2_ref[0], preferred_element_type=f32),
                      jnp.dot(a2b, s2_ref[1], preferred_element_type=f32))  # (243, 80)
    pm2 = jnp.maximum(wp2[0:MP2, :], wp2[2:MP2 + 2, :])        # (241, 80)

    # ---- gather the 5 valid pooled rows of every image into j-major blocks --
    # compact row j*B + b  ==  image b, pooled height j  (so fc1 can use
    # aligned contiguous 8-row slices per j)
    compact = jnp.dot(e4_ref[...], pm2.astype(bf16),
                      preferred_element_type=f32)              # (40, 80)

    # ---- fc1: PyTorch NCHW flatten order folded into the wf1 packing --------
    z = jnp.dot(compact[0:B, :].astype(bf16), wf1_ref[0],
                preferred_element_type=f32)
    for j in range(1, PH2):
        z = z + jnp.dot(compact[j * B:(j + 1) * B, :].astype(bf16),
                        wf1_ref[j], preferred_element_type=f32)
    z = jnp.maximum(z + bf1_ref[...], 0.0)                     # (8, 128) [:120 live]

    # ---- fc2 + ReLU, fc3 (lane-padded to 128) --------------------------------
    z = jnp.maximum(jnp.dot(z.astype(bf16), wf2_ref[...],
                            preferred_element_type=f32) + bf2_ref[...], 0.0)
    z = jnp.dot(z.astype(bf16), wf3_ref[...],
                preferred_element_type=f32) + bf3_ref[...]

    o_ref[...] = z                                             # dense (8, 128) store


# ---------------------------------------------------------------------------
# Forward pass wrapper (one pallas_call + input layout + final slice)
# ---------------------------------------------------------------------------
def _cnn_forward_fn(x_nchw, packed):
    n = x_nchw.shape[0]
    assert x_nchw.shape[1:] == (C_IN, H_IN, W_IN), x_nchw.shape
    g = (n + B - 1) // B
    n_pad = g * B

    # NCHW -> (N, H, W*C) layout used by the shifted-weight matmuls; pad the
    # batch with zero images up to a multiple of B.
    x = jnp.transpose(x_nchw.astype(jnp.float32), (0, 2, 3, 1)).reshape(
        n, H_IN, W_IN * C_IN)
    if n_pad != n:
        x = jnp.concatenate(
            [x, jnp.zeros((n_pad - n, H_IN, W_IN * C_IN), jnp.float32)], axis=0)
    x_flat = x.reshape(n_pad * H_IN, W_IN * C_IN)

    out = pl.pallas_call(
        _lenet_batched_kernel,
        out_shape=jax.ShapeDtypeStruct((n_pad, DP), jnp.float32),
        grid=(g,),
        in_specs=[
            pl.BlockSpec((BROWS, W_IN * C_IN), lambda i: (i, 0)),            # x rows
            pl.BlockSpec((K, W_IN * C_IN, OW1 * C1), lambda i: (0, 0, 0)),   # w1 shifted
            pl.BlockSpec((1, OW1 * C1), lambda i: (0, 0)),                   # b1 row
            pl.BlockSpec((2, OW1 * C1, PW1 * C1), lambda i: (0, 0, 0)),      # pool1 W sel
            pl.BlockSpec((K, PW1 * C1, OW2 * C2), lambda i: (0, 0, 0)),      # w2 shifted
            pl.BlockSpec((1, OW2 * C2), lambda i: (0, 0)),                   # b2 row
            pl.BlockSpec((2, OW2 * C2, PW2 * C2), lambda i: (0, 0, 0)),      # pool2 W sel
            pl.BlockSpec((PH2 * B, MP2), lambda i: (0, 0)),                  # row gather
            pl.BlockSpec((PH2, PW2 * C2, DP), lambda i: (0, 0, 0)),          # fc1 (per row)
            pl.BlockSpec((1, DP), lambda i: (0, 0)),                         # b_fc1
            pl.BlockSpec((DP, DP), lambda i: (0, 0)),                        # fc2
            pl.BlockSpec((1, DP), lambda i: (0, 0)),                         # b_fc2
            pl.BlockSpec((DP, DP), lambda i: (0, 0)),                        # fc3
            pl.BlockSpec((1, DP), lambda i: (0, 0)),                         # b_fc3
        ],
        out_specs=pl.BlockSpec((B, DP), lambda i: (i, 0)),
        compiler_params=pltpu.CompilerParams(
            dimension_semantics=("parallel",)),
    )(x_flat, *packed)
    return out[:n, :D3]


cnn_forward = jax.jit(_cnn_forward_fn)


# ---------------------------------------------------------------------------
# Parameters (same synthetic init / shapes as the PyTorch module)
# ---------------------------------------------------------------------------
def init_params(key):
    ks = jax.random.split(key, 10)
    scale = 0.1
    p = {}
    p["w_conv1"] = scale * jax.random.normal(ks[0], (5, 5, 3, 6), jnp.float32)
    p["b_conv1"] = scale * jax.random.normal(ks[1], (6,), jnp.float32)
    p["w_conv2"] = scale * jax.random.normal(ks[2], (5, 5, 6, 16), jnp.float32)
    p["b_conv2"] = scale * jax.random.normal(ks[3], (16,), jnp.float32)
    p["w_fc1"] = scale * jax.random.normal(ks[4], (16 * 5 * 5, 120), jnp.float32)
    p["b_fc1"] = scale * jax.random.normal(ks[5], (120,), jnp.float32)
    p["w_fc2"] = scale * jax.random.normal(ks[6], (120, 84), jnp.float32)
    p["b_fc2"] = scale * jax.random.normal(ks[7], (84,), jnp.float32)
    p["w_fc3"] = scale * jax.random.normal(ks[8], (84, 10), jnp.float32)
    p["b_fc3"] = scale * jax.random.normal(ks[9], (10,), jnp.float32)
    return p


# ---------------------------------------------------------------------------
# One-time weight repacking (host-side): shifted conv matrices (bf16), W-pool
# selection matrices (bf16), row-gather matrix (bf16), lane-padded MLP weights
# (bf16) with the NCHW flatten order baked in; biases stay f32.
# ---------------------------------------------------------------------------
def pack_params(params):
    wc1 = np.asarray(params["w_conv1"], np.float32)   # (5,5,3,6)
    bc1 = np.asarray(params["b_conv1"], np.float32)
    wc2 = np.asarray(params["w_conv2"], np.float32)   # (5,5,6,16)
    bc2 = np.asarray(params["b_conv2"], np.float32)
    wl1 = np.asarray(params["w_fc1"], np.float32)     # (400,120)
    bl1 = np.asarray(params["b_fc1"], np.float32)
    wl2 = np.asarray(params["w_fc2"], np.float32)     # (120,84)
    bl2 = np.asarray(params["b_fc2"], np.float32)
    wl3 = np.asarray(params["w_fc3"], np.float32)     # (84,10)
    bl3 = np.asarray(params["b_fc3"], np.float32)

    # conv1 shifted weights: W1s[kh, w*Cin+ci, ow*C1+co] = wc1[kh, w-ow, ci, co]
    w1s = np.zeros((K, W_IN * C_IN, OW1 * C1), np.float32)
    for kh in range(K):
        for ow in range(OW1):
            for kw in range(K):
                w = ow + kw
                w1s[kh, w * C_IN:(w + 1) * C_IN, ow * C1:(ow + 1) * C1] = wc1[kh, kw]
    b1row = np.tile(bc1, OW1)[None, :]                            # (1, 168)

    # pool1 W-direction selection matrices (168 -> 84)
    s1 = np.zeros((2, OW1 * C1, PW1 * C1), np.float32)
    for j in range(PW1):
        for c in range(C1):
            s1[0, (2 * j) * C1 + c, j * C1 + c] = 1.0
            s1[1, (2 * j + 1) * C1 + c, j * C1 + c] = 1.0

    # conv2 shifted weights
    w2s = np.zeros((K, PW1 * C1, OW2 * C2), np.float32)
    for kh in range(K):
        for ow in range(OW2):
            for kw in range(K):
                w = ow + kw
                w2s[kh, w * C1:(w + 1) * C1, ow * C2:(ow + 1) * C2] = wc2[kh, kw]
    b2row = np.tile(bc2, OW2)[None, :]                            # (1, 160)

    # pool2 W-direction selection matrices (160 -> 80)
    s2 = np.zeros((2, OW2 * C2, PW2 * C2), np.float32)
    for j in range(PW2):
        for c in range(C2):
            s2[0, (2 * j) * C2 + c, j * C2 + c] = 1.0
            s2[1, (2 * j + 1) * C2 + c, j * C2 + c] = 1.0

    # row-gather: output row j*B + b  <-  H-pooled-conv2 flat row b*RIMG + 4*j
    e4 = np.zeros((PH2 * B, MP2), np.float32)
    for j in range(PH2):
        for b in range(B):
            e4[j * B + b, b * RIMG + 4 * j] = 1.0

    # fc1: absorb PyTorch's NCHW flatten (index = c*25 + h*5 + w); pad to 128 lanes.
    wf1 = np.zeros((PH2, PW2 * C2, DP), np.float32)
    for h in range(PH2):
        for w in range(PW2):
            for c in range(C2):
                wf1[h, w * C2 + c, :D1] = wl1[c * (PH2 * PW2) + h * PW2 + w, :]
    bf1 = np.zeros((1, DP), np.float32); bf1[0, :D1] = bl1

    wf2 = np.zeros((DP, DP), np.float32); wf2[:D1, :D2] = wl2
    bf2 = np.zeros((1, DP), np.float32); bf2[0, :D2] = bl2
    wf3 = np.zeros((DP, DP), np.float32); wf3[:D2, :D3] = wl3
    bf3 = np.zeros((1, DP), np.float32); bf3[0, :D3] = bl3

    bf, f32 = jnp.bfloat16, jnp.float32
    return (jnp.asarray(w1s, bf), jnp.asarray(b1row, f32), jnp.asarray(s1, bf),
            jnp.asarray(w2s, bf), jnp.asarray(b2row, f32), jnp.asarray(s2, bf),
            jnp.asarray(e4, bf),
            jnp.asarray(wf1, bf), jnp.asarray(bf1, f32),
            jnp.asarray(wf2, bf), jnp.asarray(bf2, f32),
            jnp.asarray(wf3, bf), jnp.asarray(bf3, f32))


# ---------------------------------------------------------------------------
# Pure-JAX reference (mirrors CNN.forward) for a correctness check
# ---------------------------------------------------------------------------
def cnn_reference(x_nchw, params):
    hi = jax.lax.Precision.HIGHEST
    x = jnp.transpose(x_nchw.astype(jnp.float32), (0, 2, 3, 1))   # NHWC
    y = jax.lax.conv_general_dilated(
        x, params["w_conv1"], (1, 1), "VALID",
        dimension_numbers=("NHWC", "HWIO", "NHWC"), precision=hi) + params["b_conv1"]
    y = jnp.maximum(y, 0.0)
    y = jax.lax.reduce_window(y, -jnp.inf, jax.lax.max, (1, 2, 2, 1), (1, 2, 2, 1), "VALID")
    y = jax.lax.conv_general_dilated(
        y, params["w_conv2"], (1, 1), "VALID",
        dimension_numbers=("NHWC", "HWIO", "NHWC"), precision=hi) + params["b_conv2"]
    y = jnp.maximum(y, 0.0)
    y = jax.lax.reduce_window(y, -jnp.inf, jax.lax.max, (1, 2, 2, 1), (1, 2, 2, 1), "VALID")
    y = jnp.transpose(y, (0, 3, 1, 2)).reshape(y.shape[0], 16 * 5 * 5)   # NCHW flatten
    y = jnp.maximum(jnp.dot(y, params["w_fc1"], precision=hi) + params["b_fc1"], 0.0)
    y = jnp.maximum(jnp.dot(y, params["w_fc2"], precision=hi) + params["b_fc2"], 0.0)
    return jnp.dot(y, params["w_fc3"], precision=hi) + params["b_fc3"]


if __name__ == "__main__":
    key = jax.random.PRNGKey(0)
    k_x, k_p = jax.random.split(key)
    params = init_params(k_p)
    packed = pack_params(params)          # one-time weight repacking

    # batch=2 exercises batch padding (1 grid step); batch=10 exercises a
    # 2-step grid (both TensorCores on v7x) plus padding.
    for batch in (2, 10):
        x = jax.random.normal(jax.random.fold_in(k_x, batch),
                              (batch, 3, 32, 32), dtype=jnp.float32)
        out = jax.block_until_ready(cnn_forward(x, packed))
        assert out.shape == (batch, 10), out.shape
        assert bool(jnp.all(jnp.isfinite(out)))

        ref = cnn_reference(x, params)
        max_err = float(jnp.max(jnp.abs(out - ref)))
        # Tolerance reflects bf16 MXU operands in the kernel vs f32 HIGHEST ref.
        assert jnp.allclose(out, ref, atol=5e-2, rtol=5e-2), (batch, max_err)

    print("KERNEL_OK")
</pallas_src>

<mosaic_0001>
module attributes {stable_mosaic.version = 11 : i64} {
  func.func @_lenet_batched_kernel(%arg0: i32, %arg1: memref<256x96xf32, #tpu.memory_space<vmem>>, %arg2: memref<5x96x168xbf16, #tpu.memory_space<vmem>>, %arg3: memref<1x168xf32, #tpu.memory_space<vmem>>, %arg4: memref<2x168x84xbf16, #tpu.memory_space<vmem>>, %arg5: memref<5x84x160xbf16, #tpu.memory_space<vmem>>, %arg6: memref<1x160xf32, #tpu.memory_space<vmem>>, %arg7: memref<2x160x80xbf16, #tpu.memory_space<vmem>>, %arg8: memref<40x241xbf16, #tpu.memory_space<vmem>>, %arg9: memref<5x80x128xbf16, #tpu.memory_space<vmem>>, %arg10: memref<1x128xf32, #tpu.memory_space<vmem>>, %arg11: memref<128x128xbf16, #tpu.memory_space<vmem>>, %arg12: memref<1x128xf32, #tpu.memory_space<vmem>>, %arg13: memref<128x128xbf16, #tpu.memory_space<vmem>>, %arg14: memref<1x128xf32, #tpu.memory_space<vmem>>, %arg15: memref<8x128xf32, #tpu.memory_space<vmem>>) attributes {dimension_semantics = [#tpu.dimension_semantics<parallel>], iteration_bounds = array<i64: 1>, scalar_prefetch = 0 : i64, scratch_operands = 0 : i64, tpu.core_type = #tpu.core_type<tc>, window_params = [{transform_indices = @transform_0, window_bounds = array<i64: 256, 96>}, {pipeline_mode = #tpu.pipeline_mode<synchronous>, transform_indices = @transform_1, window_bounds = array<i64: 5, 96, 168>}, {pipeline_mode = #tpu.pipeline_mode<synchronous>, transform_indices = @transform_2, window_bounds = array<i64: 1, 168>}, {pipeline_mode = #tpu.pipeline_mode<synchronous>, transform_indices = @transform_3, window_bounds = array<i64: 2, 168, 84>}, {pipeline_mode = #tpu.pipeline_mode<synchronous>, transform_indices = @transform_4, window_bounds = array<i64: 5, 84, 160>}, {pipeline_mode = #tpu.pipeline_mode<synchronous>, transform_indices = @transform_5, window_bounds = array<i64: 1, 160>}, {pipeline_mode = #tpu.pipeline_mode<synchronous>, transform_indices = @transform_6, window_bounds = array<i64: 2, 160, 80>}, {pipeline_mode = #tpu.pipeline_mode<synchronous>, transform_indices = @transform_7, window_bounds = array<i64: 40, 241>}, {pipeline_mode = #tpu.pipeline_mode<synchronous>, transform_indices = @transform_8, window_bounds = array<i64: 5, 80, 128>}, {pipeline_mode = #tpu.pipeline_mode<synchronous>, transform_indices = @transform_9, window_bounds = array<i64: 1, 128>}, {pipeline_mode = #tpu.pipeline_mode<synchronous>, transform_indices = @transform_10, window_bounds = array<i64: 128, 128>}, {pipeline_mode = #tpu.pipeline_mode<synchronous>, transform_indices = @transform_11, window_bounds = array<i64: 1, 128>}, {pipeline_mode = #tpu.pipeline_mode<synchronous>, transform_indices = @transform_12, window_bounds = array<i64: 128, 128>}, {pipeline_mode = #tpu.pipeline_mode<synchronous>, transform_indices = @transform_13, window_bounds = array<i64: 1, 128>}, {transform_indices = @transform_14, window_bounds = array<i64: 8, 128>}]} {
    %c0 = arith.constant 0 : index
    %c0_0 = arith.constant 0 : index
    %0 = vector.load %arg1[%c0, %c0_0] : memref<256x96xf32, #tpu.memory_space<vmem>>, vector<252x96xf32>
    %1 = arith.truncf %0 : vector<252x96xf32> to vector<252x96xbf16>
    %c0_1 = arith.constant 0 : index
    %c0_2 = arith.constant 0 : index
    %c0_3 = arith.constant 0 : index
    %2 = vector.load %arg2[%c0_1, %c0_2, %c0_3] : memref<5x96x168xbf16, #tpu.memory_space<vmem>>, vector<1x96x168xbf16>
    %3 = vector.shape_cast %2 : vector<1x96x168xbf16> to vector<96x168xbf16>
    %cst = arith.constant dense<0.000000e+00> : vector<252x168xf32>
    %4 = tpu.matmul %1, %3, %cst {dimension_numbers = #tpu.dot_dimension_numbers<[1], [0], [0], [1], [0, 0, 1, 1], [], []>} : vector<252x96xbf16>, vector<96x168xbf16>, vector<252x168xf32> -> vector<252x168xf32>
    %c1 = arith.constant 1 : index
    %c0_4 = arith.constant 0 : index
    %5 = vector.load %arg1[%c1, %c0_4] : memref<256x96xf32, #tpu.memory_space<vmem>>, vector<252x96xf32>
    %6 = arith.truncf %5 : vector<252x96xf32> to vector<252x96xbf16>
    %c1_5 = arith.constant 1 : index
    %c0_6 = arith.constant 0 : index
    %c0_7 = arith.constant 0 : index
    %7 = vector.load %arg2[%c1_5, %c0_6, %c0_7] : memref<5x96x168xbf16, #tpu.memory_space<vmem>>, vector<1x96x168xbf16>
    %8 = vector.shape_cast %7 : vector<1x96x168xbf16> to vector<96x168xbf16>
    %cst_8 = arith.constant dense<0.000000e+00> : vector<252x168xf32>
    %9 = tpu.matmul %6, %8, %cst_8 {dimension_numbers = #tpu.dot_dimension_numbers<[1], [0], [0], [1], [0, 0, 1, 1], [], []>} : vector<252x96xbf16>, vector<96x168xbf16>, vector<252x168xf32> -> vector<252x168xf32>
    %10 = arith.addf %4, %9 : vector<252x168xf32>
    %c2 = arith.constant 2 : index
    %c0_9 = arith.constant 0 : index
    %11 = vector.load %arg1[%c2, %c0_9] : memref<256x96xf32, #tpu.memory_space<vmem>>, vector<252x96xf32>
    %12 = arith.truncf %11 : vector<252x96xf32> to vector<252x96xbf16>
    %c2_10 = arith.constant 2 : index
    %c0_11 = arith.constant 0 : index
    %c0_12 = arith.constant 0 : index
    %13 = vector.load %arg2[%c2_10, %c0_11, %c0_12] : memref<5x96x168xbf16, #tpu.memory_space<vmem>>, vector<1x96x168xbf16>
    %14 = vector.shape_cast %13 : vector<1x96x168xbf16> to vector<96x168xbf16>
    %cst_13 = arith.constant dense<0.000000e+00> : vector<252x168xf32>
    %15 = tpu.matmul %12, %14, %cst_13 {dimension_numbers = #tpu.dot_dimension_numbers<[1], [0], [0], [1], [0, 0, 1, 1], [], []>} : vector<252x96xbf16>, vector<96x168xbf16>, vector<252x168xf32> -> vector<252x168xf32>
    %16 = arith.addf %10, %15 : vector<252x168xf32>
    %c3 = arith.constant 3 : index
    %c0_14 = arith.constant 0 : index
    %17 = vector.load %arg1[%c3, %c0_14] : memref<256x96xf32, #tpu.memory_space<vmem>>, vector<252x96xf32>
    %18 = arith.truncf %17 : vector<252x96xf32> to vector<252x96xbf16>
    %c3_15 = arith.constant 3 : index
    %c0_16 = arith.constant 0 : index
    %c0_17 = arith.constant 0 : index
    %19 = vector.load %arg2[%c3_15, %c0_16, %c0_17] : memref<5x96x168xbf16, #tpu.memory_space<vmem>>, vector<1x96x168xbf16>
    %20 = vector.shape_cast %19 : vector<1x96x168xbf16> to vector<96x168xbf16>
    %cst_18 = arith.constant dense<0.000000e+00> : vector<252x168xf32>
    %21 = tpu.matmul %18, %20, %cst_18 {dimension_numbers = #tpu.dot_dimension_numbers<[1], [0], [0], [1], [0, 0, 1, 1], [], []>} : vector<252x96xbf16>, vector<96x168xbf16>, vector<252x168xf32> -> vector<252x168xf32>
    %22 = arith.addf %16, %21 : vector<252x168xf32>
    %c4 = arith.constant 4 : index
    %c0_19 = arith.constant 0 : index
    %23 = vector.load %arg1[%c4, %c0_19] : memref<256x96xf32, #tpu.memory_space<vmem>>, vector<252x96xf32>
    %24 = arith.truncf %23 : vector<252x96xf32> to vector<252x96xbf16>
    %c4_20 = arith.constant 4 : index
    %c0_21 = arith.constant 0 : index
    %c0_22 = arith.constant 0 : index
    %25 = vector.load %arg2[%c4_20, %c0_21, %c0_22] : memref<5x96x168xbf16, #tpu.memory_space<vmem>>, vector<1x96x168xbf16>
    %26 = vector.shape_cast %25 : vector<1x96x168xbf16> to vector<96x168xbf16>
    %cst_23 = arith.constant dense<0.000000e+00> : vector<252x168xf32>
    %27 = tpu.matmul %24, %26, %cst_23 {dimension_numbers = #tpu.dot_dimension_numbers<[1], [0], [0], [1], [0, 0, 1, 1], [], []>} : vector<252x96xbf16>, vector<96x168xbf16>, vector<252x168xf32> -> vector<252x168xf32>
    %28 = arith.addf %22, %27 : vector<252x168xf32>
    %c0_24 = arith.constant 0 : index
    %c0_25 = arith.constant 0 : index
    %29 = vector.load %arg3[%c0_24, %c0_25] : memref<1x168xf32, #tpu.memory_space<vmem>>, vector<1x168xf32>
    %30 = vector.broadcast %29 : vector<1x168xf32> to vector<252x168xf32>
    %31 = arith.addf %28, %30 : vector<252x168xf32>
    %cst_26 = arith.constant 0.000000e+00 : f32
    %32 = vector.broadcast %cst_26 : f32 to vector<252x168xf32>
    %33 = arith.maximumf %31, %32 : vector<252x168xf32>
    %34 = arith.truncf %33 : vector<252x168xf32> to vector<252x168xbf16>
    %c0_27 = arith.constant 0 : index
    %c0_28 = arith.constant 0 : index
    %c0_29 = arith.constant 0 : index
    %35 = vector.load %arg4[%c0_27, %c0_28, %c0_29] : memref<2x168x84xbf16, #tpu.memory_space<vmem>>, vector<1x168x84xbf16>
    %36 = vector.shape_cast %35 : vector<1x168x84xbf16> to vector<168x84xbf16>
    %cst_30 = arith.constant dense<0.000000e+00> : vector<252x84xf32>
    %37 = tpu.matmul %34, %36, %cst_30 {dimension_numbers = #tpu.dot_dimension_numbers<[1], [0], [0], [1], [0, 0, 1, 1], [], []>} : vector<252x168xbf16>, vector<168x84xbf16>, vector<252x84xf32> -> vector<252x84xf32>
    %c1_31 = arith.constant 1 : index
    %c0_32 = arith.constant 0 : index
    %c0_33 = arith.constant 0 : index
    %38 = vector.load %arg4[%c1_31, %c0_32, %c0_33] : memref<2x168x84xbf16, #tpu.memory_space<vmem>>, vector<1x168x84xbf16>
    %39 = vector.shape_cast %38 : vector<1x168x84xbf16> to vector<168x84xbf16>
    %cst_34 = arith.constant dense<0.000000e+00> : vector<252x84xf32>
    %40 = tpu.matmul %34, %39, %cst_34 {dimension_numbers = #tpu.dot_dimension_numbers<[1], [0], [0], [1], [0, 0, 1, 1], [], []>} : vector<252x168xbf16>, vector<168x84xbf16>, vector<252x84xf32> -> vector<252x84xf32>
    %41 = arith.maximumf %37, %40 : vector<252x84xf32>
    %42 = vector.extract_strided_slice %41 {offsets = [0, 0], sizes = [251, 84], strides = [1, 1]} : vector<252x84xf32> to vector<251x84xf32>
    %43 = vector.extract_strided_slice %41 {offsets = [1, 0], sizes = [251, 84], strides = [1, 1]} : vector<252x84xf32> to vector<251x84xf32>
    %44 = arith.maximumf %42, %43 : vector<251x84xf32>
    %45 = vector.extract_strided_slice %44 {offsets = [0, 0], sizes = [243, 84], strides = [1, 1]} : vector<251x84xf32> to vector<243x84xf32>
    %46 = arith.truncf %45 : vector<243x84xf32> to vector<243x84xbf16>
    %c0_35 = arith.constant 0 : index
    %c0_36 = arith.constant 0 : index
    %c0_37 = arith.constant 0 : index
    %47 = vector.load %arg5[%c0_35, %c0_36, %c0_37] : memref<5x84x160xbf16, #tpu.memory_space<vmem>>, vector<1x84x160xbf16>
    %48 = vector.shape_cast %47 : vector<1x84x160xbf16> to vector<84x160xbf16>
    %cst_38 = arith.constant dense<0.000000e+00> : vector<243x160xf32>
    %49 = tpu.matmul %46, %48, %cst_38 {dimension_numbers = #tpu.dot_dimension_numbers<[1], [0], [0], [1], [0, 0, 1, 1], [], []>} : vector<243x84xbf16>, vector<84x160xbf16>, vector<243x160xf32> -> vector<243x160xf32>
    %50 = vector.extract_strided_slice %44 {offsets = [2, 0], sizes = [243, 84], strides = [1, 1]} : vector<251x84xf32> to vector<243x84xf32>
    %51 = arith.truncf %50 : vector<243x84xf32> to vector<243x84xbf16>
    %c1_39 = arith.constant 1 : index
    %c0_40 = arith.constant 0 : index
    %c0_41 = arith.constant 0 : index
    %52 = vector.load %arg5[%c1_39, %c0_40, %c0_41] : memref<5x84x160xbf16, #tpu.memory_space<vmem>>, vector<1x84x160xbf16>
    %53 = vector.shape_cast %52 : vector<1x84x160xbf16> to vector<84x160xbf16>
    %cst_42 = arith.constant dense<0.000000e+00> : vector<243x160xf32>
    %54 = tpu.matmul %51, %53, %cst_42 {dimension_numbers = #tpu.dot_dimension_numbers<[1], [0], [0], [1], [0, 0, 1, 1], [], []>} : vector<243x84xbf16>, vector<84x160xbf16>, vector<243x160xf32> -> vector<243x160xf32>
    %55 = arith.addf %49, %54 : vector<243x160xf32>
    %56 = vector.extract_strided_slice %44 {offsets = [4, 0], sizes = [243, 84], strides = [1, 1]} : vector<251x84xf32> to vector<243x84xf32>
    %57 = arith.truncf %56 : vector<243x84xf32> to vector<243x84xbf16>
    %c2_43 = arith.constant 2 : index
    %c0_44 = arith.constant 0 : index
    %c0_45 = arith.constant 0 : index
    %58 = vector.load %arg5[%c2_43, %c0_44, %c0_45] : memref<5x84x160xbf16, #tpu.memory_space<vmem>>, vector<1x84x160xbf16>
    %59 = vector.shape_cast %58 : vector<1x84x160xbf16> to vector<84x160xbf16>
    %cst_46 = arith.constant dense<0.000000e+00> : vector<243x160xf32>
    %60 = tpu.matmul %57, %59, %cst_46 {dimension_numbers = #tpu.dot_dimension_numbers<[1], [0], [0], [1], [0, 0, 1, 1], [], []>} : vector<243x84xbf16>, vector<84x160xbf16>, vector<243x160xf32> -> vector<243x160xf32>
    %61 = arith.addf %55, %60 : vector<243x160xf32>
    %62 = vector.extract_strided_slice %44 {offsets = [6, 0], sizes = [243, 84], strides = [1, 1]} : vector<251x84xf32> to vector<243x84xf32>
    %63 = arith.truncf %62 : vector<243x84xf32> to vector<243x84xbf16>
    %c3_47 = arith.constant 3 : index
    %c0_48 = arith.constant 0 : index
    %c0_49 = arith.constant 0 : index
    %64 = vector.load %arg5[%c3_47, %c0_48, %c0_49] : memref<5x84x160xbf16, #tpu.memory_space<vmem>>, vector<1x84x160xbf16>
    %65 = vector.shape_cast %64 : vector<1x84x160xbf16> to vector<84x160xbf16>
    %cst_50 = arith.constant dense<0.000000e+00> : vector<243x160xf32>
    %66 = tpu.matmul %63, %65, %cst_50 {dimension_numbers = #tpu.dot_dimension_numbers<[1], [0], [0], [1], [0, 0, 1, 1], [], []>} : vector<243x84xbf16>, vector<84x160xbf16>, vector<243x160xf32> -> vector<243x160xf32>
    %67 = arith.addf %61, %66 : vector<243x160xf32>
    %68 = vector.extract_strided_slice %44 {offsets = [8, 0], sizes = [243, 84], strides = [1, 1]} : vector<251x84xf32> to vector<243x84xf32>
    %69 = arith.truncf %68 : vector<243x84xf32> to vector<243x84xbf16>
    %c4_51 = arith.constant 4 : index
    %c0_52 = arith.constant 0 : index
    %c0_53 = arith.constant 0 : index
    %70 = vector.load %arg5[%c4_51, %c0_52, %c0_53] : memref<5x84x160xbf16, #tpu.memory_space<vmem>>, vector<1x84x160xbf16>
    %71 = vector.shape_cast %70 : vector<1x84x160xbf16> to vector<84x160xbf16>
    %cst_54 = arith.constant dense<0.000000e+00> : vector<243x160xf32>
    %72 = tpu.matmul %69, %71, %cst_54 {dimension_numbers = #tpu.dot_dimension_numbers<[1], [0], [0], [1], [0, 0, 1, 1], [], []>} : vector<243x84xbf16>, vector<84x160xbf16>, vector<243x160xf32> -> vector<243x160xf32>
    %73 = arith.addf %67, %72 : vector<243x160xf32>
    %c0_55 = arith.constant 0 : index
    %c0_56 = arith.constant 0 : index
    %74 = vector.load %arg6[%c0_55, %c0_56] : memref<1x160xf32, #tpu.memory_space<vmem>>, vector<1x160xf32>
    %75 = vector.broadcast %74 : vector<1x160xf32> to vector<243x160xf32>
    %76 = arith.addf %73, %75 : vector<243x160xf32>
    %cst_57 = arith.constant 0.000000e+00 : f32
    %77 = vector.broadcast %cst_57 : f32 to vector<243x160xf32>
    %78 = arith.maximumf %76, %77 : vector<243x160xf32>
    %79 = arith.truncf %78 : vector<243x160xf32> to vector<243x160xbf16>
    %c0_58 = arith.constant 0 : index
    %c0_59 = arith.constant 0 : index
    %c0_60 = arith.constant 0 : index
    %80 = vector.load %arg7[%c0_58, %c0_59, %c0_60] : memref<2x160x80xbf16, #tpu.memory_space<vmem>>, vector<1x160x80xbf16>
    %81 = vector.shape_cast %80 : vector<1x160x80xbf16> to vector<160x80xbf16>
    %cst_61 = arith.constant dense<0.000000e+00> : vector<243x80xf32>
    %82 = tpu.matmul %79, %81, %cst_61 {dimension_numbers = #tpu.dot_dimension_numbers<[1], [0], [0], [1], [0, 0, 1, 1], [], []>} : vector<243x160xbf16>, vector<160x80xbf16>, vector<243x80xf32> -> vector<243x80xf32>
    %c1_62 = arith.constant 1 : index
    %c0_63 = arith.constant 0 : index
    %c0_64 = arith.constant 0 : index
    %83 = vector.load %arg7[%c1_62, %c0_63, %c0_64] : memref<2x160x80xbf16, #tpu.memory_space<vmem>>, vector<1x160x80xbf16>
    %84 = vector.shape_cast %83 : vector<1x160x80xbf16> to vector<160x80xbf16>
    %cst_65 = arith.constant dense<0.000000e+00> : vector<243x80xf32>
    %85 = tpu.matmul %79, %84, %cst_65 {dimension_numbers = #tpu.dot_dimension_numbers<[1], [0], [0], [1], [0, 0, 1, 1], [], []>} : vector<243x160xbf16>, vector<160x80xbf16>, vector<243x80xf32> -> vector<243x80xf32>
    %86 = arith.maximumf %82, %85 : vector<243x80xf32>
    %87 = vector.extract_strided_slice %86 {offsets = [0, 0], sizes = [241, 80], strides = [1, 1]} : vector<243x80xf32> to vector<241x80xf32>
    %88 = vector.extract_strided_slice %86 {offsets = [2, 0], sizes = [241, 80], strides = [1, 1]} : vector<243x80xf32> to vector<241x80xf32>
    %89 = arith.maximumf %87, %88 : vector<241x80xf32>
    %c0_66 = arith.constant 0 : index
    %c0_67 = arith.constant 0 : index
    %90 = vector.load %arg8[%c0_66, %c0_67] : memref<40x241xbf16, #tpu.memory_space<vmem>>, vector<40x241xbf16>
    %91 = arith.truncf %89 : vector<241x80xf32> to vector<241x80xbf16>
    %cst_68 = arith.constant dense<0.000000e+00> : vector<40x80xf32>
    %92 = tpu.matmul %90, %91, %cst_68 {dimension_numbers = #tpu.dot_dimension_numbers<[1], [0], [0], [1], [0, 0, 1, 1], [], []>} : vector<40x241xbf16>, vector<241x80xbf16>, vector<40x80xf32> -> vector<40x80xf32>
    %93 = vector.extract_strided_slice %92 {offsets = [0, 0], sizes = [8, 80], strides = [1, 1]} : vector<40x80xf32> to vector<8x80xf32>
    %94 = arith.truncf %93 : vector<8x80xf32> to vector<8x80xbf16>
    %c0_69 = arith.constant 0 : index
    %c0_70 = arith.constant 0 : index
    %c0_71 = arith.constant 0 : index
    %95 = vector.load %arg9[%c0_69, %c0_70, %c0_71] : memref<5x80x128xbf16, #tpu.memory_space<vmem>>, vector<1x80x128xbf16>
    %96 = vector.shape_cast %95 : vector<1x80x128xbf16> to vector<80x128xbf16>
    %cst_72 = arith.constant dense<0.000000e+00> : vector<8x128xf32>
    %97 = tpu.matmul %94, %96, %cst_72 {dimension_numbers = #tpu.dot_dimension_numbers<[1], [0], [0], [1], [0, 0, 1, 1], [], []>} : vector<8x80xbf16>, vector<80x128xbf16>, vector<8x128xf32> -> vector<8x128xf32>
    %98 = vector.extract_strided_slice %92 {offsets = [8, 0], sizes = [8, 80], strides = [1, 1]} : vector<40x80xf32> to vector<8x80xf32>
    %99 = arith.truncf %98 : vector<8x80xf32> to vector<8x80xbf16>
    %c1_73 = arith.constant 1 : index
    %c0_74 = arith.constant 0 : index
    %c0_75 = arith.constant 0 : index
    %100 = vector.load %arg9[%c1_73, %c0_74, %c0_75] : memref<5x80x128xbf16, #tpu.memory_space<vmem>>, vector<1x80x128xbf16>
    %101 = vector.shape_cast %100 : vector<1x80x128xbf16> to vector<80x128xbf16>
    %cst_76 = arith.constant dense<0.000000e+00> : vector<8x128xf32>
    %102 = tpu.matmul %99, %101, %cst_76 {dimension_numbers = #tpu.dot_dimension_numbers<[1], [0], [0], [1], [0, 0, 1, 1], [], []>} : vector<8x80xbf16>, vector<80x128xbf16>, vector<8x128xf32> -> vector<8x128xf32>
    %103 = arith.addf %97, %102 : vector<8x128xf32>
    %104 = vector.extract_strided_slice %92 {offsets = [16, 0], sizes = [8, 80], strides = [1, 1]} : vector<40x80xf32> to vector<8x80xf32>
    %105 = arith.truncf %104 : vector<8x80xf32> to vector<8x80xbf16>
    %c2_77 = arith.constant 2 : index
    %c0_78 = arith.constant 0 : index
    %c0_79 = arith.constant 0 : index
    %106 = vector.load %arg9[%c2_77, %c0_78, %c0_79] : memref<5x80x128xbf16, #tpu.memory_space<vmem>>, vector<1x80x128xbf16>
    %107 = vector.shape_cast %106 : vector<1x80x128xbf16> to vector<80x128xbf16>
    %cst_80 = arith.constant dense<0.000000e+00> : vector<8x128xf32>
    %108 = tpu.matmul %105, %107, %cst_80 {dimension_numbers = #tpu.dot_dimension_numbers<[1], [0], [0], [1], [0, 0, 1, 1], [], []>} : vector<8x80xbf16>, vector<80x128xbf16>, vector<8x128xf32> -> vector<8x128xf32>
    %109 = arith.addf %103, %108 : vector<8x128xf32>
    %110 = vector.extract_strided_slice %92 {offsets = [24, 0], sizes = [8, 80], strides = [1, 1]} : vector<40x80xf32> to vector<8x80xf32>
    %111 = arith.truncf %110 : vector<8x80xf32> to vector<8x80xbf16>
    %c3_81 = arith.constant 3 : index
    %c0_82 = arith.constant 0 : index
    %c0_83 = arith.constant 0 : index
    %112 = vector.load %arg9[%c3_81, %c0_82, %c0_83] : memref<5x80x128xbf16, #tpu.memory_space<vmem>>, vector<1x80x128xbf16>
    %113 = vector.shape_cast %112 : vector<1x80x128xbf16> to vector<80x128xbf16>
    %cst_84 = arith.constant dense<0.000000e+00> : vector<8x128xf32>
    %114 = tpu.matmul %111, %113, %cst_84 {dimension_numbers = #tpu.dot_dimension_numbers<[1], [0], [0], [1], [0, 0, 1, 1], [], []>} : vector<8x80xbf16>, vector<80x128xbf16>, vector<8x128xf32> -> vector<8x128xf32>
    %115 = arith.addf %109, %114 : vector<8x128xf32>
    %116 = vector.extract_strided_slice %92 {offsets = [32, 0], sizes = [8, 80], strides = [1, 1]} : vector<40x80xf32> to vector<8x80xf32>
    %117 = arith.truncf %116 : vector<8x80xf32> to vector<8x80xbf16>
    %c4_85 = arith.constant 4 : index
    %c0_86 = arith.constant 0 : index
    %c0_87 = arith.constant 0 : index
    %118 = vector.load %arg9[%c4_85, %c0_86, %c0_87] : memref<5x80x128xbf16, #tpu.memory_space<vmem>>, vector<1x80x128xbf16>
    %119 = vector.shape_cast %118 : vector<1x80x128xbf16> to vector<80x128xbf16>
    %cst_88 = arith.constant dense<0.000000e+00> : vector<8x128xf32>
    %120 = tpu.matmul %117, %119, %cst_88 {dimension_numbers = #tpu.dot_dimension_numbers<[1], [0], [0], [1], [0, 0, 1, 1], [], []>} : vector<8x80xbf16>, vector<80x128xbf16>, vector<8x128xf32> -> vector<8x128xf32>
    %121 = arith.addf %115, %120 : vector<8x128xf32>
    %c0_89 = arith.constant 0 : index
    %c0_90 = arith.constant 0 : index
    %122 = vector.load %arg10[%c0_89, %c0_90] : memref<1x128xf32, #tpu.memory_space<vmem>>, vector<1x128xf32>
    %123 = vector.broadcast %122 : vector<1x128xf32> to vector<8x128xf32>
    %124 = arith.addf %121, %123 : vector<8x128xf32>
    %cst_91 = arith.constant 0.000000e+00 : f32
    %125 = vector.broadcast %cst_91 : f32 to vector<8x128xf32>
    %126 = arith.maximumf %124, %125 : vector<8x128xf32>
    %127 = arith.truncf %126 : vector<8x128xf32> to vector<8x128xbf16>
    %c0_92 = arith.constant 0 : index
    %c0_93 = arith.constant 0 : index
    %128 = vector.load %arg11[%c0_92, %c0_93] : memref<128x128xbf16, #tpu.memory_space<vmem>>, vector<128x128xbf16>
    %cst_94 = arith.constant dense<0.000000e+00> : vector<8x128xf32>
    %129 = tpu.matmul %127, %128, %cst_94 {dimension_numbers = #tpu.dot_dimension_numbers<[1], [0], [0], [1], [0, 0, 1, 1], [], []>} : vector<8x128xbf16>, vector<128x128xbf16>, vector<8x128xf32> -> vector<8x128xf32>
    %c0_95 = arith.constant 0 : index
    %c0_96 = arith.constant 0 : index
    %130 = vector.load %arg12[%c0_95, %c0_96] : memref<1x128xf32, #tpu.memory_space<vmem>>, vector<1x128xf32>
    %131 = vector.broadcast %130 : vector<1x128xf32> to vector<8x128xf32>
    %132 = arith.addf %129, %131 : vector<8x128xf32>
    %cst_97 = arith.constant 0.000000e+00 : f32
    %133 = vector.broadcast %cst_97 : f32 to vector<8x128xf32>
    %134 = arith.maximumf %132, %133 : vector<8x128xf32>
    %135 = arith.truncf %134 : vector<8x128xf32> to vector<8x128xbf16>
    %c0_98 = arith.constant 0 : index
    %c0_99 = arith.constant 0 : index
    %136 = vector.load %arg13[%c0_98, %c0_99] : memref<128x128xbf16, #tpu.memory_space<vmem>>, vector<128x128xbf16>
    %cst_100 = arith.constant dense<0.000000e+00> : vector<8x128xf32>
    %137 = tpu.matmul %135, %136, %cst_100 {dimension_numbers = #tpu.dot_dimension_numbers<[1], [0], [0], [1], [0, 0, 1, 1], [], []>} : vector<8x128xbf16>, vector<128x128xbf16>, vector<8x128xf32> -> vector<8x128xf32>
    %c0_101 = arith.constant 0 : index
    %c0_102 = arith.constant 0 : index
    %138 = vector.load %arg14[%c0_101, %c0_102] : memref<1x128xf32, #tpu.memory_space<vmem>>, vector<1x128xf32>
    %139 = vector.broadcast %138 : vector<1x128xf32> to vector<8x128xf32>
    %140 = arith.addf %137, %139 : vector<8x128xf32>
    %c0_103 = arith.constant 0 : index
    %c0_104 = arith.constant 0 : index
    %141 = vector.load %arg15[%c0_103, %c0_104] : memref<8x128xf32, #tpu.memory_space<vmem>>, vector<8x128xf32>
    tpu.vector_store %arg15[%c0_103, %c0_104], %140 {strides = array<i32>} : memref<8x128xf32, #tpu.memory_space<vmem>>, vector<8x128xf32>,
    return
  }
  func.func @transform_0(%arg0: i32) -> (i32, i32) {
    %c0_i32 = arith.constant 0 : i32
    %c0_i32_0 = arith.constant 0 : i32
    return %arg0, %c0_i32 : i32, i32
  }
  func.func @transform_1(%arg0: i32) -> (i32, i32, i32) {
    %c0_i32 = arith.constant 0 : i32
    %c0_i32_0 = arith.constant 0 : i32
    %c0_i32_1 = arith.constant 0 : i32
    %c0_i32_2 = arith.constant 0 : i32
    return %c0_i32, %c0_i32_0, %c0_i32_1 : i32, i32, i32
  }
  func.func @transform_2(%arg0: i32) -> (i32, i32) {
    %c0_i32 = arith.constant 0 : i32
    %c0_i32_0 = arith.constant 0 : i32
    %c0_i32_1 = arith.constant 0 : i32
    return %c0_i32, %c0_i32_0 : i32, i32
  }
  func.func @transform_3(%arg0: i32) -> (i32, i32, i32) {
    %c0_i32 = arith.constant 0 : i32
    %c0_i32_0 = arith.constant 0 : i32
    %c0_i32_1 = arith.constant 0 : i32
    %c0_i32_2 = arith.constant 0 : i32
    return %c0_i32, %c0_i32_0, %c0_i32_1 : i32, i32, i32
  }
  func.func @transform_4(%arg0: i32) -> (i32, i32, i32) {
    %c0_i32 = arith.constant 0 : i32
    %c0_i32_0 = arith.constant 0 : i32
    %c0_i32_1 = arith.constant 0 : i32
    %c0_i32_2 = arith.constant 0 : i32
    return %c0_i32, %c0_i32_0, %c0_i32_1 : i32, i32, i32
  }
  func.func @transform_5(%arg0: i32) -> (i32, i32) {
    %c0_i32 = arith.constant 0 : i32
    %c0_i32_0 = arith.constant 0 : i32
    %c0_i32_1 = arith.constant 0 : i32
    return %c0_i32, %c0_i32_0 : i32, i32
  }
  func.func @transform_6(%arg0: i32) -> (i32, i32, i32) {
    %c0_i32 = arith.constant 0 : i32
    %c0_i32_0 = arith.constant 0 : i32
    %c0_i32_1 = arith.constant 0 : i32
    %c0_i32_2 = arith.constant 0 : i32
    return %c0_i32, %c0_i32_0, %c0_i32_1 : i32, i32, i32
  }
  func.func @transform_7(%arg0: i32) -> (i32, i32) {
    %c0_i32 = arith.constant 0 : i32
    %c0_i32_0 = arith.constant 0 : i32
    %c0_i32_1 = arith.constant 0 : i32
    return %c0_i32, %c0_i32_0 : i32, i32
  }
  func.func @transform_8(%arg0: i32) -> (i32, i32, i32) {
    %c0_i32 = arith.constant 0 : i32
    %c0_i32_0 = arith.constant 0 : i32
    %c0_i32_1 = arith.constant 0 : i32
    %c0_i32_2 = arith.constant 0 : i32
    return %c0_i32, %c0_i32_0, %c0_i32_1 : i32, i32, i32
  }
  func.func @transform_9(%arg0: i32) -> (i32, i32) {
    %c0_i32 = arith.constant 0 : i32
    %c0_i32_0 = arith.constant 0 : i32
    %c0_i32_1 = arith.constant 0 : i32
    return %c0_i32, %c0_i32_0 : i32, i32
  }
  func.func @transform_10(%arg0: i32) -> (i32, i32) {
    %c0_i32 = arith.constant 0 : i32
    %c0_i32_0 = arith.constant 0 : i32
    %c0_i32_1 = arith.constant 0 : i32
    return %c0_i32, %c0_i32_0 : i32, i32
  }
  func.func @transform_11(%arg0: i32) -> (i32, i32) {
    %c0_i32 = arith.constant 0 : i32
    %c0_i32_0 = arith.constant 0 : i32
    %c0_i32_1 = arith.constant 0 : i32
    return %c0_i32, %c0_i32_0 : i32, i32
  }
  func.func @transform_12(%arg0: i32) -> (i32, i32) {
    %c0_i32 = arith.constant 0 : i32
    %c0_i32_0 = arith.constant 0 : i32
    %c0_i32_1 = arith.constant 0 : i32
    return %c0_i32, %c0_i32_0 : i32, i32
  }
  func.func @transform_13(%arg0: i32) -> (i32, i32) {
    %c0_i32 = arith.constant 0 : i32
    %c0_i32_0 = arith.constant 0 : i32
    %c0_i32_1 = arith.constant 0 : i32
    return %c0_i32, %c0_i32_0 : i32, i32
  }
  func.func @transform_14(%arg0: i32) -> (i32, i32) {
    %c0_i32 = arith.constant 0 : i32
    %c0_i32_0 = arith.constant 0 : i32
    return %arg0, %c0_i32 : i32, i32
  }
}

</mosaic_0001>

<bundles_post_ra>
// kernel: _cnn_forward_fn.1
= control target key start
LH: loop header
LB: loop body
LE: loop exit
PB: predicated region body
PF: predicated region fallthrough
CT: control target
= control target key end

     0   :  { %vm229_vm0 = vcmask 785408   ;;  %vm2274_vm1 = vcmask 1043456   ;;  %vm2225_vm2 = vcmask 326656   ;;  %vm3105_vm3 = vcmask 1041408   ;;  %s11858_s1 = inlined_call_operand.vmem [shape: bf16[5,96,168], index: 1, kind: input, shape index: {}]   ;;  %s11859_s0 = inlined_call_operand.vmem [shape: f32[256,96], index: 0, kind: input, shape index: {}]   ;;  %s11860_s3 = inlined_call_operand.vmem [shape: bf16[2,168,84], index: 3, kind: input, shape index: {}]   ;;  %s11861_s2 = inlined_call_operand.vmem [shape: f32[1,168], index: 2, kind: input, shape index: {}]   ;;  %s11862_s4 = inlined_call_operand.vmem [shape: bf16[5,84,160], index: 4, kind: input, shape index: {}]   ;;  %s11863_s6 = inlined_call_operand.vmem [shape: bf16[2,160,80], index: 6, kind: input, shape index: {}]   ;;  %s11864_s5 = inlined_call_operand.vmem [shape: f32[1,160], index: 5, kind: input, shape index: {}]   ;;  %s11865_s7 = inlined_call_operand.vmem [shape: bf16[40,241], index: 7, kind: input, shape index: {}]   ;;  %s11866_s8 = inlined_call_operand.vmem [shape: bf16[5,80,128], index: 8, kind: input, shape index: {}]   ;;  %s11867_s9 = inlined_call_operand.vmem [shape: f32[1,128], index: 9, kind: input, shape index: {}]   ;;  %s11868_s11 = inlined_call_operand.vmem [shape: f32[1,128], index: 11, kind: input, shape index: {}]   ;;  %s11869_s10 = inlined_call_operand.vmem [shape: bf16[128,128], index: 10, kind: input, shape index: {}]   ;;  %s11870_s12 = inlined_call_operand.vmem [shape: bf16[128,128], index: 12, kind: input, shape index: {}]   ;;  %s11871_s13 = inlined_call_operand.vmem [shape: f32[1,128], index: 13, kind: input, shape index: {}]   ;;  %s11872_s14 = inlined_call_operand.vmem [shape: f32[8,128], index: 14, kind: output, shape index: {}]  }
   0x1   :  { %v6272_v0 = vld [vmem:[%s11858_s1 + $0xb0] sm:$0xf]  ;;  %v7586_v1 = vld [vmem:[%s11858_s1 + $0xb4] sm:$0xf0]  ;;  %v7585_v2 = vld [vmem:[%s11858_s1 + $0xb4] sm:$0xf] }
   0x2   :  { %v6273_v3 = vor.u32 %v7586_v1, %v6272_v0  ;;  %v6274_v4 = vld [vmem:[%s11858_s1 + $0xb8] sm:$0xf0]  ;;  %v6352_v5 = vld [vmem:[%s11858_s1 + $0x50] sm:$0xf]  ;;  %v7574_v6 = vld [vmem:[%s11858_s1 + $0x54] sm:$0xf0] }
   0x3   :  { %v6277_v7 = vor.u32 %v7585_v2, %v6274_v4  ;;  %v6353_v8 = vor.u32 %v7574_v6, %v6352_v5  ;;  %v7573_v9 = vld [vmem:[%s11858_s1 + $0x54] sm:$0xf]  ;;  %v6354_v10 = vld [vmem:[%s11858_s1 + $0x58] sm:$0xf0]  ;;  %v6264_v11 = vld [vmem:[%s11858_s1 + $0xa0] sm:$0xf] }
   0x4   :  { %280 = vmatpush.bf16.msra.mxu0 %v6273_v3  ;;  %v6357_v12 = vor.u32 %v7573_v9, %v6354_v10  ;;  %v7584_v13 = vld [vmem:[%s11858_s1 + $0xa4] sm:$0xf0]  ;;  %v7583_v14 = vld [vmem:[%s11858_s1 + $0xa4] sm:$0xf]  ;;  %v6266_v15 = vld [vmem:[%s11858_s1 + $0xa8] sm:$0xf0] }
   0x5   :  { %369 = vmatpush.bf16.msra.mxu1 %v6277_v7  ;;  %566 = vmatpush.bf16.msra.mxu2 %v6353_v8  ;;  %v6265_v16 = vor.u32 %v7584_v13, %v6264_v11  ;;  %v6269_v17 = vor.u32 %v7583_v14, %v6266_v15  ;;  %v6344_v18 = vld [vmem:[%s11858_s1 + $0x40] sm:$0xf]  ;;  %v7572_v19 = vld [vmem:[%s11858_s1 + $0x44] sm:$0xf0]  ;;  %v7571_v20 = vld [vmem:[%s11858_s1 + $0x44] sm:$0xf] }
   0x6   :  { %655 = vmatpush.bf16.msra.mxu3 %v6357_v12  ;;  %v6345_v21 = vor.u32 %v7572_v19, %v6344_v18  ;;  %v6346_v22 = vld [vmem:[%s11858_s1 + $0x48] sm:$0xf0]  ;;  %v6256_v23 = vld [vmem:[%s11858_s1 + $0x90] sm:$0xf]  ;;  %v7582_v24 = vld [vmem:[%s11858_s1 + $0x94] sm:$0xf0] }
   0x7   :  { %v6349_v25 = vor.u32 %v7571_v20, %v6346_v22  ;;  %v7581_v26 = vld [vmem:[%s11858_s1 + $0x94] sm:$0xf]  ;;  %v6258_v27 = vld [vmem:[%s11858_s1 + $0x98] sm:$0xf0]  ;;  %v6336_v28 = vld [vmem:[%s11858_s1 + $0x30] sm:$0xf]  ;;  %v6257_v29 = vor.u32 %v7582_v24, %v6256_v23 }
   0x8   :  { %281 = vmatpush.bf16.msra.mxu0 %v6265_v16  ;;  %v7570_v30 = vld [vmem:[%s11858_s1 + $0x34] sm:$0xf0]  ;;  %v7569_v31 = vld [vmem:[%s11858_s1 + $0x34] sm:$0xf]  ;;  %v6338_v32 = vld [vmem:[%s11858_s1 + $0x38] sm:$0xf0]  ;;  %v6261_v33 = vor.u32 %v7581_v26, %v6258_v27 }
   0x9   :  { %370 = vmatpush.bf16.msra.mxu1 %v6269_v17  ;;  %567 = vmatpush.bf16.msra.mxu2 %v6345_v21  ;;  %v6337_v34 = vor.u32 %v7570_v30, %v6336_v28  ;;  %v6248_v35 = vld [vmem:[%s11858_s1 + $0x80] sm:$0xf]  ;;  %v7580_v36 = vld [vmem:[%s11858_s1 + $0x84] sm:$0xf0]  ;;  %v7579_v37 = vld [vmem:[%s11858_s1 + $0x84] sm:$0xf]  ;;  %v6341_v38 = vor.u32 %v7569_v31, %v6338_v32 }
   0xa   :  { %656 = vmatpush.bf16.msra.mxu3 %v6349_v25  ;;  %v6250_v39 = vld [vmem:[%s11858_s1 + $0x88] sm:$0xf0]  ;;  %v6328_v40 = vld [vmem:[%s11858_s1 + $0x20] sm:$0xf]  ;;  %v7568_v41 = vld [vmem:[%s11858_s1 + $0x24] sm:$0xf0]  ;;  %v6249_v44 = vor.u32 %v7580_v36, %v6248_v35 }
   0xb   :  { %v7567_v42 = vld [vmem:[%s11858_s1 + $0x24] sm:$0xf]  ;;  %v6330_v43 = vld [vmem:[%s11858_s1 + $0x28] sm:$0xf0]  ;;  %v6253_v45 = vor.u32 %v7579_v37, %v6250_v39  ;;  %v6329_v46 = vor.u32 %v7568_v41, %v6328_v40  ;;  %v6240_v47 = vld [vmem:[%s11858_s1 + $0x70] sm:$0xf] }
   0xc   :  { %282 = vmatpush.bf16.msra.mxu0 %v6257_v29  ;;  %v7578_v48 = vld [vmem:[%s11858_s1 + $0x74] sm:$0xf0]  ;;  %v7577_v49 = vld [vmem:[%s11858_s1 + $0x74] sm:$0xf]  ;;  %v6333_v50 = vor.u32 %v7567_v42, %v6330_v43  ;;  %v6242_v51 = vld [vmem:[%s11858_s1 + $0x78] sm:$0xf0] }
   0xd   :  { %371 = vmatpush.bf16.msra.mxu1 %v6261_v33  ;;  %568 = vmatpush.bf16.msra.mxu2 %v6337_v34  ;;  %v6320_v52 = vld [vmem:[%s11858_s1 + $0x10] sm:$0xf]  ;;  %v7566_v53 = vld [vmem:[%s11858_s1 + $0x14] sm:$0xf0]  ;;  %v7565_v54 = vld [vmem:[%s11858_s1 + $0x14] sm:$0xf]  ;;  %v6241_v56 = vor.u32 %v7578_v48, %v6240_v47  ;;  %v6245_v57 = vor.u32 %v7577_v49, %v6242_v51 }
   0xe   :  { %657 = vmatpush.bf16.msra.mxu3 %v6341_v38  ;;  %v6322_v55 = vld [vmem:[%s11858_s1 + $0x18] sm:$0xf0]  ;;  %v6321_v58 = vor.u32 %v7566_v53, %v6320_v52  ;;  %v6232_v59 = vld [vmem:[%s11858_s1 + $0x60] sm:$0xf]  ;;  %v7576_v60 = vld [vmem:[%s11858_s1 + $0x64] sm:$0xf0] }
   0xf   :  { %v7575_v61 = vld [vmem:[%s11858_s1 + $0x64] sm:$0xf]  ;;  %v6325_v62 = vor.u32 %v7565_v54, %v6322_v55  ;;  %v6234_v63 = vld [vmem:[%s11858_s1 + $0x68] sm:$0xf0]  ;;  %v6312_v0 = vld [vmem:[%s11858_s1] sm:$0xf]  ;;  %v6233_v4 = vor.u32 %v7576_v60, %v6232_v59 }
  0x10   :  { %283 = vmatpush.bf16.msra.mxu0 %v6249_v44  ;;  %v7564_v1 = vld [vmem:[%s11858_s1 + $0x4] sm:$0xf0]  ;;  %v7563_v2 = vld [vmem:[%s11858_s1 + $0x4] sm:$0xf]  ;;  %v6314_v3 = vld [vmem:[%s11858_s1 + $0x8] sm:$0xf0]  ;;  %v6237_v7 = vor.u32 %v7575_v61, %v6234_v63 }
  0x11   :  { %372 = vmatpush.bf16.msra.mxu1 %v6253_v45  ;;  %569 = vmatpush.bf16.msra.mxu2 %v6329_v46  ;;  %v108_v5 = vld [vmem:[%s11859_s0 + $0x1] sm:$0xff]  ;;  %v109_v6 = vld [vmem:[%s11859_s0 + $0x9] sm:$0xff]  ;;  %v6313_v8 = vor.u32 %v7564_v1, %v6312_v0  ;;  %v6317_v11 = vor.u32 %v7563_v2, %v6314_v3  ;;  %v110_v14 = vld [vmem:[%s11859_s0 + $0x11] sm:$0xff]  ;;  %vm2786_vm4 = vcmask 1046528   ;;  %vm3056_vm5 = vcmask 687104  }
  0x12   :  { %658 = vmatpush.bf16.msra.mxu3 %v6333_v50  ;;  %v48_v9 = vld [vmem:[%s11859_s0] sm:$0xff]  ;;  %v49_v10 = vld [vmem:[%s11859_s0 + $0x8] sm:$0xff]  ;;  %v140_v12 = vpack.c.bf16 %v109_v6, %v108_v5  ;;  %v50_v16 = vld [vmem:[%s11859_s0 + $0x10] sm:$0xff]  ;;  %vm3585_vm6 = vcmask 1045504   ;;  %vm3978_vm7 = vcmask 1044480   ;;  %vm4974_vm8 = vcmask 261120  }
  0x13   :  { %v80_v13 = vpack.c.bf16 %v49_v10, %v48_v9  ;;  %v111_v15 = vld [vmem:[%s11859_s0 + $0x19] sm:$0xff]  ;;  %v112_v20 = vld [vmem:[%s11859_s0 + $0x21] sm:$0xff]  ;;  %v113_v21 = vld [vmem:[%s11859_s0 + $0x29] sm:$0xff]  ;;  %vm5697_vm9 = vcmask 1040384   ;;  %vm5687_vm10 = vcmask 924672   ;;  %vm5802_vm11 = vcmask 654336  }
  0x14   :  { %284 = vmatpush.bf16.msra.mxu0 %v6241_v56  ;;  %v51_v17 = vld [vmem:[%s11859_s0 + $0x18] sm:$0xff]  ;;  %v141_v18 = vpack.c.bf16 %v111_v15, %v110_v14  ;;  %v52_v22 = vld [vmem:[%s11859_s0 + $0x20] sm:$0xff]  ;;  %v53_v23 = vld [vmem:[%s11859_s0 + $0x28] sm:$0xff]  ;;  %v142_v24 = vpack.c.bf16 %v113_v21, %v112_v20 }
  0x15   :  { %373 = vmatpush.bf16.msra.mxu1 %v6245_v57  ;;  %570 = vmatpush.bf16.msra.mxu2 %v6321_v58  ;;  %v81_v19 = vpack.c.bf16 %v51_v17, %v50_v16  ;;  %v82_v25 = vpack.c.bf16 %v53_v23, %v52_v22  ;;  %v114_v26 = vld [vmem:[%s11859_s0 + $0x31] sm:$0xff]  ;;  %v115_v27 = vld [vmem:[%s11859_s0 + $0x39] sm:$0xff]  ;;  %v116_v32 = vld [vmem:[%s11859_s0 + $0x41] sm:$0xff] }
  0x16   :  { %659 = vmatpush.bf16.msra.mxu3 %v6325_v62  ;;  %v54_v28 = vld [vmem:[%s11859_s0 + $0x30] sm:$0xff]  ;;  %v55_v29 = vld [vmem:[%s11859_s0 + $0x38] sm:$0xff]  ;;  %v143_v30 = vpack.c.bf16 %v115_v27, %v114_v26  ;;  %v56_v34 = vld [vmem:[%s11859_s0 + $0x40] sm:$0xff] }
  0x17   :  { %v83_v31 = vpack.c.bf16 %v55_v29, %v54_v28  ;;  %v117_v33 = vld [vmem:[%s11859_s0 + $0x49] sm:$0xff]  ;;  %v118_v38 = vld [vmem:[%s11859_s0 + $0x51] sm:$0xff]  ;;  %v119_v39 = vld [vmem:[%s11859_s0 + $0x59] sm:$0xff] }
  0x18   :  { %285 = vmatpush.bf16.msra.mxu0 %v6233_v4  ;;  %v57_v35 = vld [vmem:[%s11859_s0 + $0x48] sm:$0xff]  ;;  %v144_v36 = vpack.c.bf16 %v117_v33, %v116_v32  ;;  %v58_v40 = vld [vmem:[%s11859_s0 + $0x50] sm:$0xff]  ;;  %v59_v41 = vld [vmem:[%s11859_s0 + $0x58] sm:$0xff]  ;;  %v145_v42 = vpack.c.bf16 %v119_v39, %v118_v38 }
  0x19   :  { %374 = vmatpush.bf16.msra.mxu1 %v6237_v7  ;;  %571 = vmatpush.bf16.msra.mxu2 %v6313_v8  ;;  %v84_v37 = vpack.c.bf16 %v57_v35, %v56_v34  ;;  %v85_v43 = vpack.c.bf16 %v59_v41, %v58_v40  ;;  %v120_v44 = vld [vmem:[%s11859_s0 + $0x61] sm:$0xff]  ;;  %v121_v45 = vld [vmem:[%s11859_s0 + $0x69] sm:$0xff]  ;;  %v122_v50 = vld [vmem:[%s11859_s0 + $0x71] sm:$0xff] }
  0x1a   :  { %660 = vmatpush.bf16.msra.mxu3 %v6317_v11  ;;  %v60_v46 = vld [vmem:[%s11859_s0 + $0x60] sm:$0xff]  ;;  %v61_v47 = vld [vmem:[%s11859_s0 + $0x68] sm:$0xff]  ;;  %v146_v48 = vpack.c.bf16 %v121_v45, %v120_v44  ;;  %v62_v52 = vld [vmem:[%s11859_s0 + $0x70] sm:$0xff] }
  0x1b   :  { %6278 = vmatmul.msk.bf16.vlgmr.msra.gmra.mxu0 %vm229_vm0, %v140_v12  ;;  %v86_v49 = vpack.c.bf16 %v61_v47, %v60_v46  ;;  %v123_v51 = vld [vmem:[%s11859_s0 + $0x79] sm:$0xff]  ;;  %v124_v56 = vld [vmem:[%s11859_s0 + $0x81] sm:$0xff]  ;;  %v125_v57 = vld [vmem:[%s11859_s0 + $0x89] sm:$0xff] }
  0x1c   :  { %6294 = vmatmul.msk.bf16.vlgmr.msra.gmra.mxu1 %vm229_vm0, %v140_v12  ;;  %6358 = vmatmul.msk.bf16.vlgmr.msra.gmra.mxu2 %vm229_vm0, %v80_v13  ;;  %v63_v53 = vld [vmem:[%s11859_s0 + $0x78] sm:$0xff]  ;;  %v147_v54 = vpack.c.bf16 %v123_v51, %v122_v50  ;;  %v64_v58 = vld [vmem:[%s11859_s0 + $0x80] sm:$0xff]  ;;  %v65_v59 = vld [vmem:[%s11859_s0 + $0x88] sm:$0xff]  ;;  %v148_v60 = vpack.c.bf16 %v125_v57, %v124_v56 }
  0x1d   :  { %6374 = vmatmul.msk.bf16.vlgmr.msra.gmra.mxu3 %vm229_vm0, %v80_v13  ;;  %v87_v55 = vpack.c.bf16 %v63_v53, %v62_v52  ;;  %v88_v62 = vpack.c.bf16 %v65_v59, %v64_v58  ;;  %v126_v6 = vld [vmem:[%s11859_s0 + $0x91] sm:$0xff]  ;;  %v127_v7 = vld [vmem:[%s11859_s0 + $0x99] sm:$0xff]  ;;  %v69_v27 = vld [vmem:[%s11859_s0 + $0xa8] sm:$0xff] }
  0x1e   :  { %v66_v8 = vld [vmem:[%s11859_s0 + $0x90] sm:$0xff]  ;;  %v67_v9 = vld [vmem:[%s11859_s0 + $0x98] sm:$0xff]  ;;  %v149_v11 = vpack.c.bf16 %v127_v7, %v126_v6  ;;  %v68_v26 = vld [vmem:[%s11859_s0 + $0xa0] sm:$0xff] }
  0x1f   :  { %v89_v15 = vpack.c.bf16 %v67_v9, %v66_v8  ;;  %v90_v33 = vpack.c.bf16 %v69_v27, %v68_v26  ;;  %v70_v44 = vld [vmem:[%s11859_s0 + $0xb0] sm:$0xff]  ;;  %v71_v45 = vld [vmem:[%s11859_s0 + $0xb8] sm:$0xff] }
  0x20   :  { %v91_v51 = vpack.c.bf16 %v71_v45, %v70_v44  ;;  %v6536_v26 = vld [vmem:[%s11858_s1 + $0x170] sm:$0xf]  ;;  %v7610_v27 = vld [vmem:[%s11858_s1 + $0x174] sm:$0xf0]  ;;  %v7595_v44 = vld [vmem:[%s11858_s1 + $0x104] sm:$0xf] }
  0x2b   :  { %6279 = vmatmul.msk.bf16.gmra.mxu0 %vm229_vm0, %v141_v18 }
  0x2c   :  { %6295 = vmatmul.msk.bf16.gmra.mxu1 %vm229_vm0, %v141_v18  ;;  %6359 = vmatmul.msk.bf16.gmra.mxu2 %vm229_vm0, %v81_v19 }
  0x2d   :  { %6375 = vmatmul.msk.bf16.gmra.mxu3 %vm229_vm0, %v81_v19 }
  0x3b   :  { %6280 = vmatmul.msk.bf16.gmra.mxu0 %vm229_vm0, %v142_v24 }
  0x3c   :  { %6296 = vmatmul.msk.bf16.gmra.mxu1 %vm229_vm0, %v142_v24  ;;  %6360 = vmatmul.msk.bf16.gmra.mxu2 %vm229_vm0, %v82_v25  ;;  %v128_v24 = vld [vmem:[%s11859_s0 + $0xa1] sm:$0xff] }
  0x3d   :  { %6376 = vmatmul.msk.bf16.gmra.mxu3 %vm229_vm0, %v82_v25  ;;  %v129_v25 = vld [vmem:[%s11859_s0 + $0xa9] sm:$0xff] }
  0x3e   :  { %v150_v29 = vpack.c.bf16 %v129_v25, %v128_v24 }
  0x4b   :  { %6281 = vmatmul.msk.bf16.gmra.mxu0 %vm229_vm0, %v143_v30 }
  0x4c   :  { %6297 = vmatmul.msk.bf16.gmra.mxu1 %vm229_vm0, %v143_v30  ;;  %6361 = vmatmul.msk.bf16.gmra.mxu2 %vm229_vm0, %v83_v31 }
  0x4d   :  { %6377 = vmatmul.msk.bf16.gmra.mxu3 %vm229_vm0, %v83_v31 }
  0x5b   :  { %6282 = vmatmul.msk.bf16.gmra.mxu0 %vm229_vm0, %v144_v36 }
  0x5c   :  { %6298 = vmatmul.msk.bf16.gmra.mxu1 %vm229_vm0, %v144_v36  ;;  %6362 = vmatmul.msk.bf16.gmra.mxu2 %vm229_vm0, %v84_v37 }
  0x5d   :  { %6378 = vmatmul.msk.bf16.gmra.mxu3 %vm229_vm0, %v84_v37 }
  0x6b   :  { %6283 = vmatmul.msk.bf16.gmra.mxu0 %vm229_vm0, %v145_v42 }
  0x6c   :  { %6299 = vmatmul.msk.bf16.gmra.mxu1 %vm229_vm0, %v145_v42  ;;  %6363 = vmatmul.msk.bf16.gmra.mxu2 %vm229_vm0, %v85_v43  ;;  %v130_v42 = vld [vmem:[%s11859_s0 + $0xb1] sm:$0xff] }
  0x6d   :  { %6379 = vmatmul.msk.bf16.gmra.mxu3 %vm229_vm0, %v85_v43  ;;  %v131_v43 = vld [vmem:[%s11859_s0 + $0xb9] sm:$0xff] }
  0x6e   :  { %v151_v47 = vpack.c.bf16 %v131_v43, %v130_v42  ;;  %v6436_v42 = vld [vmem:[%s11858_s1 + $0x100] sm:$0xf]  ;;  %v7596_v43 = vld [vmem:[%s11858_s1 + $0x104] sm:$0xf0] }
  0x7b   :  { %6284 = vmatmul.msk.bf16.gmra.mxu0 %vm229_vm0, %v146_v48 }
  0x7c   :  { %6300 = vmatmul.msk.bf16.gmra.mxu1 %vm229_vm0, %v146_v48  ;;  %6364 = vmatmul.msk.bf16.gmra.mxu2 %vm229_vm0, %v86_v49 }
  0x7d   :  { %6380 = vmatmul.msk.bf16.gmra.mxu3 %vm229_vm0, %v86_v49 }
  0x8b   :  { %6285 = vmatmul.msk.bf16.gmra.mxu0 %vm229_vm0, %v147_v54 }
  0x8c   :  { %6301 = vmatmul.msk.bf16.gmra.mxu1 %vm229_vm0, %v147_v54  ;;  %6365 = vmatmul.msk.bf16.gmra.mxu2 %vm229_vm0, %v87_v55 }
  0x8d   :  { %6381 = vmatmul.msk.bf16.gmra.mxu3 %vm229_vm0, %v87_v55 }
  0x98   :  { %v287_v61 = vpop.f32.mrf.mxu0 }
  0x99   :  { %v376_v63 = vpop.f32.mrf.mxu1 }
  0x9b   :  { %6286 = vmatmul.msk.bf16.gmra.mxu0 %vm229_vm0, %v148_v60 }
  0x9c   :  { %6302 = vmatmul.msk.bf16.gmra.mxu1 %vm229_vm0, %v148_v60  ;;  %6366 = vmatmul.msk.bf16.gmra.mxu2 %vm229_vm0, %v88_v62  ;;  %v132_v60 = vld [vmem:[%s11859_s0 + $0xc1] sm:$0xff] }
  0x9d   :  { %6382 = vmatmul.msk.bf16.gmra.mxu3 %vm229_vm0, %v88_v62  ;;  %v72_v62 = vld [vmem:[%s11859_s0 + $0xc0] sm:$0xff] }
  0x9f   :  { %v573_v0 = vpop.f32.mrf.mxu2 }
  0xa0   :  { %v8134_v1 = vadd.f32 %v573_v0, %v287_v61  ;;  %v662_v2 = vpop.f32.mrf.mxu3  ;;  %v289_v3 = vpop.f32.mrf.mxu0  ;;  %v133_v61 = vld [vmem:[%s11859_s0 + $0xc9] sm:$0xff] }
  0xa1   :  { %v8136_v4 = vadd.f32 %v662_v2, %v376_v63  ;;  %v378_v5 = vpop.f32.mrf.mxu1  ;;  %v73_v63 = vld [vmem:[%s11859_s0 + $0xc8] sm:$0xff]  ;;  %v152_v2 = vpack.c.bf16 %v133_v61, %v132_v60  ;;  %v7607_v61 = vld [vmem:[%s11858_s1 + $0x164] sm:$0xf] }
  0xa2   :  { %v92_v7 = vpack.c.bf16 %v73_v63, %v72_v62  ;;  %v6530_v62 = vld [vmem:[%s11858_s1 + $0x168] sm:$0xf0] }
  0xa3   :  { %v6533_v63 = vor.u32 %v7607_v61, %v6530_v62  ;;  %v6506_v61 = vld [vmem:[%s11858_s1 + $0x138] sm:$0xf0]  ;;  %v76_v62 = vld [vmem:[%s11859_s0 + $0xe0] sm:$0xff] }
  0xa7   :  { %v575_v10 = vpop.f32.mrf.mxu2 }
  0xa8   :  { %v8150_v12 = vadd.f32 %v575_v10, %v289_v3  ;;  %v664_v13 = vpop.f32.mrf.mxu3  ;;  %v292_v14 = vpop.f32.mrf.mxu0  ;;  %v6444_v10 = vld [vmem:[%s11858_s1 + $0x110] sm:$0xf] }
  0xa9   :  { %v8152_v16 = vadd.f32 %v664_v13, %v378_v5  ;;  %v381_v17 = vpop.f32.mrf.mxu1  ;;  %v7597_v13 = vld [vmem:[%s11858_s1 + $0x114] sm:$0xf] }
  0xab   :  { %6287 = vmatmul.msk.bf16.gmra.mxu0 %vm229_vm0, %v149_v11 }
  0xac   :  { %6303 = vmatmul.msk.bf16.gmra.mxu1 %vm229_vm0, %v149_v11  ;;  %6367 = vmatmul.msk.bf16.gmra.mxu2 %vm229_vm0, %v89_v15  ;;  %v7598_v11 = vld [vmem:[%s11858_s1 + $0x114] sm:$0xf0] }
  0xad   :  { %6383 = vmatmul.msk.bf16.gmra.mxu3 %vm229_vm0, %v89_v15  ;;  %v6446_v15 = vld [vmem:[%s11858_s1 + $0x118] sm:$0xf0] }
  0xaf   :  { %v578_v18 = vpop.f32.mrf.mxu2 }
  0xb0   :  { %v8158_v19 = vadd.f32 %v578_v18, %v292_v14  ;;  %v667_v20 = vpop.f32.mrf.mxu3  ;;  %v294_v21 = vpop.f32.mrf.mxu0  ;;  %v6445_v14 = vor.u32 %v7598_v11, %v6444_v10  ;;  %v6449_v18 = vor.u32 %v7597_v13, %v6446_v15  ;;  %v7606_v10 = vld [vmem:[%s11858_s1 + $0x154] sm:$0xf0]  ;;  %v6522_v15 = vld [vmem:[%s11858_s1 + $0x158] sm:$0xf0] }
  0xb1   :  { %v8160_v22 = vadd.f32 %v667_v20, %v381_v17  ;;  %v383_v23 = vpop.f32.mrf.mxu1 }
  0xb2   :  { %913 = vmatpush.bf16.msrb.mxu0 %v6445_v14  ;;  %1002 = vmatpush.bf16.msrb.mxu1 %v6449_v18  ;;  %v7605_v14 = vld [vmem:[%s11858_s1 + $0x154] sm:$0xf] }
  0xb7   :  { %v580_v28 = vpop.f32.mrf.mxu2 }
  0xb8   :  { %v8174_v30 = vadd.f32 %v580_v28, %v294_v21  ;;  %v669_v31 = vpop.f32.mrf.mxu3  ;;  %v297_v32 = vpop.f32.mrf.mxu0  ;;  %v7609_v28 = vld [vmem:[%s11858_s1 + $0x174] sm:$0xf] }
  0xb9   :  { %v8176_v34 = vadd.f32 %v669_v31, %v383_v23  ;;  %v386_v35 = vpop.f32.mrf.mxu1  ;;  %v6538_v31 = vld [vmem:[%s11858_s1 + $0x178] sm:$0xf0] }
  0xbb   :  { %6288 = vmatmul.msk.bf16.gmra.mxu0 %vm229_vm0, %v150_v29 }
  0xbc   :  { %6304 = vmatmul.msk.bf16.gmra.mxu1 %vm229_vm0, %v150_v29  ;;  %6368 = vmatmul.msk.bf16.gmra.mxu2 %vm229_vm0, %v90_v33  ;;  %v6537_v29 = vor.u32 %v7610_v27, %v6536_v26 }
  0xbd   :  { %6384 = vmatmul.msk.bf16.gmra.mxu3 %vm229_vm0, %v90_v33  ;;  %v134_v33 = vld [vmem:[%s11859_s0 + $0xd1] sm:$0xff] }
  0xbe   :  { %1324 = vmatpush.bf16.msrb.mxu2 %v6537_v29 }
  0xbf   :  { %v583_v36 = vpop.f32.mrf.mxu2 }
  0xc0   :  { %v8182_v37 = vadd.f32 %v583_v36, %v297_v32  ;;  %v672_v38 = vpop.f32.mrf.mxu3  ;;  %v299_v39 = vpop.f32.mrf.mxu0  ;;  %v6541_v32 = vor.u32 %v7609_v28, %v6538_v31  ;;  %v74_v36 = vld [vmem:[%s11859_s0 + $0xd0] sm:$0xff]  ;;  %v6422_v31 = vld [vmem:[%s11858_s1 + $0xe8] sm:$0xf0] }
  0xc1   :  { %v8184_v40 = vadd.f32 %v672_v38, %v386_v35  ;;  %v388_v41 = vpop.f32.mrf.mxu1  ;;  %v135_v35 = vld [vmem:[%s11859_s0 + $0xd9] sm:$0xff] }
  0xc2   :  { %v75_v38 = vld [vmem:[%s11859_s0 + $0xd8] sm:$0xff]  ;;  %1413 = vmatpush.bf16.msrb.mxu3 %v6541_v32  ;;  %v6512_v32 = vld [vmem:[%s11858_s1 + $0x140] sm:$0xf] }
  0xc6   :  { %1414 = vmatpush.bf16.msrb.mxu3 %v6533_v63  ;;  %v77_v63 = vld [vmem:[%s11859_s0 + $0xe8] sm:$0xff] }
  0xc7   :  { %v585_v46 = vpop.f32.mrf.mxu2 }
  0xc8   :  { %v8198_v48 = vadd.f32 %v585_v46, %v299_v39  ;;  %v674_v49 = vpop.f32.mrf.mxu3  ;;  %v302_v50 = vpop.f32.mrf.mxu0 }
  0xc9   :  { %v8200_v52 = vadd.f32 %v674_v49, %v388_v41  ;;  %v391_v53 = vpop.f32.mrf.mxu1  ;;  %v153_v41 = vpack.c.bf16 %v135_v35, %v134_v33  ;;  %v93_v49 = vpack.c.bf16 %v75_v38, %v74_v36  ;;  %v7604_v33 = vld [vmem:[%s11858_s1 + $0x144] sm:$0xf0] }
  0xcb   :  { %6289 = vmatmul.msk.bf16.gmra.mxu0 %vm229_vm0, %v151_v47 }
  0xcc   :  { %6305 = vmatmul.msk.bf16.gmra.mxu1 %vm229_vm0, %v151_v47  ;;  %6369 = vmatmul.msk.bf16.gmra.mxu2 %vm229_vm0, %v91_v51 }
  0xcd   :  { %6385 = vmatmul.msk.bf16.gmra.mxu3 %vm229_vm0, %v91_v51  ;;  %v6438_v51 = vld [vmem:[%s11858_s1 + $0x108] sm:$0xf0] }
  0xcf   :  { %v588_v54 = vpop.f32.mrf.mxu2 }
  0xd0   :  { %v8206_v55 = vadd.f32 %v588_v54, %v302_v50  ;;  %v677_v56 = vpop.f32.mrf.mxu3  ;;  %v304_v57 = vpop.f32.mrf.mxu0  ;;  %v6437_v50 = vor.u32 %v7596_v43, %v6436_v42  ;;  %v7608_v54 = vld [vmem:[%s11858_s1 + $0x164] sm:$0xf0]  ;;  %v6514_v42 = vld [vmem:[%s11858_s1 + $0x148] sm:$0xf0]  ;;  %v6412_v43 = vld [vmem:[%s11858_s1 + $0xd0] sm:$0xf] }
  0xd1   :  { %v8208_v58 = vadd.f32 %v677_v56, %v391_v53  ;;  %v393_v59 = vpop.f32.mrf.mxu1  ;;  %v6528_v53 = vld [vmem:[%s11858_s1 + $0x160] sm:$0xf] }
  0xd2   :  { %v6529_v60 = vor.u32 %v7608_v54, %v6528_v53  ;;  %914 = vmatpush.bf16.msrb.mxu0 %v6437_v50  ;;  %v6504_v53 = vld [vmem:[%s11858_s1 + $0x130] sm:$0xf]  ;;  %v7602_v54 = vld [vmem:[%s11858_s1 + $0x134] sm:$0xf0] }
  0xd4   :  { %1325 = vmatpush.bf16.msrb.mxu2 %v6529_v60  ;;  %v137_v60 = vld [vmem:[%s11859_s0 + $0xe9] sm:$0xff] }
  0xd7   :  { %v590_v0 = vpop.f32.mrf.mxu2 }
  0xd8   :  { %v8222_v3 = vadd.f32 %v590_v0, %v304_v57  ;;  %v679_v5 = vpop.f32.mrf.mxu3  ;;  %v307_v6 = vpop.f32.mrf.mxu0  ;;  %v6428_v0 = vld [vmem:[%s11858_s1 + $0xf0] sm:$0xf] }
  0xd9   :  { %v8224_v8 = vadd.f32 %v679_v5, %v393_v59  ;;  %v396_v9 = vpop.f32.mrf.mxu1  ;;  %v6441_v59 = vor.u32 %v7595_v44, %v6438_v51  ;;  %v7593_v5 = vld [vmem:[%s11858_s1 + $0xf4] sm:$0xf] }
  0xdb   :  { %6290 = vmatmul.msk.bf16.gmra.mxu0 %vm229_vm0, %v152_v2  ;;  %1003 = vmatpush.bf16.msrb.mxu1 %v6441_v59  ;;  %v136_v59 = vld [vmem:[%s11859_s0 + $0xe1] sm:$0xff] }
  0xdc   :  { %6306 = vmatmul.msk.bf16.gmra.mxu1 %vm229_vm0, %v152_v2  ;;  %6370 = vmatmul.msk.bf16.gmra.mxu2 %vm229_vm0, %v92_v7  ;;  %v7594_v2 = vld [vmem:[%s11858_s1 + $0xf4] sm:$0xf0] }
  0xdd   :  { %6386 = vmatmul.msk.bf16.gmra.mxu3 %vm229_vm0, %v92_v7  ;;  %v6430_v7 = vld [vmem:[%s11858_s1 + $0xf8] sm:$0xf0] }
  0xde   :  { %v6433_v11 = vor.u32 %v7593_v5, %v6430_v7  ;;  %v6404_v7 = vld [vmem:[%s11858_s1 + $0xc0] sm:$0xf] }
  0xdf   :  { %v593_v17 = vpop.f32.mrf.mxu2 }
  0xe0   :  { %v8242_v20 = vadd.f32 %v593_v17, %v307_v6  ;;  %v682_v21 = vpop.f32.mrf.mxu3  ;;  %v309_v23 = vpop.f32.mrf.mxu0  ;;  %v6429_v6 = vor.u32 %v7594_v2, %v6428_v0  ;;  %v6525_v17 = vor.u32 %v7605_v14, %v6522_v15  ;;  %1004 = vmatpush.bf16.msrb.mxu1 %v6433_v11  ;;  %v6505_v0 = vor.u32 %v7602_v54, %v6504_v53 }
  0xe1   :  { %v8244_v24 = vadd.f32 %v682_v21, %v396_v9  ;;  %v398_v25 = vpop.f32.mrf.mxu1  ;;  %v6520_v9 = vld [vmem:[%s11858_s1 + $0x150] sm:$0xf]  ;;  %v6420_v21 = vld [vmem:[%s11858_s1 + $0xe0] sm:$0xf]  ;;  %v94_v15 = vpack.c.bf16 %v77_v63, %v76_v62 }
  0xe2   :  { %v6521_v13 = vor.u32 %v7606_v10, %v6520_v9  ;;  %915 = vmatpush.bf16.msrb.mxu0 %v6429_v6  ;;  %1415 = vmatpush.bf16.msrb.mxu3 %v6525_v17  ;;  %v154_v6 = vpack.c.bf16 %v137_v60, %v136_v59  ;;  %v7588_v9 = vld [vmem:[%s11858_s1 + $0xc4] sm:$0xf0]  ;;  %v7587_v10 = vld [vmem:[%s11858_s1 + $0xc4] sm:$0xf] }
  0xe3   :  { %v6405_v17 = vor.u32 %v7588_v9, %v6404_v7  ;;  %v742_v7 = vld [vmem:[%s11859_s0 + $0x2] sm:$0xff]  ;;  %v743_v9 = vld [vmem:[%s11859_s0 + $0xa] sm:$0xff] }
  0xe4   :  { %1326 = vmatpush.bf16.msrb.mxu2 %v6521_v13 }
  0xe7   :  { %v595_v39 = vpop.f32.mrf.mxu2 }
  0xe8   :  { %v8279_v45 = vadd.f32 %v595_v39, %v309_v23  ;;  %v684_v46 = vpop.f32.mrf.mxu3  ;;  %v312_v47 = vpop.f32.mrf.mxu0  ;;  %v7592_v23 = vld [vmem:[%s11858_s1 + $0xe4] sm:$0xf0]  ;;  %v6513_v39 = vor.u32 %v7604_v33, %v6512_v32  ;;  %v6498_v32 = vld [vmem:[%s11858_s1 + $0x128] sm:$0xf0] }
  0xe9   :  { %v8290_v56 = vadd.f32 %v684_v46, %v398_v25  ;;  %v401_v57 = vpop.f32.mrf.mxu1  ;;  %v7591_v25 = vld [vmem:[%s11858_s1 + $0xe4] sm:$0xf]  ;;  %v6421_v29 = vor.u32 %v7592_v23, %v6420_v21  ;;  %v7590_v46 = vld [vmem:[%s11858_s1 + $0xd4] sm:$0xf0]  ;;  %v6496_v21 = vld [vmem:[%s11858_s1 + $0x120] sm:$0xf] }
  0xea   :  { %v6425_v38 = vor.u32 %v7591_v25, %v6422_v31  ;;  %v6413_v50 = vor.u32 %v7590_v46, %v6412_v43  ;;  %1327 = vmatpush.bf16.msrb.mxu2 %v6513_v39  ;;  %v7600_v23 = vld [vmem:[%s11858_s1 + $0x124] sm:$0xf0]  ;;  %v7599_v31 = vld [vmem:[%s11858_s1 + $0x124] sm:$0xf]  ;;  %v139_v46 = vld [vmem:[%s11859_s0 + $0xf9] sm:$0xf] }
  0xeb   :  { %6291 = vmatmul.msk.bf16.gmra.mxu0 %vm229_vm0, %v153_v41  ;;  %v6501_v33 = vor.u32 %v7599_v31, %v6498_v32 }
  0xec   :  { %6307 = vmatmul.msk.bf16.gmra.mxu1 %vm229_vm0, %v153_v41  ;;  %6371 = vmatmul.msk.bf16.gmra.mxu2 %vm229_vm0, %v93_v49  ;;  %v7603_v41 = vld [vmem:[%s11858_s1 + $0x144] sm:$0xf] }
  0xed   :  { %6387 = vmatmul.msk.bf16.gmra.mxu3 %vm229_vm0, %v93_v49  ;;  %916 = vmatpush.bf16.msrb.mxu0 %v6421_v29  ;;  %v6517_v44 = vor.u32 %v7603_v41, %v6514_v42  ;;  %v6414_v49 = vld [vmem:[%s11858_s1 + $0xd8] sm:$0xf0]  ;;  %v6497_v29 = vor.u32 %v7600_v23, %v6496_v21 }
  0xee   :  { %1005 = vmatpush.bf16.msrb.mxu1 %v6425_v38  ;;  %1328 = vmatpush.bf16.msrb.mxu2 %v6505_v0 }
  0xef   :  { %v598_v18 = vpop.f32.mrf.mxu2  ;;  %1416 = vmatpush.bf16.msrb.mxu3 %v6517_v44  ;;  %v138_v44 = vld [vmem:[%s11859_s0 + $0xf1] sm:$0xff] }
  0xf0   :  { %v8335_v26 = vadd.f32 %v598_v18, %v312_v47  ;;  %v687_v27 = vpop.f32.mrf.mxu3  ;;  %v314_v28 = vpop.f32.mrf.mxu0  ;;  %v7589_v47 = vld [vmem:[%s11858_s1 + $0xd4] sm:$0xf]  ;;  %v6406_v18 = vld [vmem:[%s11858_s1 + $0xc8] sm:$0xf0] }
  0xf1   :  { %v8346_v35 = vadd.f32 %v687_v27, %v401_v57  ;;  %v403_v36 = vpop.f32.mrf.mxu1  ;;  %v6417_v51 = vor.u32 %v7589_v47, %v6414_v49  ;;  %v7601_v57 = vld [vmem:[%s11858_s1 + $0x134] sm:$0xf]  ;;  %917 = vmatpush.bf16.msrb.mxu0 %v6413_v50  ;;  %v79_v49 = vld [vmem:[%s11859_s0 + $0xf8] sm:$0xf] }
  0xf2   :  { %v6509_v2 = vor.u32 %v7601_v57, %v6506_v61  ;;  %1329 = vmatpush.bf16.msrb.mxu2 %v6497_v29  ;;  %v78_v47 = vld [vmem:[%s11859_s0 + $0xf0] sm:$0xff] }
  0xf3   :  { %1006 = vmatpush.bf16.msrb.mxu1 %v6417_v51  ;;  %v155_v51 = vpack.c.bf16 %v139_v46, %v138_v44  ;;  %v95_v59 = vpack.c.bf16 %v79_v49, %v78_v47  ;;  %v1155_v44 = vld [vmem:[%s11859_s0 + $0x13] sm:$0xff]  ;;  %v1156_v46 = vld [vmem:[%s11859_s0 + $0x1b] sm:$0xff] }
  0xf4   :  { %1417 = vmatpush.bf16.msrb.mxu3 %v6509_v2 }
  0xf5   :  { %918 = vmatpush.bf16.msrb.mxu0 %v6405_v17 }
  0xf7   :  { %v600_v5 = vpop.f32.mrf.mxu2 }
  0xf8   :  { %v8399_v11 = vadd.f32 %v600_v5, %v314_v28  ;;  %v689_v13 = vpop.f32.mrf.mxu3  ;;  %v317_v14 = vpop.f32.mrf.mxu0  ;;  %v6409_v28 = vor.u32 %v7587_v10, %v6406_v18  ;;  %1418 = vmatpush.bf16.msrb.mxu3 %v6501_v33  ;;  %v1153_v10 = vld [vmem:[%s11859_s0 + $0x3] sm:$0xff] }
  0xf9   :  { %v8410_v25 = vadd.f32 %v689_v13, %v403_v36  ;;  %v406_v27 = vpop.f32.mrf.mxu1  ;;  %v1154_v13 = vld [vmem:[%s11859_s0 + $0xb] sm:$0xff] }
  0xfa   :  { %1007 = vmatpush.bf16.msrb.mxu1 %v6409_v28  ;;  %v1185_v23 = vpack.c.bf16 %v1154_v13, %v1153_v10  ;;  %v746_v10 = vld [vmem:[%s11859_s0 + $0x22] sm:$0xff]  ;;  %v747_v13 = vld [vmem:[%s11859_s0 + $0x2a] sm:$0xff] }
  0xfb   :  { %6292 = vmatmul.msk.bf16.gmra.mxu0 %vm229_vm0, %v154_v6 }
  0xfc   :  { %6308 = vmatmul.msk.bf16.gmra.mxu1 %vm229_vm0, %v154_v6  ;;  %6372 = vmatmul.msk.bf16.gmra.mxu2 %vm229_vm0, %v94_v15 }
  0xfd   :  { %6388 = vmatmul.msk.bf16.gmra.mxu3 %vm229_vm0, %v94_v15  ;;  %v774_v15 = vpack.c.bf16 %v743_v9, %v742_v7 }
  0xff   :  { %v603_v36 = vpop.f32.mrf.mxu2 }
 0x100   :  { %v8422_v38 = vadd.f32 %v603_v36, %v317_v14  ;;  %v692_v39 = vpop.f32.mrf.mxu3  ;;  %v319_v41 = vpop.f32.mrf.mxu0 }
 0x101   :  { %v8424_v42 = vadd.f32 %v692_v39, %v406_v27  ;;  %v408_v43 = vpop.f32.mrf.mxu1 }
 0x107   :  { %v605_v50 = vpop.f32.mrf.mxu2 }
 0x108   :  { %v8438_v53 = vadd.f32 %v605_v50, %v319_v41  ;;  %v694_v54 = vpop.f32.mrf.mxu3  ;;  %v322_v57 = vpop.f32.mrf.mxu0  ;;  %v744_v41 = vld [vmem:[%s11859_s0 + $0x12] sm:$0xff] }
 0x109   :  { %v8440_v60 = vadd.f32 %v694_v54, %v408_v43  ;;  %v411_v61 = vpop.f32.mrf.mxu1  ;;  %v745_v43 = vld [vmem:[%s11859_s0 + $0x1a] sm:$0xff] }
 0x10a   :  { %v775_v49 = vpack.c.bf16 %v745_v43, %v744_v41 }
 0x10b   :  { %6293 = vmatmul.msk.bf16.gmra.mxu0 %vm229_vm0, %v155_v51 }
 0x10c   :  { %6309 = vmatmul.msk.bf16.gmra.mxu1 %vm229_vm0, %v155_v51  ;;  %6373 = vmatmul.msk.bf16.gmra.mxu2 %vm229_vm0, %v95_v59 }
 0x10d   :  { %6389 = vmatmul.msk.bf16.gmra.mxu3 %vm229_vm0, %v95_v59 }
 0x10f   :  { %v608_v62 = vpop.f32.mrf.mxu2 }
 0x110   :  { %v8446_v63 = vadd.f32 %v608_v62, %v322_v57  ;;  %v697_v0 = vpop.f32.mrf.mxu3  ;;  %v324_v2 = vpop.f32.mrf.mxu0  ;;  %v1186_v57 = vpack.c.bf16 %v1156_v46, %v1155_v44 }
 0x111   :  { %v8448_v5 = vadd.f32 %v697_v0, %v411_v61  ;;  %v413_v6 = vpop.f32.mrf.mxu1 }
 0x117   :  { %v610_v14 = vpop.f32.mrf.mxu2 }
 0x118   :  { %v8462_v17 = vadd.f32 %v610_v14, %v324_v2  ;;  %v699_v18 = vpop.f32.mrf.mxu3  ;;  %v327_v21 = vpop.f32.mrf.mxu0  ;;  %v1157_v14 = vld [vmem:[%s11859_s0 + $0x23] sm:$0xff] }
 0x119   :  { %v8464_v27 = vadd.f32 %v699_v18, %v413_v6  ;;  %v416_v28 = vpop.f32.mrf.mxu1 }
 0x11b   :  { %6450 = vmatmul.msk.bf16.vlgmr.msrb.gmra.mxu0 %vm229_vm0, %v774_v15 }
 0x11c   :  { %6466 = vmatmul.msk.bf16.vlgmr.msrb.gmra.mxu1 %vm229_vm0, %v774_v15  ;;  %6542 = vmatmul.msk.bf16.vlgmr.msrb.gmra.mxu2 %vm229_vm0, %v1185_v23  ;;  %v1158_v15 = vld [vmem:[%s11859_s0 + $0x2b] sm:$0xff] }
 0x11d   :  { %6558 = vmatmul.msk.bf16.vlgmr.msrb.gmra.mxu3 %vm229_vm0, %v1185_v23 }
 0x11f   :  { %v613_v29 = vpop.f32.mrf.mxu2 }
 0x120   :  { %v8470_v31 = vadd.f32 %v613_v29, %v327_v21  ;;  %v702_v32 = vpop.f32.mrf.mxu3  ;;  %v329_v33 = vpop.f32.mrf.mxu0  ;;  %v776_v21 = vpack.c.bf16 %v747_v13, %v746_v10 }
 0x121   :  { %v8472_v36 = vadd.f32 %v702_v32, %v416_v28  ;;  %v418_v39 = vpop.f32.mrf.mxu1  ;;  %v1187_v32 = vpack.c.bf16 %v1158_v15, %v1157_v14 }
 0x127   :  { %v615_v47 = vpop.f32.mrf.mxu2 }
 0x128   :  { %v8486_v50 = vadd.f32 %v615_v47, %v329_v33  ;;  %v704_v51 = vpop.f32.mrf.mxu3  ;;  %v332_v54 = vpop.f32.mrf.mxu0 }
 0x129   :  { %v8488_v59 = vadd.f32 %v704_v51, %v418_v39  ;;  %v421_v61 = vpop.f32.mrf.mxu1  ;;  %v748_v51 = vld [vmem:[%s11859_s0 + $0x32] sm:$0xff] }
 0x12b   :  { %6451 = vmatmul.msk.bf16.gmra.mxu0 %vm229_vm0, %v775_v49 }
 0x12c   :  { %6467 = vmatmul.msk.bf16.gmra.mxu1 %vm229_vm0, %v775_v49  ;;  %6543 = vmatmul.msk.bf16.gmra.mxu2 %vm229_vm0, %v1186_v57 }
 0x12d   :  { %6559 = vmatmul.msk.bf16.gmra.mxu3 %vm229_vm0, %v1186_v57  ;;  %v1159_v57 = vld [vmem:[%s11859_s0 + $0x33] sm:$0xff] }
 0x12f   :  { %v618_v62 = vpop.f32.mrf.mxu2 }
 0x130   :  { %v8494_v0 = vadd.f32 %v618_v62, %v332_v54  ;;  %v707_v2 = vpop.f32.mrf.mxu3  ;;  %v334_v6 = vpop.f32.mrf.mxu0  ;;  %v749_v54 = vld [vmem:[%s11859_s0 + $0x3a] sm:$0xff] }
 0x131   :  { %v8496_v7 = vadd.f32 %v707_v2, %v421_v61  ;;  %v423_v9 = vpop.f32.mrf.mxu1  ;;  %v1160_v61 = vld [vmem:[%s11859_s0 + $0x3b] sm:$0xff]  ;;  %v777_v2 = vpack.c.bf16 %v749_v54, %v748_v51 }
 0x132   :  { %v1188_v13 = vpack.c.bf16 %v1160_v61, %v1159_v57 }
 0x137   :  { %v620_v18 = vpop.f32.mrf.mxu2 }
 0x138   :  { %v8510_v23 = vadd.f32 %v620_v18, %v334_v6  ;;  %v709_v28 = vpop.f32.mrf.mxu3  ;;  %v337_v29 = vpop.f32.mrf.mxu0 }
 0x139   :  { %v8512_v33 = vadd.f32 %v709_v28, %v423_v9  ;;  %v426_v39 = vpop.f32.mrf.mxu1 }
 0x13b   :  { %6452 = vmatmul.msk.bf16.gmra.mxu0 %vm229_vm0, %v776_v21 }
 0x13c   :  { %6468 = vmatmul.msk.bf16.gmra.mxu1 %vm229_vm0, %v776_v21  ;;  %6544 = vmatmul.msk.bf16.gmra.mxu2 %vm229_vm0, %v1187_v32 }
 0x13d   :  { %6560 = vmatmul.msk.bf16.gmra.mxu3 %vm229_vm0, %v1187_v32 }
 0x13f   :  { %v623_v41 = vpop.f32.mrf.mxu2 }
 0x140   :  { %v8518_v43 = vadd.f32 %v623_v41, %v337_v29  ;;  %v712_v44 = vpop.f32.mrf.mxu3  ;;  %v339_v46 = vpop.f32.mrf.mxu0  ;;  %v750_v41 = vld [vmem:[%s11859_s0 + $0x42] sm:$0xff] }
 0x141   :  { %v8520_v47 = vadd.f32 %v712_v44, %v426_v39  ;;  %v428_v49 = vpop.f32.mrf.mxu1  ;;  %v751_v44 = vld [vmem:[%s11859_s0 + $0x4a] sm:$0xff] }
 0x142   :  { %v778_v54 = vpack.c.bf16 %v751_v44, %v750_v41  ;;  %v753_v44 = vld [vmem:[%s11859_s0 + $0x5a] sm:$0xff] }
 0x147   :  { %v625_v62 = vpop.f32.mrf.mxu2 }
 0x148   :  { %v8534_v6 = vadd.f32 %v625_v62, %v339_v46  ;;  %v714_v9 = vpop.f32.mrf.mxu3  ;;  %v342_v10 = vpop.f32.mrf.mxu0  ;;  %v1161_v46 = vld [vmem:[%s11859_s0 + $0x43] sm:$0xff] }
 0x149   :  { %v8536_v14 = vadd.f32 %v714_v9, %v428_v49  ;;  %v431_v15 = vpop.f32.mrf.mxu1  ;;  %v1162_v49 = vld [vmem:[%s11859_s0 + $0x4b] sm:$0xff] }
 0x14b   :  { %6453 = vmatmul.msk.bf16.gmra.mxu0 %vm229_vm0, %v777_v2 }
 0x14c   :  { %6469 = vmatmul.msk.bf16.gmra.mxu1 %vm229_vm0, %v777_v2  ;;  %6545 = vmatmul.msk.bf16.gmra.mxu2 %vm229_vm0, %v1188_v13  ;;  %v1189_v2 = vpack.c.bf16 %v1162_v49, %v1161_v46  ;;  %v1163_v46 = vld [vmem:[%s11859_s0 + $0x53] sm:$0xff]  ;;  %v1164_v49 = vld [vmem:[%s11859_s0 + $0x5b] sm:$0xff] }
 0x14d   :  { %6561 = vmatmul.msk.bf16.gmra.mxu3 %vm229_vm0, %v1188_v13 }
 0x14f   :  { %v628_v18 = vpop.f32.mrf.mxu2 }
 0x150   :  { %v8542_v21 = vadd.f32 %v628_v18, %v342_v10  ;;  %v717_v28 = vpop.f32.mrf.mxu3  ;;  %v344_v29 = vpop.f32.mrf.mxu0 }
 0x151   :  { %v8544_v32 = vadd.f32 %v717_v28, %v431_v15  ;;  %v433_v39 = vpop.f32.mrf.mxu1 }
 0x157   :  { %v630_v51 = vpop.f32.mrf.mxu2 }
 0x158   :  { %v8558_v57 = vadd.f32 %v630_v51, %v344_v29  ;;  %v719_v61 = vpop.f32.mrf.mxu3  ;;  %v347_v62 = vpop.f32.mrf.mxu0 }
 0x159   :  { %v8560_v9 = vadd.f32 %v719_v61, %v433_v39  ;;  %v436_v10 = vpop.f32.mrf.mxu1  ;;  %v752_v39 = vld [vmem:[%s11859_s0 + $0x52] sm:$0xff] }
 0x15b   :  { %6454 = vmatmul.msk.bf16.gmra.mxu0 %vm229_vm0, %v778_v54 }
 0x15c   :  { %6470 = vmatmul.msk.bf16.gmra.mxu1 %vm229_vm0, %v778_v54  ;;  %6546 = vmatmul.msk.bf16.gmra.mxu2 %vm229_vm0, %v1189_v2  ;;  %v779_v54 = vpack.c.bf16 %v753_v44, %v752_v39 }
 0x15d   :  { %6562 = vmatmul.msk.bf16.gmra.mxu3 %vm229_vm0, %v1189_v2 }
 0x15f   :  { %v633_v13 = vpop.f32.mrf.mxu2 }
 0x160   :  { %v8566_v15 = vadd.f32 %v633_v13, %v347_v62  ;;  %v722_v18 = vpop.f32.mrf.mxu3  ;;  %v349_v28 = vpop.f32.mrf.mxu0 }
 0x161   :  { %v8568_v29 = vadd.f32 %v722_v18, %v436_v10  ;;  %v438_v41 = vpop.f32.mrf.mxu1  ;;  %v1190_v10 = vpack.c.bf16 %v1164_v49, %v1163_v46  ;;  %v755_v46 = vld [vmem:[%s11859_s0 + $0x6a] sm:$0xff] }
 0x162   :  { %11892 = vst [vmem:[#allocation2_spill] sm:$0xff] %v8566_v15  ;;  %v1165_v49 = vld [vmem:[%s11859_s0 + $0x63] sm:$0xff] }
 0x163   :  { %11893 = vst [vmem:[#allocation3_spill] sm:$0xff] %v8568_v29 }
 0x167   :  { %v635_v51 = vpop.f32.mrf.mxu2 }
 0x168   :  { %v8582_v61 = vadd.f32 %v635_v51, %v349_v28  ;;  %v724_v62 = vpop.f32.mrf.mxu3  ;;  %v352_v2 = vpop.f32.mrf.mxu0 }
 0x169   :  { %v8584_v13 = vadd.f32 %v724_v62, %v438_v41  ;;  %v441_v18 = vpop.f32.mrf.mxu1  ;;  %v754_v41 = vld [vmem:[%s11859_s0 + $0x62] sm:$0xff] }
 0x16a   :  { %11894 = vst [vmem:[#allocation4_spill] sm:$0xff] %v8582_v61  ;;  %v780_v62 = vpack.c.bf16 %v755_v46, %v754_v41 }
 0x16b   :  { %11895 = vst [vmem:[#allocation5_spill] sm:$0xff] %v8584_v13  ;;  %6455 = vmatmul.msk.bf16.gmra.mxu0 %vm229_vm0, %v779_v54 }
 0x16c   :  { %6471 = vmatmul.msk.bf16.gmra.mxu1 %vm229_vm0, %v779_v54  ;;  %6547 = vmatmul.msk.bf16.gmra.mxu2 %vm229_vm0, %v1190_v10 }
 0x16d   :  { %6563 = vmatmul.msk.bf16.gmra.mxu3 %vm229_vm0, %v1190_v10 }
 0x16f   :  { %v638_v29 = vpop.f32.mrf.mxu2 }
 0x170   :  { %v8590_v15 = vadd.f32 %v638_v29, %v352_v2  ;;  %v727_v39 = vpop.f32.mrf.mxu3  ;;  %v354_v28 = vpop.f32.mrf.mxu0  ;;  %v1166_v29 = vld [vmem:[%s11859_s0 + $0x6b] sm:$0xff] }
 0x171   :  { %v8592_v44 = vadd.f32 %v727_v39, %v441_v18  ;;  %v443_v51 = vpop.f32.mrf.mxu1  ;;  %v1191_v39 = vpack.c.bf16 %v1166_v29, %v1165_v49  ;;  %v757_v49 = vld [vmem:[%s11859_s0 + $0x7a] sm:$0xff] }
 0x172   :  { %11896 = vst [vmem:[#allocation6_spill] sm:$0xff] %v8590_v15  ;;  %v1167_v29 = vld [vmem:[%s11859_s0 + $0x73] sm:$0xff] }
 0x173   :  { %11897 = vst [vmem:[#allocation7_spill] sm:$0xff] %v8592_v44 }
 0x177   :  { %v640_v54 = vpop.f32.mrf.mxu2 }
 0x178   :  { %v8606_v2 = vadd.f32 %v640_v54, %v354_v28  ;;  %v729_v10 = vpop.f32.mrf.mxu3  ;;  %v357_v18 = vpop.f32.mrf.mxu0 }
 0x179   :  { %v8608_v44 = vadd.f32 %v729_v10, %v443_v51  ;;  %v446_v15 = vpop.f32.mrf.mxu1  ;;  %v756_v51 = vld [vmem:[%s11859_s0 + $0x72] sm:$0xff] }
 0x17a   :  { %11898 = vst [vmem:[#allocation8_spill] sm:$0xff] %v8606_v2 }
 0x17b   :  { %11899 = vst [vmem:[#allocation9_spill] sm:$0xff] %v8608_v44  ;;  %6456 = vmatmul.msk.bf16.gmra.mxu0 %vm229_vm0, %v780_v62 }
 0x17c   :  { %6472 = vmatmul.msk.bf16.gmra.mxu1 %vm229_vm0, %v780_v62  ;;  %6548 = vmatmul.msk.bf16.gmra.mxu2 %vm229_vm0, %v1191_v39 }
 0x17d   :  { %6564 = vmatmul.msk.bf16.gmra.mxu3 %vm229_vm0, %v1191_v39 }
 0x17f   :  { %v643_v13 = vpop.f32.mrf.mxu2 }
 0x180   :  { %v8614_v61 = vadd.f32 %v643_v13, %v357_v18  ;;  %v732_v41 = vpop.f32.mrf.mxu3  ;;  %v359_v28 = vpop.f32.mrf.mxu0  ;;  %v1168_v13 = vld [vmem:[%s11859_s0 + $0x7b] sm:$0xff] }
 0x181   :  { %v8616_v46 = vadd.f32 %v732_v41, %v446_v15  ;;  %v448_v54 = vpop.f32.mrf.mxu1  ;;  %v781_v15 = vpack.c.bf16 %v757_v49, %v756_v51  ;;  %v1192_v41 = vpack.c.bf16 %v1168_v13, %v1167_v29  ;;  %v759_v29 = vld [vmem:[%s11859_s0 + $0x8a] sm:$0xff] }
 0x182   :  { %11900 = vst [vmem:[#allocation10_spill] sm:$0xff] %v8614_v61  ;;  %v1169_v13 = vld [vmem:[%s11859_s0 + $0x83] sm:$0xff] }
 0x183   :  { %11901 = vst [vmem:[#allocation11_spill] sm:$0xff] %v8616_v46 }
 0x187   :  { %v645_v62 = vpop.f32.mrf.mxu2 }
 0x188   :  { %v8630_v10 = vadd.f32 %v645_v62, %v359_v28  ;;  %v734_v18 = vpop.f32.mrf.mxu3  ;;  %v362_v39 = vpop.f32.mrf.mxu0 }
 0x189   :  { %v8632_v46 = vadd.f32 %v734_v18, %v448_v54  ;;  %v451_v61 = vpop.f32.mrf.mxu1  ;;  %v758_v54 = vld [vmem:[%s11859_s0 + $0x82] sm:$0xff] }
 0x18a   :  { %11902 = vst [vmem:[#allocation12_spill] sm:$0xff] %v8630_v10 }
 0x18b   :  { %11903 = vst [vmem:[#allocation13_spill] sm:$0xff] %v8632_v46  ;;  %6457 = vmatmul.msk.bf16.gmra.mxu0 %vm229_vm0, %v781_v15 }
 0x18c   :  { %6473 = vmatmul.msk.bf16.gmra.mxu1 %vm229_vm0, %v781_v15  ;;  %6549 = vmatmul.msk.bf16.gmra.mxu2 %vm229_vm0, %v1192_v41 }
 0x18d   :  { %6565 = vmatmul.msk.bf16.gmra.mxu3 %vm229_vm0, %v1192_v41 }
 0x18f   :  { %v648_v44 = vpop.f32.mrf.mxu2 }
 0x190   :  { %v8638_v2 = vadd.f32 %v648_v44, %v362_v39  ;;  %v737_v51 = vpop.f32.mrf.mxu3  ;;  %v364_v28 = vpop.f32.mrf.mxu0  ;;  %v1170_v44 = vld [vmem:[%s11859_s0 + $0x8b] sm:$0xff] }
 0x191   :  { %v8640_v49 = vadd.f32 %v737_v51, %v451_v61  ;;  %v453_v62 = vpop.f32.mrf.mxu1  ;;  %v782_v61 = vpack.c.bf16 %v759_v29, %v758_v54  ;;  %v1193_v51 = vpack.c.bf16 %v1170_v44, %v1169_v13 }
 0x192   :  { %11904 = vst [vmem:[#allocation14_spill] sm:$0xff] %v8638_v2 }
 0x193   :  { %11905 = vst [vmem:[#allocation15_spill] sm:$0xff] %v8640_v49 }
 0x197   :  { %v650_v15 = vpop.f32.mrf.mxu2 }
 0x198   :  { %v8654_v18 = vadd.f32 %v650_v15, %v364_v28  ;;  %v739_v39 = vpop.f32.mrf.mxu3  ;;  %v920_v41 = vpop.f32.mrf.mxu0  ;;  %v761_v15 = vld [vmem:[%s11859_s0 + $0x9a] sm:$0xff] }
 0x199   :  { %v8656_v49 = vadd.f32 %v739_v39, %v453_v62  ;;  %v1089_v2 = vadd.f32 %v920_v41, %v8134_v1  ;;  %v1009_v46 = vpop.f32.mrf.mxu1 }
 0x19a   :  { %v1090_v10 = vadd.f32 %v1009_v46, %v8136_v4  ;;  %v760_v46 = vld [vmem:[%s11859_s0 + $0x92] sm:$0xff] }
 0x19b   :  { %6458 = vmatmul.msk.bf16.gmra.mxu0 %vm229_vm0, %v782_v61 }
 0x19c   :  { %6474 = vmatmul.msk.bf16.gmra.mxu1 %vm229_vm0, %v782_v61  ;;  %6550 = vmatmul.msk.bf16.gmra.mxu2 %vm229_vm0, %v1193_v51  ;;  %v783_v61 = vpack.c.bf16 %v761_v15, %v760_v46 }
 0x19d   :  { %6566 = vmatmul.msk.bf16.gmra.mxu3 %vm229_vm0, %v1193_v51 }
 0x19f   :  { %v1331_v28 = vpop.f32.mrf.mxu2 }
 0x1a0   :  { %v8664_v54 = vadd.f32 %v1331_v28, %v1089_v2  ;;  %v1420_v29 = vpop.f32.mrf.mxu3  ;;  %v922_v13 = vpop.f32.mrf.mxu0  ;;  %v1171_v2 = vld [vmem:[%s11859_s0 + $0x93] sm:$0xff] }
 0x1a1   :  { %v8666_v62 = vadd.f32 %v1420_v29, %v1090_v10  ;;  %v1091_v1 = vadd.f32 %v922_v13, %v8150_v12  ;;  %v1011_v44 = vpop.f32.mrf.mxu1  ;;  %v1172_v10 = vld [vmem:[%s11859_s0 + $0x9b] sm:$0xff] }
 0x1a2   :  { %v1092_v4 = vadd.f32 %v1011_v44, %v8152_v16  ;;  %v1194_v51 = vpack.c.bf16 %v1172_v10, %v1171_v2 }
 0x1a7   :  { %v1333_v12 = vpop.f32.mrf.mxu2 }
 0x1a8   :  { %v8682_v39 = vadd.f32 %v1333_v12, %v1091_v1  ;;  %v1422_v16 = vpop.f32.mrf.mxu3  ;;  %v925_v41 = vpop.f32.mrf.mxu0  ;;  %v762_v12 = vld [vmem:[%s11859_s0 + $0xa2] sm:$0xff] }
 0x1a9   :  { %v8684_v28 = vadd.f32 %v1422_v16, %v1092_v4  ;;  %v1093_v29 = vadd.f32 %v925_v41, %v8158_v19  ;;  %v1014_v13 = vpop.f32.mrf.mxu1  ;;  %v1173_v16 = vld [vmem:[%s11859_s0 + $0xa3] sm:$0xff]  ;;  %v1174_v41 = vld [vmem:[%s11859_s0 + $0xab] sm:$0xff] }
 0x1aa   :  { %v1094_v44 = vadd.f32 %v1014_v13, %v8160_v22 }
 0x1ab   :  { %6459 = vmatmul.msk.bf16.gmra.mxu0 %vm229_vm0, %v783_v61 }
 0x1ac   :  { %6475 = vmatmul.msk.bf16.gmra.mxu1 %vm229_vm0, %v783_v61  ;;  %6551 = vmatmul.msk.bf16.gmra.mxu2 %vm229_vm0, %v1194_v51  ;;  %v763_v61 = vld [vmem:[%s11859_s0 + $0xaa] sm:$0xff] }
 0x1ad   :  { %6567 = vmatmul.msk.bf16.gmra.mxu3 %vm229_vm0, %v1194_v51  ;;  %v784_v51 = vpack.c.bf16 %v763_v61, %v762_v12 }
 0x1af   :  { %v1336_v1 = vpop.f32.mrf.mxu2 }
 0x1b0   :  { %v8692_v46 = vadd.f32 %v1336_v1, %v1093_v29  ;;  %v1425_v15 = vpop.f32.mrf.mxu3  ;;  %v927_v2 = vpop.f32.mrf.mxu0 }
 0x1b1   :  { %v8694_v4 = vadd.f32 %v1425_v15, %v1094_v44  ;;  %v1095_v19 = vadd.f32 %v927_v2, %v8174_v30  ;;  %v1016_v10 = vpop.f32.mrf.mxu1  ;;  %v1195_v44 = vpack.c.bf16 %v1174_v41, %v1173_v16 }
 0x1b2   :  { %v1096_v22 = vadd.f32 %v1016_v10, %v8176_v34 }
 0x1b7   :  { %v1338_v30 = vpop.f32.mrf.mxu2 }
 0x1b8   :  { %v8710_v29 = vadd.f32 %v1338_v30, %v1095_v19  ;;  %v1427_v34 = vpop.f32.mrf.mxu3  ;;  %v930_v13 = vpop.f32.mrf.mxu0  ;;  %v764_v30 = vld [vmem:[%s11859_s0 + $0xb2] sm:$0xff] }
 0x1b9   :  { %v8712_v1 = vadd.f32 %v1427_v34, %v1096_v22  ;;  %v1097_v15 = vadd.f32 %v930_v13, %v8182_v37  ;;  %v1019_v2 = vpop.f32.mrf.mxu1  ;;  %v1175_v34 = vld [vmem:[%s11859_s0 + $0xb3] sm:$0xff]  ;;  %v1176_v13 = vld [vmem:[%s11859_s0 + $0xbb] sm:$0xff] }
 0x1ba   :  { %v1098_v10 = vadd.f32 %v1019_v2, %v8184_v40 }
 0x1bb   :  { %6460 = vmatmul.msk.bf16.gmra.mxu0 %vm229_vm0, %v784_v51 }
 0x1bc   :  { %6476 = vmatmul.msk.bf16.gmra.mxu1 %vm229_vm0, %v784_v51  ;;  %6552 = vmatmul.msk.bf16.gmra.mxu2 %vm229_vm0, %v1195_v44  ;;  %v765_v51 = vld [vmem:[%s11859_s0 + $0xba] sm:$0xff] }
 0x1bd   :  { %6568 = vmatmul.msk.bf16.gmra.mxu3 %vm229_vm0, %v1195_v44  ;;  %v785_v44 = vpack.c.bf16 %v765_v51, %v764_v30 }
 0x1bf   :  { %v1341_v19 = vpop.f32.mrf.mxu2 }
 0x1c0   :  { %v8720_v12 = vadd.f32 %v1341_v19, %v1097_v15  ;;  %v1430_v61 = vpop.f32.mrf.mxu3  ;;  %v932_v16 = vpop.f32.mrf.mxu0 }
 0x1c1   :  { %v8722_v22 = vadd.f32 %v1430_v61, %v1098_v10  ;;  %v1099_v37 = vadd.f32 %v932_v16, %v8198_v48  ;;  %v1021_v41 = vpop.f32.mrf.mxu1  ;;  %v1196_v10 = vpack.c.bf16 %v1176_v13, %v1175_v34 }
 0x1c2   :  { %v1100_v40 = vadd.f32 %v1021_v41, %v8200_v52 }
 0x1c7   :  { %v1343_v48 = vpop.f32.mrf.mxu2 }
 0x1c8   :  { %v8738_v15 = vadd.f32 %v1343_v48, %v1099_v37  ;;  %v1432_v52 = vpop.f32.mrf.mxu3  ;;  %v935_v2 = vpop.f32.mrf.mxu0  ;;  %v766_v48 = vld [vmem:[%s11859_s0 + $0xc2] sm:$0xff] }
 0x1c9   :  { %v8740_v19 = vadd.f32 %v1432_v52, %v1100_v40  ;;  %v1101_v61 = vadd.f32 %v935_v2, %v8206_v55  ;;  %v1024_v16 = vpop.f32.mrf.mxu1  ;;  %v1177_v52 = vld [vmem:[%s11859_s0 + $0xc3] sm:$0xff]  ;;  %v1178_v2 = vld [vmem:[%s11859_s0 + $0xcb] sm:$0xff] }
 0x1ca   :  { %v1102_v41 = vadd.f32 %v1024_v16, %v8208_v58 }
 0x1cb   :  { %6461 = vmatmul.msk.bf16.gmra.mxu0 %vm229_vm0, %v785_v44 }
 0x1cc   :  { %6477 = vmatmul.msk.bf16.gmra.mxu1 %vm229_vm0, %v785_v44  ;;  %6553 = vmatmul.msk.bf16.gmra.mxu2 %vm229_vm0, %v1196_v10  ;;  %v767_v44 = vld [vmem:[%s11859_s0 + $0xca] sm:$0xff] }
 0x1cd   :  { %6569 = vmatmul.msk.bf16.gmra.mxu3 %vm229_vm0, %v1196_v10  ;;  %v786_v10 = vpack.c.bf16 %v767_v44, %v766_v48  ;;  %v6630_v48 = vld [vmem:[%s11858_s1 + $0x1d8] sm:$0xf0] }
 0x1cf   :  { %v1346_v37 = vpop.f32.mrf.mxu2 }
 0x1d0   :  { %v8748_v30 = vadd.f32 %v1346_v37, %v1101_v61  ;;  %v1435_v51 = vpop.f32.mrf.mxu3  ;;  %v937_v34 = vpop.f32.mrf.mxu0 }
 0x1d1   :  { %v8750_v40 = vadd.f32 %v1435_v51, %v1102_v41  ;;  %v1103_v55 = vadd.f32 %v937_v34, %v8222_v3  ;;  %v1026_v13 = vpop.f32.mrf.mxu1  ;;  %v1197_v41 = vpack.c.bf16 %v1178_v2, %v1177_v52 }
 0x1d2   :  { %v1104_v58 = vadd.f32 %v1026_v13, %v8224_v8 }
 0x1d7   :  { %v1348_v3 = vpop.f32.mrf.mxu2 }
 0x1d8   :  { %v8766_v61 = vadd.f32 %v1348_v3, %v1103_v55  ;;  %v1437_v8 = vpop.f32.mrf.mxu3  ;;  %v940_v16 = vpop.f32.mrf.mxu0  ;;  %v6628_v55 = vld [vmem:[%s11858_s1 + $0x1d0] sm:$0xf] }
 0x1d9   :  { %v8768_v37 = vadd.f32 %v1437_v8, %v1104_v58  ;;  %v1105_v51 = vadd.f32 %v940_v16, %v8242_v20  ;;  %v1029_v34 = vpop.f32.mrf.mxu1  ;;  %v7622_v58 = vld [vmem:[%s11858_s1 + $0x1d4] sm:$0xf0]  ;;  %v7621_v20 = vld [vmem:[%s11858_s1 + $0x1d4] sm:$0xf] }
 0x1da   :  { %v1106_v13 = vadd.f32 %v1029_v34, %v8244_v24  ;;  %v6629_v24 = vor.u32 %v7622_v58, %v6628_v55  ;;  %v6633_v52 = vor.u32 %v7621_v20, %v6630_v48  ;;  %v768_v55 = vld [vmem:[%s11859_s0 + $0xd2] sm:$0xff]  ;;  %v6620_v20 = vld [vmem:[%s11858_s1 + $0x1c0] sm:$0xf]  ;;  %v7619_v48 = vld [vmem:[%s11858_s1 + $0x1c4] sm:$0xf] }
 0x1db   :  { %6462 = vmatmul.msk.bf16.gmra.mxu0 %vm229_vm0, %v786_v10 }
 0x1dc   :  { %6478 = vmatmul.msk.bf16.gmra.mxu1 %vm229_vm0, %v786_v10  ;;  %6554 = vmatmul.msk.bf16.gmra.mxu2 %vm229_vm0, %v1197_v41 }
 0x1dd   :  { %6570 = vmatmul.msk.bf16.gmra.mxu3 %vm229_vm0, %v1197_v41  ;;  %1735 = vmatpush.bf16.msra.mxu0 %v6629_v24  ;;  %v7620_v24 = vld [vmem:[%s11858_s1 + $0x1c4] sm:$0xf0] }
 0x1de   :  { %1824 = vmatpush.bf16.msra.mxu1 %v6633_v52 }
 0x1df   :  { %v1351_v44 = vpop.f32.mrf.mxu2 }
 0x1e0   :  { %v8788_v2 = vadd.f32 %v1351_v44, %v1105_v51  ;;  %v1440_v3 = vpop.f32.mrf.mxu3  ;;  %v942_v10 = vpop.f32.mrf.mxu0  ;;  %v769_v51 = vld [vmem:[%s11859_s0 + $0xda] sm:$0xff] }
 0x1e1   :  { %v8790_v8 = vadd.f32 %v1440_v3, %v1106_v13  ;;  %v8793_v16 = vadd.f32 %v942_v10, %v8279_v45  ;;  %v1031_v41 = vpop.f32.mrf.mxu1  ;;  %v1179_v13 = vld [vmem:[%s11859_s0 + $0xd3] sm:$0xff]  ;;  %v1180_v45 = vld [vmem:[%s11859_s0 + $0xdb] sm:$0xff]  ;;  %v6621_v10 = vor.u32 %v7620_v24, %v6620_v20  ;;  %v7616_v24 = vld [vmem:[%s11858_s1 + $0x1a4] sm:$0xf0] }
 0x1e2   :  { %v8796_v34 = vadd.f32 %v1031_v41, %v8290_v56  ;;  %v787_v56 = vpack.c.bf16 %v769_v51, %v768_v55  ;;  %v1198_v3 = vpack.c.bf16 %v1180_v45, %v1179_v13  ;;  %v6622_v41 = vld [vmem:[%s11858_s1 + $0x1c8] sm:$0xf0]  ;;  %v7618_v13 = vld [vmem:[%s11858_s1 + $0x1b4] sm:$0xf0] }
 0x1e3   :  { %1736 = vmatpush.bf16.msra.mxu0 %v6621_v10 }
 0x1e4   :  { %11906 = vst [vmem:[#allocation16_spill] sm:$0xff] %v8796_v34  ;;  %v6625_v34 = vor.u32 %v7619_v48, %v6622_v41  ;;  %v7615_v48 = vld [vmem:[%s11858_s1 + $0x1a4] sm:$0xf]  ;;  %v6606_v41 = vld [vmem:[%s11858_s1 + $0x1a8] sm:$0xf0] }
 0x1e6   :  { %1825 = vmatpush.bf16.msra.mxu1 %v6625_v34  ;;  %v6614_v34 = vld [vmem:[%s11858_s1 + $0x1b8] sm:$0xf0] }
 0x1e7   :  { %v8810_v58 = vpop.f32.mrf.mxu2 }
 0x1e8   :  { %11907 = vst [vmem:[#allocation17_spill] sm:$0xff] %v8810_v58  ;;  %v8821_v44 = vpop.f32.mrf.mxu3  ;;  %v945_v52 = vpop.f32.mrf.mxu0 }
 0x1e9   :  { %11908 = vst [vmem:[#allocation18_spill] sm:$0xff] %v8821_v44  ;;  %v1109_v55 = vadd.f32 %v945_v52, %v8335_v26  ;;  %v1034_v51 = vpop.f32.mrf.mxu1  ;;  %v6612_v44 = vld [vmem:[%s11858_s1 + $0x1b0] sm:$0xf] }
 0x1ea   :  { %v1110_v58 = vadd.f32 %v1034_v51, %v8346_v35  ;;  %v6613_v26 = vor.u32 %v7618_v13, %v6612_v44  ;;  %v7617_v35 = vld [vmem:[%s11858_s1 + $0x1b4] sm:$0xf] }
 0x1eb   :  { %6463 = vmatmul.msk.bf16.gmra.mxu0 %vm229_vm0, %v787_v56  ;;  %v6617_v45 = vor.u32 %v7617_v35, %v6614_v34  ;;  %v6609_v35 = vor.u32 %v7615_v48, %v6606_v41  ;;  %v1181_v48 = vld [vmem:[%s11859_s0 + $0xe3] sm:$0xff] }
 0x1ec   :  { %6479 = vmatmul.msk.bf16.gmra.mxu1 %vm229_vm0, %v787_v56  ;;  %6555 = vmatmul.msk.bf16.gmra.mxu2 %vm229_vm0, %v1198_v3  ;;  %v6604_v56 = vld [vmem:[%s11858_s1 + $0x1a0] sm:$0xf] }
 0x1ed   :  { %6571 = vmatmul.msk.bf16.gmra.mxu3 %vm229_vm0, %v1198_v3  ;;  %1737 = vmatpush.bf16.msra.mxu0 %v6613_v26  ;;  %v6605_v10 = vor.u32 %v7616_v24, %v6604_v56  ;;  %v771_v56 = vld [vmem:[%s11859_s0 + $0xea] sm:$0xff]  ;;  %v6588_v41 = vld [vmem:[%s11858_s1 + $0x180] sm:$0xf] }
 0x1ee   :  { %1826 = vmatpush.bf16.msra.mxu1 %v6617_v45  ;;  %v7614_v45 = vld [vmem:[%s11858_s1 + $0x194] sm:$0xf0] }
 0x1ef   :  { %v1356_v20 = vpop.f32.mrf.mxu2 }
 0x1f0   :  { %v8853_v44 = vadd.f32 %v1356_v20, %v1109_v55  ;;  %v1445_v52 = vpop.f32.mrf.mxu3  ;;  %v947_v3 = vpop.f32.mrf.mxu0  ;;  %v6596_v55 = vld [vmem:[%s11858_s1 + $0x190] sm:$0xf]  ;;  %v770_v20 = vld [vmem:[%s11859_s0 + $0xe2] sm:$0xff] }
 0x1f1   :  { %v8858_v51 = vadd.f32 %v1445_v52, %v1110_v58  ;;  %v8861_v13 = vadd.f32 %v947_v3, %v8399_v11  ;;  %v1036_v26 = vpop.f32.mrf.mxu1  ;;  %1738 = vmatpush.bf16.msra.mxu0 %v6605_v10  ;;  %v7613_v58 = vld [vmem:[%s11858_s1 + $0x194] sm:$0xf]  ;;  %v6597_v11 = vor.u32 %v7614_v45, %v6596_v55  ;;  %v1182_v52 = vld [vmem:[%s11859_s0 + $0xeb] sm:$0xff]  ;;  %v788_v10 = vpack.c.bf16 %v771_v56, %v770_v20 }
 0x1f2   :  { %v8864_v34 = vadd.f32 %v1036_v26, %v8410_v25  ;;  %1827 = vmatpush.bf16.msra.mxu1 %v6609_v35  ;;  %v6598_v25 = vld [vmem:[%s11858_s1 + $0x198] sm:$0xf0]  ;;  %v7612_v26 = vld [vmem:[%s11858_s1 + $0x184] sm:$0xf0]  ;;  %v7611_v35 = vld [vmem:[%s11858_s1 + $0x184] sm:$0xf] }
 0x1f3   :  { %v6601_v24 = vor.u32 %v7613_v58, %v6598_v25  ;;  %v1199_v58 = vpack.c.bf16 %v1182_v52, %v1181_v48  ;;  %v6590_v25 = vld [vmem:[%s11858_s1 + $0x188] sm:$0xf0] }
 0x1f4   :  { %11909 = vst [vmem:[#allocation19_spill] sm:$0xff] %v8864_v34 }
 0x1f5   :  { %1739 = vmatpush.bf16.msra.mxu0 %v6597_v11  ;;  %v6589_v11 = vor.u32 %v7612_v26, %v6588_v41 }
 0x1f6   :  { %1828 = vmatpush.bf16.msra.mxu1 %v6601_v24  ;;  %v6593_v24 = vor.u32 %v7611_v35, %v6590_v25 }
 0x1f7   :  { %v8890_v3 = vpop.f32.mrf.mxu2 }
 0x1f8   :  { %v8901_v55 = vpop.f32.mrf.mxu3  ;;  %v950_v45 = vpop.f32.mrf.mxu0 }
 0x1f9   :  { %v1113_v20 = vadd.f32 %v950_v45, %v8422_v38  ;;  %v1039_v56 = vpop.f32.mrf.mxu1  ;;  %1740 = vmatpush.bf16.msra.mxu0 %v6589_v11 }
 0x1fa   :  { %v1114_v34 = vadd.f32 %v1039_v56, %v8424_v42  ;;  %1829 = vmatpush.bf16.msra.mxu1 %v6593_v24 }
 0x1fb   :  { %6464 = vmatmul.msk.bf16.gmra.mxu0 %vm229_vm0, %v788_v10 }
 0x1fc   :  { %6480 = vmatmul.msk.bf16.gmra.mxu1 %vm229_vm0, %v788_v10  ;;  %6556 = vmatmul.msk.bf16.gmra.mxu2 %vm229_vm0, %v1199_v58  ;;  %v772_v10 = vld [vmem:[%s11859_s0 + $0xf2] sm:$0xff] }
 0x1fd   :  { %6572 = vmatmul.msk.bf16.gmra.mxu3 %vm229_vm0, %v1199_v58  ;;  %v773_v58 = vld [vmem:[%s11859_s0 + $0xfa] sm:$0xf] }
 0x1ff   :  { %v1361_v48 = vpop.f32.mrf.mxu2 }
 0x200   :  { %v8912_v52 = vadd.f32 %v1361_v48, %v1113_v20  ;;  %v1450_v41 = vpop.f32.mrf.mxu3  ;;  %v952_v26 = vpop.f32.mrf.mxu0 }
 0x201   :  { %v8914_v38 = vadd.f32 %v1450_v41, %v1114_v34  ;;  %v8917_v35 = vadd.f32 %v952_v26, %v8438_v53  ;;  %v1041_v42 = vpop.f32.mrf.mxu1  ;;  %v1183_v34 = vld [vmem:[%s11859_s0 + $0xf3] sm:$0xff]  ;;  %v1184_v53 = vld [vmem:[%s11859_s0 + $0xfb] sm:$0xf] }
 0x202   :  { %v8920_v45 = vadd.f32 %v1041_v42, %v8440_v60  ;;  %v789_v60 = vpack.c.bf16 %v773_v58, %v772_v10  ;;  %v1200_v56 = vpack.c.bf16 %v1184_v53, %v1183_v34  ;;  %v1564_v53 = vld [vmem:[%s11859_s0 + $0x4] sm:$0xff] }
 0x207   :  { %v8934_v11 = vpop.f32.mrf.mxu2 }
 0x208   :  { %v8936_v25 = vpop.f32.mrf.mxu3  ;;  %v955_v20 = vpop.f32.mrf.mxu0 }
 0x209   :  { %11910 = vst [vmem:[#allocation20_spill] sm:$0xff] %v8936_v25  ;;  %v1117_v24 = vadd.f32 %v955_v20, %v8446_v63  ;;  %v1044_v48 = vpop.f32.mrf.mxu1 }
 0x20a   :  { %v1118_v41 = vadd.f32 %v1044_v48, %v8448_v5 }
 0x20b   :  { %6465 = vmatmul.msk.bf16.gmra.mxu0 %vm229_vm0, %v789_v60 }
 0x20c   :  { %6481 = vmatmul.msk.bf16.gmra.mxu1 %vm229_vm0, %v789_v60  ;;  %6557 = vmatmul.msk.bf16.gmra.mxu2 %vm229_vm0, %v1200_v56  ;;  %v1565_v60 = vld [vmem:[%s11859_s0 + $0xc] sm:$0xff] }
 0x20d   :  { %6573 = vmatmul.msk.bf16.gmra.mxu3 %vm229_vm0, %v1200_v56  ;;  %v1596_v56 = vpack.c.bf16 %v1565_v60, %v1564_v53 }
 0x20f   :  { %v1366_v26 = vpop.f32.mrf.mxu2 }
 0x210   :  { %v8944_v42 = vadd.f32 %v1366_v26, %v1117_v24  ;;  %v1455_v10 = vpop.f32.mrf.mxu3  ;;  %v957_v58 = vpop.f32.mrf.mxu0 }
 0x211   :  { %v8946_v25 = vadd.f32 %v1455_v10, %v1118_v41  ;;  %v8949_v63 = vadd.f32 %v957_v58, %v8462_v17  ;;  %v1046_v34 = vpop.f32.mrf.mxu1 }
 0x212   :  { %v8952_v5 = vadd.f32 %v1046_v34, %v8464_v27 }
 0x214   :  { %11911 = vst [vmem:[#allocation21_spill] sm:$0xff] %v8952_v5 }
 0x217   :  { %v8960_v20 = vpop.f32.mrf.mxu2 }
 0x218   :  { %v8962_v24 = vpop.f32.mrf.mxu3  ;;  %v960_v48 = vpop.f32.mrf.mxu0 }
 0x219   :  { %v1121_v17 = vadd.f32 %v960_v48, %v8470_v31  ;;  %v1049_v41 = vpop.f32.mrf.mxu1 }
 0x21a   :  { %v1122_v27 = vadd.f32 %v1049_v41, %v8472_v36  ;;  %v1566_v36 = vld [vmem:[%s11859_s0 + $0x14] sm:$0xff] }
 0x21b   :  { %6634 = vmatmul.msk.bf16.vlgmr.msra.gmra.mxu0 %vm229_vm0, %v1596_v56 }
 0x21c   :  { %6650 = vmatmul.msk.bf16.vlgmr.msra.gmra.mxu1 %vm229_vm0, %v1596_v56  ;;  %v1567_v56 = vld [vmem:[%s11859_s0 + $0x1c] sm:$0xff] }
 0x21f   :  { %v1371_v26 = vpop.f32.mrf.mxu2 }
 0x220   :  { %v8968_v10 = vadd.f32 %v1371_v26, %v1121_v17  ;;  %v1460_v58 = vpop.f32.mrf.mxu3  ;;  %v962_v34 = vpop.f32.mrf.mxu0  ;;  %v1597_v17 = vpack.c.bf16 %v1567_v56, %v1566_v36 }
 0x221   :  { %v8970_v5 = vadd.f32 %v1460_v58, %v1122_v27  ;;  %v8973_v53 = vadd.f32 %v962_v34, %v8486_v50  ;;  %v1051_v60 = vpop.f32.mrf.mxu1 }
 0x222   :  { %v8976_v31 = vadd.f32 %v1051_v60, %v8488_v59 }
 0x223   :  { %11912 = vst [vmem:[#allocation22_spill] sm:$0xff] %v8973_v53 }
 0x224   :  { %11913 = vst [vmem:[#allocation23_spill] sm:$0xff] %v8976_v31 }
 0x227   :  { %v8984_v48 = vpop.f32.mrf.mxu2 }
 0x228   :  { %v8986_v41 = vpop.f32.mrf.mxu3  ;;  %v965_v27 = vpop.f32.mrf.mxu0 }
 0x229   :  { %v1125_v50 = vadd.f32 %v965_v27, %v8494_v0  ;;  %v1054_v26 = vpop.f32.mrf.mxu1 }
 0x22a   :  { %v1126_v59 = vadd.f32 %v1054_v26, %v8496_v7  ;;  %v1568_v7 = vld [vmem:[%s11859_s0 + $0x24] sm:$0xff] }
 0x22b   :  { %6635 = vmatmul.msk.bf16.gmra.mxu0 %vm229_vm0, %v1597_v17 }
 0x22c   :  { %6651 = vmatmul.msk.bf16.gmra.mxu1 %vm229_vm0, %v1597_v17  ;;  %v1569_v17 = vld [vmem:[%s11859_s0 + $0x2c] sm:$0xff] }
 0x22f   :  { %v1376_v58 = vpop.f32.mrf.mxu2 }
 0x230   :  { %v8992_v34 = vadd.f32 %v1376_v58, %v1125_v50  ;;  %v1465_v60 = vpop.f32.mrf.mxu3  ;;  %v967_v31 = vpop.f32.mrf.mxu0  ;;  %v1598_v50 = vpack.c.bf16 %v1569_v17, %v1568_v7 }
 0x231   :  { %v8994_v53 = vadd.f32 %v1465_v60, %v1126_v59  ;;  %v8997_v36 = vadd.f32 %v967_v31, %v8510_v23  ;;  %v1056_v56 = vpop.f32.mrf.mxu1 }
 0x232   :  { %v9000_v0 = vadd.f32 %v1056_v56, %v8512_v33 }
 0x233   :  { %11914 = vst [vmem:[#allocation24_spill] sm:$0xff] %v8997_v36 }
 0x234   :  { %11915 = vst [vmem:[#allocation25_spill] sm:$0xff] %v9000_v0 }
 0x237   :  { %v9008_v27 = vpop.f32.mrf.mxu2 }
 0x238   :  { %v9010_v26 = vpop.f32.mrf.mxu3  ;;  %v970_v59 = vpop.f32.mrf.mxu0 }
 0x239   :  { %v1129_v23 = vadd.f32 %v970_v59, %v8518_v43  ;;  %v1059_v31 = vpop.f32.mrf.mxu1 }
 0x23a   :  { %v1130_v33 = vadd.f32 %v1059_v31, %v8520_v47  ;;  %v1570_v47 = vld [vmem:[%s11859_s0 + $0x34] sm:$0xff] }
 0x23b   :  { %6636 = vmatmul.msk.bf16.gmra.mxu0 %vm229_vm0, %v1598_v50 }
 0x23c   :  { %6652 = vmatmul.msk.bf16.gmra.mxu1 %vm229_vm0, %v1598_v50  ;;  %v1571_v50 = vld [vmem:[%s11859_s0 + $0x3c] sm:$0xff] }
 0x23f   :  { %v1381_v58 = vpop.f32.mrf.mxu2 }
 0x240   :  { %v9016_v60 = vadd.f32 %v1381_v58, %v1129_v23  ;;  %v1470_v56 = vpop.f32.mrf.mxu3  ;;  %v972_v0 = vpop.f32.mrf.mxu0  ;;  %v1599_v23 = vpack.c.bf16 %v1571_v50, %v1570_v47 }
 0x241   :  { %v9018_v36 = vadd.f32 %v1470_v56, %v1130_v33  ;;  %v9021_v7 = vadd.f32 %v972_v0, %v8534_v6  ;;  %v1061_v17 = vpop.f32.mrf.mxu1 }
 0x242   :  { %v9024_v43 = vadd.f32 %v1061_v17, %v8536_v14 }
 0x243   :  { %11916 = vst [vmem:[#allocation26_spill] sm:$0xff] %v9021_v7 }
 0x244   :  { %11917 = vst [vmem:[#allocation27_spill] sm:$0xff] %v9024_v43 }
 0x247   :  { %v9032_v59 = vpop.f32.mrf.mxu2 }
 0x248   :  { %v9034_v31 = vpop.f32.mrf.mxu3  ;;  %v975_v33 = vpop.f32.mrf.mxu0 }
 0x249   :  { %v1133_v6 = vadd.f32 %v975_v33, %v8542_v21  ;;  %v1064_v0 = vpop.f32.mrf.mxu1 }
 0x24a   :  { %v1134_v14 = vadd.f32 %v1064_v0, %v8544_v32  ;;  %v1572_v32 = vld [vmem:[%s11859_s0 + $0x44] sm:$0xff] }
 0x24b   :  { %6637 = vmatmul.msk.bf16.gmra.mxu0 %vm229_vm0, %v1599_v23 }
 0x24c   :  { %6653 = vmatmul.msk.bf16.gmra.mxu1 %vm229_vm0, %v1599_v23  ;;  %v1573_v23 = vld [vmem:[%s11859_s0 + $0x4c] sm:$0xff] }
 0x24f   :  { %v1386_v58 = vpop.f32.mrf.mxu2 }
 0x250   :  { %v9040_v56 = vadd.f32 %v1386_v58, %v1133_v6  ;;  %v1475_v17 = vpop.f32.mrf.mxu3  ;;  %v977_v43 = vpop.f32.mrf.mxu0  ;;  %v1600_v6 = vpack.c.bf16 %v1573_v23, %v1572_v32  ;;  %v11928_v32 = vld [vmem:[#allocation4_spill] sm:$0xff] }
 0x251   :  { %v9042_v7 = vadd.f32 %v1475_v17, %v1134_v14  ;;  %v9045_v47 = vadd.f32 %v977_v43, %v8558_v57  ;;  %v1066_v50 = vpop.f32.mrf.mxu1  ;;  %v11924_v57 = vld [vmem:[#allocation2_spill] sm:$0xff]  ;;  %v11925_v17 = vld [vmem:[#allocation3_spill] sm:$0xff] }
 0x252   :  { %11918 = vst [vmem:[#allocation28_spill] sm:$0xff] %v9040_v56  ;;  %v9048_v21 = vadd.f32 %v1066_v50, %v8560_v9 }
 0x253   :  { %11919 = vst [vmem:[#allocation29_spill] sm:$0xff] %v9042_v7 }
 0x254   :  { %11920 = vst [vmem:[#allocation30_spill] sm:$0xff] %v9045_v47 }
 0x255   :  { %11921 = vst [vmem:[#allocation31_spill] sm:$0xff] %v9048_v21 }
 0x257   :  { %v9056_v33 = vpop.f32.mrf.mxu2 }
 0x258   :  { %11922 = vst [vmem:[#allocation32_spill] sm:$0xff] %v9056_v33  ;;  %v9058_v0 = vpop.f32.mrf.mxu3  ;;  %v980_v14 = vpop.f32.mrf.mxu0  ;;  %v11930_v33 = vld [vmem:[#allocation5_spill] sm:$0xff] }
 0x259   :  { %11923 = vst [vmem:[#allocation33_spill] sm:$0xff] %v9058_v0  ;;  %v1137_v43 = vadd.f32 %v980_v14, %v11924_v57  ;;  %v1069_v58 = vpop.f32.mrf.mxu1  ;;  %v1574_v57 = vld [vmem:[%s11859_s0 + $0x54] sm:$0xff] }
 0x25a   :  { %v1138_v9 = vadd.f32 %v1069_v58, %v11925_v17 }
 0x25b   :  { %6638 = vmatmul.msk.bf16.gmra.mxu0 %vm229_vm0, %v1600_v6 }
 0x25c   :  { %6654 = vmatmul.msk.bf16.gmra.mxu1 %vm229_vm0, %v1600_v6  ;;  %v1575_v6 = vld [vmem:[%s11859_s0 + $0x5c] sm:$0xff] }
 0x25d   :  { %v1601_v58 = vpack.c.bf16 %v1575_v6, %v1574_v57  ;;  %v7629_v57 = vld [vmem:[%s11860_s3 + $0x30] sm:$0xff] }
 0x25f   :  { %v1391_v50 = vpop.f32.mrf.mxu2 }
 0x260   :  { %v9064_v21 = vadd.f32 %v1391_v50, %v1137_v43  ;;  %v1480_v47 = vpop.f32.mrf.mxu3  ;;  %v982_v7 = vpop.f32.mrf.mxu0 }
 0x261   :  { %v9066_v56 = vadd.f32 %v1480_v47, %v1138_v9  ;;  %v9069_v23 = vadd.f32 %v982_v7, %v11928_v32  ;;  %v1071_v0 = vpop.f32.mrf.mxu1  ;;  %v11934_v7 = vld [vmem:[#allocation6_spill] sm:$0xff]  ;;  %v11935_v32 = vld [vmem:[#allocation7_spill] sm:$0xff] }
 0x262   :  { %11926 = vst [vmem:[#allocation2_spill] sm:$0xff] %v9064_v21  ;;  %v9072_v14 = vadd.f32 %v1071_v0, %v11930_v33  ;;  %v7630_v0 = vld [vmem:[%s11860_s3 + $0x38] sm:$0xff] }
 0x263   :  { %11927 = vst [vmem:[#allocation3_spill] sm:$0xff] %v9066_v56  ;;  %2278 = vmatpush.bf16.msra.mxu2 %v7630_v0  ;;  %v7627_v0 = vld [vmem:[%s11860_s3 + $0x20] sm:$0xff] }
 0x264   :  { %11929 = vst [vmem:[#allocation4_spill] sm:$0xff] %v9069_v23  ;;  %v11940_v23 = vld [vmem:[#allocation9_spill] sm:$0xff] }
 0x265   :  { %11931 = vst [vmem:[#allocation5_spill] sm:$0xff] %v9072_v14 }
 0x267   :  { %v9080_v43 = vpop.f32.mrf.mxu2  ;;  %2279 = vmatpush.bf16.msra.mxu2 %v7629_v57 }
 0x268   :  { %11932 = vst [vmem:[#allocation34_spill] sm:$0xff] %v9080_v43  ;;  %v9082_v47 = vpop.f32.mrf.mxu3  ;;  %v985_v17 = vpop.f32.mrf.mxu0 }
 0x269   :  { %11933 = vst [vmem:[#allocation35_spill] sm:$0xff] %v9082_v47  ;;  %v1141_v9 = vadd.f32 %v985_v17, %v11934_v7  ;;  %v1074_v50 = vpop.f32.mrf.mxu1 }
 0x26a   :  { %v1142_v33 = vadd.f32 %v1074_v50, %v11935_v32  ;;  %v11938_v32 = vld [vmem:[#allocation8_spill] sm:$0xff] }
 0x26b   :  { %6639 = vmatmul.msk.bf16.gmra.mxu0 %vm229_vm0, %v1601_v58 }
 0x26c   :  { %6655 = vmatmul.msk.bf16.gmra.mxu1 %vm229_vm0, %v1601_v58  ;;  %v7628_v58 = vld [vmem:[%s11860_s3 + $0x28] sm:$0xff] }
 0x26d   :  { %2280 = vmatpush.bf16.msra.mxu2 %v7628_v58  ;;  %v7626_v58 = vld [vmem:[%s11860_s3 + $0x18] sm:$0xff] }
 0x26f   :  { %v1396_v6 = vpop.f32.mrf.mxu2 }
 0x270   :  { %v9094_v47 = vadd.f32 %v1396_v6, %v1141_v9  ;;  %v1485_v17 = vpop.f32.mrf.mxu3  ;;  %v987_v7 = vpop.f32.mrf.mxu0  ;;  %v1576_v9 = vld [vmem:[%s11859_s0 + $0x64] sm:$0xff] }
 0x271   :  { %v9096_v50 = vadd.f32 %v1485_v17, %v1142_v33  ;;  %v9099_v14 = vadd.f32 %v987_v7, %v11938_v32  ;;  %v1076_v43 = vpop.f32.mrf.mxu1  ;;  %v1577_v33 = vld [vmem:[%s11859_s0 + $0x6c] sm:$0xff]  ;;  %2281 = vmatpush.bf16.msra.mxu2 %v7627_v0  ;;  %v11944_v17 = vld [vmem:[#allocation10_spill] sm:$0xff] }
 0x272   :  { %11936 = vst [vmem:[#allocation6_spill] sm:$0xff] %v9094_v47  ;;  %v9102_v56 = vadd.f32 %v1076_v43, %v11940_v23  ;;  %v1602_v23 = vpack.c.bf16 %v1577_v33, %v1576_v9  ;;  %v7625_v33 = vld [vmem:[%s11860_s3 + $0x10] sm:$0xff] }
 0x273   :  { %11937 = vst [vmem:[#allocation7_spill] sm:$0xff] %v9096_v50  ;;  %v11948_v47 = vld [vmem:[#allocation12_spill] sm:$0xff] }
 0x274   :  { %11939 = vst [vmem:[#allocation8_spill] sm:$0xff] %v9099_v14 }
 0x275   :  { %11941 = vst [vmem:[#allocation9_spill] sm:$0xff] %v9102_v56  ;;  %v11945_v56 = vld [vmem:[#allocation11_spill] sm:$0xff]  ;;  %2282 = vmatpush.bf16.msra.mxu2 %v7626_v58  ;;  %v11950_v58 = vld [vmem:[#allocation13_spill] sm:$0xff] }
 0x277   :  { %v9116_v57 = vpop.f32.mrf.mxu2 }
 0x278   :  { %11942 = vst [vmem:[#allocation36_spill] sm:$0xff] %v9116_v57  ;;  %v9118_v43 = vpop.f32.mrf.mxu3  ;;  %v990_v6 = vpop.f32.mrf.mxu0  ;;  %v2161_v57 = vld [vmem:[%s11860_s3 + $0x50] sm:$0xf] }
 0x279   :  { %11943 = vst [vmem:[#allocation37_spill] sm:$0xff] %v9118_v43  ;;  %v1145_v7 = vadd.f32 %v990_v6, %v11944_v17  ;;  %v1079_v32 = vpop.f32.mrf.mxu1  ;;  %v2203_v9 = vunpack.c.l.b16 %v2161_v57  ;;  %2283 = vmatpush.bf16.msra.mxu2 %v7625_v33  ;;  %v7631_v33 = vld [vmem:[%s11860_s3 + $0x40] sm:$0xff] }
 0x27a   :  { %v1146_v14 = vadd.f32 %v1079_v32, %v11945_v56 }
 0x27b   :  { %6640 = vmatmul.msk.bf16.gmra.mxu0 %vm229_vm0, %v1602_v23  ;;  %v2214_v0 = vpack.c.b16 %v2203_v9, %v2203_v9  ;;  %v7632_v9 = vld [vmem:[%s11860_s3 + $0x48] sm:$0xff] }
 0x27c   :  { %6656 = vmatmul.msk.bf16.gmra.mxu1 %vm229_vm0, %v1602_v23 }
 0x27d   :  { %v2276_v43 = vsel %vm2274_vm1, %v2214_v0, 0 }
 0x27e   :  { %2372 = vmatpush.bf16.msra.mxu3 %v2276_v43  ;;  %v7623_v43 = vld [vmem:[%s11860_s3] sm:$0xff] }
 0x27f   :  { %v1401_v56 = vpop.f32.mrf.mxu2 }
 0x280   :  { %v9133_v6 = vadd.f32 %v1401_v56, %v1145_v7  ;;  %v1490_v17 = vpop.f32.mrf.mxu3  ;;  %v992_v32 = vpop.f32.mrf.mxu0  ;;  %v7624_v7 = vld [vmem:[%s11860_s3 + $0x8] sm:$0xff] }
 0x281   :  { %v9136_v50 = vadd.f32 %v1490_v17, %v1146_v14  ;;  %v9139_v23 = vadd.f32 %v992_v32, %v11948_v47  ;;  %v1081_v57 = vpop.f32.mrf.mxu1  ;;  %v1578_v14 = vld [vmem:[%s11859_s0 + $0x74] sm:$0xff]  ;;  %v1579_v47 = vld [vmem:[%s11859_s0 + $0x7c] sm:$0xff]  ;;  %2284 = vmatpush.bf16.msra.mxu2 %v7624_v7  ;;  %v11954_v7 = vld [vmem:[#allocation15_spill] sm:$0xff] }
 0x282   :  { %11946 = vst [vmem:[#allocation10_spill] sm:$0xff] %v9133_v6  ;;  %v9142_v21 = vadd.f32 %v1081_v57, %v11950_v58  ;;  %2373 = vmatpush.bf16.msra.mxu3 %v7632_v9  ;;  %v1603_v56 = vpack.c.bf16 %v1579_v47, %v1578_v14  ;;  %v11953_v57 = vld [vmem:[#allocation14_spill] sm:$0xff] }
 0x283   :  { %11947 = vst [vmem:[#allocation11_spill] sm:$0xff] %v9136_v50 }
 0x284   :  { %11949 = vst [vmem:[#allocation12_spill] sm:$0xff] %v9139_v23 }
 0x285   :  { %11951 = vst [vmem:[#allocation13_spill] sm:$0xff] %v9142_v21  ;;  %2285 = vmatpush.bf16.msra.mxu2 %v7623_v43 }
 0x286   :  { %2374 = vmatpush.bf16.msra.mxu3 %v7631_v33 }
 0x287   :  { %v9162_v0 = vpop.f32.mrf.mxu2 }
 0x288   :  { %11952 = vst [vmem:[#allocation38_spill] sm:$0xff] %v9162_v0  ;;  %v9164_v17 = vpop.f32.mrf.mxu3  ;;  %v995_v32 = vpop.f32.mrf.mxu0 }
 0x289   :  { %v1149_v58 = vadd.f32 %v995_v32, %v11953_v57  ;;  %v1084_v21 = vpop.f32.mrf.mxu1 }
 0x28a   :  { %v1150_v9 = vadd.f32 %v1084_v21, %v11954_v7  ;;  %v1580_v21 = vld [vmem:[%s11859_s0 + $0x84] sm:$0xff] }
 0x28b   :  { %6641 = vmatmul.msk.bf16.gmra.mxu0 %vm229_vm0, %v1603_v56 }
 0x28c   :  { %6657 = vmatmul.msk.bf16.gmra.mxu1 %vm229_vm0, %v1603_v56 }
 0x28f   :  { %v1406_v23 = vpop.f32.mrf.mxu2 }
 0x290   :  { %v9170_v50 = vadd.f32 %v1406_v23, %v1149_v58  ;;  %v1495_v6 = vpop.f32.mrf.mxu3  ;;  %v997_v0 = vpop.f32.mrf.mxu0  ;;  %v1581_v23 = vld [vmem:[%s11859_s0 + $0x8c] sm:$0xff] }
 0x291   :  { %v9172_v14 = vadd.f32 %v1495_v6, %v1150_v9  ;;  %v9175_v47 = vadd.f32 %v997_v0, %v8654_v18  ;;  %v1086_v43 = vpop.f32.mrf.mxu1  ;;  %v1604_v33 = vpack.c.bf16 %v1581_v23, %v1580_v21  ;;  %v1975_v18 = vld [vmem:[%s11861_s2] sm:$0x3] }
 0x292   :  { %v9178_v32 = vadd.f32 %v1086_v43, %v8656_v49  ;;  %v9192_v6 = vperm.slane %v1975_v18, 0  ;;  %v9195_v58 = vperm.slane %v1975_v18, 1 }
 0x294   :  { %11955 = vst [vmem:[#allocation14_spill] sm:$0xff] %v9178_v32 }
 0x298   :  { %v1742_v56 = vpop.f32.mrf.mxu0 }
 0x299   :  { %v1831_v57 = vpop.f32.mrf.mxu1  ;;  %v1911_v49 = vadd.f32 %v1742_v56, %v8664_v54  ;;  %v1583_v56 = vld [vmem:[%s11859_s0 + $0x9c] sm:$0xff] }
 0x29a   :  { %v1912_v0 = vadd.f32 %v1831_v57, %v8666_v62  ;;  %v1582_v62 = vld [vmem:[%s11859_s0 + $0x94] sm:$0xff] }
 0x29b   :  { %6642 = vmatmul.msk.bf16.gmra.mxu0 %vm229_vm0, %v1604_v33  ;;  %v1981_v9 = vadd.f32 %v9192_v6, %v1911_v49 }
 0x29c   :  { %6658 = vmatmul.msk.bf16.gmra.mxu1 %vm229_vm0, %v1604_v33  ;;  %v1982_v23 = vadd.f32 %v9195_v58, %v1912_v0 }
 0x29d   :  { %v2045_v57 = vmax.f32 %v1981_v9, 0.0 }
 0x2a0   :  { %v1744_v7 = vpop.f32.mrf.mxu0 }
 0x2a1   :  { %v1913_v43 = vadd.f32 %v1744_v7, %v8682_v39  ;;  %v1833_v21 = vpop.f32.mrf.mxu1  ;;  %v2046_v39 = vmax.f32 %v1982_v23, 0.0 }
 0x2a2   :  { %v1914_v32 = vadd.f32 %v1833_v21, %v8684_v28  ;;  %v1605_v28 = vpack.c.bf16 %v1583_v56, %v1582_v62 }
 0x2a3   :  { %v1983_v33 = vadd.f32 %v9192_v6, %v1913_v43 }
 0x2a4   :  { %v1984_v54 = vadd.f32 %v9195_v58, %v1914_v32 }
 0x2a5   :  { %v2047_v18 = vmax.f32 %v1983_v33, 0.0 }
 0x2a6   :  { %v2048_v49 = vmax.f32 %v1984_v54, 0.0 }
 0x2a7   :  { %v9209_v7 = vpack.c.bf16 %v2047_v18, %v2045_v57 }
 0x2a8   :  { %v9211_v0 = vpack.c.bf16 %v2048_v49, %v2046_v39  ;;  %v1747_v43 = vpop.f32.mrf.mxu0 }
 0x2a9   :  { %v1836_v32 = vpop.f32.mrf.mxu1  ;;  %2286 = vmatmul.bf16.vlgmr.msra.gmra.mxu2 %v9209_v7  ;;  %v1915_v9 = vadd.f32 %v1747_v43, %v8692_v46  ;;  %v1584_v46 = vld [vmem:[%s11859_s0 + $0xa4] sm:$0xff] }
 0x2aa   :  { %6706 = vmatmul.msk.bf16.vlgmr.msra.gmra.mxu3 %vm2225_vm2, %v9211_v0  ;;  %v1916_v21 = vadd.f32 %v1836_v32, %v8694_v4  ;;  %v1585_v4 = vld [vmem:[%s11859_s0 + $0xac] sm:$0xff] }
 0x2ab   :  { %6643 = vmatmul.msk.bf16.gmra.mxu0 %vm229_vm0, %v1605_v28  ;;  %v1985_v33 = vadd.f32 %v9192_v6, %v1915_v9  ;;  %v1606_v9 = vpack.c.bf16 %v1585_v4, %v1584_v46 }
 0x2ac   :  { %6659 = vmatmul.msk.bf16.gmra.mxu1 %vm229_vm0, %v1605_v28  ;;  %v1986_v56 = vadd.f32 %v9195_v58, %v1916_v21 }
 0x2ad   :  { %v2049_v49 = vmax.f32 %v1985_v33, 0.0 }
 0x2b0   :  { %v1749_v23 = vpop.f32.mrf.mxu0 }
 0x2b1   :  { %v1917_v54 = vadd.f32 %v1749_v23, %v8710_v29  ;;  %v1838_v62 = vpop.f32.mrf.mxu1  ;;  %v2050_v29 = vmax.f32 %v1986_v56, 0.0 }
 0x2b2   :  { %v1918_v57 = vadd.f32 %v1838_v62, %v8712_v1 }
 0x2b3   :  { %v1987_v18 = vadd.f32 %v9192_v6, %v1917_v54 }
 0x2b4   :  { %v1988_v39 = vadd.f32 %v9195_v58, %v1918_v57 }
 0x2b5   :  { %v2051_v28 = vmax.f32 %v1987_v18, 0.0 }
 0x2b6   :  { %v2052_v43 = vmax.f32 %v1988_v39, 0.0 }
 0x2b7   :  { %v9232_v32 = vpack.c.bf16 %v2051_v28, %v2049_v49 }
 0x2b8   :  { %v9234_v1 = vpack.c.bf16 %v2052_v43, %v2050_v29  ;;  %v1752_v21 = vpop.f32.mrf.mxu0 }
 0x2b9   :  { %v1841_v23 = vpop.f32.mrf.mxu1  ;;  %2291 = vmatmul.bf16.gmra.mxu2 %v9232_v32  ;;  %v1919_v33 = vadd.f32 %v1752_v21, %v8720_v12  ;;  %v1586_v12 = vld [vmem:[%s11859_s0 + $0xb4] sm:$0xff] }
 0x2ba   :  { %6707 = vmatmul.msk.bf16.gmra.mxu3 %vm2225_vm2, %v9234_v1  ;;  %v1920_v54 = vadd.f32 %v1841_v23, %v8722_v22  ;;  %v1587_v22 = vld [vmem:[%s11859_s0 + $0xbc] sm:$0xff] }
 0x2bb   :  { %6644 = vmatmul.msk.bf16.gmra.mxu0 %vm229_vm0, %v1606_v9  ;;  %v1989_v56 = vadd.f32 %v9192_v6, %v1919_v33  ;;  %v1607_v21 = vpack.c.bf16 %v1587_v22, %v1586_v12 }
 0x2bc   :  { %6660 = vmatmul.msk.bf16.gmra.mxu1 %vm229_vm0, %v1606_v9  ;;  %v1990_v39 = vadd.f32 %v9195_v58, %v1920_v54 }
 0x2bd   :  { %v2053_v28 = vmax.f32 %v1989_v56, 0.0 }
 0x2c0   :  { %v1754_v62 = vpop.f32.mrf.mxu0 }
 0x2c1   :  { %v1921_v57 = vadd.f32 %v1754_v62, %v8738_v15  ;;  %v1843_v18 = vpop.f32.mrf.mxu1  ;;  %v2054_v15 = vmax.f32 %v1990_v39, 0.0 }
 0x2c2   :  { %v1922_v46 = vadd.f32 %v1843_v18, %v8740_v19 }
 0x2c3   :  { %v1991_v4 = vadd.f32 %v9192_v6, %v1921_v57 }
 0x2c4   :  { %v1992_v49 = vadd.f32 %v9195_v58, %v1922_v46 }
 0x2c5   :  { %v2055_v29 = vmax.f32 %v1991_v4, 0.0 }
 0x2c6   :  { %v2056_v43 = vmax.f32 %v1992_v49, 0.0 }
 0x2c7   :  { %v9255_v9 = vpack.c.bf16 %v2055_v29, %v2053_v28 }
 0x2c8   :  { %v9257_v19 = vpack.c.bf16 %v2056_v43, %v2054_v15  ;;  %v1757_v23 = vpop.f32.mrf.mxu0 }
 0x2c9   :  { %v1846_v33 = vpop.f32.mrf.mxu1  ;;  %2296 = vmatmul.bf16.gmra.mxu2 %v9255_v9  ;;  %v1923_v54 = vadd.f32 %v1757_v23, %v8748_v30  ;;  %v1588_v30 = vld [vmem:[%s11859_s0 + $0xc4] sm:$0xff] }
 0x2ca   :  { %6708 = vmatmul.msk.bf16.gmra.mxu3 %vm2225_vm2, %v9257_v19  ;;  %v1924_v62 = vadd.f32 %v1846_v33, %v8750_v40  ;;  %v1589_v40 = vld [vmem:[%s11859_s0 + $0xcc] sm:$0xff] }
 0x2cb   :  { %6645 = vmatmul.msk.bf16.gmra.mxu0 %vm229_vm0, %v1607_v21  ;;  %v1993_v57 = vadd.f32 %v9192_v6, %v1923_v54  ;;  %v1608_v43 = vpack.c.bf16 %v1589_v40, %v1588_v30  ;;  %v7640_v33 = vld [vmem:[%s11860_s3 + $0x8c] sm:$0xff]  ;;  %v7639_v30 = vld [vmem:[%s11860_s3 + $0x84] sm:$0xff] }
 0x2cc   :  { %6661 = vmatmul.msk.bf16.gmra.mxu1 %vm229_vm0, %v1607_v21  ;;  %v1994_v46 = vadd.f32 %v9195_v58, %v1924_v62  ;;  %2544 = vmatpush.bf16.msrb.mxu0 %v7640_v33  ;;  %v7638_v33 = vld [vmem:[%s11860_s3 + $0x7c] sm:$0xff] }
 0x2cd   :  { %v2057_v22 = vmax.f32 %v1993_v57, 0.0  ;;  %v11956_v57 = vld [vmem:[#allocation17_spill] sm:$0xff] }
 0x2d0   :  { %v1759_v56 = vpop.f32.mrf.mxu0  ;;  %2545 = vmatpush.bf16.msrb.mxu0 %v7639_v30  ;;  %v7636_v30 = vld [vmem:[%s11860_s3 + $0x6c] sm:$0xff] }
 0x2d1   :  { %v1925_v18 = vadd.f32 %v1759_v56, %v8766_v61  ;;  %v1848_v39 = vpop.f32.mrf.mxu1  ;;  %v2058_v61 = vmax.f32 %v1994_v46, 0.0  ;;  %v6742_v56 = vld [vmem:[%s11860_s3 + $0xa4] sm:$0xf]  ;;  %v11957_v46 = vld [vmem:[#allocation16_spill] sm:$0xff] }
 0x2d2   :  { %v1926_v4 = vadd.f32 %v1848_v39, %v8768_v37  ;;  %v2519_v39 = vunpack.c.l.b16 %v6742_v56 }
 0x2d3   :  { %v1995_v49 = vadd.f32 %v9192_v6, %v1925_v18  ;;  %v1518_v18 = vadd.f32 %v11956_v57, %v8793_v16 }
 0x2d4   :  { %v1996_v12 = vadd.f32 %v9195_v58, %v1926_v4  ;;  %v11958_v4 = vld [vmem:[#allocation18_spill] sm:$0xff]  ;;  %2546 = vmatpush.bf16.msrb.mxu0 %v7638_v33 }
 0x2d5   :  { %v2059_v28 = vmax.f32 %v1995_v49, 0.0  ;;  %v1519_v49 = vadd.f32 %v11958_v4, %v11957_v46  ;;  %v7634_v33 = vld [vmem:[%s11860_s3 + $0x5c] sm:$0xff] }
 0x2d6   :  { %v2060_v29 = vmax.f32 %v1996_v12, 0.0 }
 0x2d7   :  { %v9278_v15 = vpack.c.bf16 %v2059_v28, %v2057_v22  ;;  %v2530_v22 = vpack.c.b16 %v2519_v39, %v2519_v39 }
 0x2d8   :  { %v9280_v37 = vpack.c.bf16 %v2060_v29, %v2058_v61  ;;  %v1762_v21 = vpop.f32.mrf.mxu0 }
 0x2d9   :  { %v1851_v23 = vpop.f32.mrf.mxu1  ;;  %2301 = vmatmul.bf16.gmra.mxu2 %v9278_v15  ;;  %v1927_v54 = vadd.f32 %v1762_v21, %v8788_v2  ;;  %v2542_v29 = vsel %vm2274_vm1, %v2530_v22, 0  ;;  %v1590_v21 = vld [vmem:[%s11859_s0 + $0xd4] sm:$0xff]  ;;  %v11959_v22 = vld [vmem:[#allocation19_spill] sm:$0xff] }
 0x2da   :  { %6709 = vmatmul.msk.bf16.gmra.mxu3 %vm2225_vm2, %v9280_v37  ;;  %v1928_v62 = vadd.f32 %v1851_v23, %v8790_v8  ;;  %v1591_v23 = vld [vmem:[%s11859_s0 + $0xdc] sm:$0xff]  ;;  %2638 = vmatpush.bf16.msrb.mxu1 %v2542_v29 }
 0x2db   :  { %6646 = vmatmul.msk.bf16.gmra.mxu0 %vm229_vm0, %v1608_v43  ;;  %v1997_v2 = vadd.f32 %v9192_v6, %v1927_v54  ;;  %v1609_v39 = vpack.c.bf16 %v1591_v23, %v1590_v21 }
 0x2dc   :  { %6662 = vmatmul.msk.bf16.gmra.mxu1 %vm229_vm0, %v1608_v43  ;;  %v1998_v28 = vadd.f32 %v9195_v58, %v1928_v62 }
 0x2dd   :  { %v2061_v54 = vmax.f32 %v1997_v2, 0.0 }
 0x2de   :  { %v2062_v56 = vmax.f32 %v1998_v28, 0.0  ;;  %v1523_v28 = vadd.f32 %v8901_v55, %v11959_v22  ;;  %v1593_v55 = vld [vmem:[%s11859_s0 + $0xec] sm:$0xff] }
 0x2e0   :  { %v1764_v12 = vpop.f32.mrf.mxu0 }
 0x2e1   :  { %v1929_v8 = vadd.f32 %v1764_v12, %v1518_v18  ;;  %v1853_v40 = vpop.f32.mrf.mxu1 }
 0x2e2   :  { %v1930_v61 = vadd.f32 %v1853_v40, %v1519_v49  ;;  %v7637_v49 = vld [vmem:[%s11860_s3 + $0x74] sm:$0xff]  ;;  %v1522_v40 = vadd.f32 %v8890_v3, %v8861_v13  ;;  %v1592_v13 = vld [vmem:[%s11859_s0 + $0xe4] sm:$0xff] }
 0x2e3   :  { %v1999_v16 = vadd.f32 %v9192_v6, %v1929_v8  ;;  %2547 = vmatpush.bf16.msrb.mxu0 %v7637_v49  ;;  %v1610_v49 = vpack.c.bf16 %v1593_v55, %v1592_v13 }
 0x2e4   :  { %v2000_v43 = vadd.f32 %v9195_v58, %v1930_v61 }
 0x2e5   :  { %v2063_v62 = vmax.f32 %v1999_v16, 0.0  ;;  %v7635_v16 = vld [vmem:[%s11860_s3 + $0x64] sm:$0xff] }
 0x2e6   :  { %v2064_v57 = vmax.f32 %v2000_v43, 0.0 }
 0x2e7   :  { %v9316_v18 = vpack.c.bf16 %v2063_v62, %v2061_v54  ;;  %2548 = vmatpush.bf16.msrb.mxu0 %v7636_v30  ;;  %v7642_v54 = vld [vmem:[%s11860_s3 + $0x9c] sm:$0xff] }
 0x2e8   :  { %v9318_v46 = vpack.c.bf16 %v2064_v57, %v2062_v56  ;;  %v1767_v4 = vpop.f32.mrf.mxu0  ;;  %2639 = vmatpush.bf16.msrb.mxu1 %v7642_v54 }
 0x2e9   :  { %v1856_v12 = vpop.f32.mrf.mxu1  ;;  %2306 = vmatmul.bf16.gmra.mxu2 %v9316_v18  ;;  %v1931_v2 = vadd.f32 %v1767_v4, %v8853_v44 }
 0x2ea   :  { %6710 = vmatmul.msk.bf16.gmra.mxu3 %vm2225_vm2, %v9318_v46  ;;  %v1932_v8 = vadd.f32 %v1856_v12, %v8858_v51 }
 0x2eb   :  { %6647 = vmatmul.msk.bf16.gmra.mxu0 %vm229_vm0, %v1609_v39  ;;  %v2001_v29 = vadd.f32 %v9192_v6, %v1931_v2  ;;  %v7633_v2 = vld [vmem:[%s11860_s3 + $0x54] sm:$0xff] }
 0x2ec   :  { %6663 = vmatmul.msk.bf16.gmra.mxu1 %vm229_vm0, %v1609_v39  ;;  %v2002_v44 = vadd.f32 %v9195_v58, %v1932_v8  ;;  %2549 = vmatpush.bf16.msrb.mxu0 %v7635_v16  ;;  %v7641_v8 = vld [vmem:[%s11860_s3 + $0x94] sm:$0xff] }
 0x2ed   :  { %v2065_v62 = vmax.f32 %v2001_v29, 0.0  ;;  %2640 = vmatpush.bf16.msrb.mxu1 %v7641_v8  ;;  %v11960_v16 = vld [vmem:[#allocation20_spill] sm:$0xff]  ;;  %v11961_v8 = vld [vmem:[#allocation21_spill] sm:$0xff] }
 0x2ee   :  { %v2066_v57 = vmax.f32 %v2002_v44, 0.0  ;;  %v1527_v29 = vadd.f32 %v11960_v16, %v8920_v45 }
 0x2f0   :  { %v1769_v61 = vpop.f32.mrf.mxu0  ;;  %2550 = vmatpush.bf16.msrb.mxu0 %v7634_v33 }
 0x2f1   :  { %v1933_v43 = vadd.f32 %v1769_v61, %v1522_v40  ;;  %v1858_v21 = vpop.f32.mrf.mxu1  ;;  %v1526_v61 = vadd.f32 %v8934_v11, %v8917_v35  ;;  %v1595_v35 = vld [vmem:[%s11859_s0 + $0xfc] sm:$0xf] }
 0x2f2   :  { %v1934_v23 = vadd.f32 %v1858_v21, %v1523_v28 }
 0x2f3   :  { %v2003_v51 = vadd.f32 %v9192_v6, %v1933_v43 }
 0x2f4   :  { %v2004_v3 = vadd.f32 %v9195_v58, %v1934_v23  ;;  %2551 = vmatpush.bf16.msrb.mxu0 %v7633_v2  ;;  %v1530_v2 = vadd.f32 %v8960_v20, %v8949_v63 }
 0x2f5   :  { %v2067_v56 = vmax.f32 %v2003_v51, 0.0 }
 0x2f6   :  { %v2068_v39 = vmax.f32 %v2004_v3, 0.0 }
 0x2f7   :  { %v9356_v4 = vpack.c.bf16 %v2067_v56, %v2065_v62 }
 0x2f8   :  { %v9358_v12 = vpack.c.bf16 %v2068_v39, %v2066_v57  ;;  %v1772_v30 = vpop.f32.mrf.mxu0 }
 0x2f9   :  { %v1861_v40 = vpop.f32.mrf.mxu1  ;;  %2311 = vmatmul.bf16.gmra.mxu2 %v9356_v4  ;;  %v1935_v22 = vadd.f32 %v1772_v30, %v8912_v52 }
 0x2fa   :  { %6711 = vmatmul.msk.bf16.gmra.mxu3 %vm2225_vm2, %v9358_v12  ;;  %v1936_v28 = vadd.f32 %v1861_v40, %v8914_v38  ;;  %v1594_v38 = vld [vmem:[%s11859_s0 + $0xf4] sm:$0xff]  ;;  %v1531_v40 = vadd.f32 %v8962_v24, %v11961_v8 }
 0x2fb   :  { %6648 = vmatmul.msk.bf16.gmra.mxu0 %vm229_vm0, %v1610_v49  ;;  %v2005_v21 = vadd.f32 %v9192_v6, %v1935_v22  ;;  %v1611_v62 = vpack.c.bf16 %v1595_v35, %v1594_v38  ;;  %v11962_v38 = vld [vmem:[#allocation22_spill] sm:$0xff] }
 0x2fc   :  { %6664 = vmatmul.msk.bf16.gmra.mxu1 %vm229_vm0, %v1610_v49  ;;  %v2006_v51 = vadd.f32 %v9195_v58, %v1936_v28  ;;  %v1534_v35 = vadd.f32 %v8984_v48, %v11962_v38 }
 0x2fd   :  { %v2069_v45 = vmax.f32 %v2005_v21, 0.0 }
 0x2fe   :  { %v2070_v55 = vmax.f32 %v2006_v51, 0.0 }
 0x300   :  { %v1774_v43 = vpop.f32.mrf.mxu0 }
 0x301   :  { %v1937_v44 = vadd.f32 %v1774_v43, %v1526_v61  ;;  %v1863_v23 = vpop.f32.mrf.mxu1 }
 0x302   :  { %v1938_v13 = vadd.f32 %v1863_v23, %v1527_v29 }
 0x303   :  { %v2007_v3 = vadd.f32 %v9192_v6, %v1937_v44 }
 0x304   :  { %v2008_v52 = vadd.f32 %v9195_v58, %v1938_v13 }
 0x305   :  { %v2071_v11 = vmax.f32 %v2007_v3, 0.0 }
 0x306   :  { %v2072_v33 = vmax.f32 %v2008_v52, 0.0 }
 0x307   :  { %v9387_v54 = vpack.c.bf16 %v2071_v11, %v2069_v45  ;;  %v11963_v45 = vld [vmem:[#allocation23_spill] sm:$0xff] }
 0x308   :  { %v9389_v56 = vpack.c.bf16 %v2072_v33, %v2070_v55  ;;  %v1777_v57 = vpop.f32.mrf.mxu0  ;;  %v1535_v11 = vadd.f32 %v8986_v41, %v11963_v45 }
 0x309   :  { %v1866_v39 = vpop.f32.mrf.mxu1  ;;  %2316 = vmatmul.bf16.gmra.mxu2 %v9387_v54  ;;  %v1939_v49 = vadd.f32 %v1777_v57, %v8944_v42 }
 0x30a   :  { %6712 = vmatmul.msk.bf16.gmra.mxu3 %vm2225_vm2, %v9389_v56  ;;  %v1940_v30 = vadd.f32 %v1866_v39, %v8946_v25 }
 0x30b   :  { %6649 = vmatmul.msk.bf16.gmra.mxu0 %vm229_vm0, %v1611_v62  ;;  %v2009_v28 = vadd.f32 %v9192_v6, %v1939_v49  ;;  %v9425_v49 = vpop.f32.mrf.mxu2 }
 0x30c   :  { %6665 = vmatmul.msk.bf16.gmra.mxu1 %vm229_vm0, %v1611_v62  ;;  %v2010_v29 = vadd.f32 %v9195_v58, %v1940_v30 }
 0x30d   :  { %v2073_v44 = vmax.f32 %v2009_v28, 0.0 }
 0x30e   :  { %v2074_v23 = vmax.f32 %v2010_v29, 0.0 }
 0x310   :  { %v1779_v22 = vpop.f32.mrf.mxu0 }
 0x311   :  { %v1941_v61 = vadd.f32 %v1779_v22, %v1530_v2  ;;  %v1868_v16 = vpop.f32.mrf.mxu1 }
 0x312   :  { %v1942_v43 = vadd.f32 %v1868_v16, %v1531_v40 }
 0x313   :  { %v2011_v21 = vadd.f32 %v9192_v6, %v1941_v61 }
 0x314   :  { %v2012_v42 = vadd.f32 %v9195_v58, %v1942_v43 }
 0x315   :  { %v2075_v25 = vmax.f32 %v2011_v21, 0.0 }
 0x316   :  { %v2076_v51 = vmax.f32 %v2012_v42, 0.0  ;;  %v11964_v42 = vld [vmem:[#allocation24_spill] sm:$0xff] }
 0x317   :  { %v9406_v63 = vpack.c.bf16 %v2075_v25, %v2073_v44  ;;  %v1538_v44 = vadd.f32 %v9008_v27, %v11964_v42  ;;  %v11965_v25 = vld [vmem:[#allocation25_spill] sm:$0xff] }
 0x318   :  { %v9408_v20 = vpack.c.bf16 %v2076_v51, %v2074_v23  ;;  %v1782_v24 = vpop.f32.mrf.mxu0  ;;  %v1539_v23 = vadd.f32 %v9010_v26, %v11965_v25 }
 0x319   :  { %v1871_v13 = vpop.f32.mrf.mxu1  ;;  %2321 = vmatmul.bf16.gmra.mxu2 %v9406_v63  ;;  %v1943_v3 = vadd.f32 %v1782_v24, %v8968_v10  ;;  %v9428_v10 = vpop.f32.mrf.mxu3 }
 0x31a   :  { %6713 = vmatmul.msk.bf16.gmra.mxu3 %vm2225_vm2, %v9408_v20  ;;  %v1944_v52 = vadd.f32 %v1871_v13, %v8970_v5 }
 0x31b   :  { %2552 = vmatmul.bf16.vlgmr.msrb.gmra.mxu0 %v9209_v7  ;;  %v2013_v33 = vadd.f32 %v9192_v6, %v1943_v3 }
 0x31c   :  { %6783 = vmatmul.msk.bf16.vlgmr.msrb.gmra.mxu1 %vm2225_vm2, %v9211_v0  ;;  %v2014_v7 = vadd.f32 %v9195_v58, %v1944_v52 }
 0x31d   :  { %v2077_v48 = vmax.f32 %v2013_v33, 0.0 }
 0x31e   :  { %v2078_v2 = vmax.f32 %v2014_v7, 0.0 }
 0x320   :  { %v1784_v55 = vpop.f32.mrf.mxu0 }
 0x321   :  { %v1945_v62 = vadd.f32 %v1784_v55, %v1534_v35  ;;  %v1873_v57 = vpop.f32.mrf.mxu1 }
 0x322   :  { %v1946_v39 = vadd.f32 %v1873_v57, %v1535_v11 }
 0x323   :  { %v2015_v0 = vadd.f32 %v9192_v6, %v1945_v62 }
 0x324   :  { %v2016_v5 = vadd.f32 %v9195_v58, %v1946_v39 }
 0x325   :  { %v2079_v30 = vmax.f32 %v2015_v0, 0.0 }
 0x326   :  { %v2080_v41 = vmax.f32 %v2016_v5, 0.0 }
 0x327   :  { %v9430_v8 = vpack.c.bf16 %v2079_v30, %v2077_v48  ;;  %v11966_v30 = vld [vmem:[#allocation26_spill] sm:$0xff] }
 0x328   :  { %v9432_v40 = vpack.c.bf16 %v2080_v41, %v2078_v2  ;;  %v1787_v22 = vpop.f32.mrf.mxu0  ;;  %v1542_v2 = vadd.f32 %v9032_v59, %v11966_v30  ;;  %v11967_v41 = vld [vmem:[#allocation27_spill] sm:$0xff] }
 0x329   :  { %v1876_v28 = vpop.f32.mrf.mxu1  ;;  %2326 = vmatmul.bf16.gmra.mxu2 %v9430_v8  ;;  %v1947_v16 = vadd.f32 %v1787_v22, %v8992_v34  ;;  %v1543_v22 = vadd.f32 %v9034_v31, %v11967_v41 }
 0x32a   :  { %6714 = vmatmul.msk.bf16.gmra.mxu3 %vm2225_vm2, %v9432_v40  ;;  %v1948_v43 = vadd.f32 %v1876_v28, %v8994_v53 }
 0x32b   :  { %2557 = vmatmul.bf16.gmra.mxu0 %v9232_v32  ;;  %v2017_v32 = vadd.f32 %v9192_v6, %v1947_v16 }
 0x32c   :  { %6784 = vmatmul.msk.bf16.gmra.mxu1 %vm2225_vm2, %v9234_v1  ;;  %v2287_v61 = vpop.f32.mrf.mxu2  ;;  %v2018_v1 = vadd.f32 %v9195_v58, %v1948_v43 }
 0x32d   :  { %v2376_v29 = vpop.f32.mrf.mxu3  ;;  %v2081_v38 = vmax.f32 %v2017_v32, 0.0 }
 0x32e   :  { %v9442_v21 = vadd.f32 %v2376_v29, %v2287_v61  ;;  %v2082_v27 = vmax.f32 %v2018_v1, 0.0 }
 0x330   :  { %v1789_v51 = vpop.f32.mrf.mxu0 }
 0x331   :  { %v1949_v24 = vadd.f32 %v1789_v51, %v1538_v44  ;;  %v1878_v13 = vpop.f32.mrf.mxu1 }
 0x332   :  { %v1950_v3 = vadd.f32 %v1878_v13, %v1539_v23 }
 0x333   :  { %v2019_v34 = vadd.f32 %v9192_v6, %v1949_v24 }
 0x334   :  { %v2020_v53 = vadd.f32 %v9195_v58, %v1950_v3  ;;  %v2289_v52 = vpop.f32.mrf.mxu2  ;;  %v11968_v3 = vld [vmem:[#allocation28_spill] sm:$0xff] }
 0x335   :  { %v2083_v35 = vmax.f32 %v2019_v34, 0.0  ;;  %v2378_v45 = vpop.f32.mrf.mxu3 }
 0x336   :  { %v2084_v11 = vmax.f32 %v2020_v53, 0.0  ;;  %v9452_v55 = vadd.f32 %v2378_v45, %v2289_v52  ;;  %v11969_v52 = vld [vmem:[#allocation29_spill] sm:$0xff]  ;;  %v11970_v45 = vld [vmem:[#allocation30_spill] sm:$0xff] }
 0x337   :  { %v9454_v26 = vpack.c.bf16 %v2083_v35, %v2081_v38 }
 0x338   :  { %v9456_v33 = vpack.c.bf16 %v2084_v11, %v2082_v27  ;;  %v1792_v62 = vpop.f32.mrf.mxu0  ;;  %v11971_v27 = vld [vmem:[#allocation32_spill] sm:$0xff] }
 0x339   :  { %v1881_v57 = vpop.f32.mrf.mxu1  ;;  %2331 = vmatmul.bf16.gmra.mxu2 %v9454_v26  ;;  %v1951_v39 = vadd.f32 %v1792_v62, %v9016_v60  ;;  %v1546_v11 = vadd.f32 %v11971_v27, %v11970_v45  ;;  %v11972_v62 = vld [vmem:[#allocation31_spill] sm:$0xff] }
 0x33a   :  { %6715 = vmatmul.msk.bf16.gmra.mxu3 %vm2225_vm2, %v9456_v33  ;;  %v1952_v5 = vadd.f32 %v1881_v57, %v9018_v36  ;;  %v11973_v57 = vld [vmem:[#allocation33_spill] sm:$0xff] }
 0x33b   :  { %2562 = vmatmul.bf16.gmra.mxu0 %v9255_v9  ;;  %v2021_v9 = vadd.f32 %v9192_v6, %v1951_v39 }
 0x33c   :  { %6785 = vmatmul.msk.bf16.gmra.mxu1 %vm2225_vm2, %v9257_v19  ;;  %v2292_v7 = vpop.f32.mrf.mxu2  ;;  %v2022_v19 = vadd.f32 %v9195_v58, %v1952_v5 }
 0x33d   :  { %v2381_v0 = vpop.f32.mrf.mxu3  ;;  %v2085_v42 = vmax.f32 %v2021_v9, 0.0 }
 0x33e   :  { %v9466_v48 = vadd.f32 %v2381_v0, %v2292_v7  ;;  %v2086_v59 = vmax.f32 %v2022_v19, 0.0  ;;  %v1547_v7 = vadd.f32 %v11973_v57, %v11972_v62 }
 0x340   :  { %v1794_v28 = vpop.f32.mrf.mxu0 }
 0x341   :  { %v1953_v61 = vadd.f32 %v1794_v28, %v1542_v2  ;;  %v1883_v16 = vpop.f32.mrf.mxu1 }
 0x342   :  { %v1954_v29 = vadd.f32 %v1883_v16, %v1543_v22 }
 0x343   :  { %v2023_v60 = vadd.f32 %v9192_v6, %v1953_v61 }
 0x344   :  { %v2024_v36 = vadd.f32 %v9195_v58, %v1954_v29  ;;  %v2294_v43 = vpop.f32.mrf.mxu2 }
 0x345   :  { %v2087_v44 = vmax.f32 %v2023_v60, 0.0  ;;  %v2383_v25 = vpop.f32.mrf.mxu3 }
 0x346   :  { %v2088_v23 = vmax.f32 %v2024_v36, 0.0  ;;  %v9476_v51 = vadd.f32 %v2383_v25, %v2294_v43  ;;  %v11974_v25 = vld [vmem:[#allocation2_spill] sm:$0xff] }
 0x347   :  { %v9478_v31 = vpack.c.bf16 %v2087_v44, %v2085_v42 }
 0x348   :  { %v9480_v32 = vpack.c.bf16 %v2088_v23, %v2086_v59  ;;  %v1797_v24 = vpop.f32.mrf.mxu0 }
 0x349   :  { %v1886_v13 = vpop.f32.mrf.mxu1  ;;  %2336 = vmatmul.bf16.gmra.mxu2 %v9478_v31  ;;  %v1955_v34 = vadd.f32 %v1797_v24, %v11968_v3  ;;  %v11975_v24 = vld [vmem:[#allocation3_spill] sm:$0xff]  ;;  %v11976_v3 = vld [vmem:[#allocation4_spill] sm:$0xff] }
 0x34a   :  { %6716 = vmatmul.msk.bf16.gmra.mxu3 %vm2225_vm2, %v9480_v32  ;;  %v1956_v38 = vadd.f32 %v1886_v13, %v11969_v52  ;;  %v11978_v52 = vld [vmem:[#allocation5_spill] sm:$0xff] }
 0x34b   :  { %2567 = vmatmul.bf16.gmra.mxu0 %v9278_v15  ;;  %v2025_v15 = vadd.f32 %v9192_v6, %v1955_v34  ;;  %v11977_v34 = vld [vmem:[#allocation34_spill] sm:$0xff] }
 0x34c   :  { %6786 = vmatmul.msk.bf16.gmra.mxu1 %vm2225_vm2, %v9280_v37  ;;  %v2297_v1 = vpop.f32.mrf.mxu2  ;;  %v2026_v37 = vadd.f32 %v9195_v58, %v1956_v38  ;;  %v11979_v38 = vld [vmem:[#allocation35_spill] sm:$0xff] }
 0x34d   :  { %v2386_v53 = vpop.f32.mrf.mxu3  ;;  %v2089_v28 = vmax.f32 %v2025_v15, 0.0  ;;  %v1551_v45 = vadd.f32 %v11979_v38, %v11978_v52 }
 0x34e   :  { %v9490_v35 = vadd.f32 %v2386_v53, %v2297_v1  ;;  %v2090_v16 = vmax.f32 %v2026_v37, 0.0  ;;  %v1550_v53 = vadd.f32 %v11977_v34, %v11976_v3  ;;  %v11984_v3 = vld [vmem:[#allocation9_spill] sm:$0xff] }
 0x34f   :  { %v11985_v34 = vld [vmem:[#allocation37_spill] sm:$0xff] }
 0x350   :  { %v1799_v39 = vpop.f32.mrf.mxu0 }
 0x351   :  { %v1957_v0 = vadd.f32 %v1799_v39, %v1546_v11  ;;  %v1888_v5 = vpop.f32.mrf.mxu1 }
 0x352   :  { %v1958_v30 = vadd.f32 %v1888_v5, %v1547_v7 }
 0x353   :  { %v2027_v2 = vadd.f32 %v9192_v6, %v1957_v0 }
 0x354   :  { %v2028_v41 = vadd.f32 %v9195_v58, %v1958_v30  ;;  %v2299_v22 = vpop.f32.mrf.mxu2 }
 0x355   :  { %v2091_v9 = vmax.f32 %v2027_v2, 0.0  ;;  %v2388_v61 = vpop.f32.mrf.mxu3 }
 0x356   :  { %v2092_v19 = vmax.f32 %v2028_v41, 0.0  ;;  %v9500_v29 = vadd.f32 %v2388_v61, %v2299_v22 }
 0x357   :  { %v9502_v60 = vpack.c.bf16 %v2091_v9, %v2089_v28 }
 0x358   :  { %v9504_v36 = vpack.c.bf16 %v2092_v19, %v2090_v16  ;;  %v1802_v43 = vpop.f32.mrf.mxu0  ;;  %v11980_v19 = vld [vmem:[#allocation6_spill] sm:$0xff] }
 0x359   :  { %v1891_v42 = vpop.f32.mrf.mxu1  ;;  %2341 = vmatmul.bf16.gmra.mxu2 %v9502_v60  ;;  %v1959_v59 = vadd.f32 %v1802_v43, %v11974_v25 }
 0x35a   :  { %6717 = vmatmul.msk.bf16.gmra.mxu3 %vm2225_vm2, %v9504_v36  ;;  %v1960_v13 = vadd.f32 %v1891_v42, %v11975_v24  ;;  %v11983_v24 = vld [vmem:[#allocation36_spill] sm:$0xff] }
 0x35b   :  { %2572 = vmatmul.bf16.gmra.mxu0 %v9316_v18  ;;  %v2029_v18 = vadd.f32 %v9192_v6, %v1959_v59 }
 0x35c   :  { %6787 = vmatmul.msk.bf16.gmra.mxu1 %vm2225_vm2, %v9318_v46  ;;  %v2302_v44 = vpop.f32.mrf.mxu2  ;;  %v2030_v46 = vadd.f32 %v9195_v58, %v1960_v13 }
 0x35d   :  { %v2391_v23 = vpop.f32.mrf.mxu3  ;;  %v2093_v0 = vmax.f32 %v2029_v18, 0.0 }
 0x35e   :  { %v9514_v1 = vadd.f32 %v2391_v23, %v2302_v44  ;;  %v2094_v30 = vmax.f32 %v2030_v46, 0.0  ;;  %v11981_v44 = vld [vmem:[#allocation7_spill] sm:$0xff]  ;;  %v11982_v23 = vld [vmem:[#allocation8_spill] sm:$0xff] }
 0x35f   :  { %v1554_v13 = vadd.f32 %v11983_v24, %v11982_v23  ;;  %v11990_v24 = vld [vmem:[#allocation13_spill] sm:$0xff] }
 0x360   :  { %v1804_v27 = vpop.f32.mrf.mxu0 }
 0x361   :  { %v1961_v11 = vadd.f32 %v1804_v27, %v1550_v53  ;;  %v1893_v62 = vpop.f32.mrf.mxu1  ;;  %v1555_v53 = vadd.f32 %v11985_v34, %v11984_v3 }
 0x362   :  { %v1962_v57 = vadd.f32 %v1893_v62, %v1551_v45 }
 0x363   :  { %v2031_v7 = vadd.f32 %v9192_v6, %v1961_v11 }
 0x364   :  { %v2032_v39 = vadd.f32 %v9195_v58, %v1962_v57  ;;  %v2304_v15 = vpop.f32.mrf.mxu2 }
 0x365   :  { %v2095_v5 = vmax.f32 %v2031_v7, 0.0  ;;  %v2393_v37 = vpop.f32.mrf.mxu3 }
 0x366   :  { %v2096_v2 = vmax.f32 %v2032_v39, 0.0  ;;  %v9524_v41 = vadd.f32 %v2393_v37, %v2304_v15 }
 0x367   :  { %v9526_v22 = vpack.c.bf16 %v2095_v5, %v2093_v0 }
 0x368   :  { %v9528_v28 = vpack.c.bf16 %v2096_v2, %v2094_v30  ;;  %v1807_v9 = vpop.f32.mrf.mxu0 }
 0x369   :  { %v1896_v61 = vpop.f32.mrf.mxu1  ;;  %2346 = vmatmul.bf16.gmra.mxu2 %v9526_v22  ;;  %v1963_v43 = vadd.f32 %v1807_v9, %v11980_v19  ;;  %v11986_v9 = vld [vmem:[#allocation10_spill] sm:$0xff]  ;;  %v11987_v19 = vld [vmem:[#allocation11_spill] sm:$0xff] }
 0x36a   :  { %6718 = vmatmul.msk.bf16.gmra.mxu3 %vm2225_vm2, %v9528_v28  ;;  %v1964_v25 = vadd.f32 %v1896_v61, %v11981_v44  ;;  %v11988_v44 = vld [vmem:[#allocation12_spill] sm:$0xff] }
 0x36b   :  { %2577 = vmatmul.bf16.gmra.mxu0 %v9356_v4  ;;  %v2033_v4 = vadd.f32 %v9192_v6, %v1963_v43 }
 0x36c   :  { %6788 = vmatmul.msk.bf16.gmra.mxu1 %vm2225_vm2, %v9358_v12  ;;  %v2307_v16 = vpop.f32.mrf.mxu2  ;;  %v2034_v12 = vadd.f32 %v9195_v58, %v1964_v25  ;;  %v11989_v25 = vld [vmem:[#allocation38_spill] sm:$0xff] }
 0x36d   :  { %v2396_v42 = vpop.f32.mrf.mxu3  ;;  %v2097_v46 = vmax.f32 %v2033_v4, 0.0  ;;  %v1558_v23 = vadd.f32 %v11989_v25, %v11988_v44 }
 0x36e   :  { %v9538_v59 = vadd.f32 %v2396_v42, %v2307_v16  ;;  %v2098_v39 = vmax.f32 %v2034_v12, 0.0 }
 0x370   :  { %v1809_v52 = vpop.f32.mrf.mxu0 }
 0x371   :  { %v1965_v38 = vadd.f32 %v1809_v52, %v1554_v13  ;;  %v1898_v45 = vpop.f32.mrf.mxu1  ;;  %v1559_v13 = vadd.f32 %v9164_v17, %v11990_v24 }
 0x372   :  { %v1966_v27 = vadd.f32 %v1898_v45, %v1555_v53 }
 0x373   :  { %v2035_v18 = vadd.f32 %v9192_v6, %v1965_v38 }
 0x374   :  { %v2036_v11 = vadd.f32 %v9195_v58, %v1966_v27  ;;  %v9548_v62 = vpop.f32.mrf.mxu2 }
 0x375   :  { %v2099_v57 = vmax.f32 %v2035_v18, 0.0  ;;  %v9550_v7 = vpop.f32.mrf.mxu3 }
 0x376   :  { %v2100_v15 = vmax.f32 %v2036_v11, 0.0 }
 0x377   :  { %v9552_v0 = vpack.c.bf16 %v2099_v57, %v2097_v46 }
 0x378   :  { %v9554_v5 = vpack.c.bf16 %v2100_v15, %v2098_v39  ;;  %v1812_v37 = vpop.f32.mrf.mxu0 }
 0x379   :  { %v1901_v30 = vpop.f32.mrf.mxu1  ;;  %2351 = vmatmul.bf16.gmra.mxu2 %v9552_v0  ;;  %v1967_v61 = vadd.f32 %v1812_v37, %v11986_v9 }
 0x37a   :  { %6719 = vmatmul.msk.bf16.gmra.mxu3 %vm2225_vm2, %v9554_v5  ;;  %v1968_v43 = vadd.f32 %v1901_v30, %v11987_v19  ;;  %v6809_v30 = vld [vmem:[%s11862_s4 + $0xa8] sm:$0x33] }
 0x37b   :  { %2582 = vmatmul.bf16.gmra.mxu0 %v9387_v54  ;;  %v2037_v54 = vadd.f32 %v9192_v6, %v1967_v61  ;;  %v3032_v61 = vunpack.c.l.b16 %v6809_v30 }
 0x37c   :  { %6789 = vmatmul.msk.bf16.gmra.mxu1 %vm2225_vm2, %v9389_v56  ;;  %v2312_v2 = vpop.f32.mrf.mxu2  ;;  %v2038_v56 = vadd.f32 %v9195_v58, %v1968_v43 }
 0x37d   :  { %v2401_v16 = vpop.f32.mrf.mxu3  ;;  %v2101_v12 = vmax.f32 %v2037_v54, 0.0  ;;  %v3044_v44 = vpack.c.b16 %v3032_v61, %v3032_v61 }
 0x37e   :  { %v9564_v42 = vadd.f32 %v2401_v16, %v2312_v2  ;;  %v2102_v11 = vmax.f32 %v2038_v56, 0.0  ;;  %v3033_v16 = vunpack.c.h.b16 %v6809_v30  ;;  %v7661_v56 = vld [vmem:[%s11862_s4 + $0x9c] sm:$0xf]  ;;  %v7660_v30 = vld [vmem:[%s11862_s4 + $0x8c] sm:$0xf0] }
 0x37f   :  { %v3107_v54 = vsel %vm3105_vm3, %v3044_v44, 0 }
 0x380   :  { %v1814_v3 = vpop.f32.mrf.mxu0  ;;  %v3045_v25 = vpack.c.b16 %v3033_v16, %v3033_v16  ;;  %3114 = vmatpush.bf16.msrb.mxu2 %v3107_v54 }
 0x381   :  { %v1969_v34 = vadd.f32 %v1814_v3, %v1558_v23  ;;  %v1903_v53 = vpop.f32.mrf.mxu1 }
 0x382   :  { %v1970_v52 = vadd.f32 %v1903_v53, %v1559_v13 }
 0x383   :  { %v2039_v4 = vadd.f32 %v9192_v6, %v1969_v34 }
 0x384   :  { %v2040_v38 = vadd.f32 %v9195_v58, %v1970_v52  ;;  %v9574_v45 = vpop.f32.mrf.mxu2 }
 0x385   :  { %v2103_v27 = vmax.f32 %v2039_v4, 0.0  ;;  %v9576_v18 = vpop.f32.mrf.mxu3 }
 0x386   :  { %v2104_v17 = vmax.f32 %v2040_v38, 0.0 }
 0x387   :  { %v9578_v46 = vpack.c.bf16 %v2103_v27, %v2101_v12 }
 0x388   :  { %v9580_v57 = vpack.c.bf16 %v2104_v17, %v2102_v11  ;;  %v1817_v39 = vpop.f32.mrf.mxu0 }
 0x389   :  { %v1906_v15 = vpop.f32.mrf.mxu1  ;;  %2356 = vmatmul.bf16.gmra.mxu2 %v9578_v46  ;;  %v1971_v2 = vadd.f32 %v1817_v39, %v9170_v50 }
 0x38a   :  { %6720 = vmatmul.msk.bf16.gmra.mxu3 %vm2225_vm2, %v9580_v57  ;;  %v1972_v19 = vadd.f32 %v1906_v15, %v9172_v14  ;;  %v3110_v14 = vsel %vm3105_vm3, %v3045_v25, 0  ;;  %v6828_v25 = vld [vmem:[%s11862_s4 + $0x78] sm:$0xf] }
 0x38b   :  { %2587 = vmatmul.bf16.gmra.mxu0 %v9406_v63  ;;  %v1562_v63 = vadd.f32 %v9425_v49, %v9175_v47  ;;  %v2041_v13 = vadd.f32 %v9192_v6, %v1971_v2  ;;  %3202 = vmatpush.bf16.msrb.mxu3 %v3110_v14  ;;  %v6844_v49 = vld [vmem:[%s11862_s4 + $0x98] sm:$0xf]  ;;  %v7659_v2 = vld [vmem:[%s11862_s4 + $0x8c] sm:$0xf] }
 0x38c   :  { %6790 = vmatmul.msk.bf16.gmra.mxu1 %vm2225_vm2, %v9408_v20  ;;  %v2317_v37 = vpop.f32.mrf.mxu2  ;;  %v11991_v20 = vld [vmem:[#allocation14_spill] sm:$0xff]  ;;  %v2042_v34 = vadd.f32 %v9195_v58, %v1972_v19  ;;  %v6838_v19 = vld [vmem:[%s11862_s4 + $0x90] sm:$0xf0] }
 0x38d   :  { %v2406_v9 = vpop.f32.mrf.mxu3  ;;  %v1563_v23 = vadd.f32 %v9428_v10, %v11991_v20  ;;  %v7662_v10 = vld [vmem:[%s11862_s4 + $0x9c] sm:$0xf0]  ;;  %v2105_v12 = vmax.f32 %v2041_v13, 0.0  ;;  %v6841_v44 = vor.u32 %v7659_v2, %v6838_v19 }
 0x38e   :  { %v9593_v43 = vadd.f32 %v2406_v9, %v2317_v37  ;;  %v6845_v38 = vor.u32 %v7662_v10, %v6844_v49  ;;  %v2106_v39 = vmax.f32 %v2042_v34, 0.0  ;;  %v7658_v20 = vld [vmem:[%s11862_s4 + $0x7c] sm:$0xf0]  ;;  %v6820_v34 = vld [vmem:[%s11862_s4 + $0x68] sm:$0xf] }
 0x38f   :  { %v6829_v13 = vor.u32 %v7658_v20, %v6828_v25  ;;  %v6822_v10 = vld [vmem:[%s11862_s4 + $0x70] sm:$0xf0] }
 0x390   :  { %v1819_v24 = vpop.f32.mrf.mxu0  ;;  %3115 = vmatpush.bf16.msrb.mxu2 %v6845_v38 }
 0x391   :  { %v1973_v50 = vadd.f32 %v1819_v24, %v1562_v63  ;;  %v1908_v3 = vpop.f32.mrf.mxu1 }
 0x392   :  { %v1974_v53 = vadd.f32 %v1908_v3, %v1563_v23  ;;  %v7657_v23 = vld [vmem:[%s11862_s4 + $0x7c] sm:$0xf] }
 0x393   :  { %v2043_v47 = vadd.f32 %v9192_v6, %v1973_v50  ;;  %v6846_v6 = vld [vmem:[%s11862_s4 + $0xa0] sm:$0xf0] }
 0x394   :  { %v2044_v52 = vadd.f32 %v9195_v58, %v1974_v53  ;;  %v9614_v4 = vpop.f32.mrf.mxu2  ;;  %v6849_v17 = vor.u32 %v7661_v56, %v6846_v6  ;;  %v6836_v58 = vld [vmem:[%s11862_s4 + $0x88] sm:$0xf]  ;;  %v7655_v53 = vld [vmem:[%s11862_s4 + $0x6c] sm:$0xf] }
 0x395   :  { %v2107_v27 = vmax.f32 %v2043_v47, 0.0  ;;  %v9619_v11 = vpop.f32.mrf.mxu3  ;;  %v6837_v16 = vor.u32 %v7660_v30, %v6836_v58  ;;  %v6814_v58 = vld [vmem:[%s11862_s4 + $0x60] sm:$0xf0] }
 0x396   :  { %v2108_v15 = vmax.f32 %v2044_v52, 0.0  ;;  %3203 = vmatpush.bf16.msrb.mxu3 %v6849_v17  ;;  %v6825_v52 = vor.u32 %v7655_v53, %v6822_v10  ;;  %v7653_v17 = vld [vmem:[%s11862_s4 + $0x5c] sm:$0xf] }
 0x397   :  { %v9621_v37 = vpack.c.bf16 %v2107_v27, %v2105_v12  ;;  %3116 = vmatpush.bf16.msrb.mxu2 %v6837_v16  ;;  %v6812_v12 = vld [vmem:[%s11862_s4 + $0x58] sm:$0xf]  ;;  %v7654_v27 = vld [vmem:[%s11862_s4 + $0x5c] sm:$0xf0]  ;;  %v6817_v2 = vor.u32 %v7653_v17, %v6814_v58 }
 0x398   :  { %v9632_v9 = vpack.c.bf16 %v2108_v15, %v2106_v39  ;;  %v2553_v61 = vpop.f32.mrf.mxu0 }
 0x399   :  { %v2642_v63 = vpop.f32.mrf.mxu1  ;;  %2361 = vmatmul.bf16.gmra.mxu2 %v9621_v37 }
 0x39a   :  { %6721 = vmatmul.msk.bf16.gmra.mxu3 %vm2225_vm2, %v9632_v9  ;;  %v2643_v54 = vadd.f32 %v2642_v63, %v2553_v61 }
 0x39b   :  { %2592 = vmatmul.bf16.gmra.mxu0 %v9430_v8  ;;  %3204 = vmatpush.bf16.msrb.mxu3 %v6841_v44  ;;  %v6830_v8 = vld [vmem:[%s11862_s4 + $0x80] sm:$0xf0] }
 0x39c   :  { %6791 = vmatmul.msk.bf16.gmra.mxu1 %vm2225_vm2, %v9432_v40  ;;  %v2322_v24 = vpop.f32.mrf.mxu2  ;;  %v6833_v3 = vor.u32 %v7657_v23, %v6830_v8  ;;  %3117 = vmatpush.bf16.msrb.mxu2 %v6829_v13  ;;  %v7656_v40 = vld [vmem:[%s11862_s4 + $0x6c] sm:$0xf0]  ;;  %v2722_v38 = vmax.f32 %v9442_v21, %v2643_v54  ;;  %v6813_v21 = vor.u32 %v7654_v27, %v6812_v12 }
 0x39d   :  { %v2411_v50 = vpop.f32.mrf.mxu3  ;;  %v6821_v49 = vor.u32 %v7656_v40, %v6820_v34 }
 0x39e   :  { %v9655_v14 = vadd.f32 %v2411_v50, %v2322_v24  ;;  %v2787_v61 = vrot.slane %v2722_v38, 1 }
 0x39f   :  { %3205 = vmatpush.bf16.msrb.mxu3 %v6833_v3 }
 0x3a0   :  { %v2555_v47 = vpop.f32.mrf.mxu0  ;;  %3118 = vmatpush.bf16.msrb.mxu2 %v6821_v49 }
 0x3a1   :  { %v2644_v56 = vpop.f32.mrf.mxu1 }
 0x3a2   :  { %v2645_v6 = vadd.f32 %v2644_v56, %v2555_v47 }
 0x3a3   :  { %3206 = vmatpush.bf16.msrb.mxu3 %v6825_v52 }
 0x3a4   :  { %v2723_v39 = vmax.f32 %v9452_v55, %v2645_v6  ;;  %v9680_v15 = vpop.f32.mrf.mxu2  ;;  %3119 = vmatpush.bf16.msrb.mxu2 %v6813_v21 }
 0x3a5   :  { %v9685_v30 = vpop.f32.mrf.mxu3 }
 0x3a6   :  { %v2788_v16 = vrot.slane %v2723_v39, 1 }
 0x3a7   :  { %3207 = vmatpush.bf16.msrb.mxu3 %v6817_v2 }
 0x3a8   :  { %v2789_v19 = vsel %vm2786_vm4, %v2787_v61, %v2788_v16  ;;  %v2558_v63 = vpop.f32.mrf.mxu0 }
 0x3a9   :  { %v2882_v44 = vmax.f32 %v2722_v38, %v2789_v19  ;;  %v2647_v55 = vpop.f32.mrf.mxu1 }
 0x3aa   :  { %v2648_v25 = vadd.f32 %v2647_v55, %v2558_v63 }
 0x3ab   :  { %2597 = vmatmul.bf16.gmra.mxu0 %v9454_v26 }
 0x3ac   :  { %v2724_v20 = vmax.f32 %v9466_v48, %v2648_v25  ;;  %6792 = vmatmul.msk.bf16.gmra.mxu1 %vm2225_vm2, %v9456_v33  ;;  %v2327_v23 = vpop.f32.mrf.mxu2 }
 0x3ad   :  { %v2416_v24 = vpop.f32.mrf.mxu3 }
 0x3ae   :  { %v2790_v13 = vrot.slane %v2724_v20, 1  ;;  %v9692_v8 = vadd.f32 %v2416_v24, %v2327_v23 }
 0x3b0   :  { %v2791_v50 = vsel %vm2786_vm4, %v2788_v16, %v2790_v13  ;;  %v2560_v3 = vpop.f32.mrf.mxu0 }
 0x3b1   :  { %v2883_v54 = vmax.f32 %v2723_v39, %v2791_v50  ;;  %v2649_v34 = vpop.f32.mrf.mxu1 }
 0x3b2   :  { %v2650_v40 = vadd.f32 %v2649_v34, %v2560_v3 }
 0x3b3   :  { %v9695_v53 = vpack.c.bf16 %v2883_v54, %v2882_v44 }
 0x3b4   :  { %v2725_v26 = vmax.f32 %v9476_v51, %v2650_v40  ;;  %v9698_v47 = vpop.f32.mrf.mxu2 }
 0x3b5   :  { %v9700_v48 = vpop.f32.mrf.mxu3 }
 0x3b6   :  { %v2792_v33 = vrot.slane %v2725_v26, 1 }
 0x3b8   :  { %v2793_v49 = vsel %vm2786_vm4, %v2790_v13, %v2792_v33  ;;  %v2563_v10 = vpop.f32.mrf.mxu0 }
 0x3b9   :  { %v2884_v56 = vmax.f32 %v2724_v20, %v2793_v49  ;;  %v2652_v52 = vpop.f32.mrf.mxu1 }
 0x3ba   :  { %v2653_v38 = vadd.f32 %v2652_v52, %v2563_v10 }
 0x3bb   :  { %v9703_v6 = vpack.c.bf16 %v2884_v56, %v2883_v54  ;;  %2602 = vmatmul.bf16.gmra.mxu0 %v9478_v31 }
 0x3bc   :  { %v2726_v12 = vmax.f32 %v9490_v35, %v2653_v38  ;;  %6793 = vmatmul.msk.bf16.gmra.mxu1 %vm2225_vm2, %v9480_v32  ;;  %v2332_v51 = vpop.f32.mrf.mxu2  ;;  %v2970_v32 = vrot.slane %v9695_v53, 1 }
 0x3bd   :  { %11992 = vst [vmem:[#allocation15_spill] sm:$0xff] %v9703_v6  ;;  %v2421_v27 = vpop.f32.mrf.mxu3 }
 0x3be   :  { %v2794_v17 = vrot.slane %v2726_v12, 1  ;;  %v9709_v39 = vadd.f32 %v2421_v27, %v2332_v51 }
 0x3c0   :  { %v2795_v21 = vsel %vm2786_vm4, %v2792_v33, %v2794_v17  ;;  %v2565_v58 = vpop.f32.mrf.mxu0 }
 0x3c1   :  { %v2885_v2 = vmax.f32 %v2725_v26, %v2795_v21  ;;  %v2654_v61 = vpop.f32.mrf.mxu1 }
 0x3c2   :  { %v2655_v16 = vadd.f32 %v2654_v61, %v2565_v58 }
 0x3c3   :  { %v9712_v19 = vpack.c.bf16 %v2885_v2, %v2884_v56 }
 0x3c4   :  { %v2727_v31 = vmax.f32 %v9500_v29, %v2655_v16  ;;  %v9715_v63 = vpop.f32.mrf.mxu2 }
 0x3c5   :  { %v9717_v35 = vpop.f32.mrf.mxu3  ;;  %v2971_v44 = vrot.slane %v9712_v19, 1 }
 0x3c6   :  { %v2796_v55 = vrot.slane %v2727_v31, 1 }
 0x3c7   :  { %v2972_v25 = vsel %vm2786_vm4, %v2970_v32, %v2971_v44 }
 0x3c8   :  { %v2797_v20 = vsel %vm2786_vm4, %v2794_v17, %v2796_v55  ;;  %6850 = vmatmul.msk.bf16.vlgmr.msrb.gmra.mxu2 %vm3056_vm5, %v2972_v25  ;;  %6866 = vmatmul.msk.bf16.vlgmr.msrb.gmra.mxu3 %vm3056_vm5, %v2972_v25  ;;  %v2568_v23 = vpop.f32.mrf.mxu0 }
 0x3c9   :  { %v2886_v29 = vmax.f32 %v2726_v12, %v2797_v20  ;;  %v2657_v24 = vpop.f32.mrf.mxu1 }
 0x3ca   :  { %v2658_v13 = vadd.f32 %v2657_v24, %v2568_v23  ;;  %v2940_v23 = vld [vmem:[%s11862_s4 + $0x50] sm:$0x33] }
 0x3cb   :  { %2607 = vmatmul.bf16.gmra.mxu0 %v9502_v60  ;;  %v9726_v50 = vpack.c.bf16 %v2886_v29, %v2885_v2  ;;  %v3319_v24 = vunpack.c.l.b16 %v2940_v23 }
 0x3cc   :  { %v2728_v3 = vmax.f32 %v9514_v1, %v2658_v13  ;;  %6794 = vmatmul.msk.bf16.gmra.mxu1 %vm2225_vm2, %v9504_v36  ;;  %v2337_v54 = vpop.f32.mrf.mxu2  ;;  %v3320_v13 = vunpack.c.h.b16 %v2940_v23 }
 0x3cd   :  { %11993 = vst [vmem:[#allocation17_spill] sm:$0xff] %v9726_v50  ;;  %v2426_v34 = vpop.f32.mrf.mxu3 }
 0x3ce   :  { %v2798_v40 = vrot.slane %v2728_v3, 1  ;;  %v9731_v26 = vadd.f32 %v2426_v34, %v2337_v54  ;;  %v3331_v54 = vpack.c.b16 %v3319_v24, %v3319_v24  ;;  %v3332_v34 = vpack.c.b16 %v3320_v13, %v3320_v13  ;;  %v6910_v24 = vld [vmem:[%s11862_s4 + $0x38] sm:$0xf0] }
 0x3d0   :  { %v2799_v33 = vsel %vm2786_vm4, %v2796_v55, %v2798_v40  ;;  %v2570_v49 = vpop.f32.mrf.mxu0 }
 0x3d1   :  { %v2887_v10 = vmax.f32 %v2727_v31, %v2799_v33  ;;  %v2659_v56 = vpop.f32.mrf.mxu1 }
 0x3d2   :  { %v2660_v52 = vadd.f32 %v2659_v56, %v2570_v49  ;;  %v3392_v56 = vsel %vm3105_vm3, %v3331_v54, 0 }
 0x3d3   :  { %v9734_v38 = vpack.c.bf16 %v2887_v10, %v2886_v29  ;;  %3399 = vmatpush.bf16.msra.mxu0 %v3392_v56 }
 0x3d4   :  { %v2729_v60 = vmax.f32 %v9524_v41, %v2660_v52  ;;  %v9737_v12 = vpop.f32.mrf.mxu2  ;;  %v3395_v52 = vsel %vm3105_vm3, %v3332_v34, 0 }
 0x3d5   :  { %v9739_v1 = vpop.f32.mrf.mxu3  ;;  %v2973_v36 = vrot.slane %v9734_v38, 1  ;;  %3487 = vmatpush.bf16.msra.mxu1 %v3395_v52 }
 0x3d6   :  { %v2800_v51 = vrot.slane %v2729_v60, 1 }
 0x3d7   :  { %v2974_v27 = vsel %vm2786_vm4, %v2971_v44, %v2973_v36 }
 0x3d8   :  { %v2801_v17 = vsel %vm2786_vm4, %v2798_v40, %v2800_v51  ;;  %6851 = vmatmul.msk.bf16.gmra.mxu2 %vm3056_vm5, %v2974_v27  ;;  %6867 = vmatmul.msk.bf16.gmra.mxu3 %vm3056_vm5, %v2974_v27  ;;  %v2573_v21 = vpop.f32.mrf.mxu0  ;;  %v7651_v27 = vld [vmem:[%s11862_s4 + $0x44] sm:$0xf] }
 0x3d9   :  { %v2888_v58 = vmax.f32 %v2728_v3, %v2801_v17  ;;  %v2662_v2 = vpop.f32.mrf.mxu1 }
 0x3da   :  { %v2663_v61 = vadd.f32 %v2662_v2, %v2573_v21 }
 0x3db   :  { %2612 = vmatmul.bf16.gmra.mxu0 %v9526_v22  ;;  %v9747_v41 = vpack.c.bf16 %v2888_v58, %v2887_v10 }
 0x3dc   :  { %v2730_v16 = vmax.f32 %v9538_v59, %v2663_v61  ;;  %6795 = vmatmul.msk.bf16.gmra.mxu1 %vm2225_vm2, %v9528_v28  ;;  %v2342_v31 = vpop.f32.mrf.mxu2  ;;  %v2399_v59 = vadd.f32 %v9550_v7, %v9548_v62  ;;  %v6916_v7 = vld [vmem:[%s11862_s4 + $0x40] sm:$0xf] }
 0x3dd   :  { %11994 = vst [vmem:[#allocation16_spill] sm:$0xff] %v9747_v41  ;;  %v2431_v32 = vpop.f32.mrf.mxu3  ;;  %v3586_v41 = vrot.slane %v9695_v53, 2 }
 0x3de   :  { %v2802_v44 = vrot.slane %v2730_v16, 1  ;;  %v9752_v55 = vadd.f32 %v2431_v32, %v2342_v31 }
 0x3e0   :  { %v2803_v25 = vsel %vm2786_vm4, %v2800_v51, %v2802_v44  ;;  %v2575_v20 = vpop.f32.mrf.mxu0  ;;  %v7652_v51 = vld [vmem:[%s11862_s4 + $0x44] sm:$0xf0] }
 0x3e1   :  { %v2889_v22 = vmax.f32 %v2729_v60, %v2803_v25  ;;  %v2664_v29 = vpop.f32.mrf.mxu1  ;;  %v7650_v25 = vld [vmem:[%s11862_s4 + $0x34] sm:$0xf0] }
 0x3e2   :  { %v2665_v28 = vadd.f32 %v2664_v29, %v2575_v20  ;;  %v7649_v20 = vld [vmem:[%s11862_s4 + $0x34] sm:$0xf] }
 0x3e3   :  { %v9760_v3 = vpack.c.bf16 %v2889_v22, %v2888_v58  ;;  %v6918_v58 = vld [vmem:[%s11862_s4 + $0x48] sm:$0xf0] }
 0x3e4   :  { %v2731_v40 = vmax.f32 %v2399_v59, %v2665_v28  ;;  %v9762_v33 = vpop.f32.mrf.mxu2  ;;  %v6921_v31 = vor.u32 %v7651_v27, %v6918_v58  ;;  %v6913_v59 = vor.u32 %v7649_v20, %v6910_v24  ;;  %v7646_v58 = vld [vmem:[%s11862_s4 + $0x14] sm:$0xf0]  ;;  %v7643_v24 = vld [vmem:[%s11862_s4 + $0x4] sm:$0xf] }
 0x3e5   :  { %v9764_v49 = vpop.f32.mrf.mxu3  ;;  %v2975_v10 = vrot.slane %v9760_v3, 1 }
 0x3e6   :  { %v2804_v60 = vrot.slane %v2731_v40, 1  ;;  %3488 = vmatpush.bf16.msra.mxu1 %v6921_v31 }
 0x3e7   :  { %v2976_v62 = vsel %vm2786_vm4, %v2973_v36, %v2975_v10  ;;  %v6917_v36 = vor.u32 %v7652_v51, %v6916_v7 }
 0x3e8   :  { %v2805_v17 = vsel %vm2786_vm4, %v2802_v44, %v2804_v60  ;;  %6852 = vmatmul.msk.bf16.gmra.mxu2 %vm3056_vm5, %v2976_v62  ;;  %6868 = vmatmul.msk.bf16.gmra.mxu3 %vm3056_vm5, %v2976_v62  ;;  %v2578_v21 = vpop.f32.mrf.mxu0  ;;  %v6908_v44 = vld [vmem:[%s11862_s4 + $0x30] sm:$0xf]  ;;  %v6902_v62 = vld [vmem:[%s11862_s4 + $0x28] sm:$0xf0] }
 0x3e9   :  { %v2890_v2 = vmax.f32 %v2730_v16, %v2805_v17  ;;  %v2667_v61 = vpop.f32.mrf.mxu1  ;;  %3400 = vmatpush.bf16.msra.mxu0 %v6917_v36  ;;  %v6909_v29 = vor.u32 %v7650_v25, %v6908_v44  ;;  %v2404_v17 = vadd.f32 %v9576_v18, %v9574_v45  ;;  %v6894_v18 = vld [vmem:[%s11862_s4 + $0x18] sm:$0xf0] }
 0x3ea   :  { %v2668_v32 = vadd.f32 %v2667_v61, %v2578_v21  ;;  %3489 = vmatpush.bf16.msra.mxu1 %v6913_v59 }
 0x3eb   :  { %2617 = vmatmul.bf16.gmra.mxu0 %v9552_v0  ;;  %v9797_v16 = vpack.c.bf16 %v2890_v2, %v2889_v22  ;;  %v7647_v22 = vld [vmem:[%s11862_s4 + $0x24] sm:$0xf] }
 0x3ec   :  { %v2732_v23 = vmax.f32 %v9564_v42, %v2668_v32  ;;  %6796 = vmatmul.msk.bf16.gmra.mxu1 %vm2225_vm2, %v9554_v5  ;;  %v2347_v0 = vpop.f32.mrf.mxu2  ;;  %v6900_v42 = vld [vmem:[%s11862_s4 + $0x20] sm:$0xf]  ;;  %v7648_v5 = vld [vmem:[%s11862_s4 + $0x24] sm:$0xf0]  ;;  %v6905_v27 = vor.u32 %v7647_v22, %v6902_v62 }
 0x3ed   :  { %11995 = vst [vmem:[#allocation18_spill] sm:$0xff] %v9797_v16  ;;  %v2436_v13 = vpop.f32.mrf.mxu3  ;;  %3401 = vmatpush.bf16.msra.mxu0 %v6909_v29  ;;  %v6901_v52 = vor.u32 %v7648_v5, %v6900_v42  ;;  %v7644_v29 = vld [vmem:[%s11862_s4 + $0x4] sm:$0xf0]  ;;  %v6886_v42 = vld [vmem:[%s11862_s4 + $0x8] sm:$0xf0] }
 0x3ee   :  { %v2806_v28 = vrot.slane %v2732_v23, 1  ;;  %v9805_v54 = vadd.f32 %v2436_v13, %v2347_v0  ;;  %3490 = vmatpush.bf16.msra.mxu1 %v6905_v27  ;;  %v6884_v0 = vld [vmem:[%s11862_s4] sm:$0xf] }
 0x3ef   :  { %v6885_v59 = vor.u32 %v7644_v29, %v6884_v0 }
 0x3f0   :  { %v2807_v34 = vsel %vm2786_vm4, %v2804_v60, %v2806_v28  ;;  %v2580_v56 = vpop.f32.mrf.mxu0  ;;  %v6892_v60 = vld [vmem:[%s11862_s4 + $0x10] sm:$0xf] }
 0x3f1   :  { %v2891_v7 = vmax.f32 %v2731_v40, %v2807_v34  ;;  %v2669_v51 = vpop.f32.mrf.mxu1  ;;  %3402 = vmatpush.bf16.msra.mxu0 %v6901_v52  ;;  %v7645_v40 = vld [vmem:[%s11862_s4 + $0x14] sm:$0xf]  ;;  %v6893_v45 = vor.u32 %v7646_v58, %v6892_v60  ;;  %v6889_v34 = vor.u32 %v7643_v24, %v6886_v42 }
 0x3f2   :  { %v2670_v21 = vadd.f32 %v2669_v51, %v2580_v56  ;;  %v6897_v44 = vor.u32 %v7645_v40, %v6894_v18 }
 0x3f3   :  { %v9822_v36 = vpack.c.bf16 %v2891_v7, %v2890_v2 }
 0x3f4   :  { %v2733_v61 = vmax.f32 %v2404_v17, %v2670_v21  ;;  %v9833_v31 = vpop.f32.mrf.mxu2  ;;  %3491 = vmatpush.bf16.msra.mxu1 %v6897_v44 }
 0x3f5   :  { %v9838_v2 = vpop.f32.mrf.mxu3  ;;  %v2977_v32 = vrot.slane %v9822_v36, 1  ;;  %3403 = vmatpush.bf16.msra.mxu0 %v6893_v45 }
 0x3f6   :  { %v2808_v25 = vrot.slane %v2733_v61, 1 }
 0x3f7   :  { %v2978_v20 = vsel %vm2786_vm4, %v2975_v10, %v2977_v32 }
 0x3f8   :  { %v2809_v13 = vsel %vm2786_vm4, %v2806_v28, %v2808_v25  ;;  %6853 = vmatmul.msk.bf16.gmra.mxu2 %vm3056_vm5, %v2978_v20  ;;  %6869 = vmatmul.msk.bf16.gmra.mxu3 %vm3056_vm5, %v2978_v20  ;;  %v2583_v10 = vpop.f32.mrf.mxu0 }
 0x3f9   :  { %v2892_v5 = vmax.f32 %v2732_v23, %v2809_v13  ;;  %v2672_v22 = vpop.f32.mrf.mxu1  ;;  %3404 = vmatpush.bf16.msra.mxu0 %v6885_v59  ;;  %3492 = vmatpush.bf16.msra.mxu1 %v6889_v34 }
 0x3fa   :  { %v2673_v56 = vadd.f32 %v2672_v22, %v2583_v10 }
 0x3fb   :  { %2622 = vmatmul.bf16.gmra.mxu0 %v9578_v46  ;;  %v9860_v52 = vpack.c.bf16 %v2892_v5, %v2891_v7  ;;  %v2409_v46 = vadd.f32 %v9619_v11, %v9614_v4 }
 0x3fc   :  { %v2734_v28 = vmax.f32 %v9593_v43, %v2673_v56  ;;  %6797 = vmatmul.msk.bf16.gmra.mxu1 %vm2225_vm2, %v9580_v57  ;;  %v2352_v62 = vpop.f32.mrf.mxu2 }
 0x3fd   :  { %11996 = vst [vmem:[#allocation19_spill] sm:$0xff] %v9860_v52  ;;  %v2441_v51 = vpop.f32.mrf.mxu3 }
 0x3fe   :  { %v2810_v27 = vrot.slane %v2734_v28, 1  ;;  %v9865_v17 = vadd.f32 %v2441_v51, %v2352_v62 }
 0x400   :  { %v2811_v23 = vsel %vm2786_vm4, %v2808_v25, %v2810_v27  ;;  %v2585_v21 = vpop.f32.mrf.mxu0 }
 0x401   :  { %v2893_v60 = vmax.f32 %v2733_v61, %v2811_v23  ;;  %v2674_v58 = vpop.f32.mrf.mxu1 }
 0x402   :  { %v2675_v7 = vadd.f32 %v2674_v58, %v2585_v21 }
 0x403   :  { %v9870_v40 = vpack.c.bf16 %v2893_v60, %v2892_v5 }
 0x404   :  { %v2735_v43 = vmax.f32 %v2409_v46, %v2675_v7  ;;  %v9872_v45 = vpop.f32.mrf.mxu2 }
 0x405   :  { %v9874_v57 = vpop.f32.mrf.mxu3  ;;  %v2979_v18 = vrot.slane %v9870_v40, 1 }
 0x406   :  { %v2812_v44 = vrot.slane %v2735_v43, 1 }
 0x407   :  { %v2980_v20 = vsel %vm2786_vm4, %v2977_v32, %v2979_v18 }
 0x408   :  { %v2813_v25 = vsel %vm2786_vm4, %v2810_v27, %v2812_v44  ;;  %6854 = vmatmul.msk.bf16.gmra.mxu2 %vm3056_vm5, %v2980_v20  ;;  %6870 = vmatmul.msk.bf16.gmra.mxu3 %vm3056_vm5, %v2980_v20  ;;  %v2588_v4 = vpop.f32.mrf.mxu0 }
 0x409   :  { %v2894_v11 = vmax.f32 %v2734_v28, %v2813_v25  ;;  %v2677_v61 = vpop.f32.mrf.mxu1 }
 0x40a   :  { %v2678_v0 = vadd.f32 %v2677_v61, %v2588_v4 }
 0x40b   :  { %2627 = vmatmul.bf16.gmra.mxu0 %v9621_v37  ;;  %v9882_v29 = vpack.c.bf16 %v2894_v11, %v2893_v60  ;;  %v2414_v37 = vadd.f32 %v9685_v30, %v9680_v15 }
 0x40c   :  { %v2736_v24 = vmax.f32 %v9655_v14, %v2678_v0  ;;  %6798 = vmatmul.msk.bf16.gmra.mxu1 %vm2225_vm2, %v9632_v9  ;;  %v2357_v32 = vpop.f32.mrf.mxu2  ;;  %v2419_v0 = vadd.f32 %v9700_v48, %v9698_v47 }
 0x40d   :  { %11997 = vst [vmem:[#allocation20_spill] sm:$0xff] %v9882_v29  ;;  %v2446_v13 = vpop.f32.mrf.mxu3 }
 0x40e   :  { %v2814_v10 = vrot.slane %v2736_v24, 1  ;;  %v9887_v59 = vadd.f32 %v2446_v13, %v2357_v32 }
 0x410   :  { %v2815_v42 = vsel %vm2786_vm4, %v2812_v44, %v2814_v10  ;;  %v2590_v5 = vpop.f32.mrf.mxu0 }
 0x411   :  { %v2895_v22 = vmax.f32 %v2735_v43, %v2815_v42  ;;  %v2679_v34 = vpop.f32.mrf.mxu1 }
 0x412   :  { %v2680_v56 = vadd.f32 %v2679_v34, %v2590_v5 }
 0x413   :  { %v9892_v28 = vpack.c.bf16 %v2895_v22, %v2894_v11 }
 0x414   :  { %v2737_v14 = vmax.f32 %v2414_v37, %v2680_v56  ;;  %v9894_v62 = vpop.f32.mrf.mxu2 }
 0x415   :  { %v9896_v9 = vpop.f32.mrf.mxu3  ;;  %v2981_v51 = vrot.slane %v9892_v28, 1 }
 0x416   :  { %v2816_v27 = vrot.slane %v2737_v14, 1 }
 0x417   :  { %v2982_v23 = vsel %vm2786_vm4, %v2979_v18, %v2981_v51 }
 0x418   :  { %v2817_v21 = vsel %vm2786_vm4, %v2814_v10, %v2816_v27  ;;  %6855 = vmatmul.msk.bf16.gmra.mxu2 %vm3056_vm5, %v2982_v23  ;;  %6871 = vmatmul.msk.bf16.gmra.mxu3 %vm3056_vm5, %v2982_v23  ;;  %v2593_v15 = vpop.f32.mrf.mxu0 }
 0x419   :  { %v2896_v30 = vmax.f32 %v2736_v24, %v2817_v21  ;;  %v2682_v60 = vpop.f32.mrf.mxu1 }
 0x41a   :  { %v2683_v58 = vadd.f32 %v2682_v60, %v2593_v15  ;;  %v2424_v15 = vadd.f32 %v9717_v35, %v9715_v63 }
 0x41b   :  { %6922 = vmatmul.msk.bf16.vlgmr.msra.gmra.mxu0 %vm3056_vm5, %v9695_v53  ;;  %v9905_v46 = vpack.c.bf16 %v2896_v30, %v2895_v22 }
 0x41c   :  { %v2738_v7 = vmax.f32 %v9692_v8, %v2683_v58  ;;  %6938 = vmatmul.msk.bf16.vlgmr.msra.gmra.mxu1 %vm3056_vm5, %v9695_v53  ;;  %v2362_v43 = vpop.f32.mrf.mxu2 }
 0x41d   :  { %11998 = vst [vmem:[#allocation21_spill] sm:$0xff] %v9905_v46  ;;  %v2451_v18 = vpop.f32.mrf.mxu3 }
 0x41e   :  { %v2818_v44 = vrot.slane %v2738_v7, 1  ;;  %v9910_v20 = vadd.f32 %v2451_v18, %v2362_v43 }
 0x420   :  { %v2819_v25 = vsel %vm2786_vm4, %v2816_v27, %v2818_v44  ;;  %v2595_v4 = vpop.f32.mrf.mxu0 }
 0x421   :  { %v2897_v11 = vmax.f32 %v2737_v14, %v2819_v25  ;;  %v2684_v61 = vpop.f32.mrf.mxu1 }
 0x422   :  { %v2685_v24 = vadd.f32 %v2684_v61, %v2595_v4 }
 0x423   :  { %v9915_v32 = vpack.c.bf16 %v2897_v11, %v2896_v30 }
 0x424   :  { %v2739_v8 = vmax.f32 %v2419_v0, %v2685_v24 }
 0x425   :  { %v2983_v13 = vrot.slane %v9915_v32, 1 }
 0x426   :  { %v2820_v10 = vrot.slane %v2739_v8, 1 }
 0x427   :  { %v2984_v42 = vsel %vm2786_vm4, %v2981_v51, %v2983_v13 }
 0x428   :  { %v2821_v5 = vsel %vm2786_vm4, %v2818_v44, %v2820_v10  ;;  %6856 = vmatmul.msk.bf16.gmra.mxu2 %vm3056_vm5, %v2984_v42  ;;  %6872 = vmatmul.msk.bf16.gmra.mxu3 %vm3056_vm5, %v2984_v42  ;;  %v2598_v22 = vpop.f32.mrf.mxu0 }
 0x429   :  { %v2898_v34 = vmax.f32 %v2738_v7, %v2821_v5  ;;  %v2687_v37 = vpop.f32.mrf.mxu1  ;;  %v9949_v5 = vpop.f32.mrf.mxu2 }
 0x42a   :  { %v2688_v56 = vadd.f32 %v2687_v37, %v2598_v22  ;;  %v9951_v22 = vpop.f32.mrf.mxu3 }
 0x42b   :  { %6923 = vmatmul.msk.bf16.gmra.mxu0 %vm3056_vm5, %v9712_v19  ;;  %v9924_v47 = vpack.c.bf16 %v2898_v34, %v2897_v11 }
 0x42c   :  { %v2740_v48 = vmax.f32 %v9709_v39, %v2688_v56  ;;  %6939 = vmatmul.msk.bf16.gmra.mxu1 %vm3056_vm5, %v9712_v19 }
 0x42d   :  { %11999 = vst [vmem:[#allocation22_spill] sm:$0xff] %v9924_v47 }
 0x42e   :  { %v2822_v14 = vrot.slane %v2740_v48, 1 }
 0x430   :  { %v2823_v51 = vsel %vm2786_vm4, %v2820_v10, %v2822_v14  ;;  %v2600_v27 = vpop.f32.mrf.mxu0  ;;  %v2429_v10 = vadd.f32 %v9739_v1, %v9737_v12 }
 0x431   :  { %v2899_v23 = vmax.f32 %v2739_v8, %v2823_v51  ;;  %v2689_v21 = vpop.f32.mrf.mxu1 }
 0x432   :  { %v2690_v30 = vadd.f32 %v2689_v21, %v2600_v27 }
 0x433   :  { %v9932_v60 = vpack.c.bf16 %v2899_v23, %v2898_v34 }
 0x434   :  { %v2741_v58 = vmax.f32 %v2424_v15, %v2690_v30 }
 0x435   :  { %v2985_v7 = vrot.slane %v9932_v60, 1 }
 0x436   :  { %v2824_v43 = vrot.slane %v2741_v58, 1 }
 0x437   :  { %v2986_v39 = vsel %vm2786_vm4, %v2983_v13, %v2985_v7 }
 0x438   :  { %v2825_v18 = vsel %vm2786_vm4, %v2822_v14, %v2824_v43  ;;  %6857 = vmatmul.msk.bf16.gmra.mxu2 %vm3056_vm5, %v2986_v39  ;;  %6873 = vmatmul.msk.bf16.gmra.mxu3 %vm3056_vm5, %v2986_v39  ;;  %v2603_v44 = vpop.f32.mrf.mxu0 }
 0x439   :  { %v2900_v25 = vmax.f32 %v2740_v48, %v2825_v18  ;;  %v2692_v4 = vpop.f32.mrf.mxu1 }
 0x43a   :  { %v2693_v11 = vadd.f32 %v2692_v4, %v2603_v44  ;;  %v2434_v44 = vadd.f32 %v9764_v49, %v9762_v33 }
 0x43b   :  { %6924 = vmatmul.msk.bf16.gmra.mxu0 %vm3056_vm5, %v9734_v38  ;;  %v9941_v63 = vpack.c.bf16 %v2900_v25, %v2899_v23 }
 0x43c   :  { %v2742_v35 = vmax.f32 %v9731_v26, %v2693_v11  ;;  %6940 = vmatmul.msk.bf16.gmra.mxu1 %vm3056_vm5, %v9734_v38 }
 0x43d   :  { %12000 = vst [vmem:[#allocation23_spill] sm:$0xff] %v9941_v63 }
 0x43e   :  { %v2826_v61 = vrot.slane %v2742_v35, 1 }
 0x440   :  { %v2827_v0 = vsel %vm2786_vm4, %v2824_v43, %v2826_v61  ;;  %v2605_v24 = vpop.f32.mrf.mxu0 }
 0x441   :  { %v2901_v8 = vmax.f32 %v2741_v58, %v2827_v0  ;;  %v2694_v13 = vpop.f32.mrf.mxu1 }
 0x442   :  { %v2695_v42 = vadd.f32 %v2694_v13, %v2605_v24 }
 0x443   :  { %v9953_v34 = vpack.c.bf16 %v2901_v8, %v2900_v25 }
 0x444   :  { %v2743_v26 = vmax.f32 %v2429_v10, %v2695_v42 }
 0x445   :  { %v2987_v37 = vrot.slane %v9953_v34, 1 }
 0x446   :  { %v2828_v56 = vrot.slane %v2743_v26, 1 }
 0x447   :  { %v2988_v48 = vsel %vm2786_vm4, %v2985_v7, %v2987_v37 }
 0x448   :  { %v2829_v14 = vsel %vm2786_vm4, %v2826_v61, %v2828_v56  ;;  %6858 = vmatmul.msk.bf16.gmra.mxu2 %vm3056_vm5, %v2988_v48  ;;  %6874 = vmatmul.msk.bf16.gmra.mxu3 %vm3056_vm5, %v2988_v48  ;;  %v2608_v12 = vpop.f32.mrf.mxu0 }
 0x449   :  { %v2902_v1 = vmax.f32 %v2742_v35, %v2829_v14  ;;  %v2697_v51 = vpop.f32.mrf.mxu1 }
 0x44a   :  { %v2698_v27 = vadd.f32 %v2697_v51, %v2608_v12 }
 0x44b   :  { %v9960_v23 = vpop.f32.mrf.mxu2  ;;  %v9962_v21 = vpop.f32.mrf.mxu3  ;;  %6925 = vmatmul.msk.bf16.gmra.mxu0 %vm3056_vm5, %v9760_v3  ;;  %v9966_v15 = vpack.c.bf16 %v2902_v1, %v2901_v8 }
 0x44c   :  { %v2744_v30 = vmax.f32 %v9752_v55, %v2698_v27  ;;  %6941 = vmatmul.msk.bf16.gmra.mxu1 %vm3056_vm5, %v9760_v3  ;;  %v2439_v27 = vadd.f32 %v9838_v2, %v9833_v31 }
 0x44d   :  { %12001 = vst [vmem:[#allocation24_spill] sm:$0xff] %v9966_v15  ;;  %v6967_v15 = vld [vmem:[%s11862_s4 + $0xb0] sm:$0xf] }
 0x44e   :  { %v2830_v58 = vrot.slane %v2744_v30, 1 }
 0x450   :  { %v2831_v7 = vsel %vm2786_vm4, %v2828_v56, %v2830_v58  ;;  %v2610_v43 = vpop.f32.mrf.mxu0 }
 0x451   :  { %v2903_v39 = vmax.f32 %v2743_v26, %v2831_v7  ;;  %v2699_v18 = vpop.f32.mrf.mxu1 }
 0x452   :  { %v2700_v25 = vadd.f32 %v2699_v18, %v2610_v43 }
 0x453   :  { %v9974_v4 = vpack.c.bf16 %v2903_v39, %v2902_v1  ;;  %v9976_v11 = vpop.f32.mrf.mxu2  ;;  %v9978_v35 = vpop.f32.mrf.mxu3 }
 0x454   :  { %v2745_v55 = vmax.f32 %v2434_v44, %v2700_v25 }
 0x455   :  { %v2989_v61 = vrot.slane %v9974_v4, 1 }
 0x456   :  { %v2832_v0 = vrot.slane %v2745_v55, 1 }
 0x457   :  { %v2990_v24 = vsel %vm2786_vm4, %v2987_v37, %v2989_v61 }
 0x458   :  { %v2833_v8 = vsel %vm2786_vm4, %v2830_v58, %v2832_v0  ;;  %6859 = vmatmul.msk.bf16.gmra.mxu2 %vm3056_vm5, %v2990_v24  ;;  %6875 = vmatmul.msk.bf16.gmra.mxu3 %vm3056_vm5, %v2990_v24  ;;  %v2613_v33 = vpop.f32.mrf.mxu0 }
 0x459   :  { %v2904_v49 = vmax.f32 %v2744_v30, %v2833_v8  ;;  %v2702_v13 = vpop.f32.mrf.mxu1 }
 0x45a   :  { %v2703_v10 = vadd.f32 %v2702_v13, %v2613_v33 }
 0x45b   :  { %v9985_v42 = vpop.f32.mrf.mxu2  ;;  %v9987_v26 = vpop.f32.mrf.mxu3  ;;  %6926 = vmatmul.msk.bf16.gmra.mxu0 %vm3056_vm5, %v9822_v36  ;;  %v9991_v56 = vpack.c.bf16 %v2904_v49, %v2903_v39 }
 0x45c   :  { %v2746_v37 = vmax.f32 %v9805_v54, %v2703_v10  ;;  %6942 = vmatmul.msk.bf16.gmra.mxu1 %vm3056_vm5, %v9822_v36 }
 0x45d   :  { %12002 = vst [vmem:[#allocation25_spill] sm:$0xff] %v9991_v56 }
 0x45e   :  { %v2834_v48 = vrot.slane %v2746_v37, 1 }
 0x460   :  { %v2835_v14 = vsel %vm2786_vm4, %v2832_v0, %v2834_v48  ;;  %v2615_v12 = vpop.f32.mrf.mxu0 }
 0x461   :  { %v2905_v1 = vmax.f32 %v2745_v55, %v2835_v14  ;;  %v2704_v51 = vpop.f32.mrf.mxu1  ;;  %v2444_v14 = vadd.f32 %v9874_v57, %v9872_v45 }
 0x462   :  { %v2705_v30 = vadd.f32 %v2704_v51, %v2615_v12 }
 0x463   :  { %v9999_v58 = vpack.c.bf16 %v2905_v1, %v2904_v49  ;;  %v10001_v7 = vpop.f32.mrf.mxu2  ;;  %v10003_v43 = vpop.f32.mrf.mxu3 }
 0x464   :  { %v2747_v54 = vmax.f32 %v2439_v27, %v2705_v30 }
 0x465   :  { %v2991_v39 = vrot.slane %v9999_v58, 1 }
 0x466   :  { %v2836_v18 = vrot.slane %v2747_v54, 1 }
 0x467   :  { %v2992_v44 = vsel %vm2786_vm4, %v2989_v61, %v2991_v39 }
 0x468   :  { %v2837_v25 = vsel %vm2786_vm4, %v2834_v48, %v2836_v18  ;;  %6860 = vmatmul.msk.bf16.gmra.mxu2 %vm3056_vm5, %v2992_v44  ;;  %6876 = vmatmul.msk.bf16.gmra.mxu3 %vm3056_vm5, %v2992_v44  ;;  %v2618_v31 = vpop.f32.mrf.mxu0 }
 0x469   :  { %v2906_v2 = vmax.f32 %v2746_v37, %v2837_v25  ;;  %v2707_v55 = vpop.f32.mrf.mxu1 }
 0x46a   :  { %v2708_v0 = vadd.f32 %v2707_v55, %v2618_v31 }
 0x46b   :  { %v10010_v24 = vpop.f32.mrf.mxu2  ;;  %v10012_v8 = vpop.f32.mrf.mxu3  ;;  %6927 = vmatmul.msk.bf16.gmra.mxu0 %vm3056_vm5, %v9870_v40  ;;  %v10016_v33 = vpack.c.bf16 %v2906_v2, %v2905_v1 }
 0x46c   :  { %v2748_v61 = vmax.f32 %v9865_v17, %v2708_v0  ;;  %6943 = vmatmul.msk.bf16.gmra.mxu1 %vm3056_vm5, %v9870_v40 }
 0x46d   :  { %12003 = vst [vmem:[#allocation26_spill] sm:$0xff] %v10016_v33 }
 0x46e   :  { %v2838_v49 = vrot.slane %v2748_v61, 1 }
 0x470   :  { %v2839_v13 = vsel %vm2786_vm4, %v2836_v18, %v2838_v49  ;;  %v2620_v10 = vpop.f32.mrf.mxu0 }
 0x471   :  { %v2907_v37 = vmax.f32 %v2747_v54, %v2839_v13  ;;  %v2709_v48 = vpop.f32.mrf.mxu1 }
 0x472   :  { %v2710_v12 = vadd.f32 %v2709_v48, %v2620_v10 }
 0x473   :  { %v10024_v51 = vpack.c.bf16 %v2907_v37, %v2906_v2  ;;  %v10026_v27 = vpop.f32.mrf.mxu2  ;;  %v10028_v1 = vpop.f32.mrf.mxu3 }
 0x474   :  { %v2749_v17 = vmax.f32 %v2444_v14, %v2710_v12  ;;  %v2449_v14 = vadd.f32 %v9896_v9, %v9894_v62 }
 0x475   :  { %v2993_v30 = vrot.slane %v10024_v51, 1 }
 0x476   :  { %v2840_v44 = vrot.slane %v2749_v17, 1 }
 0x477   :  { %v2994_v25 = vsel %vm2786_vm4, %v2991_v39, %v2993_v30 }
 0x478   :  { %v2841_v18 = vsel %vm2786_vm4, %v2838_v49, %v2840_v44  ;;  %6861 = vmatmul.msk.bf16.gmra.mxu2 %vm3056_vm5, %v2994_v25  ;;  %6877 = vmatmul.msk.bf16.gmra.mxu3 %vm3056_vm5, %v2994_v25  ;;  %v2623_v45 = vpop.f32.mrf.mxu0 }
 0x479   :  { %v2908_v57 = vmax.f32 %v2748_v61, %v2841_v18  ;;  %v2712_v54 = vpop.f32.mrf.mxu1 }
 0x47a   :  { %v2713_v31 = vadd.f32 %v2712_v54, %v2623_v45 }
 0x47b   :  { %v10035_v2 = vpop.f32.mrf.mxu2  ;;  %v10037_v55 = vpop.f32.mrf.mxu3  ;;  %6928 = vmatmul.msk.bf16.gmra.mxu0 %vm3056_vm5, %v9892_v28  ;;  %v10041_v0 = vpack.c.bf16 %v2908_v57, %v2907_v37 }
 0x47c   :  { %v2750_v39 = vmax.f32 %v9887_v59, %v2713_v31  ;;  %6944 = vmatmul.msk.bf16.gmra.mxu1 %vm3056_vm5, %v9892_v28 }
 0x47d   :  { %12004 = vst [vmem:[#allocation27_spill] sm:$0xff] %v10041_v0 }
 0x47e   :  { %v2842_v49 = vrot.slane %v2750_v39, 1 }
 0x480   :  { %v2843_v13 = vsel %vm2786_vm4, %v2840_v44, %v2842_v49  ;;  %v2625_v61 = vpop.f32.mrf.mxu0 }
 0x481   :  { %v2909_v10 = vmax.f32 %v2749_v17, %v2843_v13  ;;  %v2714_v48 = vpop.f32.mrf.mxu1  ;;  %v6964_v13 = vld [vmem:[%s11862_s4 + $0x100] sm:$0x33] }
 0x482   :  { %v2715_v12 = vadd.f32 %v2714_v48, %v2625_v61 }
 0x483   :  { %v10049_v25 = vpack.c.bf16 %v2909_v10, %v2908_v57  ;;  %v10051_v18 = vpop.f32.mrf.mxu2  ;;  %v10053_v37 = vpop.f32.mrf.mxu3 }
 0x484   :  { %v2751_v59 = vmax.f32 %v2449_v14, %v2715_v12 }
 0x485   :  { %v2995_v45 = vrot.slane %v10049_v25, 1 }
 0x486   :  { %v2844_v54 = vrot.slane %v2751_v59, 1 }
 0x487   :  { %v2996_v31 = vsel %vm2786_vm4, %v2993_v30, %v2995_v45  ;;  %v3648_v30 = vunpack.c.l.b16 %v6964_v13 }
 0x488   :  { %v2845_v44 = vsel %vm2786_vm4, %v2842_v49, %v2844_v54  ;;  %6862 = vmatmul.msk.bf16.gmra.mxu2 %vm3056_vm5, %v2996_v31  ;;  %6878 = vmatmul.msk.bf16.gmra.mxu3 %vm3056_vm5, %v2996_v31  ;;  %v2628_v62 = vpop.f32.mrf.mxu0  ;;  %v3649_v49 = vunpack.c.h.b16 %v6964_v13 }
 0x489   :  { %v2910_v9 = vmax.f32 %v2750_v39, %v2845_v44  ;;  %v2717_v17 = vpop.f32.mrf.mxu1  ;;  %v3660_v39 = vpack.c.b16 %v3648_v30, %v3648_v30 }
 0x48a   :  { %v2718_v57 = vadd.f32 %v2717_v17, %v2628_v62  ;;  %v3661_v31 = vpack.c.b16 %v3649_v49, %v3649_v49 }
 0x48b   :  { %v10063_v61 = vpop.f32.mrf.mxu2  ;;  %v10065_v48 = vpop.f32.mrf.mxu3  ;;  %6929 = vmatmul.msk.bf16.gmra.mxu0 %vm3056_vm5, %v9915_v32  ;;  %v10069_v14 = vpack.c.bf16 %v2910_v9, %v2909_v10  ;;  %v3721_v62 = vsel %vm3105_vm3, %v3660_v39, 0  ;;  %v6999_v39 = vld [vmem:[%s11862_s4 + $0xf0] sm:$0xf] }
 0x48c   :  { %v2752_v12 = vmax.f32 %v9910_v20, %v2718_v57  ;;  %6945 = vmatmul.msk.bf16.gmra.mxu1 %vm3056_vm5, %v9915_v32  ;;  %v3724_v17 = vsel %vm3105_vm3, %v3661_v31, 0  ;;  %3728 = vmatpush.bf16.msra.mxu2 %v3721_v62  ;;  %v2454_v20 = vadd.f32 %v9951_v22, %v9949_v5 }
 0x48d   :  { %12005 = vst [vmem:[#allocation28_spill] sm:$0xff] %v10069_v14  ;;  %3816 = vmatpush.bf16.msra.mxu3 %v3724_v17  ;;  %v6991_v17 = vld [vmem:[%s11862_s4 + $0xe0] sm:$0xf] }
 0x48e   :  { %v2846_v44 = vrot.slane %v2752_v12, 1 }
 0x490   :  { %v2847_v0 = vsel %vm2786_vm4, %v2844_v54, %v2846_v44  ;;  %v2630_v33 = vpop.f32.mrf.mxu0  ;;  %v7672_v54 = vld [vmem:[%s11862_s4 + $0xf4] sm:$0xf0] }
 0x491   :  { %v2911_v13 = vmax.f32 %v2751_v59, %v2847_v0  ;;  %v2719_v10 = vpop.f32.mrf.mxu1  ;;  %v7671_v0 = vld [vmem:[%s11862_s4 + $0xf4] sm:$0xf]  ;;  %v7000_v22 = vor.u32 %v7672_v54, %v6999_v39 }
 0x492   :  { %v2720_v57 = vadd.f32 %v2719_v10, %v2630_v33  ;;  %v7001_v33 = vld [vmem:[%s11862_s4 + $0xf8] sm:$0xf0]  ;;  %v7670_v10 = vld [vmem:[%s11862_s4 + $0xe4] sm:$0xf0] }
 0x493   :  { %v10079_v14 = vpack.c.bf16 %v2911_v13, %v2910_v9  ;;  %v10081_v30 = vpop.f32.mrf.mxu2  ;;  %v10083_v49 = vpop.f32.mrf.mxu3  ;;  %v7004_v9 = vor.u32 %v7671_v0, %v7001_v33  ;;  %3729 = vmatpush.bf16.msra.mxu2 %v7000_v22  ;;  %v6992_v54 = vor.u32 %v7670_v10, %v6991_v17  ;;  %v6993_v0 = vld [vmem:[%s11862_s4 + $0xe8] sm:$0xf0]  ;;  %v7667_v17 = vld [vmem:[%s11862_s4 + $0xd4] sm:$0xf] }
 0x494   :  { %12006 = vst [vmem:[#allocation29_spill] sm:$0xff] %v10081_v30  ;;  %v2753_v5 = vmax.f32 %v2454_v20, %v2720_v57  ;;  %v7669_v20 = vld [vmem:[%s11862_s4 + $0xe4] sm:$0xf] }
 0x495   :  { %12007 = vst [vmem:[#allocation30_spill] sm:$0xff] %v10083_v49  ;;  %v2997_v59 = vrot.slane %v10079_v14, 1  ;;  %3817 = vmatpush.bf16.msra.mxu3 %v7004_v9  ;;  %v6996_v9 = vor.u32 %v7669_v20, %v6993_v0 }
 0x496   :  { %v2848_v31 = vrot.slane %v2753_v5, 1 }
 0x497   :  { %v2998_v62 = vsel %vm2786_vm4, %v2995_v45, %v2997_v59  ;;  %3730 = vmatpush.bf16.msra.mxu2 %v6992_v54 }
 0x498   :  { %v2849_v57 = vsel %vm2786_vm4, %v2846_v44, %v2848_v31  ;;  %v10109_v39 = vmax.f32 %v2753_v5, %v2848_v31  ;;  %6863 = vmatmul.msk.bf16.gmra.mxu2 %vm3056_vm5, %v2998_v62  ;;  %6879 = vmatmul.msk.bf16.gmra.mxu3 %vm3056_vm5, %v2998_v62  ;;  %v10113_v45 = vpop.f32.mrf.mxu0  ;;  %v7668_v62 = vld [vmem:[%s11862_s4 + $0xd4] sm:$0xf0] }
 0x499   :  { %v10118_v22 = vmax.f32 %v2752_v12, %v2849_v57  ;;  %v10120_v33 = vpop.f32.mrf.mxu1  ;;  %3818 = vmatpush.bf16.msra.mxu3 %v6996_v9  ;;  %v6983_v12 = vld [vmem:[%s11862_s4 + $0xd0] sm:$0xf]  ;;  %v6985_v57 = vld [vmem:[%s11862_s4 + $0xd8] sm:$0xf0]  ;;  %v7666_v9 = vld [vmem:[%s11862_s4 + $0xc4] sm:$0xf0] }
 0x49a   :  { %12008 = vst [vmem:[#allocation32_spill] sm:$0xff] %v10109_v39  ;;  %v6984_v20 = vor.u32 %v7668_v62, %v6983_v12  ;;  %v6988_v54 = vor.u32 %v7667_v17, %v6985_v57  ;;  %v7665_v12 = vld [vmem:[%s11862_s4 + $0xc4] sm:$0xf]  ;;  %v3587_v39 = vrot.slane %v9712_v19, 2 }
 0x49b   :  { %12009 = vst [vmem:[#allocation31_spill] sm:$0xff] %v10118_v22  ;;  %v10124_v5 = vpop.f32.mrf.mxu2  ;;  %v10126_v31 = vpop.f32.mrf.mxu3  ;;  %6930 = vmatmul.msk.bf16.gmra.mxu0 %vm3056_vm5, %v9932_v60  ;;  %v10140_v10 = vpack.c.bf16 %v10118_v22, %v2911_v13  ;;  %v10149_v0 = vpack.c.bf16 %v10118_v22, %v10118_v22  ;;  %v6975_v13 = vld [vmem:[%s11862_s4 + $0xc0] sm:$0xf] }
 0x49c   :  { %12010 = vst [vmem:[#allocation33_spill] sm:$0xff] %v10124_v5  ;;  %6946 = vmatmul.msk.bf16.gmra.mxu1 %vm3056_vm5, %v9932_v60  ;;  %3731 = vmatpush.bf16.msra.mxu2 %v6984_v20  ;;  %v6976_v17 = vor.u32 %v7666_v9, %v6975_v13  ;;  %v6977_v20 = vld [vmem:[%s11862_s4 + $0xc8] sm:$0xf0]  ;;  %v7664_v13 = vld [vmem:[%s11862_s4 + $0xb4] sm:$0xf0]  ;;  %v3588_v50 = vsel %vm3585_vm6, %v3586_v41, %v3587_v39 }
 0x49d   :  { %12011 = vst [vmem:[#allocation2_spill] sm:$0xff] %v10126_v31  ;;  %3819 = vmatpush.bf16.msra.mxu3 %v6988_v54  ;;  %v6980_v54 = vor.u32 %v7665_v12, %v6977_v20  ;;  %v2999_v44 = vrot.slane %v10149_v0, 1  ;;  %v7663_v9 = vld [vmem:[%s11862_s4 + $0xb4] sm:$0xf]  ;;  %v6968_v12 = vor.u32 %v7664_v13, %v6967_v15 }
 0x49e   :  { %12012 = vst [vmem:[#allocation3_spill] sm:$0xff] %v10140_v10 }
 0x4a0   :  { %v10160_v62 = vpop.f32.mrf.mxu0  ;;  %3732 = vmatpush.bf16.msra.mxu2 %v6976_v17  ;;  %v6969_v17 = vld [vmem:[%s11862_s4 + $0xb8] sm:$0xf0] }
 0x4a1   :  { %v10165_v57 = vpop.f32.mrf.mxu1  ;;  %3820 = vmatpush.bf16.msra.mxu3 %v6980_v54  ;;  %v6972_v20 = vor.u32 %v7663_v9, %v6969_v17  ;;  %v3000_v54 = vsel %vm2786_vm4, %v2997_v59, %v2999_v44 }
 0x4a3   :  { %v10168_v10 = vpop.f32.mrf.mxu2  ;;  %v10170_v56 = vpop.f32.mrf.mxu3 }
 0x4a4   :  { %12013 = vst [vmem:[#allocation4_spill] sm:$0xff] %v10168_v10  ;;  %3733 = vmatpush.bf16.msra.mxu2 %v6968_v12 }
 0x4a5   :  { %12014 = vst [vmem:[#allocation34_spill] sm:$0xff] %v10170_v56  ;;  %3821 = vmatpush.bf16.msra.mxu3 %v6972_v20 }
 0x4a8   :  { %6864 = vmatmul.msk.bf16.gmra.mxu2 %vm3056_vm5, %v3000_v54  ;;  %6880 = vmatmul.msk.bf16.gmra.mxu3 %vm3056_vm5, %v3000_v54  ;;  %v10187_v63 = vpop.f32.mrf.mxu0 }
 0x4a9   :  { %v10189_v47 = vpop.f32.mrf.mxu1 }
 0x4ab   :  { %v10191_v46 = vpop.f32.mrf.mxu2  ;;  %v10193_v15 = vpop.f32.mrf.mxu3  ;;  %6931 = vmatmul.msk.bf16.gmra.mxu0 %vm3056_vm5, %v9953_v34 }
 0x4ac   :  { %12015 = vst [vmem:[#allocation5_spill] sm:$0xff] %v10191_v46  ;;  %6947 = vmatmul.msk.bf16.gmra.mxu1 %vm3056_vm5, %v9953_v34 }
 0x4ad   :  { %12016 = vst [vmem:[#allocation35_spill] sm:$0xff] %v10193_v15 }
 0x4b0   :  { %v10199_v59 = vpop.f32.mrf.mxu0 }
 0x4b1   :  { %v10201_v13 = vpop.f32.mrf.mxu1 }
 0x4b3   :  { %v10203_v9 = vpop.f32.mrf.mxu2  ;;  %v10205_v12 = vpop.f32.mrf.mxu3 }
 0x4b4   :  { %12017 = vst [vmem:[#allocation6_spill] sm:$0xff] %v10203_v9  ;;  %v3589_v9 = vrot.slane %v9734_v38, 2 }
 0x4b5   :  { %12018 = vst [vmem:[#allocation7_spill] sm:$0xff] %v10205_v12 }
 0x4b8   :  { %6865 = vmatmul.msk.bf16.gmra.mxu2 %vm3056_vm5, %v2999_v44  ;;  %6881 = vmatmul.msk.bf16.gmra.mxu3 %vm3056_vm5, %v2999_v44  ;;  %v10209_v17 = vpop.f32.mrf.mxu0 }
 0x4b9   :  { %v10211_v20 = vpop.f32.mrf.mxu1 }
 0x4bb   :  { %v10213_v54 = vpop.f32.mrf.mxu2  ;;  %v10215_v29 = vpop.f32.mrf.mxu3  ;;  %6932 = vmatmul.msk.bf16.gmra.mxu0 %vm3056_vm5, %v9974_v4 }
 0x4bc   :  { %12019 = vst [vmem:[#allocation8_spill] sm:$0xff] %v10213_v54  ;;  %6948 = vmatmul.msk.bf16.gmra.mxu1 %vm3056_vm5, %v9974_v4 }
 0x4bd   :  { %12020 = vst [vmem:[#allocation36_spill] sm:$0xff] %v10215_v29 }
 0x4c0   :  { %v10221_v52 = vpop.f32.mrf.mxu0 }
 0x4c1   :  { %v10223_v16 = vpop.f32.mrf.mxu1 }
 0x4c3   :  { %v10225_v22 = vpop.f32.mrf.mxu2  ;;  %v10227_v44 = vpop.f32.mrf.mxu3 }
 0x4c4   :  { %12021 = vst [vmem:[#allocation9_spill] sm:$0xff] %v10225_v22 }
 0x4c5   :  { %12022 = vst [vmem:[#allocation37_spill] sm:$0xff] %v10227_v44 }
 0x4c8   :  { %7005 = vmatmul.msk.bf16.vlgmr.msra.gmra.mxu2 %vm3056_vm5, %v3588_v50  ;;  %7021 = vmatmul.msk.bf16.vlgmr.msra.gmra.mxu3 %vm3056_vm5, %v3588_v50  ;;  %v10234_v6 = vpop.f32.mrf.mxu0 }
 0x4c9   :  { %v10236_v29 = vpop.f32.mrf.mxu1 }
 0x4cb   :  { %v10238_v54 = vpop.f32.mrf.mxu2  ;;  %v10240_v22 = vpop.f32.mrf.mxu3  ;;  %6933 = vmatmul.msk.bf16.gmra.mxu0 %vm3056_vm5, %v9999_v58 }
 0x4cc   :  { %12023 = vst [vmem:[#allocation10_spill] sm:$0xff] %v10238_v54  ;;  %6949 = vmatmul.msk.bf16.gmra.mxu1 %vm3056_vm5, %v9999_v58  ;;  %v3590_v54 = vsel %vm3585_vm6, %v3587_v39, %v3589_v9  ;;  %v7047_v39 = vld [vmem:[%s11862_s4 + $0x158] sm:$0x33] }
 0x4cd   :  { %12024 = vst [vmem:[#allocation11_spill] sm:$0xff] %v10240_v22  ;;  %v4042_v10 = vunpack.c.h.b16 %v7047_v39 }
 0x4cf   :  { %v4054_v49 = vpack.c.b16 %v4042_v10, %v4042_v10  ;;  %v7681_v10 = vld [vmem:[%s11862_s4 + $0x14c] sm:$0xf] }
 0x4d0   :  { %v10246_v44 = vpop.f32.mrf.mxu0 }
 0x4d1   :  { %v10248_v41 = vpop.f32.mrf.mxu1 }
 0x4d3   :  { %v10250_v12 = vpop.f32.mrf.mxu2  ;;  %v10252_v50 = vpop.f32.mrf.mxu3 }
 0x4d4   :  { %12025 = vst [vmem:[#allocation12_spill] sm:$0xff] %v10250_v12  ;;  %v4041_v12 = vunpack.c.l.b16 %v7047_v39  ;;  %v7082_v39 = vld [vmem:[%s11862_s4 + $0x148] sm:$0xf] }
 0x4d5   :  { %12026 = vst [vmem:[#allocation38_spill] sm:$0xff] %v10252_v50 }
 0x4d6   :  { %v4053_v5 = vpack.c.b16 %v4041_v12, %v4041_v12 }
 0x4d8   :  { %7006 = vmatmul.msk.bf16.gmra.mxu2 %vm3056_vm5, %v3590_v54  ;;  %7022 = vmatmul.msk.bf16.gmra.mxu3 %vm3056_vm5, %v3590_v54  ;;  %v10258_v22 = vpop.f32.mrf.mxu0  ;;  %v4114_v30 = vsel %vm3105_vm3, %v4053_v5, 0  ;;  %v7084_v5 = vld [vmem:[%s11862_s4 + $0x150] sm:$0xf0] }
 0x4d9   :  { %v10260_v15 = vpop.f32.mrf.mxu1  ;;  %4121 = vmatpush.bf16.msrb.mxu0 %v4114_v30  ;;  %v7087_v12 = vor.u32 %v7681_v10, %v7084_v5 }
 0x4da   :  { %12027 = vst [vmem:[#allocation13_spill] sm:$0xff] %v10260_v15 }
 0x4db   :  { %v10262_v46 = vpop.f32.mrf.mxu2  ;;  %v10264_v56 = vpop.f32.mrf.mxu3  ;;  %6934 = vmatmul.msk.bf16.gmra.mxu0 %vm3056_vm5, %v10024_v51 }
 0x4dc   :  { %12028 = vst [vmem:[#allocation14_spill] sm:$0xff] %v10262_v46  ;;  %6950 = vmatmul.msk.bf16.gmra.mxu1 %vm3056_vm5, %v10024_v51 }
 0x4dd   :  { %12029 = vst [vmem:[#allocation39_spill] sm:$0xff] %v10264_v56  ;;  %v3591_v56 = vrot.slane %v9760_v3, 2 }
 0x4df   :  { %v3592_v15 = vsel %vm3585_vm6, %v3589_v9, %v3591_v56 }
 0x4e0   :  { %v10270_v50 = vpop.f32.mrf.mxu0 }
 0x4e1   :  { %12030 = vst [vmem:[#allocation40_spill] sm:$0xff] %v10270_v50  ;;  %v10275_v54 = vpop.f32.mrf.mxu1  ;;  %v4117_v50 = vsel %vm3105_vm3, %v4054_v49, 0 }
 0x4e2   :  { %4209 = vmatpush.bf16.msrb.mxu1 %v4117_v50 }
 0x4e3   :  { %v10277_v31 = vpop.f32.mrf.mxu2  ;;  %v10279_v46 = vpop.f32.mrf.mxu3 }
 0x4e4   :  { %12031 = vst [vmem:[#allocation41_spill] sm:$0xff] %v10277_v31 }
 0x4e5   :  { %12032 = vst [vmem:[#allocation42_spill] sm:$0xff] %v10279_v46  ;;  %v7682_v46 = vld [vmem:[%s11862_s4 + $0x14c] sm:$0xf0] }
 0x4e6   :  { %v7083_v49 = vor.u32 %v7682_v46, %v7082_v39  ;;  %4210 = vmatpush.bf16.msrb.mxu1 %v7087_v12  ;;  %v7074_v46 = vld [vmem:[%s11862_s4 + $0x138] sm:$0xf]  ;;  %v7679_v39 = vld [vmem:[%s11862_s4 + $0x13c] sm:$0xf]  ;;  %v7066_v12 = vld [vmem:[%s11862_s4 + $0x128] sm:$0xf] }
 0x4e8   :  { %7007 = vmatmul.msk.bf16.gmra.mxu2 %vm3056_vm5, %v3592_v15  ;;  %7023 = vmatmul.msk.bf16.gmra.mxu3 %vm3056_vm5, %v3592_v15  ;;  %v10296_v30 = vpop.f32.mrf.mxu0  ;;  %v7680_v15 = vld [vmem:[%s11862_s4 + $0x13c] sm:$0xf0] }
 0x4e9   :  { %12033 = vst [vmem:[#allocation43_spill] sm:$0xff] %v10296_v30  ;;  %v10301_v9 = vpop.f32.mrf.mxu1  ;;  %4122 = vmatpush.bf16.msrb.mxu0 %v7083_v49  ;;  %v7075_v10 = vor.u32 %v7680_v15, %v7074_v46  ;;  %v7076_v49 = vld [vmem:[%s11862_s4 + $0x140] sm:$0xf0] }
 0x4ea   :  { %12034 = vst [vmem:[#allocation44_spill] sm:$0xff] %v10301_v9  ;;  %v7079_v5 = vor.u32 %v7679_v39, %v7076_v49  ;;  %v7068_v39 = vld [vmem:[%s11862_s4 + $0x130] sm:$0xf0] }
 0x4eb   :  { %v10303_v50 = vpop.f32.mrf.mxu2  ;;  %v10305_v31 = vpop.f32.mrf.mxu3  ;;  %6935 = vmatmul.msk.bf16.gmra.mxu0 %vm3056_vm5, %v10049_v25 }
 0x4ec   :  { %12035 = vst [vmem:[#allocation45_spill] sm:$0xff] %v10303_v50  ;;  %6951 = vmatmul.msk.bf16.gmra.mxu1 %vm3056_vm5, %v10049_v25  ;;  %v7677_v50 = vld [vmem:[%s11862_s4 + $0x12c] sm:$0xf] }
 0x4ed   :  { %12036 = vst [vmem:[#allocation46_spill] sm:$0xff] %v10305_v31  ;;  %4123 = vmatpush.bf16.msrb.mxu0 %v7075_v10  ;;  %4211 = vmatpush.bf16.msrb.mxu1 %v7079_v5  ;;  %v7678_v31 = vld [vmem:[%s11862_s4 + $0x12c] sm:$0xf0]  ;;  %v7071_v49 = vor.u32 %v7677_v50, %v7068_v39  ;;  %v3593_v5 = vrot.slane %v9822_v36, 2  ;;  %v7675_v50 = vld [vmem:[%s11862_s4 + $0x11c] sm:$0xf] }
 0x4ee   :  { %v7067_v15 = vor.u32 %v7678_v31, %v7066_v12  ;;  %v7676_v31 = vld [vmem:[%s11862_s4 + $0x11c] sm:$0xf0] }
 0x4f0   :  { %v10332_v46 = vpop.f32.mrf.mxu0 }
 0x4f1   :  { %12037 = vst [vmem:[#allocation47_spill] sm:$0xff] %v10332_v46  ;;  %v10337_v10 = vpop.f32.mrf.mxu1  ;;  %4124 = vmatpush.bf16.msrb.mxu0 %v7067_v15  ;;  %4212 = vmatpush.bf16.msrb.mxu1 %v7071_v49  ;;  %v7058_v46 = vld [vmem:[%s11862_s4 + $0x118] sm:$0xf]  ;;  %v7060_v15 = vld [vmem:[%s11862_s4 + $0x120] sm:$0xf0]  ;;  %v3594_v49 = vsel %vm3585_vm6, %v3591_v56, %v3593_v5 }
 0x4f2   :  { %12038 = vst [vmem:[#allocation48_spill] sm:$0xff] %v10337_v10  ;;  %v7059_v12 = vor.u32 %v7676_v31, %v7058_v46  ;;  %v7063_v39 = vor.u32 %v7675_v50, %v7060_v15  ;;  %v7673_v46 = vld [vmem:[%s11862_s4 + $0x10c] sm:$0xf]  ;;  %v7052_v50 = vld [vmem:[%s11862_s4 + $0x110] sm:$0xf0] }
 0x4f3   :  { %v10340_v9 = vpop.f32.mrf.mxu2  ;;  %v10342_v30 = vpop.f32.mrf.mxu3  ;;  %v7055_v15 = vor.u32 %v7673_v46, %v7052_v50  ;;  %v3595_v46 = vrot.slane %v9870_v40, 2 }
 0x4f4   :  { %12039 = vst [vmem:[#allocation49_spill] sm:$0xff] %v10340_v9  ;;  %v7674_v9 = vld [vmem:[%s11862_s4 + $0x10c] sm:$0xf0] }
 0x4f5   :  { %12040 = vst [vmem:[#allocation50_spill] sm:$0xff] %v10342_v30  ;;  %4125 = vmatpush.bf16.msrb.mxu0 %v7059_v12  ;;  %4213 = vmatpush.bf16.msrb.mxu1 %v7063_v39  ;;  %v7050_v30 = vld [vmem:[%s11862_s4 + $0x108] sm:$0xf] }
 0x4f6   :  { %v7051_v56 = vor.u32 %v7674_v9, %v7050_v30 }
 0x4f8   :  { %7008 = vmatmul.msk.bf16.gmra.mxu2 %vm3056_vm5, %v3594_v49  ;;  %7024 = vmatmul.msk.bf16.gmra.mxu3 %vm3056_vm5, %v3594_v49  ;;  %v10368_v31 = vpop.f32.mrf.mxu0 }
 0x4f9   :  { %v10373_v12 = vpop.f32.mrf.mxu1  ;;  %4126 = vmatpush.bf16.msrb.mxu0 %v7051_v56  ;;  %4214 = vmatpush.bf16.msrb.mxu1 %v7055_v15  ;;  %v3596_v56 = vsel %vm3585_vm6, %v3593_v5, %v3595_v46 }
 0x4fa   :  { %12041 = vst [vmem:[#allocation51_spill] sm:$0xff] %v10373_v12 }
 0x4fb   :  { %v10375_v39 = vpop.f32.mrf.mxu2  ;;  %v10377_v10 = vpop.f32.mrf.mxu3  ;;  %6936 = vmatmul.msk.bf16.gmra.mxu0 %vm3056_vm5, %v10079_v14 }
 0x4fc   :  { %12042 = vst [vmem:[#allocation52_spill] sm:$0xff] %v10375_v39  ;;  %6952 = vmatmul.msk.bf16.gmra.mxu1 %vm3056_vm5, %v10079_v14 }
 0x4fd   :  { %12043 = vst [vmem:[#allocation53_spill] sm:$0xff] %v10377_v10 }
 0x500   :  { %v10383_v30 = vpop.f32.mrf.mxu0 }
 0x501   :  { %v10385_v9 = vpop.f32.mrf.mxu1 }
 0x502   :  { %12044 = vst [vmem:[#allocation54_spill] sm:$0xff] %v10385_v9 }
 0x503   :  { %v10387_v49 = vpop.f32.mrf.mxu2  ;;  %v10389_v12 = vpop.f32.mrf.mxu3 }
 0x504   :  { %12045 = vst [vmem:[#allocation55_spill] sm:$0xff] %v10387_v49 }
 0x505   :  { %12046 = vst [vmem:[#allocation56_spill] sm:$0xff] %v10389_v12 }
 0x508   :  { %7009 = vmatmul.msk.bf16.gmra.mxu2 %vm3056_vm5, %v3596_v56  ;;  %7025 = vmatmul.msk.bf16.gmra.mxu3 %vm3056_vm5, %v3596_v56  ;;  %v10395_v50 = vpop.f32.mrf.mxu0 }
 0x509   :  { %12047 = vst [vmem:[#allocation57_spill] sm:$0xff] %v10395_v50  ;;  %v10397_v15 = vpop.f32.mrf.mxu1 }
 0x50a   :  { %12048 = vst [vmem:[#allocation58_spill] sm:$0xff] %v10397_v15  ;;  %v3597_v15 = vrot.slane %v9892_v28, 2 }
 0x50b   :  { %v10399_v10 = vpop.f32.mrf.mxu2  ;;  %v10401_v39 = vpop.f32.mrf.mxu3  ;;  %6937 = vmatmul.msk.bf16.gmra.mxu0 %vm3056_vm5, %v10149_v0 }
 0x50c   :  { %12049 = vst [vmem:[#allocation59_spill] sm:$0xff] %v10399_v10  ;;  %6953 = vmatmul.msk.bf16.gmra.mxu1 %vm3056_vm5, %v10149_v0  ;;  %v3980_v10 = vrot.slane %v9712_v19, 3 }
 0x50d   :  { %12050 = vst [vmem:[#allocation60_spill] sm:$0xff] %v10401_v39  ;;  %v3598_v39 = vsel %vm3585_vm6, %v3595_v46, %v3597_v15 }
 0x510   :  { %v10407_v12 = vpop.f32.mrf.mxu0 }
 0x511   :  { %12051 = vst [vmem:[#allocation61_spill] sm:$0xff] %v10407_v12  ;;  %v10409_v5 = vpop.f32.mrf.mxu1  ;;  %v3979_v12 = vrot.slane %v9695_v53, 3  ;;  %v3599_v53 = vrot.slane %v9915_v32, 2 }
 0x512   :  { %12052 = vst [vmem:[#allocation62_spill] sm:$0xff] %v10409_v5 }
 0x513   :  { %v10411_v49 = vpop.f32.mrf.mxu2  ;;  %v10413_v56 = vpop.f32.mrf.mxu3 }
 0x514   :  { %12053 = vst [vmem:[#allocation63_spill] sm:$0xff] %v10411_v49  ;;  %v3981_v49 = vsel %vm3978_vm7, %v3979_v12, %v3980_v10  ;;  %v3982_v12 = vrot.slane %v9734_v38, 3 }
 0x515   :  { %12054 = vst [vmem:[#allocation64_spill] sm:$0xff] %v10413_v56 }
 0x518   :  { %7010 = vmatmul.msk.bf16.gmra.mxu2 %vm3056_vm5, %v3598_v39  ;;  %7026 = vmatmul.msk.bf16.gmra.mxu3 %vm3056_vm5, %v3598_v39  ;;  %v10420_v50 = vpop.f32.mrf.mxu0 }
 0x519   :  { %12055 = vst [vmem:[#allocation65_spill] sm:$0xff] %v10420_v50  ;;  %v10423_v5 = vpop.f32.mrf.mxu1 }
 0x51b   :  { %v10426_v56 = vpop.f32.mrf.mxu2  ;;  %v10428_v9 = vpop.f32.mrf.mxu3  ;;  %7088 = vmatmul.msk.bf16.vlgmr.msrb.gmra.mxu0 %vm3056_vm5, %v3981_v49 }
 0x51c   :  { %12056 = vst [vmem:[#allocation66_spill] sm:$0xff] %v10426_v56  ;;  %7104 = vmatmul.msk.bf16.vlgmr.msrb.gmra.mxu1 %vm3056_vm5, %v3981_v49  ;;  %v3600_v56 = vsel %vm3585_vm6, %v3597_v15, %v3599_v53 }
 0x51d   :  { %12057 = vst [vmem:[#allocation67_spill] sm:$0xff] %v10428_v9 }
 0x520   :  { %v10432_v19 = vpop.f32.mrf.mxu0 }
 0x521   :  { %12058 = vst [vmem:[#allocation68_spill] sm:$0xff] %v10432_v19  ;;  %v10434_v46 = vpop.f32.mrf.mxu1 }
 0x522   :  { %12059 = vst [vmem:[#allocation69_spill] sm:$0xff] %v10434_v46  ;;  %v3983_v46 = vsel %vm3978_vm7, %v3980_v10, %v3982_v12  ;;  %v3984_v10 = vrot.slane %v9760_v3, 3 }
 0x523   :  { %v10436_v39 = vpop.f32.mrf.mxu2  ;;  %v10438_v50 = vpop.f32.mrf.mxu3 }
 0x524   :  { %12060 = vst [vmem:[#allocation70_spill] sm:$0xff] %v10436_v39 }
 0x525   :  { %12061 = vst [vmem:[#allocation71_spill] sm:$0xff] %v10438_v50 }
 0x528   :  { %7011 = vmatmul.msk.bf16.gmra.mxu2 %vm3056_vm5, %v3600_v56  ;;  %7027 = vmatmul.msk.bf16.gmra.mxu3 %vm3056_vm5, %v3600_v56  ;;  %v10445_v9 = vpop.f32.mrf.mxu0 }
 0x529   :  { %v10447_v49 = vpop.f32.mrf.mxu1 }
 0x52a   :  { %12062 = vst [vmem:[#allocation72_spill] sm:$0xff] %v10447_v49  ;;  %v3601_v49 = vrot.slane %v9932_v60, 2 }
 0x52b   :  { %v10450_v19 = vpop.f32.mrf.mxu2  ;;  %v10452_v39 = vpop.f32.mrf.mxu3  ;;  %7089 = vmatmul.msk.bf16.gmra.mxu0 %vm3056_vm5, %v3983_v46 }
 0x52c   :  { %12063 = vst [vmem:[#allocation73_spill] sm:$0xff] %v10450_v19  ;;  %7105 = vmatmul.msk.bf16.gmra.mxu1 %vm3056_vm5, %v3983_v46  ;;  %v3602_v19 = vsel %vm3585_vm6, %v3599_v53, %v3601_v49 }
 0x52d   :  { %12064 = vst [vmem:[#allocation74_spill] sm:$0xff] %v10452_v39 }
 0x530   :  { %v10456_v38 = vpop.f32.mrf.mxu0 }
 0x531   :  { %12065 = vst [vmem:[#allocation75_spill] sm:$0xff] %v10456_v38  ;;  %v10458_v15 = vpop.f32.mrf.mxu1 }
 0x532   :  { %12066 = vst [vmem:[#allocation76_spill] sm:$0xff] %v10458_v15  ;;  %v3985_v15 = vsel %vm3978_vm7, %v3982_v12, %v3984_v10 }
 0x533   :  { %v10460_v50 = vpop.f32.mrf.mxu2  ;;  %v10462_v56 = vpop.f32.mrf.mxu3 }
 0x534   :  { %12067 = vst [vmem:[#allocation77_spill] sm:$0xff] %v10460_v50 }
 0x535   :  { %12068 = vst [vmem:[#allocation78_spill] sm:$0xff] %v10462_v56 }
 0x538   :  { %7012 = vmatmul.msk.bf16.gmra.mxu2 %vm3056_vm5, %v3602_v19  ;;  %7028 = vmatmul.msk.bf16.gmra.mxu3 %vm3056_vm5, %v3602_v19  ;;  %v10469_v39 = vpop.f32.mrf.mxu0 }
 0x539   :  { %12069 = vst [vmem:[#allocation79_spill] sm:$0xff] %v10469_v39  ;;  %v10471_v46 = vpop.f32.mrf.mxu1  ;;  %v3603_v39 = vrot.slane %v9953_v34, 2 }
 0x53a   :  { %12070 = vst [vmem:[#allocation80_spill] sm:$0xff] %v10471_v46  ;;  %v3986_v46 = vrot.slane %v9822_v36, 3 }
 0x53b   :  { %v10474_v38 = vpop.f32.mrf.mxu2  ;;  %v10476_v50 = vpop.f32.mrf.mxu3  ;;  %7090 = vmatmul.msk.bf16.gmra.mxu0 %vm3056_vm5, %v3985_v15  ;;  %v3604_v12 = vsel %vm3585_vm6, %v3601_v49, %v3603_v39 }
 0x53c   :  { %12071 = vst [vmem:[#allocation81_spill] sm:$0xff] %v10474_v38  ;;  %7106 = vmatmul.msk.bf16.gmra.mxu1 %vm3056_vm5, %v3985_v15  ;;  %v3407_v15 = vadd.f32 %v10113_v45, %v9960_v23  ;;  %v3409_v23 = vadd.f32 %v10160_v62, %v9976_v11 }
 0x53d   :  { %12072 = vst [vmem:[#allocation82_spill] sm:$0xff] %v10476_v50 }
 0x540   :  { %v10480_v3 = vpop.f32.mrf.mxu0 }
 0x541   :  { %12073 = vst [vmem:[#allocation83_spill] sm:$0xff] %v10480_v3  ;;  %v10482_v53 = vpop.f32.mrf.mxu1 }
 0x542   :  { %12074 = vst [vmem:[#allocation84_spill] sm:$0xff] %v10482_v53 }
 0x543   :  { %v3198_v56 = vpop.f32.mrf.mxu2  ;;  %v3286_v19 = vpop.f32.mrf.mxu3 }
 0x544   :  { %v3495_v56 = vadd.f32 %v10120_v33, %v9962_v21  ;;  %v3987_v19 = vsel %vm3978_vm7, %v3984_v10, %v3986_v46  ;;  %v3497_v21 = vadd.f32 %v10165_v57, %v9978_v35  ;;  %v3605_v10 = vrot.slane %v9974_v4, 2 }
 0x545   :  { %v3412_v35 = vadd.f32 %v10187_v63, %v9985_v42  ;;  %v3500_v57 = vadd.f32 %v10189_v47, %v9987_v26  ;;  %v3414_v63 = vadd.f32 %v10199_v59, %v10001_v7  ;;  %v3502_v47 = vadd.f32 %v10201_v13, %v10003_v43 }
 0x546   :  { %v3417_v43 = vadd.f32 %v10209_v17, %v10010_v24  ;;  %v3505_v13 = vadd.f32 %v10211_v20, %v10012_v8  ;;  %v3419_v24 = vadd.f32 %v10221_v52, %v10026_v27  ;;  %v3507_v8 = vadd.f32 %v10223_v16, %v10028_v1 }
 0x547   :  { %v3422_v16 = vadd.f32 %v10234_v6, %v10035_v2  ;;  %v3510_v1 = vadd.f32 %v10236_v29, %v10037_v55  ;;  %v3424_v6 = vadd.f32 %v10246_v44, %v10051_v18  ;;  %v3512_v29 = vadd.f32 %v10248_v41, %v10053_v37  ;;  %v12078_v41 = vld [vmem:[#allocation13_spill] sm:$0xff] }
 0x548   :  { %7013 = vmatmul.msk.bf16.gmra.mxu2 %vm3056_vm5, %v3604_v12  ;;  %7029 = vmatmul.msk.bf16.gmra.mxu3 %vm3056_vm5, %v3604_v12  ;;  %v10489_v50 = vpop.f32.mrf.mxu0  ;;  %v3427_v37 = vadd.f32 %v10258_v22, %v10063_v61 }
 0x549   :  { %v10491_v38 = vpop.f32.mrf.mxu1 }
 0x54a   :  { %12075 = vst [vmem:[#allocation85_spill] sm:$0xff] %v10491_v38 }
 0x54b   :  { %v3735_v53 = vpop.f32.mrf.mxu2  ;;  %v3823_v36 = vpop.f32.mrf.mxu3  ;;  %7091 = vmatmul.msk.bf16.gmra.mxu0 %vm3056_vm5, %v3987_v19 }
 0x54c   :  { %v10499_v49 = vadd.f32 %v3735_v53, %v3407_v15  ;;  %v10501_v3 = vadd.f32 %v3823_v36, %v3495_v56  ;;  %7107 = vmatmul.msk.bf16.gmra.mxu1 %vm3056_vm5, %v3987_v19  ;;  %v3988_v56 = vrot.slane %v9870_v40, 3  ;;  %v3606_v19 = vsel %vm3585_vm6, %v3603_v39, %v3605_v10 }
 0x54e   :  { %v3989_v36 = vsel %vm3978_vm7, %v3986_v46, %v3988_v56  ;;  %v3607_v46 = vrot.slane %v9999_v58, 2 }
 0x550   :  { %v10504_v12 = vpop.f32.mrf.mxu0 }
 0x551   :  { %v10506_v38 = vpop.f32.mrf.mxu1 }
 0x553   :  { %v3737_v45 = vpop.f32.mrf.mxu2  ;;  %v3825_v33 = vpop.f32.mrf.mxu3 }
 0x554   :  { %v10513_v53 = vadd.f32 %v3737_v45, %v3409_v23  ;;  %v10515_v15 = vadd.f32 %v3825_v33, %v3497_v21 }
 0x558   :  { %7014 = vmatmul.msk.bf16.gmra.mxu2 %vm3056_vm5, %v3606_v19  ;;  %7030 = vmatmul.msk.bf16.gmra.mxu3 %vm3056_vm5, %v3606_v19  ;;  %v10521_v11 = vpop.f32.mrf.mxu0 }
 0x559   :  { %v10523_v62 = vpop.f32.mrf.mxu1 }
 0x55b   :  { %v3740_v23 = vpop.f32.mrf.mxu2  ;;  %v3828_v40 = vpop.f32.mrf.mxu3  ;;  %7092 = vmatmul.msk.bf16.gmra.mxu0 %vm3056_vm5, %v3989_v36 }
 0x55c   :  { %v10531_v39 = vadd.f32 %v3740_v23, %v3412_v35  ;;  %v10533_v21 = vadd.f32 %v3828_v40, %v3500_v57  ;;  %7108 = vmatmul.msk.bf16.gmra.mxu1 %vm3056_vm5, %v3989_v36  ;;  %v3990_v57 = vrot.slane %v9892_v28, 3  ;;  %v3608_v36 = vsel %vm3585_vm6, %v3605_v10, %v3607_v46 }
 0x55e   :  { %v3991_v23 = vsel %vm3978_vm7, %v3988_v56, %v3990_v57  ;;  %v3609_v56 = vrot.slane %v10024_v51, 2 }
 0x560   :  { %v10536_v45 = vpop.f32.mrf.mxu0 }
 0x561   :  { %v10538_v33 = vpop.f32.mrf.mxu1 }
 0x563   :  { %v3742_v42 = vpop.f32.mrf.mxu2  ;;  %v3830_v26 = vpop.f32.mrf.mxu3 }
 0x564   :  { %v10545_v19 = vadd.f32 %v3742_v42, %v3414_v63  ;;  %v10547_v35 = vadd.f32 %v3830_v26, %v3502_v47 }
 0x568   :  { %7015 = vmatmul.msk.bf16.gmra.mxu2 %vm3056_vm5, %v3608_v36  ;;  %7031 = vmatmul.msk.bf16.gmra.mxu3 %vm3056_vm5, %v3608_v36  ;;  %v10553_v7 = vpop.f32.mrf.mxu0 }
 0x569   :  { %v10555_v59 = vpop.f32.mrf.mxu1 }
 0x56b   :  { %v3745_v40 = vpop.f32.mrf.mxu2  ;;  %v3833_v28 = vpop.f32.mrf.mxu3  ;;  %7093 = vmatmul.msk.bf16.gmra.mxu0 %vm3056_vm5, %v3991_v23 }
 0x56c   :  { %v10563_v10 = vadd.f32 %v3745_v40, %v3417_v43  ;;  %v10565_v63 = vadd.f32 %v3833_v28, %v3505_v13  ;;  %7109 = vmatmul.msk.bf16.gmra.mxu1 %vm3056_vm5, %v3991_v23  ;;  %v3992_v43 = vrot.slane %v9915_v32, 3  ;;  %v3610_v13 = vsel %vm3585_vm6, %v3607_v46, %v3609_v56 }
 0x56e   :  { %v3993_v23 = vsel %vm3978_vm7, %v3990_v57, %v3992_v43  ;;  %v3611_v57 = vrot.slane %v10049_v25, 2 }
 0x570   :  { %v10568_v47 = vpop.f32.mrf.mxu0 }
 0x571   :  { %v10570_v42 = vpop.f32.mrf.mxu1 }
 0x573   :  { %v3747_v17 = vpop.f32.mrf.mxu2  ;;  %v3835_v20 = vpop.f32.mrf.mxu3 }
 0x574   :  { %v10577_v26 = vadd.f32 %v3747_v17, %v3419_v24  ;;  %v10579_v36 = vadd.f32 %v3835_v20, %v3507_v8 }
 0x578   :  { %7016 = vmatmul.msk.bf16.gmra.mxu2 %vm3056_vm5, %v3610_v13  ;;  %7032 = vmatmul.msk.bf16.gmra.mxu3 %vm3056_vm5, %v3610_v13  ;;  %v10585_v52 = vpop.f32.mrf.mxu0  ;;  %v3994_v13 = vrot.slane %v9932_v60, 3  ;;  %v7130_v60 = vld [vmem:[%s11862_s4 + $0x1b0] sm:$0x33] }
 0x579   :  { %v10587_v27 = vpop.f32.mrf.mxu1 }
 0x57b   :  { %v3750_v40 = vpop.f32.mrf.mxu2  ;;  %v3838_v32 = vpop.f32.mrf.mxu3  ;;  %7094 = vmatmul.msk.bf16.gmra.mxu0 %vm3056_vm5, %v3993_v23 }
 0x57c   :  { %v10595_v46 = vadd.f32 %v3750_v40, %v3422_v16  ;;  %v10597_v28 = vadd.f32 %v3838_v32, %v3510_v1  ;;  %7110 = vmatmul.msk.bf16.gmra.mxu1 %vm3056_vm5, %v3993_v23  ;;  %v3612_v16 = vsel %vm3585_vm6, %v3609_v56, %v3611_v57  ;;  %v3515_v1 = vadd.f32 %v12078_v41, %v10065_v48  ;;  %v12079_v41 = vld [vmem:[#allocation29_spill] sm:$0xff] }
 0x57d   :  { %v3995_v23 = vsel %vm3978_vm7, %v3992_v43, %v3994_v13  ;;  %v4416_v32 = vunpack.c.l.b16 %v7130_v60 }
 0x57f   :  { %v4428_v61 = vpack.c.b16 %v4416_v32, %v4416_v32  ;;  %v7692_v32 = vld [vmem:[%s11862_s4 + $0x1a4] sm:$0xf0] }
 0x580   :  { %v10600_v24 = vpop.f32.mrf.mxu0 }
 0x581   :  { %v10602_v8 = vpop.f32.mrf.mxu1  ;;  %v4489_v22 = vsel %vm3105_vm3, %v4428_v61, 0 }
 0x582   :  { %4496 = vmatpush.bf16.msrb.mxu2 %v4489_v22 }
 0x583   :  { %v3752_v2 = vpop.f32.mrf.mxu2  ;;  %v3840_v55 = vpop.f32.mrf.mxu3 }
 0x584   :  { %v10609_v17 = vadd.f32 %v3752_v2, %v3424_v6  ;;  %v10611_v20 = vadd.f32 %v3840_v55, %v3512_v29  ;;  %v4417_v6 = vunpack.c.h.b16 %v7130_v60  ;;  %v12081_v60 = vld [vmem:[#allocation30_spill] sm:$0xff] }
 0x586   :  { %v4429_v48 = vpack.c.b16 %v4417_v6, %v4417_v6  ;;  %v7691_v6 = vld [vmem:[%s11862_s4 + $0x1a4] sm:$0xf] }
 0x588   :  { %7017 = vmatmul.msk.bf16.gmra.mxu2 %vm3056_vm5, %v3612_v16  ;;  %7033 = vmatmul.msk.bf16.gmra.mxu3 %vm3056_vm5, %v3612_v16  ;;  %v10617_v18 = vpop.f32.mrf.mxu0  ;;  %v4492_v43 = vsel %vm3105_vm3, %v4429_v48, 0  ;;  %v7167_v48 = vld [vmem:[%s11862_s4 + $0x1a8] sm:$0xf0] }
 0x589   :  { %12076 = vst [vmem:[#allocation86_spill] sm:$0xff] %v10617_v18  ;;  %v10619_v44 = vpop.f32.mrf.mxu1  ;;  %4584 = vmatpush.bf16.msrb.mxu3 %v4492_v43  ;;  %v7170_v22 = vor.u32 %v7691_v6, %v7167_v48  ;;  %v12084_v6 = vld [vmem:[#allocation43_spill] sm:$0xff]  ;;  %v12085_v48 = vld [vmem:[#allocation2_spill] sm:$0xff] }
 0x58a   :  { %12077 = vst [vmem:[#allocation87_spill] sm:$0xff] %v10619_v44  ;;  %v12080_v44 = vld [vmem:[#allocation40_spill] sm:$0xff] }
 0x58b   :  { %v3755_v56 = vpop.f32.mrf.mxu2  ;;  %v3843_v40 = vpop.f32.mrf.mxu3  ;;  %7095 = vmatmul.msk.bf16.gmra.mxu0 %vm3056_vm5, %v3995_v23  ;;  %v3429_v18 = vadd.f32 %v12080_v44, %v12079_v41  ;;  %v7689_v41 = vld [vmem:[%s11862_s4 + $0x194] sm:$0xf] }
 0x58c   :  { %v10630_v29 = vadd.f32 %v3755_v56, %v3427_v37  ;;  %v10632_v2 = vadd.f32 %v3843_v40, %v3515_v1  ;;  %7111 = vmatmul.msk.bf16.gmra.mxu1 %vm3056_vm5, %v3995_v23  ;;  %v3517_v37 = vadd.f32 %v10275_v54, %v12081_v60  ;;  %v11891_v1 = vrot.slane %v10079_v14, 2  ;;  %v7165_v40 = vld [vmem:[%s11862_s4 + $0x1a0] sm:$0xf] }
 0x58d   :  { %v7166_v54 = vor.u32 %v7692_v32, %v7165_v40  ;;  %4585 = vmatpush.bf16.msrb.mxu3 %v7170_v22  ;;  %v12083_v32 = vld [vmem:[#allocation33_spill] sm:$0xff]  ;;  %v12086_v22 = vld [vmem:[#allocation44_spill] sm:$0xff] }
 0x58f   :  { %4497 = vmatpush.bf16.msrb.mxu2 %v7166_v54  ;;  %v3432_v54 = vadd.f32 %v12084_v6, %v12083_v32  ;;  %v7686_v32 = vld [vmem:[%s11862_s4 + $0x174] sm:$0xf0] }
 0x590   :  { %v3483_v55 = vpop.f32.mrf.mxu0 }
 0x591   :  { %v3571_v16 = vpop.f32.mrf.mxu1  ;;  %v3614_v55 = vsel %vm3585_vm6, %v3611_v57, %v11891_v1  ;;  %v7159_v57 = vld [vmem:[%s11862_s4 + $0x198] sm:$0xf0]  ;;  %v3520_v1 = vadd.f32 %v12086_v22, %v12085_v48 }
 0x592   :  { %v7690_v16 = vld [vmem:[%s11862_s4 + $0x194] sm:$0xf0]  ;;  %v7162_v40 = vor.u32 %v7689_v41, %v7159_v57  ;;  %v7688_v41 = vld [vmem:[%s11862_s4 + $0x184] sm:$0xf0]  ;;  %v7151_v57 = vld [vmem:[%s11862_s4 + $0x188] sm:$0xf0] }
 0x593   :  { %v3757_v56 = vpop.f32.mrf.mxu2  ;;  %v3845_v23 = vpop.f32.mrf.mxu3 }
 0x594   :  { %v10651_v44 = vadd.f32 %v3757_v56, %v3429_v18  ;;  %v10653_v61 = vadd.f32 %v3845_v23, %v3517_v37  ;;  %v7157_v18 = vld [vmem:[%s11862_s4 + $0x190] sm:$0xf]  ;;  %4586 = vmatpush.bf16.msrb.mxu3 %v7162_v40 }
 0x595   :  { %v7158_v37 = vor.u32 %v7690_v16, %v7157_v18  ;;  %v7141_v40 = vld [vmem:[%s11862_s4 + $0x170] sm:$0xf] }
 0x596   :  { %12082 = vst [vmem:[#allocation13_spill] sm:$0xff] %v10653_v61  ;;  %v7142_v6 = vor.u32 %v7686_v32, %v7141_v40 }
 0x597   :  { %4498 = vmatpush.bf16.msrb.mxu2 %v7158_v37 }
 0x598   :  { %7018 = vmatmul.msk.bf16.gmra.mxu2 %vm3056_vm5, %v3614_v55  ;;  %7034 = vmatmul.msk.bf16.gmra.mxu3 %vm3056_vm5, %v3614_v55  ;;  %v4128_v60 = vpop.f32.mrf.mxu0  ;;  %v12087_v55 = vrot.slane %v9953_v34, 3 }
 0x599   :  { %v10677_v56 = vadd.f32 %v4128_v60, %v10499_v49  ;;  %v4216_v23 = vpop.f32.mrf.mxu1  ;;  %v7149_v49 = vld [vmem:[%s11862_s4 + $0x180] sm:$0xf] }
 0x59a   :  { %v10684_v43 = vadd.f32 %v4216_v23, %v10501_v3  ;;  %v3997_v18 = vsel %vm3978_vm7, %v3994_v13, %v12087_v55  ;;  %v7687_v3 = vld [vmem:[%s11862_s4 + $0x184] sm:$0xf]  ;;  %v7150_v37 = vor.u32 %v7688_v41, %v7149_v49 }
 0x59b   :  { %v3760_v16 = vpop.f32.mrf.mxu2  ;;  %v3848_v61 = vpop.f32.mrf.mxu3  ;;  %7096 = vmatmul.msk.bf16.gmra.mxu0 %vm3056_vm5, %v3997_v18  ;;  %v7154_v23 = vor.u32 %v7687_v3, %v7151_v57  ;;  %v12090_v41 = vld [vmem:[#allocation34_spill] sm:$0xff]  ;;  %v12091_v3 = vld [vmem:[#allocation48_spill] sm:$0xff] }
 0x59c   :  { %v10699_v60 = vadd.f32 %v3760_v16, %v3432_v54  ;;  %v10701_v13 = vadd.f32 %v3848_v61, %v3520_v1  ;;  %7112 = vmatmul.msk.bf16.gmra.mxu1 %vm3056_vm5, %v3997_v18  ;;  %4499 = vmatpush.bf16.msrb.mxu2 %v7150_v37  ;;  %v7685_v1 = vld [vmem:[%s11862_s4 + $0x174] sm:$0xf]  ;;  %v7143_v54 = vld [vmem:[%s11862_s4 + $0x178] sm:$0xf0]  ;;  %v12089_v16 = vld [vmem:[#allocation47_spill] sm:$0xff]  ;;  %v3522_v37 = vadd.f32 %v12091_v3, %v12090_v41 }
 0x59d   :  { %4587 = vmatpush.bf16.msrb.mxu3 %v7154_v23  ;;  %v7146_v55 = vor.u32 %v7685_v1, %v7143_v54  ;;  %v12088_v18 = vld [vmem:[#allocation4_spill] sm:$0xff]  ;;  %v3615_v23 = vrot.slane %v10149_v0, 2  ;;  %v7684_v1 = vld [vmem:[%s11862_s4 + $0x164] sm:$0xf0] }
 0x59e   :  { %v3434_v49 = vadd.f32 %v12089_v16, %v12088_v18  ;;  %v12094_v18 = vrot.slane %v10079_v14, 2 }
 0x5a0   :  { %v4130_v61 = vpop.f32.mrf.mxu0  ;;  %4500 = vmatpush.bf16.msrb.mxu2 %v7142_v6  ;;  %v7135_v6 = vld [vmem:[%s11862_s4 + $0x168] sm:$0xf0]  ;;  %v3616_v16 = vsel %vm3585_vm6, %v12094_v18, %v3615_v23 }
 0x5a1   :  { %v10720_v48 = vadd.f32 %v4130_v61, %v10513_v53  ;;  %v4218_v22 = vpop.f32.mrf.mxu1  ;;  %4588 = vmatpush.bf16.msrb.mxu3 %v7146_v55  ;;  %v7133_v53 = vld [vmem:[%s11862_s4 + $0x160] sm:$0xf]  ;;  %v7683_v61 = vld [vmem:[%s11862_s4 + $0x164] sm:$0xf]  ;;  %v3998_v55 = vrot.slane %v9974_v4, 3  ;;  %v12097_v4 = vld [vmem:[#allocation51_spill] sm:$0xff] }
 0x5a2   :  { %v10727_v57 = vadd.f32 %v4218_v22, %v10515_v15  ;;  %v7134_v0 = vor.u32 %v7684_v1, %v7133_v53  ;;  %v7138_v22 = vor.u32 %v7683_v61, %v7135_v6  ;;  %v12098_v61 = vrot.slane %v9953_v34, 3 }
 0x5a3   :  { %v3762_v40 = vpop.f32.mrf.mxu2  ;;  %v3850_v32 = vpop.f32.mrf.mxu3 }
 0x5a4   :  { %v10739_v15 = vadd.f32 %v3762_v40, %v3434_v49  ;;  %v10741_v54 = vadd.f32 %v3850_v32, %v3522_v37  ;;  %4501 = vmatpush.bf16.msrb.mxu2 %v7134_v0  ;;  %v12095_v37 = vld [vmem:[#allocation5_spill] sm:$0xff]  ;;  %v12096_v32 = vld [vmem:[#allocation35_spill] sm:$0xff]  ;;  %v3999_v0 = vsel %vm3978_vm7, %v12098_v61, %v3998_v55 }
 0x5a5   :  { %4589 = vmatpush.bf16.msrb.mxu3 %v7138_v22  ;;  %v3437_v40 = vadd.f32 %v10368_v31, %v12095_v37  ;;  %v3525_v53 = vadd.f32 %v12097_v4, %v12096_v32  ;;  %v12101_v37 = vld [vmem:[#allocation54_spill] sm:$0xff] }
 0x5a6   :  { %12092 = vst [vmem:[#allocation29_spill] sm:$0xff] %v10739_v15 }
 0x5a7   :  { %12093 = vst [vmem:[#allocation40_spill] sm:$0xff] %v10741_v54 }
 0x5a8   :  { %7019 = vmatmul.msk.bf16.gmra.mxu2 %vm3056_vm5, %v3616_v16  ;;  %7035 = vmatmul.msk.bf16.gmra.mxu3 %vm3056_vm5, %v3616_v16  ;;  %v4133_v49 = vpop.f32.mrf.mxu0 }
 0x5a9   :  { %v10753_v41 = vadd.f32 %v4133_v49, %v10531_v39  ;;  %v4221_v3 = vpop.f32.mrf.mxu1  ;;  %v12099_v49 = vld [vmem:[#allocation6_spill] sm:$0xff] }
 0x5aa   :  { %v10760_v1 = vadd.f32 %v4221_v3, %v10533_v21  ;;  %v3439_v34 = vadd.f32 %v10383_v30, %v12099_v49  ;;  %v12100_v3 = vld [vmem:[#allocation7_spill] sm:$0xff]  ;;  %v12106_v49 = vld [vmem:[#allocation36_spill] sm:$0xff] }
 0x5ab   :  { %v3765_v6 = vpop.f32.mrf.mxu2  ;;  %v3853_v22 = vpop.f32.mrf.mxu3  ;;  %7097 = vmatmul.msk.bf16.gmra.mxu0 %vm3056_vm5, %v3999_v0  ;;  %v3527_v32 = vadd.f32 %v12101_v37, %v12100_v3  ;;  %v12107_v3 = vld [vmem:[#allocation58_spill] sm:$0xff] }
 0x5ac   :  { %v10766_v39 = vadd.f32 %v3765_v6, %v3437_v40  ;;  %v10768_v18 = vadd.f32 %v3853_v22, %v3525_v53  ;;  %7113 = vmatmul.msk.bf16.gmra.mxu1 %vm3056_vm5, %v3999_v0  ;;  %v4000_v0 = vrot.slane %v9999_v58, 3 }
 0x5ae   :  { %v4001_v58 = vsel %vm3978_vm7, %v3998_v55, %v4000_v0  ;;  %v12111_v55 = vld [vmem:[#allocation62_spill] sm:$0xff] }
 0x5b0   :  { %v4135_v31 = vpop.f32.mrf.mxu0 }
 0x5b1   :  { %v10772_v16 = vadd.f32 %v4135_v31, %v10545_v19  ;;  %v4223_v21 = vpop.f32.mrf.mxu1  ;;  %v12104_v31 = vld [vmem:[#allocation8_spill] sm:$0xff] }
 0x5b2   :  { %v10779_v4 = vadd.f32 %v4223_v21, %v10547_v35  ;;  %v12105_v35 = vld [vmem:[#allocation57_spill] sm:$0xff] }
 0x5b3   :  { %v3767_v40 = vpop.f32.mrf.mxu2  ;;  %v3855_v61 = vpop.f32.mrf.mxu3  ;;  %v3442_v21 = vadd.f32 %v12105_v35, %v12104_v31  ;;  %v12108_v35 = vld [vmem:[#allocation9_spill] sm:$0xff] }
 0x5b4   :  { %v10781_v53 = vadd.f32 %v3767_v40, %v3439_v34  ;;  %v10783_v6 = vadd.f32 %v3855_v61, %v3527_v32  ;;  %v3530_v34 = vadd.f32 %v12107_v3, %v12106_v49  ;;  %v12110_v49 = vld [vmem:[#allocation37_spill] sm:$0xff] }
 0x5b5   :  { %v3532_v3 = vadd.f32 %v12111_v55, %v12110_v49 }
 0x5b6   :  { %12102 = vst [vmem:[#allocation30_spill] sm:$0xff] %v10781_v53 }
 0x5b7   :  { %12103 = vst [vmem:[#allocation33_spill] sm:$0xff] %v10783_v6 }
 0x5b8   :  { %7020 = vmatmul.msk.bf16.gmra.mxu2 %vm3056_vm5, %v3615_v23  ;;  %7036 = vmatmul.msk.bf16.gmra.mxu3 %vm3056_vm5, %v3615_v23  ;;  %v4138_v19 = vpop.f32.mrf.mxu0 }
 0x5b9   :  { %v10789_v30 = vadd.f32 %v4138_v19, %v10563_v10  ;;  %v4226_v22 = vpop.f32.mrf.mxu1 }
 0x5ba   :  { %v10796_v37 = vadd.f32 %v4226_v22, %v10565_v63  ;;  %v12109_v63 = vld [vmem:[#allocation61_spill] sm:$0xff] }
 0x5bb   :  { %v3770_v32 = vpop.f32.mrf.mxu2  ;;  %v3858_v40 = vpop.f32.mrf.mxu3  ;;  %7098 = vmatmul.msk.bf16.gmra.mxu0 %vm3056_vm5, %v4001_v58  ;;  %v3444_v22 = vadd.f32 %v12109_v63, %v12108_v35  ;;  %v12116_v63 = vld [vmem:[#allocation65_spill] sm:$0xff] }
 0x5bc   :  { %v10800_v23 = vadd.f32 %v3770_v32, %v3442_v21  ;;  %v10802_v10 = vadd.f32 %v3858_v40, %v3530_v34  ;;  %7114 = vmatmul.msk.bf16.gmra.mxu1 %vm3056_vm5, %v4001_v58  ;;  %v4002_v58 = vrot.slane %v10024_v51, 3 }
 0x5be   :  { %v4003_v51 = vsel %vm3978_vm7, %v4000_v0, %v4002_v58  ;;  %v12121_v0 = vld [vmem:[#allocation69_spill] sm:$0xff] }
 0x5c0   :  { %v4140_v61 = vpop.f32.mrf.mxu0 }
 0x5c1   :  { %v10806_v19 = vadd.f32 %v4140_v61, %v10577_v26  ;;  %v4228_v31 = vpop.f32.mrf.mxu1  ;;  %v12114_v26 = vld [vmem:[#allocation15_spill] sm:$0xff] }
 0x5c2   :  { %v10813_v6 = vadd.f32 %v4228_v31, %v10579_v36  ;;  %v12115_v31 = vld [vmem:[#allocation10_spill] sm:$0xff] }
 0x5c3   :  { %v3772_v21 = vpop.f32.mrf.mxu2  ;;  %v3860_v32 = vpop.f32.mrf.mxu3  ;;  %v3447_v49 = vadd.f32 %v12116_v63, %v12115_v31  ;;  %v12118_v63 = vld [vmem:[#allocation12_spill] sm:$0xff] }
 0x5c4   :  { %v10815_v34 = vadd.f32 %v3772_v21, %v3444_v22  ;;  %v10817_v40 = vadd.f32 %v3860_v32, %v3532_v3  ;;  %v12117_v22 = vld [vmem:[#allocation11_spill] sm:$0xff] }
 0x5c5   :  { %v3535_v55 = vadd.f32 %v10423_v5, %v12117_v22  ;;  %v12120_v22 = vld [vmem:[#allocation38_spill] sm:$0xff] }
 0x5c6   :  { %12112 = vst [vmem:[#allocation43_spill] sm:$0xff] %v10815_v34 }
 0x5c7   :  { %12113 = vst [vmem:[#allocation2_spill] sm:$0xff] %v10817_v40  ;;  %v3537_v40 = vadd.f32 %v12121_v0, %v12120_v22  ;;  %v12127_v22 = vld [vmem:[#allocation72_spill] sm:$0xff] }
 0x5c8   :  { %7171 = vmatmul.msk.bf16.vlgmr.msrb.gmra.mxu2 %vm3056_vm5, %v12114_v26  ;;  %7187 = vmatmul.msk.bf16.vlgmr.msrb.gmra.mxu3 %vm3056_vm5, %v12114_v26  ;;  %v4143_v61 = vpop.f32.mrf.mxu0 }
 0x5c9   :  { %v10825_v35 = vadd.f32 %v4143_v61, %v10595_v46  ;;  %v4231_v36 = vpop.f32.mrf.mxu1 }
 0x5ca   :  { %v10832_v3 = vadd.f32 %v4231_v36, %v10597_v28  ;;  %v12119_v28 = vld [vmem:[#allocation68_spill] sm:$0xff] }
 0x5cb   :  { %v3775_v21 = vpop.f32.mrf.mxu2  ;;  %v3863_v32 = vpop.f32.mrf.mxu3  ;;  %7099 = vmatmul.msk.bf16.gmra.mxu0 %vm3056_vm5, %v4003_v51  ;;  %v3449_v36 = vadd.f32 %v12119_v28, %v12118_v63 }
 0x5cc   :  { %v10836_v26 = vadd.f32 %v3775_v21, %v3447_v49  ;;  %v10838_v46 = vadd.f32 %v3863_v32, %v3535_v55  ;;  %7115 = vmatmul.msk.bf16.gmra.mxu1 %vm3056_vm5, %v4003_v51  ;;  %v4004_v51 = vrot.slane %v10049_v25, 3 }
 0x5ce   :  { %v4005_v25 = vsel %vm3978_vm7, %v4002_v58, %v4004_v51 }
 0x5d0   :  { %v4145_v61 = vpop.f32.mrf.mxu0 }
 0x5d1   :  { %v10842_v31 = vadd.f32 %v4145_v61, %v10609_v17  ;;  %v4233_v5 = vpop.f32.mrf.mxu1  ;;  %v12124_v17 = vld [vmem:[#allocation17_spill] sm:$0xff] }
 0x5d2   :  { %v10849_v34 = vadd.f32 %v4233_v5, %v10611_v20  ;;  %v12125_v5 = vld [vmem:[#allocation14_spill] sm:$0xff] }
 0x5d3   :  { %v3777_v49 = vpop.f32.mrf.mxu2  ;;  %v3865_v21 = vpop.f32.mrf.mxu3  ;;  %v3452_v28 = vadd.f32 %v10445_v9, %v12125_v5  ;;  %v12128_v5 = vld [vmem:[#allocation41_spill] sm:$0xff] }
 0x5d4   :  { %v10851_v55 = vadd.f32 %v3777_v49, %v3449_v36  ;;  %v10853_v32 = vadd.f32 %v3865_v21, %v3537_v40  ;;  %v12126_v36 = vld [vmem:[#allocation39_spill] sm:$0xff] }
 0x5d5   :  { %v3540_v40 = vadd.f32 %v12127_v22, %v12126_v36  ;;  %v12129_v36 = vld [vmem:[#allocation75_spill] sm:$0xff]  ;;  %v12131_v22 = vld [vmem:[#allocation76_spill] sm:$0xff] }
 0x5d6   :  { %12122 = vst [vmem:[#allocation44_spill] sm:$0xff] %v10851_v55 }
 0x5d7   :  { %12123 = vst [vmem:[#allocation4_spill] sm:$0xff] %v10853_v32 }
 0x5d8   :  { %7172 = vmatmul.msk.bf16.gmra.mxu2 %vm3056_vm5, %v12124_v17  ;;  %7188 = vmatmul.msk.bf16.gmra.mxu3 %vm3056_vm5, %v12124_v17  ;;  %v4148_v61 = vpop.f32.mrf.mxu0 }
 0x5d9   :  { %v10861_v63 = vadd.f32 %v4148_v61, %v10630_v29  ;;  %v4236_v20 = vpop.f32.mrf.mxu1 }
 0x5da   :  { %v10868_v0 = vadd.f32 %v4236_v20, %v10632_v2  ;;  %v3454_v2 = vadd.f32 %v12129_v36, %v12128_v5  ;;  %v12130_v20 = vld [vmem:[#allocation42_spill] sm:$0xff]  ;;  %v12136_v36 = vld [vmem:[#allocation45_spill] sm:$0xff] }
 0x5db   :  { %v3780_v49 = vpop.f32.mrf.mxu2  ;;  %v3868_v21 = vpop.f32.mrf.mxu3  ;;  %7100 = vmatmul.msk.bf16.gmra.mxu0 %vm3056_vm5, %v4005_v25  ;;  %v3542_v58 = vadd.f32 %v12131_v22, %v12130_v20  ;;  %v12137_v20 = vld [vmem:[#allocation79_spill] sm:$0xff] }
 0x5dc   :  { %v10872_v17 = vadd.f32 %v3780_v49, %v3452_v28  ;;  %v10874_v29 = vadd.f32 %v3868_v21, %v3540_v40  ;;  %7116 = vmatmul.msk.bf16.gmra.mxu1 %vm3056_vm5, %v4005_v25  ;;  %v4006_v40 = vrot.slane %v10079_v14, 3  ;;  %v12134_v49 = vld [vmem:[#allocation16_spill] sm:$0xff]  ;;  %v3457_v22 = vadd.f32 %v12137_v20, %v12136_v36  ;;  %v12141_v20 = vld [vmem:[#allocation49_spill] sm:$0xff] }
 0x5de   :  { %v4007_v14 = vsel %vm3978_vm7, %v4004_v51, %v4006_v40 }
 0x5e0   :  { %v10877_v61 = vpop.f32.mrf.mxu0 }
 0x5e1   :  { %v10879_v9 = vpop.f32.mrf.mxu1 }
 0x5e3   :  { %v3782_v32 = vpop.f32.mrf.mxu2  ;;  %v3870_v55 = vpop.f32.mrf.mxu3 }
 0x5e4   :  { %v10885_v53 = vadd.f32 %v3782_v32, %v3454_v2  ;;  %v10887_v28 = vadd.f32 %v3870_v55, %v3542_v58  ;;  %v12138_v32 = vld [vmem:[#allocation46_spill] sm:$0xff]  ;;  %v12139_v2 = vld [vmem:[#allocation80_spill] sm:$0xff] }
 0x5e5   :  { %v3545_v55 = vadd.f32 %v12139_v2, %v12138_v32  ;;  %v12142_v32 = vld [vmem:[#allocation83_spill] sm:$0xff]  ;;  %v12144_v2 = vld [vmem:[#allocation84_spill] sm:$0xff] }
 0x5e6   :  { %12132 = vst [vmem:[#allocation47_spill] sm:$0xff] %v10885_v53 }
 0x5e7   :  { %12133 = vst [vmem:[#allocation34_spill] sm:$0xff] %v10887_v28 }
 0x5e8   :  { %7173 = vmatmul.msk.bf16.gmra.mxu2 %vm3056_vm5, %v12134_v49  ;;  %7189 = vmatmul.msk.bf16.gmra.mxu3 %vm3056_vm5, %v12134_v49  ;;  %v4153_v25 = vpop.f32.mrf.mxu0 }
 0x5e9   :  { %v10895_v21 = vadd.f32 %v4153_v25, %v10699_v60  ;;  %v4241_v5 = vpop.f32.mrf.mxu1 }
 0x5ea   :  { %v10902_v58 = vadd.f32 %v4241_v5, %v10701_v13  ;;  %v3459_v13 = vadd.f32 %v12142_v32, %v12141_v20  ;;  %v12143_v5 = vld [vmem:[#allocation50_spill] sm:$0xff] }
 0x5eb   :  { %12135 = vst [vmem:[#allocation48_spill] sm:$0xff] %v10895_v21  ;;  %v3785_v28 = vpop.f32.mrf.mxu2  ;;  %v3873_v53 = vpop.f32.mrf.mxu3  ;;  %7101 = vmatmul.msk.bf16.gmra.mxu0 %vm3056_vm5, %v4007_v14  ;;  %v3547_v51 = vadd.f32 %v12144_v2, %v12143_v5  ;;  %v12150_v21 = vld [vmem:[#allocation18_spill] sm:$0xff]  ;;  %v12151_v2 = vld [vmem:[#allocation52_spill] sm:$0xff] }
 0x5ec   :  { %12140 = vst [vmem:[#allocation5_spill] sm:$0xff] %v10902_v58  ;;  %v10906_v49 = vadd.f32 %v3785_v28, %v3457_v22  ;;  %v10908_v60 = vadd.f32 %v3873_v53, %v3545_v55  ;;  %7117 = vmatmul.msk.bf16.gmra.mxu1 %vm3056_vm5, %v4007_v14  ;;  %v12147_v53 = vld [vmem:[#allocation32_spill] sm:$0xff]  ;;  %v12148_v22 = vld [vmem:[#allocation31_spill] sm:$0xff] }
 0x5ed   :  { %v12149_v55 = vpack.c.bf16 %v12147_v53, %v12148_v22 }
 0x5ef   :  { %v4008_v14 = vrot.slane %v12149_v55, 3 }
 0x5f0   :  { %v10911_v25 = vpop.f32.mrf.mxu0 }
 0x5f1   :  { %v10913_v36 = vpop.f32.mrf.mxu1  ;;  %v4009_v55 = vsel %vm3978_vm7, %v4006_v40, %v4008_v14 }
 0x5f3   :  { %v3787_v54 = vpop.f32.mrf.mxu2  ;;  %v3875_v15 = vpop.f32.mrf.mxu3 }
 0x5f4   :  { %v10919_v58 = vadd.f32 %v3787_v54, %v3459_v13  ;;  %v10921_v28 = vadd.f32 %v3875_v15, %v3547_v51  ;;  %v3462_v54 = vadd.f32 %v10489_v50, %v12151_v2  ;;  %v12152_v15 = vld [vmem:[#allocation53_spill] sm:$0xff]  ;;  %v12154_v2 = vld [vmem:[#allocation55_spill] sm:$0xff] }
 0x5f5   :  { %v12153_v13 = vld [vmem:[#allocation85_spill] sm:$0xff] }
 0x5f6   :  { %12145 = vst [vmem:[#allocation35_spill] sm:$0xff] %v10919_v58  ;;  %v3550_v51 = vadd.f32 %v12153_v13, %v12152_v15 }
 0x5f7   :  { %12146 = vst [vmem:[#allocation51_spill] sm:$0xff] %v10921_v28 }
 0x5f8   :  { %7174 = vmatmul.msk.bf16.gmra.mxu2 %vm3056_vm5, %v12150_v21  ;;  %7190 = vmatmul.msk.bf16.gmra.mxu3 %vm3056_vm5, %v12150_v21  ;;  %v4158_v20 = vpop.f32.mrf.mxu0 }
 0x5f9   :  { %v10931_v32 = vadd.f32 %v4158_v20, %v10766_v39  ;;  %v4246_v5 = vpop.f32.mrf.mxu1 }
 0x5fa   :  { %v10938_v22 = vadd.f32 %v4246_v5, %v10768_v18  ;;  %v3464_v18 = vadd.f32 %v10504_v12, %v12154_v2  ;;  %v12155_v5 = vld [vmem:[#allocation56_spill] sm:$0xff] }
 0x5fb   :  { %v3790_v28 = vpop.f32.mrf.mxu2  ;;  %v3878_v58 = vpop.f32.mrf.mxu3  ;;  %7102 = vmatmul.msk.bf16.gmra.mxu0 %vm3056_vm5, %v4009_v55  ;;  %v3552_v40 = vadd.f32 %v10506_v38, %v12155_v5  ;;  %v12160_v2 = vld [vmem:[#allocation60_spill] sm:$0xff] }
 0x5fc   :  { %v10942_v21 = vadd.f32 %v3790_v28, %v3462_v54  ;;  %v10944_v39 = vadd.f32 %v3878_v58, %v3550_v51  ;;  %7118 = vmatmul.msk.bf16.gmra.mxu1 %vm3056_vm5, %v4009_v55  ;;  %v12158_v58 = vld [vmem:[#allocation19_spill] sm:$0xff] }
 0x5fd   :  { %v12159_v55 = vld [vmem:[#allocation59_spill] sm:$0xff] }
 0x5fe   :  { %v3467_v38 = vadd.f32 %v10521_v11, %v12159_v55  ;;  %v12161_v11 = vld [vmem:[#allocation63_spill] sm:$0xff]  ;;  %v12162_v55 = vld [vmem:[#allocation64_spill] sm:$0xff] }
 0x600   :  { %v10947_v20 = vpop.f32.mrf.mxu0 }
 0x601   :  { %v10949_v50 = vpop.f32.mrf.mxu1 }
 0x603   :  { %v3792_v15 = vpop.f32.mrf.mxu2  ;;  %v3880_v13 = vpop.f32.mrf.mxu3 }
 0x604   :  { %v10955_v53 = vadd.f32 %v3792_v15, %v3464_v18  ;;  %v10957_v28 = vadd.f32 %v3880_v13, %v3552_v40  ;;  %v3555_v18 = vadd.f32 %v10523_v62, %v12160_v2  ;;  %v3469_v62 = vadd.f32 %v10536_v45, %v12161_v11  ;;  %v12167_v11 = vld [vmem:[#allocation67_spill] sm:$0xff] }
 0x606   :  { %12156 = vst [vmem:[#allocation6_spill] sm:$0xff] %v10955_v53 }
 0x607   :  { %12157 = vst [vmem:[#allocation7_spill] sm:$0xff] %v10957_v28 }
 0x608   :  { %7175 = vmatmul.msk.bf16.gmra.mxu2 %vm3056_vm5, %v12158_v58  ;;  %7191 = vmatmul.msk.bf16.gmra.mxu3 %vm3056_vm5, %v12158_v58  ;;  %v4163_v54 = vpop.f32.mrf.mxu0 }
 0x609   :  { %v10964_v51 = vadd.f32 %v4163_v54, %v10800_v23  ;;  %v4251_v12 = vpop.f32.mrf.mxu1 }
 0x60a   :  { %v10971_v5 = vadd.f32 %v4251_v12, %v10802_v10  ;;  %v3557_v10 = vadd.f32 %v10538_v33, %v12162_v55 }
 0x60b   :  { %v3795_v40 = vpop.f32.mrf.mxu2  ;;  %v3883_v15 = vpop.f32.mrf.mxu3  ;;  %7103 = vmatmul.msk.bf16.gmra.mxu0 %vm3056_vm5, %v4008_v14 }
 0x60c   :  { %v10974_v13 = vadd.f32 %v3795_v40, %v3467_v38  ;;  %v10976_v58 = vadd.f32 %v3883_v15, %v3555_v18  ;;  %7119 = vmatmul.msk.bf16.gmra.mxu1 %vm3056_vm5, %v4008_v14  ;;  %v12165_v18 = vld [vmem:[#allocation20_spill] sm:$0xff]  ;;  %v12166_v15 = vld [vmem:[#allocation66_spill] sm:$0xff] }
 0x60d   :  { %v3472_v33 = vadd.f32 %v10553_v7, %v12166_v15  ;;  %v7699_v7 = vld [vmem:[%s11863_s6 + $0x30] sm:$0xff] }
 0x610   :  { %v10979_v23 = vpop.f32.mrf.mxu0 }
 0x611   :  { %v10981_v54 = vpop.f32.mrf.mxu1 }
 0x613   :  { %v3797_v12 = vpop.f32.mrf.mxu2  ;;  %v3885_v2 = vpop.f32.mrf.mxu3 }
 0x614   :  { %v10987_v28 = vadd.f32 %v3797_v12, %v3469_v62  ;;  %v10989_v38 = vadd.f32 %v3885_v2, %v3557_v10  ;;  %v3560_v62 = vadd.f32 %v10555_v59, %v12167_v11 }
 0x616   :  { %12163 = vst [vmem:[#allocation54_spill] sm:$0xff] %v10987_v28 }
 0x617   :  { %12164 = vst [vmem:[#allocation8_spill] sm:$0xff] %v10989_v38 }
 0x618   :  { %7176 = vmatmul.msk.bf16.gmra.mxu2 %vm3056_vm5, %v12165_v18  ;;  %7192 = vmatmul.msk.bf16.gmra.mxu3 %vm3056_vm5, %v12165_v18  ;;  %v4168_v14 = vpop.f32.mrf.mxu0 }
 0x619   :  { %v10996_v40 = vadd.f32 %v4168_v14, %v10836_v26  ;;  %v4256_v45 = vpop.f32.mrf.mxu1  ;;  %v7700_v26 = vld [vmem:[%s11863_s6 + $0x38] sm:$0xff] }
 0x61a   :  { %v11003_v55 = vadd.f32 %v4256_v45, %v10838_v46  ;;  %5023 = vmatpush.bf16.msra.mxu0 %v7700_v26  ;;  %v12168_v46 = vld [vmem:[#allocation70_spill] sm:$0xff]  ;;  %v12169_v45 = vld [vmem:[#allocation71_spill] sm:$0xff]  ;;  %v12172_v26 = vld [vmem:[#allocation21_spill] sm:$0xff] }
 0x61b   :  { %v3800_v10 = vpop.f32.mrf.mxu2  ;;  %v3888_v12 = vpop.f32.mrf.mxu3  ;;  %v3474_v14 = vadd.f32 %v10568_v47, %v12168_v46  ;;  %v3562_v15 = vadd.f32 %v10570_v42, %v12169_v45  ;;  %v7697_v42 = vld [vmem:[%s11863_s6 + $0x20] sm:$0xff] }
 0x61c   :  { %v11005_v2 = vadd.f32 %v3800_v10, %v3472_v33  ;;  %v11007_v38 = vadd.f32 %v3888_v12, %v3560_v62  ;;  %v7698_v62 = vld [vmem:[%s11863_s6 + $0x28] sm:$0xff] }
 0x61e   :  { %5024 = vmatpush.bf16.msra.mxu0 %v7699_v7 }
 0x620   :  { %v11012_v18 = vpop.f32.mrf.mxu0 }
 0x621   :  { %v11017_v59 = vpop.f32.mrf.mxu1 }
 0x622   :  { %5025 = vmatpush.bf16.msra.mxu0 %v7698_v62 }
 0x623   :  { %v3802_v33 = vpop.f32.mrf.mxu2  ;;  %v3890_v11 = vpop.f32.mrf.mxu3 }
 0x624   :  { %v11026_v10 = vadd.f32 %v3802_v33, %v3474_v14  ;;  %v11028_v12 = vadd.f32 %v3890_v11, %v3562_v15  ;;  %v12173_v14 = vld [vmem:[#allocation73_spill] sm:$0xff]  ;;  %v12174_v15 = vld [vmem:[#allocation74_spill] sm:$0xff] }
 0x625   :  { %v3477_v45 = vadd.f32 %v10585_v52, %v12173_v14  ;;  %v3565_v33 = vadd.f32 %v10587_v27, %v12174_v15  ;;  %v7695_v52 = vld [vmem:[%s11863_s6 + $0x10] sm:$0xff] }
 0x626   :  { %12170 = vst [vmem:[#allocation57_spill] sm:$0xff] %v11026_v10  ;;  %5026 = vmatpush.bf16.msra.mxu0 %v7697_v42 }
 0x627   :  { %12171 = vst [vmem:[#allocation36_spill] sm:$0xff] %v11028_v12 }
 0x628   :  { %7177 = vmatmul.msk.bf16.gmra.mxu2 %vm3056_vm5, %v12172_v26  ;;  %7193 = vmatmul.msk.bf16.gmra.mxu3 %vm3056_vm5, %v12172_v26  ;;  %v4173_v47 = vpop.f32.mrf.mxu0 }
 0x629   :  { %v11038_v7 = vadd.f32 %v4173_v47, %v10872_v17  ;;  %v4261_v46 = vpop.f32.mrf.mxu1  ;;  %v7696_v17 = vld [vmem:[%s11863_s6 + $0x18] sm:$0xff] }
 0x62a   :  { %v11045_v11 = vadd.f32 %v4261_v46, %v10874_v29  ;;  %5027 = vmatpush.bf16.msra.mxu0 %v7696_v17  ;;  %v12176_v29 = vld [vmem:[#allocation77_spill] sm:$0xff]  ;;  %v12177_v46 = vld [vmem:[#allocation78_spill] sm:$0xff]  ;;  %v7702_v17 = vld [vmem:[%s11863_s6 + $0x48] sm:$0xff] }
 0x62b   :  { %v3805_v62 = vpop.f32.mrf.mxu2  ;;  %v3893_v26 = vpop.f32.mrf.mxu3  ;;  %v3479_v42 = vadd.f32 %v10600_v24, %v12176_v29  ;;  %v3567_v14 = vadd.f32 %v10602_v8, %v12177_v46  ;;  %5117 = vmatpush.bf16.msra.mxu1 %v7702_v17  ;;  %v12180_v24 = vld [vmem:[#allocation22_spill] sm:$0xff]  ;;  %v12185_v17 = vld [vmem:[#allocation87_spill] sm:$0xff] }
 0x62c   :  { %v11047_v12 = vadd.f32 %v3805_v62, %v3477_v45  ;;  %v11049_v10 = vadd.f32 %v3893_v26, %v3565_v33  ;;  %v7694_v26 = vld [vmem:[%s11863_s6 + $0x8] sm:$0xff]  ;;  %v7701_v29 = vld [vmem:[%s11863_s6 + $0x40] sm:$0xff] }
 0x62e   :  { %5028 = vmatpush.bf16.msra.mxu0 %v7695_v52  ;;  %v7693_v52 = vld [vmem:[%s11863_s6] sm:$0xff] }
 0x62f   :  { %5118 = vmatpush.bf16.msra.mxu1 %v7701_v29 }
 0x630   :  { %v11054_v47 = vpop.f32.mrf.mxu0 }
 0x631   :  { %v11059_v27 = vpop.f32.mrf.mxu1 }
 0x632   :  { %12175 = vst [vmem:[#allocation58_spill] sm:$0xff] %v11059_v27  ;;  %5029 = vmatpush.bf16.msra.mxu0 %v7694_v26  ;;  %v12184_v26 = vld [vmem:[#allocation82_spill] sm:$0xff] }
 0x633   :  { %v3807_v45 = vpop.f32.mrf.mxu2  ;;  %v3895_v15 = vpop.f32.mrf.mxu3 }
 0x634   :  { %v11065_v33 = vadd.f32 %v3807_v45, %v3479_v42  ;;  %v11067_v62 = vadd.f32 %v3895_v15, %v3567_v14  ;;  %v12182_v14 = vld [vmem:[#allocation81_spill] sm:$0xff]  ;;  %v12183_v45 = vld [vmem:[#allocation86_spill] sm:$0xff] }
 0x635   :  { %v3482_v15 = vadd.f32 %v12183_v45, %v12182_v14  ;;  %v12187_v45 = vld [vmem:[#allocation23_spill] sm:$0xff] }
 0x636   :  { %12178 = vst [vmem:[#allocation9_spill] sm:$0xff] %v11065_v33  ;;  %5030 = vmatpush.bf16.msra.mxu0 %v7693_v52 }
 0x637   :  { %12179 = vst [vmem:[#allocation61_spill] sm:$0xff] %v11067_v62  ;;  %v3570_v62 = vadd.f32 %v12185_v17, %v12184_v26 }
 0x638   :  { %7178 = vmatmul.msk.bf16.gmra.mxu2 %vm3056_vm5, %v12180_v24  ;;  %7194 = vmatmul.msk.bf16.gmra.mxu3 %vm3056_vm5, %v12180_v24  ;;  %v4178_v8 = vpop.f32.mrf.mxu0 }
 0x639   :  { %v11086_v42 = vadd.f32 %v4178_v8, %v10906_v49  ;;  %v4266_v46 = vpop.f32.mrf.mxu1 }
 0x63a   :  { %v11093_v24 = vadd.f32 %v4266_v46, %v10908_v60 }
 0x63b   :  { %12181 = vst [vmem:[#allocation37_spill] sm:$0xff] %v11086_v42  ;;  %v3810_v33 = vpop.f32.mrf.mxu2  ;;  %v3898_v28 = vpop.f32.mrf.mxu3 }
 0x63c   :  { %v11095_v53 = vadd.f32 %v3810_v33, %v3482_v15  ;;  %v11097_v27 = vadd.f32 %v3898_v28, %v3570_v62 }
 0x640   :  { %v11099_v49 = vpop.f32.mrf.mxu0 }
 0x641   :  { %v11101_v8 = vpop.f32.mrf.mxu1 }
 0x642   :  { %12186 = vst [vmem:[#allocation62_spill] sm:$0xff] %v11101_v8  ;;  %v12191_v8 = vld [vmem:[#allocation24_spill] sm:$0xff] }
 0x643   :  { %v3812_v42 = vpop.f32.mrf.mxu2  ;;  %v3900_v14 = vpop.f32.mrf.mxu3 }
 0x644   :  { %v4732_v42 = vld [vmem:[%s11864_s5] sm:$0x3] }
 0x645   :  { %v11117_v15 = vperm.slane %v4732_v42, 0  ;;  %v11120_v17 = vperm.slane %v4732_v42, 1 }
 0x648   :  { %7179 = vmatmul.msk.bf16.gmra.mxu2 %vm3056_vm5, %v12187_v45  ;;  %7195 = vmatmul.msk.bf16.gmra.mxu3 %vm3056_vm5, %v12187_v45  ;;  %v4183_v60 = vpop.f32.mrf.mxu0 }
 0x649   :  { %v11108_v52 = vadd.f32 %v4183_v60, %v10942_v21  ;;  %v4271_v33 = vpop.f32.mrf.mxu1 }
 0x64a   :  { %v11111_v28 = vadd.f32 %v4271_v33, %v10944_v39 }
 0x64b   :  { %12188 = vst [vmem:[#allocation15_spill] sm:$0xff] %v11108_v52  ;;  %v4503_v62 = vpop.f32.mrf.mxu2  ;;  %v4591_v29 = vpop.f32.mrf.mxu3 }
 0x64c   :  { %12189 = vst [vmem:[#allocation10_spill] sm:$0xff] %v11111_v28  ;;  %v4670_v46 = vadd.f32 %v4503_v62, %v10677_v56  ;;  %v4671_v26 = vadd.f32 %v4591_v29, %v10684_v43 }
 0x64e   :  { %v4738_v60 = vadd.f32 %v11117_v15, %v4670_v46  ;;  %v4739_v33 = vadd.f32 %v11120_v17, %v4671_v26 }
 0x650   :  { %v11122_v21 = vpop.f32.mrf.mxu0  ;;  %v4800_v29 = vmax.f32 %v4738_v60, 0.0  ;;  %v4801_v42 = vmax.f32 %v4739_v33, 0.0 }
 0x651   :  { %12190 = vst [vmem:[#allocation65_spill] sm:$0xff] %v11122_v21  ;;  %v11124_v14 = vpop.f32.mrf.mxu1 }
 0x653   :  { %v4505_v39 = vpop.f32.mrf.mxu2  ;;  %v4593_v45 = vpop.f32.mrf.mxu3 }
 0x654   :  { %v4672_v28 = vadd.f32 %v4505_v39, %v10720_v48  ;;  %v4673_v56 = vadd.f32 %v4593_v45, %v10727_v57 }
 0x656   :  { %v4740_v62 = vadd.f32 %v11117_v15, %v4672_v28  ;;  %v4741_v43 = vadd.f32 %v11120_v17, %v4673_v56 }
 0x658   :  { %v4802_v52 = vmax.f32 %v4740_v62, 0.0  ;;  %v4803_v21 = vmax.f32 %v4741_v43, 0.0  ;;  %7180 = vmatmul.msk.bf16.gmra.mxu2 %vm3056_vm5, %v12191_v8  ;;  %7196 = vmatmul.msk.bf16.gmra.mxu3 %vm3056_vm5, %v12191_v8  ;;  %v4188_v46 = vpop.f32.mrf.mxu0 }
 0x659   :  { %v11137_v26 = vadd.f32 %v4188_v46, %v10974_v13  ;;  %v4276_v48 = vpop.f32.mrf.mxu1 }
 0x65a   :  { %v11139_v57 = vpack.c.bf16 %v4802_v52, %v4800_v29  ;;  %v11141_v28 = vpack.c.bf16 %v4803_v21, %v4801_v42  ;;  %v11144_v39 = vadd.f32 %v4276_v48, %v10976_v58 }
 0x65b   :  { %v4508_v45 = vpop.f32.mrf.mxu2  ;;  %v4596_v60 = vpop.f32.mrf.mxu3 }
 0x65c   :  { %5031 = vmatmul.bf16.vlgmr.msra.gmra.mxu0 %v11139_v57  ;;  %7243 = vmatmul.msk.bf16.vlgmr.msra.gmra.mxu1 %vm4974_vm8, %v11141_v28  ;;  %v4674_v8 = vadd.f32 %v4508_v45, %v10753_v41  ;;  %v4675_v13 = vadd.f32 %v4596_v60, %v10760_v1  ;;  %v12192_v60 = vld [vmem:[#allocation25_spill] sm:$0xff] }
 0x65e   :  { %v4742_v58 = vadd.f32 %v11117_v15, %v4674_v8  ;;  %v4743_v62 = vadd.f32 %v11120_v17, %v4675_v13 }
 0x660   :  { %v11151_v33 = vpop.f32.mrf.mxu0  ;;  %v4804_v46 = vmax.f32 %v4742_v58, 0.0  ;;  %v4805_v1 = vmax.f32 %v4743_v62, 0.0 }
 0x661   :  { %v11153_v52 = vpop.f32.mrf.mxu1 }
 0x663   :  { %v4510_v21 = vpop.f32.mrf.mxu2  ;;  %v4598_v56 = vpop.f32.mrf.mxu3 }
 0x664   :  { %v4676_v43 = vadd.f32 %v4510_v21, %v10772_v16  ;;  %v4677_v29 = vadd.f32 %v4598_v56, %v10779_v4 }
 0x666   :  { %v4744_v42 = vadd.f32 %v11117_v15, %v4676_v43  ;;  %v4745_v41 = vadd.f32 %v11120_v17, %v4677_v29 }
 0x668   :  { %v4806_v48 = vmax.f32 %v4744_v42, 0.0  ;;  %v4807_v45 = vmax.f32 %v4745_v41, 0.0  ;;  %7181 = vmatmul.msk.bf16.gmra.mxu2 %vm3056_vm5, %v12192_v60  ;;  %7197 = vmatmul.msk.bf16.gmra.mxu3 %vm3056_vm5, %v12192_v60  ;;  %v4193_v8 = vpop.f32.mrf.mxu0 }
 0x669   :  { %v11166_v13 = vadd.f32 %v4193_v8, %v11005_v2  ;;  %v4281_v16 = vpop.f32.mrf.mxu1 }
 0x66a   :  { %v11168_v4 = vpack.c.bf16 %v4807_v45, %v4805_v1  ;;  %v11171_v21 = vadd.f32 %v4281_v16, %v11007_v38  ;;  %v11173_v56 = vpack.c.bf16 %v4806_v48, %v4804_v46 }
 0x66b   :  { %v4513_v58 = vpop.f32.mrf.mxu2  ;;  %v4601_v62 = vpop.f32.mrf.mxu3 }
 0x66c   :  { %5036 = vmatmul.bf16.gmra.mxu0 %v11173_v56  ;;  %7244 = vmatmul.msk.bf16.gmra.mxu1 %vm4974_vm8, %v11168_v4  ;;  %v4678_v43 = vadd.f32 %v4513_v58, %v10789_v30  ;;  %v4679_v2 = vadd.f32 %v4601_v62, %v10796_v37  ;;  %v12193_v62 = vld [vmem:[#allocation26_spill] sm:$0xff] }
 0x66e   :  { %v4746_v46 = vadd.f32 %v11117_v15, %v4678_v43  ;;  %v4747_v1 = vadd.f32 %v11120_v17, %v4679_v2 }
 0x670   :  { %v11180_v29 = vpop.f32.mrf.mxu0  ;;  %v4808_v8 = vmax.f32 %v4746_v46, 0.0  ;;  %v4809_v37 = vmax.f32 %v4747_v1, 0.0 }
 0x671   :  { %v11182_v42 = vpop.f32.mrf.mxu1 }
 0x673   :  { %v4515_v41 = vpop.f32.mrf.mxu2  ;;  %v4603_v38 = vpop.f32.mrf.mxu3 }
 0x674   :  { %v4680_v48 = vadd.f32 %v4515_v41, %v10806_v19  ;;  %v4681_v45 = vadd.f32 %v4603_v38, %v10813_v6 }
 0x676   :  { %v4748_v60 = vadd.f32 %v11117_v15, %v4680_v48  ;;  %v4749_v30 = vadd.f32 %v11120_v17, %v4681_v45 }
 0x678   :  { %v4810_v16 = vmax.f32 %v4748_v60, 0.0  ;;  %v4811_v58 = vmax.f32 %v4749_v30, 0.0  ;;  %7182 = vmatmul.msk.bf16.gmra.mxu2 %vm3056_vm5, %v12193_v62  ;;  %7198 = vmatmul.msk.bf16.gmra.mxu3 %vm3056_vm5, %v12193_v62  ;;  %v4198_v43 = vpop.f32.mrf.mxu0 }
 0x679   :  { %v11195_v2 = vadd.f32 %v4198_v43, %v11047_v12  ;;  %v4286_v19 = vpop.f32.mrf.mxu1 }
 0x67a   :  { %v11197_v6 = vpack.c.bf16 %v4811_v58, %v4809_v37  ;;  %v11200_v41 = vadd.f32 %v4286_v19, %v11049_v10  ;;  %v11202_v38 = vpack.c.bf16 %v4810_v16, %v4808_v8 }
 0x67b   :  { %v4518_v46 = vpop.f32.mrf.mxu2  ;;  %v4606_v1 = vpop.f32.mrf.mxu3 }
 0x67c   :  { %5041 = vmatmul.bf16.gmra.mxu0 %v11202_v38  ;;  %7245 = vmatmul.msk.bf16.gmra.mxu1 %vm4974_vm8, %v11197_v6  ;;  %v4682_v48 = vadd.f32 %v4518_v46, %v10825_v35  ;;  %v4683_v12 = vadd.f32 %v4606_v1, %v10832_v3  ;;  %v12194_v1 = vld [vmem:[#allocation27_spill] sm:$0xff] }
 0x67e   :  { %v4750_v8 = vadd.f32 %v11117_v15, %v4682_v48  ;;  %v4751_v37 = vadd.f32 %v11120_v17, %v4683_v12 }
 0x680   :  { %v11209_v45 = vpop.f32.mrf.mxu0  ;;  %v4812_v43 = vmax.f32 %v4750_v8, 0.0  ;;  %v4813_v3 = vmax.f32 %v4751_v37, 0.0  ;;  %v7712_v37 = vld [vmem:[%s11863_s6 + $0x98] sm:$0xff] }
 0x681   :  { %v11211_v60 = vpop.f32.mrf.mxu1  ;;  %5374 = vmatpush.bf16.msra.mxu3 %v7712_v37 }
 0x683   :  { %v4520_v30 = vpop.f32.mrf.mxu2  ;;  %v4608_v10 = vpop.f32.mrf.mxu3 }
 0x684   :  { %v4684_v16 = vadd.f32 %v4520_v30, %v10842_v31  ;;  %v4685_v58 = vadd.f32 %v4608_v10, %v10849_v34  ;;  %v7710_v31 = vld [vmem:[%s11863_s6 + $0x88] sm:$0xff] }
 0x685   :  { %5280 = vmatpush.bf16.msra.mxu2 %v7710_v31 }
 0x686   :  { %v4752_v62 = vadd.f32 %v11117_v15, %v4684_v16  ;;  %v4753_v35 = vadd.f32 %v11120_v17, %v4685_v58 }
 0x688   :  { %v4814_v19 = vmax.f32 %v4752_v62, 0.0  ;;  %v4815_v46 = vmax.f32 %v4753_v35, 0.0  ;;  %7183 = vmatmul.msk.bf16.gmra.mxu2 %vm3056_vm5, %v12194_v1  ;;  %7199 = vmatmul.msk.bf16.gmra.mxu3 %vm3056_vm5, %v12194_v1  ;;  %v4203_v48 = vpop.f32.mrf.mxu0 }
 0x689   :  { %v11227_v34 = vadd.f32 %v4203_v48, %v11095_v53  ;;  %v4291_v12 = vpop.f32.mrf.mxu1  ;;  %v7709_v53 = vld [vmem:[%s11863_s6 + $0x80] sm:$0xff] }
 0x68a   :  { %v11229_v30 = vpack.c.bf16 %v4815_v46, %v4813_v3  ;;  %v11232_v10 = vadd.f32 %v4291_v12, %v11097_v27  ;;  %v11234_v8 = vpack.c.bf16 %v4814_v19, %v4812_v43  ;;  %5281 = vmatpush.bf16.msra.mxu2 %v7709_v53  ;;  %v7708_v43 = vld [vmem:[%s11863_s6 + $0x78] sm:$0xff]  ;;  %v4313_v19 = vadd.f32 %v10877_v61, %v10651_v44 }
 0x68b   :  { %v4523_v16 = vpop.f32.mrf.mxu2  ;;  %v4611_v58 = vpop.f32.mrf.mxu3  ;;  %v12195_v46 = vld [vmem:[#allocation13_spill] sm:$0xff] }
 0x68c   :  { %5046 = vmatmul.bf16.gmra.mxu0 %v11234_v8  ;;  %7246 = vmatmul.msk.bf16.gmra.mxu1 %vm4974_vm8, %v11229_v30  ;;  %v4686_v27 = vadd.f32 %v4523_v16, %v10861_v63  ;;  %v4687_v62 = vadd.f32 %v4611_v58, %v10868_v0  ;;  %v4314_v1 = vadd.f32 %v10879_v9, %v12195_v46  ;;  %v7707_v16 = vld [vmem:[%s11863_s6 + $0x70] sm:$0xff] }
 0x68e   :  { %5282 = vmatpush.bf16.msra.mxu2 %v7708_v43  ;;  %v4754_v12 = vadd.f32 %v11117_v15, %v4686_v27  ;;  %v4755_v63 = vadd.f32 %v11120_v17, %v4687_v62  ;;  %v12196_v43 = vld [vmem:[#allocation28_spill] sm:$0xff]  ;;  %v7706_v27 = vld [vmem:[%s11863_s6 + $0x68] sm:$0xff] }
 0x690   :  { %v4205_v35 = vpop.f32.mrf.mxu0  ;;  %v4816_v61 = vmax.f32 %v4754_v12, 0.0  ;;  %v4817_v9 = vmax.f32 %v4755_v63, 0.0  ;;  %v12198_v12 = vld [vmem:[#allocation5_spill] sm:$0xff] }
 0x691   :  { %v4293_v3 = vpop.f32.mrf.mxu1 }
 0x692   :  { %5283 = vmatpush.bf16.msra.mxu2 %v7707_v16 }
 0x693   :  { %v4525_v48 = vpop.f32.mrf.mxu2  ;;  %v4613_v31 = vpop.f32.mrf.mxu3 }
 0x694   :  { %v4688_v0 = vadd.f32 %v4525_v48, %v4313_v19  ;;  %v4689_v37 = vadd.f32 %v4613_v31, %v4314_v1  ;;  %v7705_v1 = vld [vmem:[%s11863_s6 + $0x60] sm:$0xff]  ;;  %v12197_v48 = vld [vmem:[#allocation48_spill] sm:$0xff] }
 0x696   :  { %v4756_v58 = vadd.f32 %v11117_v15, %v4688_v0  ;;  %v4757_v44 = vadd.f32 %v11120_v17, %v4689_v37  ;;  %5284 = vmatpush.bf16.msra.mxu2 %v7706_v27  ;;  %v7704_v0 = vld [vmem:[%s11863_s6 + $0x58] sm:$0xff] }
 0x697   :  { %v12199_v37 = vld [vmem:[#allocation29_spill] sm:$0xff] }
 0x698   :  { %v4818_v53 = vmax.f32 %v4756_v58, 0.0  ;;  %v4819_v35 = vmax.f32 %v4757_v44, 0.0  ;;  %7184 = vmatmul.msk.bf16.gmra.mxu2 %vm3056_vm5, %v12196_v43  ;;  %7200 = vmatmul.msk.bf16.gmra.mxu3 %vm3056_vm5, %v12196_v43  ;;  %v4317_v16 = vadd.f32 %v10911_v25, %v12199_v37  ;;  %v12200_v58 = vld [vmem:[#allocation40_spill] sm:$0xff] }
 0x699   :  { %v4318_v44 = vadd.f32 %v10913_v36, %v12200_v58  ;;  %v7711_v25 = vld [vmem:[%s11863_s6 + $0x90] sm:$0xff] }
 0x69a   :  { %v11268_v62 = vpack.c.bf16 %v4819_v35, %v4817_v9  ;;  %v11270_v3 = vpack.c.bf16 %v4818_v53, %v4816_v61  ;;  %5285 = vmatpush.bf16.msra.mxu2 %v7705_v1  ;;  %5375 = vmatpush.bf16.msra.mxu3 %v7711_v25 }
 0x69b   :  { %v4528_v19 = vpop.f32.mrf.mxu2  ;;  %v4616_v46 = vpop.f32.mrf.mxu3 }
 0x69c   :  { %5051 = vmatmul.bf16.gmra.mxu0 %v11270_v3  ;;  %7247 = vmatmul.msk.bf16.gmra.mxu1 %vm4974_vm8, %v11268_v62  ;;  %v4690_v31 = vadd.f32 %v4528_v19, %v12197_v48  ;;  %v4691_v63 = vadd.f32 %v4616_v46, %v12198_v12  ;;  %v7703_v19 = vld [vmem:[%s11863_s6 + $0x50] sm:$0xff] }
 0x69e   :  { %5286 = vmatpush.bf16.msra.mxu2 %v7704_v0  ;;  %v4758_v53 = vadd.f32 %v11117_v15, %v4690_v31  ;;  %v4759_v35 = vadd.f32 %v11120_v17, %v4691_v63  ;;  %v12201_v63 = vld [vmem:[#allocation3_spill] sm:$0xff] }
 0x6a0   :  { %v4820_v1 = vmax.f32 %v4758_v53, 0.0  ;;  %v4821_v48 = vmax.f32 %v4759_v35, 0.0  ;;  %v12203_v35 = vld [vmem:[#allocation33_spill] sm:$0xff] }
 0x6a2   :  { %5287 = vmatpush.bf16.msra.mxu2 %v7703_v19 }
 0x6a3   :  { %v4530_v61 = vpop.f32.mrf.mxu2  ;;  %v4618_v9 = vpop.f32.mrf.mxu3 }
 0x6a4   :  { %v4692_v43 = vadd.f32 %v4530_v61, %v4317_v16  ;;  %v4693_v27 = vadd.f32 %v4618_v9, %v4318_v44  ;;  %v12202_v9 = vld [vmem:[#allocation30_spill] sm:$0xff] }
 0x6a5   :  { %v4321_v53 = vadd.f32 %v10947_v20, %v12202_v9 }
 0x6a6   :  { %v4760_v46 = vadd.f32 %v11117_v15, %v4692_v43  ;;  %v4761_v36 = vadd.f32 %v11120_v17, %v4693_v27  ;;  %v4322_v43 = vadd.f32 %v10949_v50, %v12203_v35  ;;  %v12205_v35 = vld [vmem:[#allocation43_spill] sm:$0xff] }
 0x6a8   :  { %v4822_v31 = vmax.f32 %v4760_v46, 0.0  ;;  %v4823_v12 = vmax.f32 %v4761_v36, 0.0  ;;  %7185 = vmatmul.msk.bf16.gmra.mxu2 %vm3056_vm5, %v12201_v63  ;;  %7201 = vmatmul.msk.bf16.gmra.mxu3 %vm3056_vm5, %v12201_v63 }
 0x6aa   :  { %v11301_v0 = vpack.c.bf16 %v4823_v12, %v4821_v48  ;;  %v11303_v37 = vpack.c.bf16 %v4822_v31, %v4820_v1  ;;  %v12204_v31 = vld [vmem:[#allocation32_spill] sm:$0xff] }
 0x6ab   :  { %v4533_v16 = vpop.f32.mrf.mxu2  ;;  %v4621_v58 = vpop.f32.mrf.mxu3 }
 0x6ac   :  { %5056 = vmatmul.bf16.gmra.mxu0 %v11303_v37  ;;  %7248 = vmatmul.msk.bf16.gmra.mxu1 %vm4974_vm8, %v11301_v0  ;;  %v4694_v44 = vadd.f32 %v4533_v16, %v10931_v32  ;;  %v4695_v61 = vadd.f32 %v4621_v58, %v10938_v22  ;;  %v4372_v22 = vpack.c.bf16 %v12204_v31, %v12204_v31 }
 0x6ae   :  { %v4762_v25 = vadd.f32 %v11117_v15, %v4694_v44  ;;  %v4763_v46 = vadd.f32 %v11120_v17, %v4695_v61 }
 0x6b0   :  { %v4824_v12 = vmax.f32 %v4762_v25, 0.0  ;;  %v4825_v20 = vmax.f32 %v4763_v46, 0.0 }
 0x6b3   :  { %v4535_v27 = vpop.f32.mrf.mxu2  ;;  %v4623_v19 = vpop.f32.mrf.mxu3 }
 0x6b4   :  { %v4696_v36 = vadd.f32 %v4535_v27, %v4321_v53  ;;  %v4697_v1 = vadd.f32 %v4623_v19, %v4322_v43  ;;  %v4325_v43 = vadd.f32 %v10979_v23, %v12205_v35  ;;  %v12206_v27 = vld [vmem:[#allocation2_spill] sm:$0xff] }
 0x6b5   :  { %v4326_v19 = vadd.f32 %v10981_v54, %v12206_v27 }
 0x6b6   :  { %v4764_v48 = vadd.f32 %v11117_v15, %v4696_v36  ;;  %v4765_v32 = vadd.f32 %v11120_v17, %v4697_v1 }
 0x6b8   :  { %v4826_v63 = vmax.f32 %v4764_v48, 0.0  ;;  %v4827_v16 = vmax.f32 %v4765_v32, 0.0  ;;  %7186 = vmatmul.msk.bf16.gmra.mxu2 %vm3056_vm5, %v4372_v22  ;;  %7202 = vmatmul.msk.bf16.gmra.mxu3 %vm3056_vm5, %v4372_v22 }
 0x6ba   :  { %v11322_v50 = vpack.c.bf16 %v4827_v16, %v4825_v20  ;;  %v11324_v58 = vpack.c.bf16 %v4826_v63, %v4824_v12 }
 0x6bb   :  { %v4538_v44 = vpop.f32.mrf.mxu2  ;;  %v4626_v61 = vpop.f32.mrf.mxu3 }
 0x6bc   :  { %5061 = vmatmul.bf16.gmra.mxu0 %v11324_v58  ;;  %7249 = vmatmul.msk.bf16.gmra.mxu1 %vm4974_vm8, %v11322_v50  ;;  %v4698_v9 = vadd.f32 %v4538_v44, %v10964_v51  ;;  %v4699_v53 = vadd.f32 %v4626_v61, %v10971_v5 }
 0x6be   :  { %v4766_v36 = vadd.f32 %v11117_v15, %v4698_v9  ;;  %v4767_v1 = vadd.f32 %v11120_v17, %v4699_v53  ;;  %v12207_v9 = vld [vmem:[#allocation44_spill] sm:$0xff] }
 0x6bf   :  { %v12208_v53 = vld [vmem:[#allocation4_spill] sm:$0xff] }
 0x6c0   :  { %v4828_v22 = vmax.f32 %v4766_v36, 0.0  ;;  %v4829_v5 = vmax.f32 %v4767_v1, 0.0 }
 0x6c3   :  { %v4540_v25 = vpop.f32.mrf.mxu2  ;;  %v4628_v46 = vpop.f32.mrf.mxu3 }
 0x6c4   :  { %v4700_v48 = vadd.f32 %v4540_v25, %v4325_v43  ;;  %v4701_v32 = vadd.f32 %v4628_v46, %v4326_v19 }
 0x6c6   :  { %v4768_v31 = vadd.f32 %v11117_v15, %v4700_v48  ;;  %v4769_v51 = vadd.f32 %v11120_v17, %v4701_v32 }
 0x6c8   :  { %v4830_v12 = vmax.f32 %v4768_v31, 0.0  ;;  %v4831_v20 = vmax.f32 %v4769_v51, 0.0  ;;  %5288 = vmatmul.bf16.vlgmr.msra.gmra.mxu2 %v11139_v57  ;;  %7319 = vmatmul.msk.bf16.vlgmr.msra.gmra.mxu3 %vm4974_vm8, %v11141_v28  ;;  %v4329_v57 = vadd.f32 %v11012_v18, %v12207_v9  ;;  %v4330_v28 = vadd.f32 %v11017_v59, %v12208_v53  ;;  %v12211_v9 = vld [vmem:[#allocation58_spill] sm:$0xff] }
 0x6ca   :  { %v11342_v23 = vpack.c.bf16 %v4831_v20, %v4829_v5  ;;  %v11344_v54 = vpack.c.bf16 %v4830_v12, %v4828_v22 }
 0x6cb   :  { %v4543_v63 = vpop.f32.mrf.mxu2  ;;  %v4631_v16 = vpop.f32.mrf.mxu3 }
 0x6cc   :  { %5066 = vmatmul.bf16.gmra.mxu0 %v11344_v54  ;;  %7250 = vmatmul.msk.bf16.gmra.mxu1 %vm4974_vm8, %v11342_v23  ;;  %v4702_v44 = vadd.f32 %v4543_v63, %v10996_v40  ;;  %v4703_v61 = vadd.f32 %v4631_v16, %v11003_v55  ;;  %v12209_v16 = vld [vmem:[#allocation47_spill] sm:$0xff] }
 0x6ce   :  { %v4770_v27 = vadd.f32 %v11117_v15, %v4702_v44  ;;  %v4771_v19 = vadd.f32 %v11120_v17, %v4703_v61  ;;  %v4333_v44 = vadd.f32 %v11054_v47, %v12209_v16  ;;  %v12210_v61 = vld [vmem:[#allocation34_spill] sm:$0xff]  ;;  %v12214_v16 = vld [vmem:[#allocation51_spill] sm:$0xff] }
 0x6d0   :  { %v4832_v1 = vmax.f32 %v4770_v27, 0.0  ;;  %v4833_v55 = vmax.f32 %v4771_v19, 0.0 }
 0x6d3   :  { %v4545_v35 = vpop.f32.mrf.mxu2  ;;  %v4633_v43 = vpop.f32.mrf.mxu3 }
 0x6d4   :  { %v4704_v25 = vadd.f32 %v4545_v35, %v4329_v57  ;;  %v4705_v46 = vadd.f32 %v4633_v43, %v4330_v28  ;;  %v4334_v57 = vadd.f32 %v12211_v9, %v12210_v61 }
 0x6d6   :  { %v4772_v36 = vadd.f32 %v11117_v15, %v4704_v25  ;;  %v4773_v40 = vadd.f32 %v11120_v17, %v4705_v46 }
 0x6d8   :  { %v4834_v48 = vmax.f32 %v4772_v36, 0.0  ;;  %v4835_v32 = vmax.f32 %v4773_v40, 0.0  ;;  %5293 = vmatmul.bf16.gmra.mxu2 %v11173_v56  ;;  %7320 = vmatmul.msk.bf16.gmra.mxu3 %vm4974_vm8, %v11168_v4 }
 0x6d9   :  { %v5032_v18 = vpop.f32.mrf.mxu0  ;;  %v5120_v59 = vpop.f32.mrf.mxu1 }
 0x6da   :  { %v11362_v31 = vpack.c.bf16 %v4835_v32, %v4833_v55  ;;  %v11364_v51 = vadd.f32 %v5120_v59, %v5032_v18  ;;  %v11366_v22 = vpack.c.bf16 %v4834_v48, %v4832_v1 }
 0x6db   :  { %v4548_v5 = vpop.f32.mrf.mxu2  ;;  %v4636_v12 = vpop.f32.mrf.mxu3 }
 0x6dc   :  { %5071 = vmatmul.bf16.gmra.mxu0 %v11366_v22  ;;  %7251 = vmatmul.msk.bf16.gmra.mxu1 %vm4974_vm8, %v11362_v31  ;;  %v4706_v56 = vadd.f32 %v4548_v5, %v11038_v7  ;;  %v4707_v20 = vadd.f32 %v4636_v12, %v11045_v11  ;;  %v12212_v12 = vld [vmem:[#allocation37_spill] sm:$0xff] }
 0x6de   :  { %v4774_v43 = vadd.f32 %v11117_v15, %v4706_v56  ;;  %v4775_v27 = vadd.f32 %v11120_v17, %v4707_v20 }
 0x6e0   :  { %v4836_v46 = vmax.f32 %v4774_v43, 0.0  ;;  %v4837_v36 = vmax.f32 %v4775_v27, 0.0 }
 0x6e1   :  { %v5034_v4 = vpop.f32.mrf.mxu0  ;;  %v5122_v63 = vpop.f32.mrf.mxu1 }
 0x6e2   :  { %v11377_v53 = vadd.f32 %v5122_v63, %v5034_v4  ;;  %v12213_v4 = vld [vmem:[#allocation35_spill] sm:$0xff] }
 0x6e3   :  { %v4550_v28 = vpop.f32.mrf.mxu2  ;;  %v4638_v35 = vpop.f32.mrf.mxu3  ;;  %v4337_v63 = vadd.f32 %v11099_v49, %v12213_v4  ;;  %v12219_v4 = vld [vmem:[#allocation65_spill] sm:$0xff] }
 0x6e4   :  { %v4708_v19 = vadd.f32 %v4550_v28, %v4333_v44  ;;  %v4709_v7 = vadd.f32 %v4638_v35, %v4334_v57  ;;  %v12215_v44 = vld [vmem:[#allocation62_spill] sm:$0xff] }
 0x6e5   :  { %v4338_v61 = vadd.f32 %v12215_v44, %v12214_v16  ;;  %v12220_v16 = vld [vmem:[#allocation7_spill] sm:$0xff] }
 0x6e6   :  { %v4776_v11 = vadd.f32 %v11117_v15, %v4708_v19  ;;  %v4777_v25 = vadd.f32 %v11120_v17, %v4709_v7  ;;  %v4342_v44 = vadd.f32 %v11124_v14, %v12220_v16 }
 0x6e8   :  { %v4838_v47 = vmax.f32 %v4776_v11, 0.0  ;;  %v4839_v40 = vmax.f32 %v4777_v25, 0.0  ;;  %5298 = vmatmul.bf16.gmra.mxu2 %v11202_v38  ;;  %7321 = vmatmul.msk.bf16.gmra.mxu3 %vm4974_vm8, %v11197_v6 }
 0x6e9   :  { %v5037_v1 = vpop.f32.mrf.mxu0  ;;  %v5125_v55 = vpop.f32.mrf.mxu1 }
 0x6ea   :  { %v11386_v48 = vpack.c.bf16 %v4839_v40, %v4837_v36  ;;  %v11388_v32 = vadd.f32 %v5125_v55, %v5037_v1  ;;  %v11390_v18 = vpack.c.bf16 %v4838_v47, %v4836_v46 }
 0x6eb   :  { %v4553_v59 = vpop.f32.mrf.mxu2  ;;  %v4641_v5 = vpop.f32.mrf.mxu3 }
 0x6ec   :  { %5076 = vmatmul.bf16.gmra.mxu0 %v11390_v18  ;;  %7252 = vmatmul.msk.bf16.gmra.mxu1 %vm4974_vm8, %v11386_v48  ;;  %v4710_v38 = vadd.f32 %v4553_v59, %v12212_v12  ;;  %v4711_v56 = vadd.f32 %v4641_v5, %v11093_v24  ;;  %v12216_v12 = vld [vmem:[#allocation15_spill] sm:$0xff] }
 0x6ee   :  { %v4778_v35 = vadd.f32 %v11117_v15, %v4710_v38  ;;  %v4779_v43 = vadd.f32 %v11120_v17, %v4711_v56  ;;  %v12217_v38 = vld [vmem:[#allocation10_spill] sm:$0xff] }
 0x6f0   :  { %v4840_v11 = vmax.f32 %v4778_v35, 0.0  ;;  %v4841_v25 = vmax.f32 %v4779_v43, 0.0 }
 0x6f1   :  { %v5039_v6 = vpop.f32.mrf.mxu0  ;;  %v5127_v20 = vpop.f32.mrf.mxu1 }
 0x6f2   :  { %v11401_v9 = vadd.f32 %v5127_v20, %v5039_v6  ;;  %v12218_v20 = vld [vmem:[#allocation6_spill] sm:$0xff] }
 0x6f3   :  { %v4555_v57 = vpop.f32.mrf.mxu2  ;;  %v4643_v28 = vpop.f32.mrf.mxu3 }
 0x6f4   :  { %v4712_v27 = vadd.f32 %v4555_v57, %v4337_v63  ;;  %v4713_v19 = vadd.f32 %v4643_v28, %v4338_v61  ;;  %v4341_v63 = vadd.f32 %v12219_v4, %v12218_v20  ;;  %v12222_v20 = vld [vmem:[#allocation8_spill] sm:$0xff] }
 0x6f5   :  { %v4346_v4 = vadd.f32 %v11153_v52, %v12222_v20 }
 0x6f6   :  { %v4780_v24 = vadd.f32 %v11117_v15, %v4712_v27  ;;  %v4781_v7 = vadd.f32 %v11120_v17, %v4713_v19 }
 0x6f8   :  { %v4842_v49 = vmax.f32 %v4780_v24, 0.0  ;;  %v4843_v46 = vmax.f32 %v4781_v7, 0.0  ;;  %5303 = vmatmul.bf16.gmra.mxu2 %v11234_v8  ;;  %7322 = vmatmul.msk.bf16.gmra.mxu3 %vm4974_vm8, %v11229_v30 }
 0x6f9   :  { %v5042_v36 = vpop.f32.mrf.mxu0  ;;  %v5130_v47 = vpop.f32.mrf.mxu1 }
 0x6fa   :  { %v11410_v40 = vpack.c.bf16 %v4843_v46, %v4841_v25  ;;  %v11412_v1 = vadd.f32 %v5130_v47, %v5042_v36  ;;  %v11414_v55 = vpack.c.bf16 %v4842_v49, %v4840_v11 }
 0x6fb   :  { %v4558_v59 = vpop.f32.mrf.mxu2  ;;  %v4646_v5 = vpop.f32.mrf.mxu3 }
 0x6fc   :  { %5081 = vmatmul.bf16.gmra.mxu0 %v11414_v55  ;;  %7253 = vmatmul.msk.bf16.gmra.mxu1 %vm4974_vm8, %v11410_v40  ;;  %v4714_v8 = vadd.f32 %v4558_v59, %v12216_v12  ;;  %v4715_v56 = vadd.f32 %v4646_v5, %v12217_v38 }
 0x6fe   :  { %v4782_v35 = vadd.f32 %v11117_v15, %v4714_v8  ;;  %v4783_v43 = vadd.f32 %v11120_v17, %v4715_v56 }
 0x700   :  { %v4844_v11 = vmax.f32 %v4782_v35, 0.0  ;;  %v4845_v25 = vmax.f32 %v4783_v43, 0.0 }
 0x701   :  { %v5044_v30 = vpop.f32.mrf.mxu0  ;;  %v5132_v6 = vpop.f32.mrf.mxu1 }
 0x702   :  { %v11425_v61 = vadd.f32 %v5132_v6, %v5044_v30  ;;  %v12221_v30 = vld [vmem:[#allocation54_spill] sm:$0xff] }
 0x703   :  { %v4560_v57 = vpop.f32.mrf.mxu2  ;;  %v4648_v28 = vpop.f32.mrf.mxu3  ;;  %v4345_v6 = vadd.f32 %v11151_v33, %v12221_v30 }
 0x704   :  { %v4716_v27 = vadd.f32 %v4560_v57, %v4341_v63  ;;  %v4717_v19 = vadd.f32 %v4648_v28, %v4342_v44 }
 0x706   :  { %v4784_v24 = vadd.f32 %v11117_v15, %v4716_v27  ;;  %v4785_v7 = vadd.f32 %v11120_v17, %v4717_v19 }
 0x708   :  { %v4846_v49 = vmax.f32 %v4784_v24, 0.0  ;;  %v4847_v46 = vmax.f32 %v4785_v7, 0.0  ;;  %5308 = vmatmul.bf16.gmra.mxu2 %v11270_v3  ;;  %7323 = vmatmul.msk.bf16.gmra.mxu3 %vm4974_vm8, %v11268_v62 }
 0x709   :  { %v5047_v14 = vpop.f32.mrf.mxu0  ;;  %v5135_v36 = vpop.f32.mrf.mxu1 }
 0x70a   :  { %v11434_v47 = vpack.c.bf16 %v4847_v46, %v4845_v25  ;;  %v11436_v59 = vadd.f32 %v5135_v36, %v5047_v14  ;;  %v11438_v5 = vpack.c.bf16 %v4846_v49, %v4844_v11 }
 0x70b   :  { %v4563_v12 = vpop.f32.mrf.mxu2  ;;  %v4651_v8 = vpop.f32.mrf.mxu3 }
 0x70c   :  { %5086 = vmatmul.bf16.gmra.mxu0 %v11438_v5  ;;  %7254 = vmatmul.msk.bf16.gmra.mxu1 %vm4974_vm8, %v11434_v47  ;;  %v4718_v3 = vadd.f32 %v4563_v12, %v11137_v26  ;;  %v4719_v38 = vadd.f32 %v4651_v8, %v11144_v39  ;;  %v12223_v8 = vld [vmem:[#allocation57_spill] sm:$0xff] }
 0x70e   :  { %v4786_v57 = vadd.f32 %v11117_v15, %v4718_v3  ;;  %v4787_v28 = vadd.f32 %v11120_v17, %v4719_v38  ;;  %v4349_v3 = vadd.f32 %v11180_v29, %v12223_v8  ;;  %v12224_v38 = vld [vmem:[#allocation36_spill] sm:$0xff] }
 0x710   :  { %v4848_v27 = vmax.f32 %v4786_v57, 0.0  ;;  %v4849_v19 = vmax.f32 %v4787_v28, 0.0 }
 0x711   :  { %v5049_v62 = vpop.f32.mrf.mxu0  ;;  %v5137_v56 = vpop.f32.mrf.mxu1 }
 0x712   :  { %v11449_v63 = vadd.f32 %v5137_v56, %v5049_v62  ;;  %v4350_v62 = vadd.f32 %v11182_v42, %v12224_v38 }
 0x713   :  { %v4565_v16 = vpop.f32.mrf.mxu2  ;;  %v4653_v44 = vpop.f32.mrf.mxu3 }
 0x714   :  { %v4720_v35 = vadd.f32 %v4565_v16, %v4345_v6  ;;  %v4721_v26 = vadd.f32 %v4653_v44, %v4346_v4 }
 0x716   :  { %v4788_v39 = vadd.f32 %v11117_v15, %v4720_v35  ;;  %v4789_v43 = vadd.f32 %v11120_v17, %v4721_v26 }
 0x718   :  { %v4850_v33 = vmax.f32 %v4788_v39, 0.0  ;;  %v4851_v24 = vmax.f32 %v4789_v43, 0.0  ;;  %5313 = vmatmul.bf16.gmra.mxu2 %v11303_v37  ;;  %7324 = vmatmul.msk.bf16.gmra.mxu3 %vm4974_vm8, %v11301_v0 }
 0x719   :  { %v5052_v52 = vpop.f32.mrf.mxu0  ;;  %v5140_v7 = vpop.f32.mrf.mxu1 }
 0x71a   :  { %v11458_v11 = vpack.c.bf16 %v4851_v24, %v4849_v19  ;;  %v11460_v25 = vadd.f32 %v5140_v7, %v5052_v52  ;;  %v11462_v49 = vpack.c.bf16 %v4850_v33, %v4848_v27  ;;  %v12225_v52 = vld [vmem:[#allocation9_spill] sm:$0xff] }
 0x71b   :  { %v4568_v46 = vpop.f32.mrf.mxu2  ;;  %v4656_v14 = vpop.f32.mrf.mxu3  ;;  %v4353_v7 = vadd.f32 %v11209_v45, %v12225_v52 }
 0x71c   :  { %5091 = vmatmul.bf16.gmra.mxu0 %v11462_v49  ;;  %7255 = vmatmul.msk.bf16.gmra.mxu1 %vm4974_vm8, %v11458_v11  ;;  %v4722_v37 = vadd.f32 %v4568_v46, %v11166_v13  ;;  %v4723_v36 = vadd.f32 %v4656_v14, %v11171_v21  ;;  %v12226_v46 = vld [vmem:[#allocation61_spill] sm:$0xff] }
 0x71d   :  { %v4354_v14 = vadd.f32 %v11211_v60, %v12226_v46 }
 0x71e   :  { %v4790_v6 = vadd.f32 %v11117_v15, %v4722_v37  ;;  %v4791_v20 = vadd.f32 %v11120_v17, %v4723_v36 }
 0x720   :  { %v4852_v44 = vmax.f32 %v4790_v6, 0.0  ;;  %v4853_v57 = vmax.f32 %v4791_v20, 0.0 }
 0x721   :  { %v11469_v0 = vpop.f32.mrf.mxu0  ;;  %v11471_v12 = vpop.f32.mrf.mxu1 }
 0x723   :  { %v4570_v56 = vpop.f32.mrf.mxu2  ;;  %v4658_v30 = vpop.f32.mrf.mxu3 }
 0x724   :  { %v4724_v4 = vadd.f32 %v4570_v56, %v4349_v3  ;;  %v4725_v13 = vadd.f32 %v4658_v30, %v4350_v62 }
 0x726   :  { %v4792_v21 = vadd.f32 %v11117_v15, %v4724_v4  ;;  %v4793_v16 = vadd.f32 %v11120_v17, %v4725_v13 }
 0x728   :  { %v4854_v28 = vmax.f32 %v4792_v21, 0.0  ;;  %v4855_v35 = vmax.f32 %v4793_v16, 0.0  ;;  %5318 = vmatmul.bf16.gmra.mxu2 %v11324_v58  ;;  %7325 = vmatmul.msk.bf16.gmra.mxu3 %vm4974_vm8, %v11322_v50 }
 0x729   :  { %v5057_v29 = vpop.f32.mrf.mxu0  ;;  %v5145_v42 = vpop.f32.mrf.mxu1 }
 0x72a   :  { %v11484_v26 = vpack.c.bf16 %v4855_v35, %v4853_v57  ;;  %v11486_v39 = vadd.f32 %v5145_v42, %v5057_v29  ;;  %v11488_v43 = vpack.c.bf16 %v4854_v28, %v4852_v44 }
 0x72b   :  { %v4573_v27 = vpop.f32.mrf.mxu2  ;;  %v4661_v19 = vpop.f32.mrf.mxu3 }
 0x72c   :  { %5096 = vmatmul.bf16.gmra.mxu0 %v11488_v43  ;;  %7256 = vmatmul.msk.bf16.gmra.mxu1 %vm4974_vm8, %v11484_v26  ;;  %v4726_v58 = vadd.f32 %v4573_v27, %v11195_v2  ;;  %v4727_v33 = vadd.f32 %v4661_v19, %v11200_v41 }
 0x72e   :  { %v4794_v8 = vadd.f32 %v11117_v15, %v4726_v58  ;;  %v4795_v3 = vadd.f32 %v11120_v17, %v4727_v33 }
 0x730   :  { %v4856_v56 = vmax.f32 %v4794_v8, 0.0  ;;  %v4857_v30 = vmax.f32 %v4795_v3, 0.0 }
 0x731   :  { %v11495_v50 = vpop.f32.mrf.mxu0  ;;  %v11497_v24 = vpop.f32.mrf.mxu1 }
 0x733   :  { %v4575_v37 = vpop.f32.mrf.mxu2  ;;  %v4663_v36 = vpop.f32.mrf.mxu3 }
 0x734   :  { %v4728_v38 = vadd.f32 %v4575_v37, %v4353_v7  ;;  %v4729_v2 = vadd.f32 %v4663_v36, %v4354_v14 }
 0x736   :  { %v4796_v41 = vadd.f32 %v11117_v15, %v4728_v38  ;;  %v4797_v62 = vadd.f32 %v11120_v17, %v4729_v2 }
 0x738   :  { %v4858_v6 = vmax.f32 %v4796_v41, 0.0  ;;  %v4859_v20 = vmax.f32 %v4797_v62, 0.0  ;;  %5323 = vmatmul.bf16.gmra.mxu2 %v11344_v54  ;;  %7326 = vmatmul.msk.bf16.gmra.mxu3 %vm4974_vm8, %v11342_v23 }
 0x739   :  { %v5062_v45 = vpop.f32.mrf.mxu0  ;;  %v5150_v60 = vpop.f32.mrf.mxu1 }
 0x73a   :  { %v11510_v4 = vpack.c.bf16 %v4859_v20, %v4857_v30  ;;  %v11512_v13 = vadd.f32 %v5150_v60, %v5062_v45  ;;  %v11514_v21 = vpack.c.bf16 %v4858_v6, %v4856_v56 }
 0x73b   :  { %v4578_v16 = vpop.f32.mrf.mxu2  ;;  %v4666_v44 = vpop.f32.mrf.mxu3 }
 0x73c   :  { %5101 = vmatmul.bf16.gmra.mxu0 %v11514_v21  ;;  %7257 = vmatmul.msk.bf16.gmra.mxu1 %vm4974_vm8, %v11510_v4  ;;  %v4730_v54 = vadd.f32 %v4578_v16, %v11227_v34  ;;  %v4731_v57 = vadd.f32 %v4666_v44, %v11232_v10 }
 0x73e   :  { %v4798_v35 = vadd.f32 %v11117_v15, %v4730_v54  ;;  %v4799_v29 = vadd.f32 %v11120_v17, %v4731_v57 }
 0x740   :  { %v4860_v19 = vmax.f32 %v4798_v35, 0.0  ;;  %v4861_v58 = vmax.f32 %v4799_v29, 0.0 }
 0x741   :  { %v11521_v23 = vpop.f32.mrf.mxu0  ;;  %v11523_v28 = vpop.f32.mrf.mxu1 }
 0x742   :  { %v11530_v10 = vpack.c.bf16 %v4860_v19, %v4860_v19  ;;  %v11532_v52 = vpack.c.bf16 %v4861_v58, %v4861_v58 }
 0x743   :  { %v4580_v42 = vpop.f32.mrf.mxu2  ;;  %v4668_v27 = vpop.f32.mrf.mxu3 }
 0x748   :  { %5328 = vmatmul.bf16.gmra.mxu2 %v11366_v22  ;;  %7327 = vmatmul.msk.bf16.gmra.mxu3 %vm4974_vm8, %v11362_v31 }
 0x749   :  { %v5067_v34 = vpop.f32.mrf.mxu0  ;;  %v5155_v33 = vpop.f32.mrf.mxu1 }
 0x74a   :  { %v11534_v7 = vadd.f32 %v5155_v33, %v5067_v34 }
 0x74b   :  { %v5289_v15 = vpop.f32.mrf.mxu2  ;;  %v5377_v46 = vpop.f32.mrf.mxu3 }
 0x74c   :  { %v5378_v17 = vadd.f32 %v5377_v46, %v5289_v15  ;;  %5106 = vmatmul.bf16.gmra.mxu0 %v11530_v10  ;;  %7258 = vmatmul.msk.bf16.gmra.mxu1 %vm4974_vm8, %v11532_v52 }
 0x74e   :  { %v5456_v22 = vmax.f32 %v11364_v51, %v5378_v17 }
 0x750   :  { %v5519_v38 = vrot.slane %v5456_v22, 2 }
 0x751   :  { %v11540_v14 = vpop.f32.mrf.mxu0  ;;  %v11542_v31 = vpop.f32.mrf.mxu1 }
 0x753   :  { %v5291_v37 = vpop.f32.mrf.mxu2  ;;  %v5379_v36 = vpop.f32.mrf.mxu3 }
 0x754   :  { %v5380_v8 = vadd.f32 %v5379_v36, %v5291_v37 }
 0x756   :  { %v5457_v3 = vmax.f32 %v11377_v53, %v5380_v8 }
 0x758   :  { %v5520_v2 = vrot.slane %v5457_v3, 2  ;;  %5333 = vmatmul.bf16.gmra.mxu2 %v11390_v18  ;;  %7328 = vmatmul.msk.bf16.gmra.mxu3 %vm4974_vm8, %v11386_v48 }
 0x759   :  { %v5072_v41 = vpop.f32.mrf.mxu0  ;;  %v5160_v62 = vpop.f32.mrf.mxu1 }
 0x75a   :  { %v11548_v56 = vadd.f32 %v5160_v62, %v5072_v41  ;;  %v5521_v51 = vsel %vm3585_vm6, %v5519_v38, %v5520_v2 }
 0x75b   :  { %v5294_v30 = vpop.f32.mrf.mxu2  ;;  %v5382_v6 = vpop.f32.mrf.mxu3  ;;  %v5611_v20 = vmax.f32 %v5456_v22, %v5521_v51 }
 0x75c   :  { %v5383_v45 = vadd.f32 %v5382_v6, %v5294_v30 }
 0x75e   :  { %v5458_v60 = vmax.f32 %v11388_v32, %v5383_v45 }
 0x760   :  { %v5522_v53 = vrot.slane %v5458_v60, 2 }
 0x761   :  { %v5074_v16 = vpop.f32.mrf.mxu0  ;;  %v5162_v44 = vpop.f32.mrf.mxu1 }
 0x762   :  { %v11552_v54 = vadd.f32 %v5162_v44, %v5074_v16  ;;  %v5523_v18 = vsel %vm3585_vm6, %v5520_v2, %v5522_v53 }
 0x763   :  { %v5296_v48 = vpop.f32.mrf.mxu2  ;;  %v5384_v57 = vpop.f32.mrf.mxu3  ;;  %v5612_v35 = vmax.f32 %v5457_v3, %v5523_v18 }
 0x764   :  { %v5385_v29 = vadd.f32 %v5384_v57, %v5296_v48 }
 0x765   :  { %v11555_v42 = vpack.c.bf16 %v5612_v35, %v5611_v20 }
 0x766   :  { %v5459_v27 = vmax.f32 %v11401_v9, %v5385_v29 }
 0x768   :  { %v5524_v19 = vrot.slane %v5459_v27, 2  ;;  %5338 = vmatmul.bf16.gmra.mxu2 %v11414_v55  ;;  %7329 = vmatmul.msk.bf16.gmra.mxu3 %vm4974_vm8, %v11410_v40 }
 0x769   :  { %v5077_v32 = vpop.f32.mrf.mxu0  ;;  %v5165_v58 = vpop.f32.mrf.mxu1 }
 0x76a   :  { %v11561_v34 = vadd.f32 %v5165_v58, %v5077_v32  ;;  %v5525_v33 = vsel %vm3585_vm6, %v5522_v53, %v5524_v19 }
 0x76b   :  { %v5299_v15 = vpop.f32.mrf.mxu2  ;;  %v5387_v46 = vpop.f32.mrf.mxu3  ;;  %v5613_v17 = vmax.f32 %v5458_v60, %v5525_v33 }
 0x76c   :  { %v5388_v22 = vadd.f32 %v5387_v46, %v5299_v15 }
 0x76e   :  { %v5460_v37 = vmax.f32 %v11412_v1, %v5388_v22 }
 0x770   :  { %v5526_v36 = vrot.slane %v5460_v37, 2 }
 0x771   :  { %v5079_v9 = vpop.f32.mrf.mxu0  ;;  %v5167_v8 = vpop.f32.mrf.mxu1 }
 0x772   :  { %v11565_v3 = vadd.f32 %v5167_v8, %v5079_v9  ;;  %v5527_v55 = vsel %vm3585_vm6, %v5524_v19, %v5526_v36 }
 0x773   :  { %v5301_v40 = vpop.f32.mrf.mxu2  ;;  %v5389_v38 = vpop.f32.mrf.mxu3  ;;  %v5614_v2 = vmax.f32 %v5459_v27, %v5527_v55 }
 0x774   :  { %v5390_v41 = vadd.f32 %v5389_v38, %v5301_v40 }
 0x775   :  { %v11568_v62 = vpack.c.bf16 %v5614_v2, %v5613_v17 }
 0x776   :  { %v5461_v51 = vmax.f32 %v11425_v61, %v5390_v41 }
 0x778   :  { %v5528_v30 = vrot.slane %v5461_v51, 2  ;;  %5343 = vmatmul.bf16.gmra.mxu2 %v11438_v5  ;;  %7330 = vmatmul.msk.bf16.gmra.mxu3 %vm4974_vm8, %v11434_v47 }
 0x779   :  { %v5082_v1 = vpop.f32.mrf.mxu0  ;;  %v5170_v6 = vpop.f32.mrf.mxu1 }
 0x77a   :  { %v11574_v20 = vadd.f32 %v5170_v6, %v5082_v1  ;;  %v5529_v45 = vsel %vm3585_vm6, %v5526_v36, %v5528_v30  ;;  %v5143_v1 = vadd.f32 %v11471_v12, %v11469_v0 }
 0x77b   :  { %v5304_v60 = vpop.f32.mrf.mxu2  ;;  %v5392_v53 = vpop.f32.mrf.mxu3  ;;  %v5615_v16 = vmax.f32 %v5460_v37, %v5529_v45 }
 0x77c   :  { %v5393_v44 = vadd.f32 %v5392_v53, %v5304_v60 }
 0x77e   :  { %v5462_v18 = vmax.f32 %v11436_v59, %v5393_v44 }
 0x780   :  { %v5530_v48 = vrot.slane %v5462_v18, 2 }
 0x781   :  { %v5084_v61 = vpop.f32.mrf.mxu0  ;;  %v5172_v57 = vpop.f32.mrf.mxu1 }
 0x782   :  { %v11578_v35 = vadd.f32 %v5172_v57, %v5084_v61  ;;  %v5531_v5 = vsel %vm3585_vm6, %v5528_v30, %v5530_v48 }
 0x783   :  { %v5306_v47 = vpop.f32.mrf.mxu2  ;;  %v5394_v29 = vpop.f32.mrf.mxu3  ;;  %v5616_v27 = vmax.f32 %v5461_v51, %v5531_v5 }
 0x784   :  { %v5395_v19 = vadd.f32 %v5394_v29, %v5306_v47 }
 0x785   :  { %v11581_v32 = vpack.c.bf16 %v5616_v27, %v5615_v16 }
 0x786   :  { %v5463_v58 = vmax.f32 %v11449_v63, %v5395_v19 }
 0x788   :  { %v5532_v33 = vrot.slane %v5463_v58, 2  ;;  %5348 = vmatmul.bf16.gmra.mxu2 %v11462_v49  ;;  %7331 = vmatmul.msk.bf16.gmra.mxu3 %vm4974_vm8, %v11458_v11 }
 0x789   :  { %v5087_v59 = vpop.f32.mrf.mxu0  ;;  %v5175_v15 = vpop.f32.mrf.mxu1 }
 0x78a   :  { %v11587_v46 = vadd.f32 %v5175_v15, %v5087_v59  ;;  %v5533_v17 = vsel %vm3585_vm6, %v5530_v48, %v5532_v33 }
 0x78b   :  { %v5309_v22 = vpop.f32.mrf.mxu2  ;;  %v5397_v37 = vpop.f32.mrf.mxu3  ;;  %v5617_v36 = vmax.f32 %v5462_v18, %v5533_v17 }
 0x78c   :  { %v5398_v9 = vadd.f32 %v5397_v37, %v5309_v22 }
 0x78e   :  { %v5464_v8 = vmax.f32 %v11460_v25, %v5398_v9 }
 0x790   :  { %v5534_v55 = vrot.slane %v5464_v8, 2 }
 0x791   :  { %v5089_v63 = vpop.f32.mrf.mxu0  ;;  %v5177_v40 = vpop.f32.mrf.mxu1 }
 0x792   :  { %v11591_v38 = vadd.f32 %v5177_v40, %v5089_v63  ;;  %v5535_v49 = vsel %vm3585_vm6, %v5532_v33, %v5534_v55  ;;  %v5148_v33 = vadd.f32 %v11497_v24, %v11495_v50 }
 0x793   :  { %v5311_v11 = vpop.f32.mrf.mxu2  ;;  %v5399_v2 = vpop.f32.mrf.mxu3  ;;  %v5618_v41 = vmax.f32 %v5463_v58, %v5535_v49 }
 0x794   :  { %v5400_v51 = vadd.f32 %v5399_v2, %v5311_v11 }
 0x795   :  { %v11594_v30 = vpack.c.bf16 %v5618_v41, %v5617_v36 }
 0x796   :  { %v5465_v6 = vmax.f32 %v5143_v1, %v5400_v51  ;;  %v5153_v1 = vadd.f32 %v11523_v28, %v11521_v23 }
 0x798   :  { %5353 = vmatmul.bf16.gmra.mxu2 %v11488_v43  ;;  %7332 = vmatmul.msk.bf16.gmra.mxu3 %vm4974_vm8, %v11484_v26  ;;  %v5536_v44 = vrot.slane %v5465_v6, 2 }
 0x799   :  { %v5092_v25 = vpop.f32.mrf.mxu0  ;;  %v5180_v45 = vpop.f32.mrf.mxu1 }
 0x79a   :  { %v11601_v60 = vadd.f32 %v5180_v45, %v5092_v25  ;;  %v5537_v57 = vsel %vm3585_vm6, %v5534_v55, %v5536_v44 }
 0x79b   :  { %v5314_v53 = vpop.f32.mrf.mxu2  ;;  %v5402_v16 = vpop.f32.mrf.mxu3  ;;  %v5619_v29 = vmax.f32 %v5464_v8, %v5537_v57 }
 0x79c   :  { %v5403_v18 = vadd.f32 %v5402_v16, %v5314_v53 }
 0x79e   :  { %v5466_v48 = vmax.f32 %v11486_v39, %v5403_v18 }
 0x7a0   :  { %v5538_v61 = vrot.slane %v5466_v48, 2 }
 0x7a1   :  { %v5094_v0 = vpop.f32.mrf.mxu0  ;;  %v5182_v12 = vpop.f32.mrf.mxu1 }
 0x7a2   :  { %v11605_v5 = vadd.f32 %v5182_v12, %v5094_v0  ;;  %v5539_v43 = vsel %vm3585_vm6, %v5536_v44, %v5538_v61 }
 0x7a3   :  { %v5316_v26 = vpop.f32.mrf.mxu2  ;;  %v5404_v47 = vpop.f32.mrf.mxu3  ;;  %v5620_v27 = vmax.f32 %v5465_v6, %v5539_v43 }
 0x7a4   :  { %v5405_v19 = vadd.f32 %v5404_v47, %v5316_v26  ;;  %v5158_v47 = vadd.f32 %v11542_v31, %v11540_v14 }
 0x7a5   :  { %v11608_v58 = vpack.c.bf16 %v5620_v27, %v5619_v29 }
 0x7a6   :  { %v5467_v39 = vmax.f32 %v5148_v33, %v5405_v19 }
 0x7a8   :  { %5358 = vmatmul.bf16.gmra.mxu2 %v11514_v21  ;;  %7333 = vmatmul.msk.bf16.gmra.mxu3 %vm4974_vm8, %v11510_v4  ;;  %v5540_v36 = vrot.slane %v5467_v39, 2 }
 0x7a9   :  { %v5097_v59 = vpop.f32.mrf.mxu0  ;;  %v5185_v15 = vpop.f32.mrf.mxu1 }
 0x7aa   :  { %v11615_v17 = vadd.f32 %v5185_v15, %v5097_v59  ;;  %v5541_v63 = vsel %vm3585_vm6, %v5538_v61, %v5540_v36 }
 0x7ab   :  { %v5319_v22 = vpop.f32.mrf.mxu2  ;;  %v5407_v37 = vpop.f32.mrf.mxu3  ;;  %v5621_v11 = vmax.f32 %v5466_v48, %v5541_v63 }
 0x7ac   :  { %v5408_v9 = vadd.f32 %v5407_v37, %v5319_v22 }
 0x7ae   :  { %v5468_v8 = vmax.f32 %v11512_v13, %v5408_v9 }
 0x7b0   :  { %v5542_v55 = vrot.slane %v5468_v8, 2 }
 0x7b1   :  { %v5099_v50 = vpop.f32.mrf.mxu0  ;;  %v5187_v24 = vpop.f32.mrf.mxu1 }
 0x7b2   :  { %v11619_v40 = vadd.f32 %v5187_v24, %v5099_v50  ;;  %v5543_v21 = vsel %vm3585_vm6, %v5540_v36, %v5542_v55 }
 0x7b3   :  { %v5321_v4 = vpop.f32.mrf.mxu2  ;;  %v5409_v49 = vpop.f32.mrf.mxu3  ;;  %v5622_v2 = vmax.f32 %v5467_v39, %v5543_v21 }
 0x7b4   :  { %v5410_v41 = vadd.f32 %v5409_v49, %v5321_v4 }
 0x7b5   :  { %v5652_v51 = vpack.c.bf16 %v5622_v2, %v5621_v11 }
 0x7b6   :  { %v5469_v6 = vmax.f32 %v5153_v1, %v5410_v41 }
 0x7b8   :  { %5363 = vmatmul.bf16.gmra.mxu2 %v11530_v10  ;;  %7334 = vmatmul.msk.bf16.gmra.mxu3 %vm4974_vm8, %v11532_v52  ;;  %v5544_v44 = vrot.slane %v5469_v6, 2 }
 0x7b9   :  { %v5102_v13 = vpop.f32.mrf.mxu0  ;;  %v5190_v25 = vpop.f32.mrf.mxu1 }
 0x7ba   :  { %v11627_v45 = vadd.f32 %v5190_v25, %v5102_v13  ;;  %v5545_v57 = vsel %vm3585_vm6, %v5542_v55, %v5544_v44 }
 0x7bb   :  { %v5324_v53 = vpop.f32.mrf.mxu2  ;;  %v5412_v16 = vpop.f32.mrf.mxu3  ;;  %v5623_v43 = vmax.f32 %v5468_v8, %v5545_v57 }
 0x7bc   :  { %v5413_v18 = vadd.f32 %v5412_v16, %v5324_v53 }
 0x7be   :  { %v5470_v48 = vmax.f32 %v11534_v7, %v5413_v18 }
 0x7c0   :  { %v5546_v61 = vrot.slane %v5470_v48, 2 }
 0x7c1   :  { %v5104_v23 = vpop.f32.mrf.mxu0  ;;  %v5192_v28 = vpop.f32.mrf.mxu1 }
 0x7c2   :  { %v11631_v0 = vadd.f32 %v5192_v28, %v5104_v23  ;;  %v5547_v10 = vsel %vm3585_vm6, %v5544_v44, %v5546_v61 }
 0x7c3   :  { %v5326_v52 = vpop.f32.mrf.mxu2  ;;  %v5414_v12 = vpop.f32.mrf.mxu3  ;;  %v5624_v26 = vmax.f32 %v5469_v6, %v5547_v10 }
 0x7c4   :  { %v5415_v29 = vadd.f32 %v5414_v12, %v5326_v52 }
 0x7c5   :  { %v5653_v27 = vpack.c.bf16 %v5624_v26, %v5623_v43 }
 0x7c6   :  { %v5471_v19 = vmax.f32 %v5158_v47, %v5415_v29 }
 0x7c8   :  { %v5548_v7 = vrot.slane %v5471_v19, 2 }
 0x7c9   :  { %v5107_v33 = vpop.f32.mrf.mxu0  ;;  %v5195_v39 = vpop.f32.mrf.mxu1 }
 0x7ca   :  { %v5549_v59 = vsel %vm3585_vm6, %v5546_v61, %v5548_v7  ;;  %v11637_v15 = vadd.f32 %v5195_v39, %v5107_v33 }
 0x7cb   :  { %v5329_v22 = vpop.f32.mrf.mxu2  ;;  %v5417_v37 = vpop.f32.mrf.mxu3  ;;  %v5625_v36 = vmax.f32 %v5470_v48, %v5549_v59 }
 0x7cc   :  { %v5418_v9 = vadd.f32 %v5417_v37, %v5329_v22 }
 0x7ce   :  { %v5472_v8 = vmax.f32 %v11548_v56, %v5418_v9 }
 0x7d0   :  { %v5550_v55 = vrot.slane %v5472_v8, 2 }
 0x7d1   :  { %v5109_v63 = vpop.f32.mrf.mxu0  ;;  %v5197_v50 = vpop.f32.mrf.mxu1 }
 0x7d2   :  { %v5551_v14 = vsel %vm3585_vm6, %v5548_v7, %v5550_v55 }
 0x7d3   :  { %v5331_v31 = vpop.f32.mrf.mxu2  ;;  %v5419_v24 = vpop.f32.mrf.mxu3  ;;  %v5626_v21 = vmax.f32 %v5471_v19, %v5551_v14 }
 0x7d4   :  { %v5420_v4 = vadd.f32 %v5419_v24, %v5331_v31 }
 0x7d5   :  { %v5654_v49 = vpack.c.bf16 %v5626_v21, %v5625_v36 }
 0x7d6   :  { %v5473_v11 = vmax.f32 %v11552_v54, %v5420_v4 }
 0x7d7   :  { %5703 = vmatpush.bf16.msrb.mxu0 %v5654_v49  ;;  %7758 = vmatpush.bf16.msrb.mxu3 %v5654_v49 }
 0x7d8   :  { %v5552_v2 = vrot.slane %v5473_v11, 2 }
 0x7da   :  { %v5553_v41 = vsel %vm3585_vm6, %v5550_v55, %v5552_v2 }
 0x7db   :  { %v5334_v1 = vpop.f32.mrf.mxu2  ;;  %v5422_v6 = vpop.f32.mrf.mxu3  ;;  %5704 = vmatpush.bf16.msrb.mxu0 %v5653_v27  ;;  %7759 = vmatpush.bf16.msrb.mxu3 %v5653_v27  ;;  %v5627_v56 = vmax.f32 %v5472_v8, %v5553_v41 }
 0x7dc   :  { %v5423_v13 = vadd.f32 %v5422_v6, %v5334_v1 }
 0x7de   :  { %v5474_v25 = vmax.f32 %v11561_v34, %v5423_v13 }
 0x7df   :  { %5705 = vmatpush.bf16.msrb.mxu0 %v5652_v51  ;;  %7760 = vmatpush.bf16.msrb.mxu3 %v5652_v51 }
 0x7e0   :  { %v5554_v53 = vrot.slane %v5474_v25, 2 }
 0x7e2   :  { %v5555_v16 = vsel %vm3585_vm6, %v5552_v2, %v5554_v53 }
 0x7e3   :  { %v5336_v44 = vpop.f32.mrf.mxu2  ;;  %v5424_v54 = vpop.f32.mrf.mxu3  ;;  %5706 = vmatpush.bf16.msrb.mxu0 %v11608_v58  ;;  %7761 = vmatpush.bf16.msrb.mxu3 %v11608_v58  ;;  %v5628_v18 = vmax.f32 %v5473_v11, %v5555_v16 }
 0x7e4   :  { %v5425_v48 = vadd.f32 %v5424_v54, %v5336_v44 }
 0x7e5   :  { %v11647_v61 = vpack.c.bf16 %v5628_v18, %v5627_v56 }
 0x7e6   :  { %v5475_v57 = vmax.f32 %v11565_v3, %v5425_v48 }
 0x7e7   :  { %5707 = vmatpush.bf16.msrb.mxu0 %v11594_v30  ;;  %7762 = vmatpush.bf16.msrb.mxu3 %v11594_v30 }
 0x7e8   :  { %v5556_v34 = vrot.slane %v5475_v57, 2 }
 0x7ea   :  { %v5557_v51 = vsel %vm3585_vm6, %v5554_v53, %v5556_v34 }
 0x7eb   :  { %v5339_v23 = vpop.f32.mrf.mxu2  ;;  %v5427_v28 = vpop.f32.mrf.mxu3  ;;  %5708 = vmatpush.bf16.msrb.mxu0 %v11581_v32  ;;  %7763 = vmatpush.bf16.msrb.mxu3 %v11581_v32  ;;  %v5629_v58 = vmax.f32 %v5474_v25, %v5557_v51 }
 0x7ec   :  { %v5428_v10 = vadd.f32 %v5427_v28, %v5339_v23 }
 0x7ee   :  { %v5476_v52 = vmax.f32 %v11574_v20, %v5428_v10 }
 0x7ef   :  { %5709 = vmatpush.bf16.msrb.mxu0 %v11568_v62  ;;  %7764 = vmatpush.bf16.msrb.mxu3 %v11568_v62 }
 0x7f0   :  { %v5558_v3 = vrot.slane %v5476_v52, 2 }
 0x7f2   :  { %v5559_v30 = vsel %vm3585_vm6, %v5556_v34, %v5558_v3 }
 0x7f3   :  { %v5341_v12 = vpop.f32.mrf.mxu2  ;;  %v5429_v43 = vpop.f32.mrf.mxu3  ;;  %5710 = vmatpush.bf16.msrb.mxu0 %v11555_v42  ;;  %7765 = vmatpush.bf16.msrb.mxu3 %v11555_v42  ;;  %v5630_v26 = vmax.f32 %v5475_v57, %v5559_v30 }
 0x7f4   :  { %v5430_v47 = vadd.f32 %v5429_v43, %v5341_v12 }
 0x7f5   :  { %v11661_v32 = vpack.c.bf16 %v5630_v26, %v5629_v58 }
 0x7f6   :  { %v5477_v29 = vmax.f32 %v11578_v35, %v5430_v47 }
 0x7f8   :  { %v5560_v20 = vrot.slane %v5477_v29, 2 }
 0x7fa   :  { %v5561_v27 = vsel %vm3585_vm6, %v5558_v3, %v5560_v20 }
 0x7fb   :  { %v5344_v19 = vpop.f32.mrf.mxu2  ;;  %v5432_v62 = vpop.f32.mrf.mxu3  ;;  %v5631_v7 = vmax.f32 %v5476_v52, %v5561_v27 }
 0x7fc   :  { %v5433_v33 = vadd.f32 %v5432_v62, %v5344_v19 }
 0x7fe   :  { %v5478_v39 = vmax.f32 %v11587_v46, %v5433_v33 }
 0x800   :  { %v5562_v59 = vrot.slane %v5478_v39, 2 }
 0x802   :  { %v5563_v22 = vsel %vm3585_vm6, %v5560_v20, %v5562_v59 }
 0x803   :  { %v5346_v37 = vpop.f32.mrf.mxu2  ;;  %v5434_v42 = vpop.f32.mrf.mxu3  ;;  %v5632_v36 = vmax.f32 %v5477_v29, %v5563_v22 }
 0x804   :  { %v5435_v9 = vadd.f32 %v5434_v42, %v5346_v37 }
 0x805   :  { %v11667_v8 = vpack.c.bf16 %v5632_v36, %v5631_v7 }
 0x806   :  { %v5479_v35 = vmax.f32 %v11591_v38, %v5435_v9  ;;  %v7770_v9 = vmov 0  }
 0x808   :  { %v5564_v55 = vrot.slane %v5479_v35, 2 }
 0x80a   :  { %v5565_v63 = vsel %vm3585_vm6, %v5562_v59, %v5564_v55  ;;  %v7714_v59 = vld [vmem:[%s11865_s7 + $0x4] sm:$0xf0] }
 0x80b   :  { %v5349_v50 = vpop.f32.mrf.mxu2  ;;  %v5437_v14 = vpop.f32.mrf.mxu3  ;;  %v5633_v31 = vmax.f32 %v5478_v39, %v5565_v63 }
 0x80c   :  { %v5438_v24 = vadd.f32 %v5437_v14, %v5349_v50 }
 0x80e   :  { %v5480_v46 = vmax.f32 %v11601_v60, %v5438_v24 }
 0x810   :  { %v5566_v21 = vrot.slane %v5480_v46, 2 }
 0x812   :  { %v5567_v4 = vsel %vm3585_vm6, %v5564_v55, %v5566_v21 }
 0x813   :  { %v5351_v49 = vpop.f32.mrf.mxu2  ;;  %v5439_v11 = vpop.f32.mrf.mxu3  ;;  %v5634_v2 = vmax.f32 %v5479_v35, %v5567_v4  ;;  %v5699_v35 = vsel %vm5697_vm9, 65535, %v7770_v9  ;;  %v7716_v4 = vld [vmem:[%s11865_s7 + $0x14] sm:$0xf0] }
 0x814   :  { %v5440_v41 = vadd.f32 %v5439_v11, %v5351_v49  ;;  %v7724_v11 = vld [vmem:[%s11866_s8 + $0x38] sm:$0xff] }
 0x815   :  { %v11673_v1 = vpack.c.bf16 %v5634_v2, %v5633_v31  ;;  %v7726_v31 = vld [vmem:[%s11866_s8 + $0x48] sm:$0xff]  ;;  %v5646_v2 = vld [vmem:[%s11865_s7 + $0x20] sm:$0xff] }
 0x816   :  { %v5481_v38 = vmax.f32 %v11605_v5, %v5440_v41  ;;  %5809 = vmatpush.bf16.msrb.mxu2 %v7726_v31  ;;  %v5676_v41 = vunpack.c.l.b16 %v5646_v2  ;;  %v7748_v31 = vld [vmem:[%s11869_s10 + $0x30] sm:$0xff] }
 0x818   :  { %v5568_v6 = vrot.slane %v5481_v38, 2 }
 0x81a   :  { %v5569_v56 = vsel %vm3585_vm6, %v5566_v21, %v5568_v6  ;;  %v7345_v21 = vld [vmem:[%s11865_s7 + $0x10] sm:$0xf] }
 0x81b   :  { %v5354_v13 = vpop.f32.mrf.mxu2  ;;  %v5442_v25 = vpop.f32.mrf.mxu3  ;;  %v5635_v53 = vmax.f32 %v5480_v46, %v5569_v56  ;;  %v7346_v49 = vor.u32 %v7716_v4, %v7345_v21  ;;  %v7339_v56 = vld [vmem:[%s11865_s7 + $0x8] sm:$0xf0]  ;;  %v7745_v21 = vld [vmem:[%s11869_s10 + $0x18] sm:$0xff]  ;;  %v7744_v4 = vld [vmem:[%s11869_s10 + $0x10] sm:$0xff] }
 0x81c   :  { %v5443_v16 = vadd.f32 %v5442_v25, %v5354_v13 }
 0x81e   :  { %v5482_v60 = vmax.f32 %v11615_v17, %v5443_v16 }
 0x820   :  { %v5570_v44 = vrot.slane %v5482_v60, 2 }
 0x822   :  { %v5571_v54 = vsel %vm3585_vm6, %v5568_v6, %v5570_v44  ;;  %v7713_v6 = vld [vmem:[%s11865_s7 + $0x4] sm:$0xf] }
 0x823   :  { %v5356_v18 = vpop.f32.mrf.mxu2  ;;  %v5444_v48 = vpop.f32.mrf.mxu3  ;;  %v5636_v57 = vmax.f32 %v5481_v38, %v5571_v54  ;;  %v5682_v38 = vpack.c.b16 %v5676_v41, %v5676_v41  ;;  %v7342_v13 = vor.u32 %v7713_v6, %v7339_v56  ;;  %v7718_v54 = vld [vmem:[%s11866_s8 + $0x8] sm:$0xff]  ;;  %v7742_v41 = vld [vmem:[%s11869_s10] sm:$0xff]  ;;  %v7757_v6 = vld [vmem:[%s11870_s12 + $0x38] sm:$0xff] }
 0x824   :  { %v5445_v34 = vadd.f32 %v5444_v48, %v5356_v18  ;;  %v7717_v18 = vld [vmem:[%s11866_s8] sm:$0xff]  ;;  %v7722_v48 = vld [vmem:[%s11866_s8 + $0x28] sm:$0xff]  ;;  %v7756_v56 = vld [vmem:[%s11870_s12 + $0x30] sm:$0xff] }
 0x825   :  { %v5659_v51 = vpack.c.bf16 %v5636_v57, %v5635_v53  ;;  %5721 = vmatmul.bf16.vlgmr.msrb.gmra.mxu3 %v5682_v38  ;;  %v5677_v53 = vunpack.c.h.b16 %v5646_v2  ;;  %v7731_v57 = vld [vmem:[%s11866_s8 + $0x70] sm:$0xff]  ;;  %v7743_v2 = vld [vmem:[%s11869_s10 + $0x8] sm:$0xff] }
 0x826   :  { %v5483_v23 = vmax.f32 %v11619_v40, %v5445_v34  ;;  %v7736_v34 = vld [vmem:[%s11866_s8 + $0x98] sm:$0xff] }
 0x827   :  { %v5683_v16 = vpack.c.b16 %v5677_v53, %v5677_v53 }
 0x828   :  { %v5572_v5 = vrot.slane %v5483_v23, 2 }
 0x82a   :  { %v5573_v28 = vsel %vm3585_vm6, %v5570_v44, %v5572_v5  ;;  %v7719_v44 = vld [vmem:[%s11866_s8 + $0x10] sm:$0xff] }
 0x82b   :  { %v5359_v58 = vpop.f32.mrf.mxu2  ;;  %v5447_v10 = vpop.f32.mrf.mxu3  ;;  %v5637_v52 = vmax.f32 %v5482_v60, %v5573_v28  ;;  %v7720_v60 = vld [vmem:[%s11866_s8 + $0x18] sm:$0xff]  ;;  %v7734_v28 = vld [vmem:[%s11866_s8 + $0x88] sm:$0xff] }
 0x82c   :  { %v5448_v3 = vadd.f32 %v5447_v10, %v5359_v58  ;;  %v7728_v58 = vld [vmem:[%s11866_s8 + $0x58] sm:$0xff]  ;;  %v7733_v10 = vld [vmem:[%s11866_s8 + $0x80] sm:$0xff] }
 0x82e   :  { %v5484_v30 = vmax.f32 %v11627_v45, %v5448_v3  ;;  %v7337_v45 = vld [vmem:[%s11865_s7] sm:$0xf]  ;;  %v7732_v3 = vld [vmem:[%s11866_s8 + $0x78] sm:$0xff] }
 0x82f   :  { %v7338_v37 = vor.u32 %v7714_v59, %v7337_v45 }
 0x830   :  { %v5574_v17 = vrot.slane %v5484_v30, 2 }
 0x831   :  { %5711 = vmatmul.bf16.vlgmr.msrb.gmra.mxu0 %v7338_v37 }
 0x832   :  { %v5575_v12 = vsel %vm3585_vm6, %v5572_v5, %v5574_v17  ;;  %v7729_v5 = vld [vmem:[%s11866_s8 + $0x60] sm:$0xff] }
 0x833   :  { %v5361_v43 = vpop.f32.mrf.mxu2  ;;  %v5449_v26 = vpop.f32.mrf.mxu3  ;;  %v5638_v47 = vmax.f32 %v5483_v23, %v5575_v12  ;;  %v7735_v23 = vld [vmem:[%s11866_s8 + $0x90] sm:$0xff] }
 0x834   :  { %v5450_v29 = vadd.f32 %v5449_v26, %v5361_v43 }
 0x835   :  { %v5660_v20 = vpack.c.bf16 %v5638_v47, %v5637_v52  ;;  %v7727_v52 = vld [vmem:[%s11866_s8 + $0x50] sm:$0xff] }
 0x836   :  { %v5485_v27 = vmax.f32 %v11631_v0, %v5450_v29 }
 0x838   :  { %v5576_v40 = vrot.slane %v5485_v27, 2 }
 0x83a   :  { %v5577_v19 = vsel %vm3585_vm6, %v5574_v17, %v5576_v40 }
 0x83b   :  { %v5364_v62 = vpop.f32.mrf.mxu2  ;;  %v5452_v7 = vpop.f32.mrf.mxu3  ;;  %v5639_v33 = vmax.f32 %v5484_v30, %v5577_v19 }
 0x83c   :  { %v5453_v39 = vadd.f32 %v5452_v7, %v5364_v62  ;;  %v7740_v7 = vld [vmem:[%s11866_s8 + $0xb8] sm:$0xff] }
 0x83e   :  { %v5486_v22 = vmax.f32 %v11637_v15, %v5453_v39  ;;  %v7725_v15 = vld [vmem:[%s11866_s8 + $0x40] sm:$0xff]  ;;  %v7739_v39 = vld [vmem:[%s11866_s8 + $0xb0] sm:$0xff] }
 0x83f   :  { %5810 = vmatpush.bf16.msrb.mxu2 %v7725_v15 }
 0x840   :  { %v5578_v42 = vrot.slane %v5486_v22, 2 }
 0x841   :  { %5716 = vmatmul.bf16.gmra.mxu0 %v7346_v49 }
 0x842   :  { %v5641_v0 = vmax.f32 %v5486_v22, %v5578_v42  ;;  %v5579_v36 = vsel %vm3585_vm6, %v5576_v40, %v5578_v42  ;;  %v7741_v40 = vld [vmem:[%s11866_s8 + $0xc0] sm:$0xff]  ;;  %v7738_v22 = vld [vmem:[%s11866_s8 + $0xa8] sm:$0xff] }
 0x843   :  { %v5366_v55 = vpop.f32.mrf.mxu2  ;;  %v5454_v63 = vpop.f32.mrf.mxu3  ;;  %v5640_v50 = vmax.f32 %v5485_v27, %v5579_v36  ;;  %5811 = vmatpush.bf16.msrb.mxu2 %v7724_v11  ;;  %v7737_v36 = vld [vmem:[%s11866_s8 + $0xa0] sm:$0xff] }
 0x844   :  { %v5662_v14 = vpack.c.bf16 %v5641_v0, %v5641_v0 }
 0x845   :  { %v5661_v24 = vpack.c.bf16 %v5640_v50, %v5639_v33 }
 0x846   :  { %v5701_v46 = vand.u32 %v5699_v35, %v5662_v14  ;;  %v7749_v14 = vld [vmem:[%s11869_s10 + $0x38] sm:$0xff] }
 0x847   :  { %6117 = vmatpush.bf16.msra.mxu0 %v7749_v14 }
 0x848   :  { %5726 = vmatpush.bf16.msrb.mxu1 %v5701_v46  ;;  %v7746_v46 = vld [vmem:[%s11869_s10 + $0x20] sm:$0xff] }
 0x84b   :  { %6118 = vmatpush.bf16.msra.mxu0 %v7748_v31 }
 0x84c   :  { %5727 = vmatpush.bf16.msrb.mxu1 %v5661_v24  ;;  %v7747_v24 = vld [vmem:[%s11869_s10 + $0x28] sm:$0xff] }
 0x84f   :  { %6119 = vmatpush.bf16.msra.mxu0 %v7747_v24 }
 0x850   :  { %5728 = vmatpush.bf16.msrb.mxu1 %v5660_v20 }
 0x853   :  { %6120 = vmatpush.bf16.msra.mxu0 %v7746_v46 }
 0x854   :  { %5729 = vmatpush.bf16.msrb.mxu1 %v5659_v51  ;;  %v7730_v51 = vld [vmem:[%s11866_s8 + $0x68] sm:$0xff] }
 0x857   :  { %6121 = vmatpush.bf16.msra.mxu0 %v7745_v21 }
 0x858   :  { %5730 = vmatpush.bf16.msrb.mxu1 %v11673_v1  ;;  %v7347_v1 = vld [vmem:[%s11865_s7 + $0x18] sm:$0xf0] }
 0x85b   :  { %6122 = vmatpush.bf16.msra.mxu0 %v7744_v4 }
 0x85c   :  { %5731 = vmatpush.bf16.msrb.mxu1 %v11667_v8  ;;  %v7723_v8 = vld [vmem:[%s11866_s8 + $0x30] sm:$0xff] }
 0x85d   :  { %5812 = vmatpush.bf16.msrb.mxu2 %v7723_v8 }
 0x85f   :  { %6123 = vmatpush.bf16.msra.mxu0 %v7743_v2 }
 0x860   :  { %5732 = vmatpush.bf16.msrb.mxu1 %v11661_v32  ;;  %v7715_v32 = vld [vmem:[%s11865_s7 + $0x14] sm:$0xf] }
 0x861   :  { %v7350_v25 = vor.u32 %v7715_v32, %v7347_v1  ;;  %5813 = vmatpush.bf16.msrb.mxu2 %v7722_v48  ;;  %v7754_v1 = vld [vmem:[%s11870_s12 + $0x20] sm:$0xff] }
 0x863   :  { %6124 = vmatpush.bf16.msra.mxu0 %v7742_v41 }
 0x864   :  { %5733 = vmatpush.bf16.msrb.mxu1 %v11647_v61  ;;  %v7721_v61 = vld [vmem:[%s11866_s8 + $0x20] sm:$0xff] }
 0x865   :  { %5855 = vmatpush.bf16.msra.mxu3 %v7721_v61  ;;  %5913 = vmatpush.bf16.msra.mxu2 %v7731_v57 }
 0x867   :  { %7351 = vmatmul.msk.bf16.vlgmr.msrb.gmra.mxu1 %vm5687_vm10, %v7342_v13  ;;  %v7755_v13 = vld [vmem:[%s11870_s12 + $0x28] sm:$0xff] }
 0x868   :  { %6200 = vmatpush.bf16.msra.mxu1 %v7757_v6 }
 0x869   :  { %5856 = vmatpush.bf16.msra.mxu3 %v7720_v60  ;;  %5914 = vmatpush.bf16.msra.mxu2 %v7730_v51 }
 0x86c   :  { %6201 = vmatpush.bf16.msra.mxu1 %v7756_v56 }
 0x86d   :  { %5857 = vmatpush.bf16.msra.mxu3 %v7719_v44  ;;  %5915 = vmatpush.bf16.msra.mxu2 %v7729_v5  ;;  %v7752_v44 = vld [vmem:[%s11870_s12 + $0x10] sm:$0xff] }
 0x870   :  { %6202 = vmatpush.bf16.msra.mxu1 %v7755_v13 }
 0x871   :  { %5858 = vmatpush.bf16.msra.mxu3 %v7718_v54  ;;  %5916 = vmatpush.bf16.msra.mxu2 %v7728_v58  ;;  %v7750_v58 = vld [vmem:[%s11870_s12] sm:$0xff] }
 0x874   :  { %6203 = vmatpush.bf16.msra.mxu1 %v7754_v1 }
 0x875   :  { %5859 = vmatpush.bf16.msra.mxu3 %v7717_v18  ;;  %5917 = vmatpush.bf16.msra.mxu2 %v7727_v52  ;;  %v7767_v18 = vld [vmem:[%s11867_s9] ss:$0 sm:$0xff] }
 0x877   :  { %7352 = vmatmul.msk.bf16.gmra.mxu1 %vm5687_vm10, %v7350_v25  ;;  %v7753_v25 = vld [vmem:[%s11870_s12 + $0x18] sm:$0xff] }
 0x878   :  { %6204 = vmatpush.bf16.msra.mxu1 %v7753_v25 }
 0x879   :  { %5972 = vmatpush.bf16.msrb.mxu3 %v7736_v34 }
 0x87c   :  { %6205 = vmatpush.bf16.msra.mxu1 %v7752_v44 }
 0x87d   :  { %5973 = vmatpush.bf16.msrb.mxu3 %v7735_v23 }
 0x881   :  { %5974 = vmatpush.bf16.msrb.mxu3 %v7734_v28  ;;  %v7751_v28 = vld [vmem:[%s11870_s12 + $0x8] sm:$0xff] }
 0x882   :  { %6206 = vmatpush.bf16.msra.mxu1 %v7751_v28 }
 0x885   :  { %5975 = vmatpush.bf16.msrb.mxu3 %v7733_v10  ;;  %v7768_v10 = vld [vmem:[%s11868_s11] ss:$0 sm:$0xff] }
 0x886   :  { %6207 = vmatpush.bf16.msra.mxu1 %v7750_v58 }
 0x887   :  { %7353 = vmatmul.msk.bf16.gmra.mxu1 %vm5687_vm10, %v5683_v16 }
 0x889   :  { %5976 = vmatpush.bf16.msrb.mxu3 %v7732_v3 }
 0x8a8   :  { %v5722_v17 = vpop.f32.mrf.mxu3 }
 0x8ae   :  { %v5712_v30 = vpop.f32.mrf.mxu0 }
 0x8b0   :  { %v5724_v29 = vpop.f32.mrf.mxu3 }
 0x8b6   :  { %v5714_v47 = vpop.f32.mrf.mxu0 }
 0x8be   :  { %v5717_v62 = vpop.f32.mrf.mxu0 }
 0x8c6   :  { %v5719_v59 = vpop.f32.mrf.mxu0 }
 0x8e4   :  { %v5735_v12 = vpop.f32.mrf.mxu1 }
 0x8e5   :  { %v5736_v43 = vadd.f32 %v5735_v12, %v5712_v30 }
 0x8e7   :  { %v5749_v26 = vpack.c.bf16 %v5736_v43, %v5736_v43  ;;  %v7769_v43 = vld [vmem:[%s11871_s13] ss:$0 sm:$0xff] }
 0x8e9   :  { %7405 = vmatmul.msk.bf16.vlgmr.msra.gmra.mxu3 %vm5802_vm11, %v5749_v26 }
 0x8ec   :  { %v5737_v20 = vpop.f32.mrf.mxu1 }
 0x8ed   :  { %v5738_v27 = vadd.f32 %v5737_v20, %v5714_v47 }
 0x8ef   :  { %v5760_v19 = vpack.c.bf16 %v5738_v27, %v5738_v27 }
 0x8f1   :  { %7384 = vmatmul.msk.bf16.vlgmr.msrb.gmra.mxu2 %vm5802_vm11, %v5760_v19 }
 0x8f2   :  { %6031 = vmatpush.bf16.msrb.mxu2 %v7741_v40 }
 0x8f4   :  { %v5740_v33 = vpop.f32.mrf.mxu1 }
 0x8f5   :  { %v5741_v45 = vadd.f32 %v5740_v33, %v5717_v62 }
 0x8f6   :  { %6032 = vmatpush.bf16.msrb.mxu2 %v7740_v7 }
 0x8f7   :  { %v5865_v42 = vpack.c.bf16 %v5741_v45, %v5741_v45 }
 0x8fa   :  { %6033 = vmatpush.bf16.msrb.mxu2 %v7739_v39 }
 0x8fc   :  { %v5742_v37 = vpop.f32.mrf.mxu1 }
 0x8fd   :  { %v5743_v0 = vadd.f32 %v5742_v37, %v5719_v59 }
 0x8fe   :  { %6034 = vmatpush.bf16.msrb.mxu2 %v7738_v22 }
 0x8ff   :  { %v5924_v9 = vpack.c.bf16 %v5743_v0, %v5743_v0 }
 0x901   :  { %7436 = vmatmul.msk.bf16.vlgmr.msra.gmra.mxu2 %vm5802_vm11, %v5865_v42  ;;  %7467 = vmatmul.msk.bf16.vlgmr.msrb.gmra.mxu3 %vm5802_vm11, %v5924_v9 }
 0x902   :  { %6035 = vmatpush.bf16.msrb.mxu2 %v7737_v36 }
 0x904   :  { %v5745_v35 = vpop.f32.mrf.mxu1 }
 0x905   :  { %v5746_v55 = vadd.f32 %v5745_v35, %v5722_v17 }
 0x907   :  { %v5983_v50 = vpack.c.bf16 %v5746_v55, %v5746_v55 }
 0x90c   :  { %v5747_v63 = vpop.f32.mrf.mxu1 }
 0x911   :  { %7498 = vmatmul.msk.bf16.vlgmr.msrb.gmra.mxu2 %vm5802_vm11, %v5983_v50 }
 0x96c   :  { %v5861_v15 = vpop.f32.mrf.mxu3 }
 0x974   :  { %v5815_v49 = vpop.f32.mrf.mxu2  ;;  %v5863_v11 = vpop.f32.mrf.mxu3 }
 0x975   :  { %v5862_v61 = vadd.f32 %v5861_v15, %v5815_v49 }
 0x97c   :  { %v5817_v38 = vpop.f32.mrf.mxu2 }
 0x984   :  { %v5919_v8 = vpop.f32.mrf.mxu2  ;;  %v5978_v32 = vpop.f32.mrf.mxu3 }
 0x985   :  { %v5923_v60 = vadd.f32 %v5919_v8, %v5862_v61 }
 0x987   :  { %v5982_v54 = vadd.f32 %v5978_v32, %v5923_v60 }
 0x98c   :  { %v5921_v53 = vpop.f32.mrf.mxu2  ;;  %v5980_v16 = vpop.f32.mrf.mxu3 }
 0x994   :  { %v6037_v48 = vpop.f32.mrf.mxu2 }
 0x995   :  { %v6041_v57 = vadd.f32 %v6037_v48, %v5982_v54 }
 0x997   :  { %v6046_v34 = vadd.f32 %v7767_v18, %v6041_v57 }
 0x999   :  { %v6047_v51 = vmax.f32 %v6046_v34, 0.0 }
 0x99b   :  { %v6048_v23 = vpack.c.bf16 %v6047_v51, %v6047_v51 }
 0x99c   :  { %v6039_v5 = vpop.f32.mrf.mxu2 }
 0x99d   :  { %6125 = vmatmul.bf16.vlgmr.msra.gmra.mxu0 %v6048_v23 }
 0xa1a   :  { %v6126_v52 = vpop.f32.mrf.mxu0 }
 0xa1b   :  { %v6127_v3 = vadd.f32 %v7768_v10, %v6126_v52 }
 0xa1d   :  { %v6130_v30 = vmax.f32 %v6127_v3, 0.0 }
 0xa1f   :  { %v6131_v17 = vpack.c.bf16 %v6130_v30, %v6130_v30 }
 0xa21   :  { %6208 = vmatmul.bf16.vlgmr.msra.gmra.mxu1 %v6131_v17 }
 0xa22   :  { %v6128_v12 = vpop.f32.mrf.mxu0 }
 0xa9e   :  { %v6209_v26 = vpop.f32.mrf.mxu1 }
 0xa9f   :  { %v6210_v47 = vadd.f32 %v7769_v43, %v6209_v26 }
 0xaa1   :  { %6213 = vst [vmem:[%s11872_s14] sm:$0xff] %v6210_v47 }
 0xaa6   :  { %v6211_v29 = vpop.f32.mrf.mxu1 }

</bundles_post_ra>
